<compile_context>
chip_gen: v5e
topology: v5e:2x2
jax: 0.10.0
libtpu: 0.0.40
codegen_flags: <defaults>
</compile_context>

<pallas_src>
import functools

import jax
import jax.numpy as jnp
from jax.experimental import pallas as pl
from jax.experimental.pallas import tpu as pltpu


def _round_up(x, m):
    return (x + m - 1) // m * m


# ----------------------------------------------------------------------------
# Tiled matmul with fused affine + LeakyReLU epilogue (used for strided Down convs)
# ----------------------------------------------------------------------------
def _mm_epilogue_kernel(a_ref, b_ref, s_ref, c_ref, o_ref, acc_ref, *, act, slope):
    @pl.when(pl.program_id(2) == 0)
    def _():
        acc_ref[...] = jnp.zeros_like(acc_ref)

    acc_ref[...] += jnp.dot(a_ref[...], b_ref[...], preferred_element_type=jnp.float32)

    @pl.when(pl.program_id(2) == pl.num_programs(2) - 1)
    def _():
        z = acc_ref[...] * s_ref[...] + c_ref[...]
        if act:
            z = jnp.where(z >= 0, z, slope * z)
        o_ref[...] = z.astype(o_ref.dtype)


def matmul_affine_act(a, b, scale, bias, *, act=True, slope=0.2,
                      out_dtype=jnp.bfloat16):
    """out = act((a @ b) * scale + bias); a:(M,K), b:(K,N), scale/bias:(N,)."""
    M, K = a.shape
    _, N = b.shape
    a = a.astype(jnp.bfloat16)
    b = b.astype(jnp.bfloat16)

    tm = min(256, _round_up(M, 16))
    if tm >= 32 and _round_up(M, tm) == tm:
        tm //= 2                                  # >=2 M-tiles -> megacore parallel axis
    tn = 128
    Kp0 = _round_up(K, 128)
    tk = min(512, Kp0)
    Mp, Np, Kp = _round_up(M, tm), _round_up(N, tn), _round_up(Kp0, tk)

    a = jnp.pad(a, ((0, Mp - M), (0, Kp - K)))
    b = jnp.pad(b, ((0, Kp - K), (0, Np - N)))
    s2 = jnp.pad(scale.astype(jnp.float32).reshape(1, N), ((0, 0), (0, Np - N)))
    c2 = jnp.pad(bias.astype(jnp.float32).reshape(1, N), ((0, 0), (0, Np - N)))

    kern = functools.partial(_mm_epilogue_kernel, act=act, slope=slope)
    out = pl.pallas_call(
        kern,
        out_shape=jax.ShapeDtypeStruct((Mp, Np), out_dtype),
        grid=(Mp // tm, Np // tn, Kp // tk),
        in_specs=[
            pl.BlockSpec((tm, tk), lambda i, j, k: (i, k)),
            pl.BlockSpec((tk, tn), lambda i, j, k: (k, j)),
            pl.BlockSpec((1, tn), lambda i, j, k: (0, j)),
            pl.BlockSpec((1, tn), lambda i, j, k: (0, j)),
        ],
        out_specs=pl.BlockSpec((tm, tn), lambda i, j, k: (i, j)),
        scratch_shapes=[pltpu.VMEM((tm, tn), jnp.float32)],
        compiler_params=pltpu.CompilerParams(
            dimension_semantics=("parallel", "parallel", "arbitrary")),
    )(a, b, s2, c2)
    return out[:M, :N]


# ----------------------------------------------------------------------------
# Fused stride-1 conv + folded BN + LeakyReLU (+ residual), no im2col.
# The padded image is flattened to a (Hp*Wp, Cin) canvas; tap (i, j) is a
# contiguous row window, so the kernel only needs 2-D slices and 2-D matmuls.
# ----------------------------------------------------------------------------
def _conv_s1_kernel(*refs, K, Wp, rows_out, dil, act, slope, has_res):
    if has_res:
        x_ref, w_ref, s_ref, b_ref, r_ref, o_ref = refs
    else:
        x_ref, w_ref, s_ref, b_ref, o_ref = refs
        r_ref = None
    acc = jnp.zeros(o_ref.shape, jnp.float32)            # (rows_out, Cout)
    for i in range(K):
        for j in range(K):
            start = dil * (i * Wp + j)                    # static -> aligned slice
            a = x_ref[pl.ds(start, rows_out), :]          # (rows_out, Cin) bf16
            acc = acc + jnp.dot(a, w_ref[i * K + j],
                                preferred_element_type=jnp.float32)
    z = acc * s_ref[...] + b_ref[...]
    if has_res:
        z = z + r_ref[...].astype(jnp.float32)
    if act:
        z = jnp.where(z >= 0, z, slope * z)
    o_ref[...] = z.astype(o_ref.dtype)


def conv_bn_act(x, w, scale, bias, *, ksize, dilation=1, act=True, slope=0.2,
                residual=None):
    """Stride-1 conv (same padding = dilation*(k-1)//2) fused with BN affine,
    optional residual add and LeakyReLU.  x:(B,H,W,Cin), w:(k,k,Cin,Cout)."""
    B, H, W, Cin = x.shape
    Cout = w.shape[-1]
    pad = dilation * (ksize - 1) // 2
    xp = jnp.pad(x.astype(jnp.bfloat16), ((0, 0), (pad, pad), (pad, pad), (0, 0)))
    Hp, Wp = H + 2 * pad, W + 2 * pad
    rows_in = Hp * Wp + Wp                     # extra row keeps every tap slice in-bounds
    rows_out = H * Wp
    xf = jnp.pad(xp.reshape(B, Hp * Wp, Cin), ((0, 0), (0, Wp), (0, 0)))
    w_taps = w.reshape(ksize * ksize, Cin, Cout).astype(jnp.bfloat16)

    args = [xf, w_taps,
            scale.astype(jnp.float32).reshape(1, Cout),
            bias.astype(jnp.float32).reshape(1, Cout)]
    in_specs = [
        pl.BlockSpec((None, rows_in, Cin), lambda b: (b, 0, 0)),
        pl.BlockSpec((ksize * ksize, Cin, Cout), lambda b: (0, 0, 0)),
        pl.BlockSpec((1, Cout), lambda b: (0, 0)),
        pl.BlockSpec((1, Cout), lambda b: (0, 0)),
    ]
    if residual is not None:
        rp = jnp.pad(residual.astype(jnp.bfloat16),
                     ((0, 0), (0, 0), (0, Wp - W), (0, 0)))
        args.append(rp.reshape(B, rows_out, Cout))
        in_specs.append(pl.BlockSpec((None, rows_out, Cout), lambda b: (b, 0, 0)))

    kern = functools.partial(_conv_s1_kernel, K=ksize, Wp=Wp, rows_out=rows_out,
                             dil=dilation, act=act, slope=slope,
                             has_res=residual is not None)
    out = pl.pallas_call(
        kern,
        out_shape=jax.ShapeDtypeStruct((B, rows_out, Cout), jnp.bfloat16),
        grid=(B,),
        in_specs=in_specs,
        out_specs=pl.BlockSpec((None, rows_out, Cout), lambda b: (b, 0, 0)),
        compiler_params=pltpu.CompilerParams(dimension_semantics=("parallel",)),
    )(*args)
    return out.reshape(B, H, Wp, Cout)[:, :, :W, :]


# ----------------------------------------------------------------------------
# Strided Down block: Conv(k=f+1, s=f) + BN + LeakyReLU via small im2col +
# the tiled fused matmul (feature maps here are tiny, im2col cost is negligible).
# TODO(synk): Down module source unavailable; Conv-BN-LeakyReLU(0.2) assumed.
# ----------------------------------------------------------------------------
def down_conv(x, w, scale, bias, factor):
    B, H, W, Cin = x.shape
    k, s = factor + 1, factor
    pad = (factor + 1) // 2
    Cout = w.shape[-1]
    xp = jnp.pad(x.astype(jnp.bfloat16), ((0, 0), (pad, pad), (pad, pad), (0, 0)))
    Ho = (H + 2 * pad - k) // s + 1
    Wo = (W + 2 * pad - k) // s + 1
    patches = []
    for i in range(k):
        for j in range(k):
            patches.append(xp[:, i:i + s * (Ho - 1) + 1:s,
                              j:j + s * (Wo - 1) + 1:s, :])
    a = jnp.concatenate(patches, axis=-1).reshape(B * Ho * Wo, k * k * Cin)
    wm = w.reshape(k * k * Cin, Cout)
    out = matmul_affine_act(a, wm, scale, bias, act=True, slope=0.2)
    return out.reshape(B, Ho, Wo, Cout)


# ----------------------------------------------------------------------------
# Depthwise 7x7 positional conv + bias + inner positional embedding, fused.
# ----------------------------------------------------------------------------
def _dwpos_kernel(x_ref, w_ref, b_ref, p_ref, o_ref, *, K, Wp, rows_out):
    acc = jnp.zeros(o_ref.shape, jnp.float32)             # (rows_out, C)
    for i in range(K):
        for j in range(K):
            tap = x_ref[pl.ds(i * Wp + j, rows_out), :].astype(jnp.float32)
            acc = acc + tap * w_ref[pl.ds(i * K + j, 1), :]   # (1, C) broadcast
    o_ref[...] = (acc + b_ref[...] + p_ref[...]).astype(o_ref.dtype)


def dwconv_pos(x, w_taps, bias, inner_pos):
    B, H, W, C = x.shape
    pad = 3
    xp = jnp.pad(x.astype(jnp.bfloat16), ((0, 0), (pad, pad), (pad, pad), (0, 0)))
    Hp, Wp = H + 2 * pad, W + 2 * pad
    rows_in = Hp * Wp + Wp
    rows_out = H * Wp
    xf = jnp.pad(xp.reshape(B, Hp * Wp, C), ((0, 0), (0, Wp), (0, 0)))
    posp = jnp.pad(inner_pos.reshape(H, W, C).astype(jnp.float32),
                   ((0, 0), (0, Wp - W), (0, 0))).reshape(rows_out, C)
    kern = functools.partial(_dwpos_kernel, K=7, Wp=Wp, rows_out=rows_out)
    out = pl.pallas_call(
        kern,
        out_shape=jax.ShapeDtypeStruct((B, rows_out, C), jnp.bfloat16),
        grid=(B,),
        in_specs=[
            pl.BlockSpec((None, rows_in, C), lambda b: (b, 0, 0)),
            pl.BlockSpec((49, C), lambda b: (0, 0)),
            pl.BlockSpec((1, C), lambda b: (0, 0)),
            pl.BlockSpec((rows_out, C), lambda b: (0, 0)),
        ],
        out_specs=pl.BlockSpec((None, rows_out, C), lambda b: (b, 0, 0)),
        compiler_params=pltpu.CompilerParams(dimension_semantics=("parallel",)),
    )(xf, w_taps.astype(jnp.float32),
      bias.astype(jnp.float32).reshape(1, C), posp)
    return out.reshape(B, H, Wp, C)[:, :, :W, :].reshape(B, H * W, C)


# ----------------------------------------------------------------------------
# One fully-fused transformer encoder layer per batch element:
# fused QKV, per-head attention + softmax, output proj, post-norm affines, FFN,
# all biases and residual adds, in a single pallas_call.
# TODO(synk): transformer_encoder_bn.TFEncoder source unavailable; a post-norm
# encoder (MHA + ReLU-FFN) with eval-mode BatchNorm affines is assumed.
# ----------------------------------------------------------------------------
def _encoder_kernel(x_ref, wqkv_ref, bqkv_ref, wo_ref, bo_ref,
                    n1s_ref, n1b_ref, w1_ref, b1_ref, w2_ref, b2_ref,
                    n2s_ref, n2b_ref, o_ref, *, n_heads, att_scale):
    L, C = x_ref.shape
    dh = C // n_heads
    x = x_ref[...].astype(jnp.float32)
    qkv = jnp.dot(x_ref[...], wqkv_ref[...],
                  preferred_element_type=jnp.float32) + bqkv_ref[...]
    qkvb = qkv.astype(jnp.bfloat16)
    heads = []
    for h in range(n_heads):
        q = qkvb[:, h * dh:(h + 1) * dh]
        k = qkvb[:, C + h * dh:C + (h + 1) * dh]
        v = qkvb[:, 2 * C + h * dh:2 * C + (h + 1) * dh]
        s = jax.lax.dot_general(q, k, (((1,), (1,)), ((), ())),
                                preferred_element_type=jnp.float32) * att_scale
        s = s - jnp.max(s, axis=-1, keepdims=True)
        p = jnp.exp(s)
        p = p / jnp.sum(p, axis=-1, keepdims=True)
        heads.append(jnp.dot(p.astype(jnp.bfloat16), v,
                             preferred_element_type=jnp.float32))
    o = jnp.concatenate(heads, axis=-1)
    attn = jnp.dot(o.astype(jnp.bfloat16), wo_ref[...],
                   preferred_element_type=jnp.float32) + bo_ref[...]
    y = (x + attn) * n1s_ref[...] + n1b_ref[...]          # residual + norm affine
    h1 = jnp.dot(y.astype(jnp.bfloat16), w1_ref[...],
                 preferred_element_type=jnp.float32) + b1_ref[...]
    h1 = jnp.maximum(h1, 0.0)
    h2 = jnp.dot(h1.astype(jnp.bfloat16), w2_ref[...],
                 preferred_element_type=jnp.float32) + b2_ref[...]
    z = (y + h2) * n2s_ref[...] + n2b_ref[...]
    o_ref[...] = z.astype(o_ref.dtype)


def encoder_layer(tokens, p, n_heads):
    B, L, C = tokens.shape
    ffd = p["w1"].shape[-1]
    att_scale = 1.0 / float(C // n_heads) ** 0.5
    kern = functools.partial(_encoder_kernel, n_heads=n_heads, att_scale=att_scale)
    row = lambda n: pl.BlockSpec((1, n), lambda b: (0, 0))
    mat = lambda r, c: pl.BlockSpec((r, c), lambda b: (0, 0))
    return pl.pallas_call(
        kern,
        out_shape=jax.ShapeDtypeStruct((B, L, C), jnp.bfloat16),
        grid=(B,),
        in_specs=[
            pl.BlockSpec((None, L, C), lambda b: (b, 0, 0)),
            mat(C, 3 * C), row(3 * C),
            mat(C, C), row(C),
            row(C), row(C),
            mat(C, ffd), row(ffd),
            mat(ffd, C), row(C),
            row(C), row(C),
        ],
        out_specs=pl.BlockSpec((None, L, C), lambda b: (b, 0, 0)),
        compiler_params=pltpu.CompilerParams(dimension_semantics=("parallel",)),
    )(tokens,
      p["wqkv"], p["bqkv"].reshape(1, 3 * C),
      p["wo"], p["bo"].reshape(1, C),
      p["n1_s"].reshape(1, C), p["n1_b"].reshape(1, C),
      p["w1"], p["b1"].reshape(1, ffd),
      p["w2"], p["b2"].reshape(1, C),
      p["n2_s"].reshape(1, C), p["n2_b"].reshape(1, C))


# ----------------------------------------------------------------------------
# Final LayerNorm + global average pool + Linear head, fused.
# ----------------------------------------------------------------------------
def _head_kernel(x_ref, g_ref, b_ref, w_ref, pb_ref, o_ref, *, eps):
    x = x_ref[...].astype(jnp.float32)                    # (B, L, C)
    mu = jnp.mean(x, axis=-1, keepdims=True)
    xc = x - mu
    var = jnp.mean(xc * xc, axis=-1, keepdims=True)
    xn = xc * jax.lax.rsqrt(var + eps) * g_ref[...] + b_ref[...]
    pooled = jnp.mean(xn, axis=1)                         # (B, C)
    out = jnp.dot(pooled, w_ref[...], preferred_element_type=jnp.float32)
    o_ref[...] = out + pb_ref[...]


def head(tokens, ln_g, ln_b, proj_w, proj_b, eps=1e-5):
    B, L, C = tokens.shape
    N = proj_w.shape[-1]
    kern = functools.partial(_head_kernel, eps=eps)
    return pl.pallas_call(
        kern,
        out_shape=jax.ShapeDtypeStruct((B, N), jnp.float32),
        grid=(1,),
        in_specs=[
            pl.BlockSpec((B, L, C), lambda i: (0, 0, 0)),
            pl.BlockSpec((1, C), lambda i: (0, 0)),
            pl.BlockSpec((1, C), lambda i: (0, 0)),
            pl.BlockSpec((C, N), lambda i: (0, 0)),
            pl.BlockSpec((1, N), lambda i: (0, 0)),
        ],
        out_specs=pl.BlockSpec((B, N), lambda i: (0, 0)),
    )(tokens,
      ln_g.astype(jnp.float32).reshape(1, C), ln_b.astype(jnp.float32).reshape(1, C),
      proj_w.astype(jnp.float32), proj_b.astype(jnp.float32).reshape(1, N))


# ----------------------------------------------------------------------------
# Model assembly
# ----------------------------------------------------------------------------
def space_to_depth(x, bs=4):
    B, H, W, C = x.shape
    x = x.reshape(B, H // bs, bs, W // bs, bs, C)
    x = x.transpose(0, 1, 3, 2, 4, 5)
    return x.reshape(B, H // bs, W // bs, bs * bs * C)


# TODO(synk): ResBlock source unavailable; conv-BN-LReLU -> conv-BN -> +res -> LReLU assumed.
def resblock(x, p, dilation):
    y = conv_bn_act(x, p["w1"], p["s1"], p["b1"], ksize=3, dilation=dilation,
                    act=True, slope=0.2)
    y = conv_bn_act(y, p["w2"], p["s2"], p["b2"], ksize=3, dilation=1,
                    act=True, slope=0.2, residual=x)
    return y


def cnn_forward(params, x_nhwc, factors):
    x = space_to_depth(x_nhwc, 4)
    st = params["stem"]
    x = conv_bn_act(x, st["w"], st["scale"], st["bias"], ksize=3, dilation=1)
    for i, f in enumerate(factors):
        dp = params[f"down{i}"]
        x = down_conv(x, dp["w"], dp["scale"], dp["bias"], f)
        x = resblock(x, params[f"res{i}_0"], 1)
        x = resblock(x, params[f"res{i}_1"], 3)
    return x


def tf_forward(params, feat, n_heads=2):
    tokens = dwconv_pos(feat, params["pos_w"], params["pos_b"], params["inner_pos"])
    for lp in params["layers"]:
        tokens = encoder_layer(tokens, lp, n_heads)
    return tokens


def net_forward(params, x_nchw, factors):
    x = jnp.transpose(x_nchw, (0, 2, 3, 1)).astype(jnp.float32)  # NCHW -> NHWC
    feat = cnn_forward(params["cnn"], x, factors)
    tokens = tf_forward(params["tf"], feat)
    return head(tokens, params["tf"]["ln_g"], params["tf"]["ln_b"],
                params["proj_w"], params["proj_b"])


# ----------------------------------------------------------------------------
# Deterministic parameter initialization (synthetic; no checkpoint loading)
# ----------------------------------------------------------------------------
def init_params(key, nf, factors, emb_dim, n_classes, inp_sz):
    keys = iter(jax.random.split(key, 512))

    def xavier(shape, dtype=jnp.bfloat16):
        fan_in = 1
        for d in shape[:-1]:
            fan_in *= d
        fan_out = shape[-1]
        limit = (6.0 / (fan_in + fan_out)) ** 0.5
        w = jax.random.uniform(next(keys), shape, jnp.float32, -limit, limit)
        return w.astype(dtype)

    def small(shape, s=0.02):
        return s * jax.random.normal(next(keys), shape, jnp.float32)

    def bn_fold(C, eps=1e-5):
        gamma = 1.0 + 0.1 * jax.random.normal(next(keys), (C,), jnp.float32)
        beta = 0.1 * jax.random.normal(next(keys), (C,), jnp.float32)
        mean = 0.05 * jax.random.normal(next(keys), (C,), jnp.float32)
        var = 1.0 + 0.1 * jnp.abs(jax.random.normal(next(keys), (C,), jnp.float32))
        scale = gamma / jnp.sqrt(var + eps)
        return scale, beta - mean * scale

    cnn = {}
    ch = nf
    s, b = bn_fold(ch)
    cnn["stem"] = {"w": xavier((3, 3, 48, ch)), "scale": s, "bias": b}
    for i, f in enumerate(factors):
        s, b = bn_fold(2 * ch)
        cnn[f"down{i}"] = {"w": xavier((f + 1, f + 1, ch, 2 * ch)), "scale": s, "bias": b}
        ch *= 2
        for j in range(2):
            s1, b1 = bn_fold(ch)
            s2, b2 = bn_fold(ch)
            cnn[f"res{i}_{j}"] = {"w1": xavier((3, 3, ch, ch)), "s1": s1, "b1": b1,
                                  "w2": xavier((3, 3, ch, ch)), "s2": s2, "b2": b2}
    assert ch == emb_dim, "emb_dim must equal nf * 2**len(factors)"

    red = 4
    for f in factors:
        red *= f
    L = (inp_sz // red) ** 2

    layers = []
    for _ in range(4):
        n1s, n1b = bn_fold(emb_dim)
        n2s, n2b = bn_fold(emb_dim)
        layers.append({
            "wqkv": xavier((emb_dim, 3 * emb_dim)), "bqkv": small((3 * emb_dim,)),
            "wo": xavier((emb_dim, emb_dim)), "bo": small((emb_dim,)),
            "n1_s": n1s, "n1_b": n1b,
            "w1": xavier((emb_dim, 4 * emb_dim)), "b1": small((4 * emb_dim,)),
            "w2": xavier((4 * emb_dim, emb_dim)), "b2": small((emb_dim,)),
            "n2_s": n2s, "n2_b": n2b,
        })
    tf = {
        "pos_w": small((49, emb_dim), 0.05),      # depthwise 7x7 taps, per channel
        "pos_b": small((emb_dim,)),
        "inner_pos": small((1, L, emb_dim), 0.05),
        "layers": layers,
        "ln_g": jnp.ones((emb_dim,), jnp.float32),
        "ln_b": jnp.zeros((emb_dim,), jnp.float32),
    }
    return {"cnn": cnn, "tf": tf,
            "proj_w": xavier((emb_dim, n_classes), jnp.float32),
            "proj_b": small((n_classes,))}


# ----------------------------------------------------------------------------
if __name__ == "__main__":
    # Small config: Net(emb_dim=64, n_classes=10, nf=32, factors=[2], inp_sz=32)
    NF, FACTORS, EMB, NCLS, INP = 32, (2,), 64, 10, 32
    key = jax.random.PRNGKey(0)
    pkey, xkey = jax.random.split(key)
    params = init_params(pkey, NF, FACTORS, EMB, NCLS, INP)
    x = jax.random.normal(xkey, (2, 3, INP, INP), jnp.float32)   # NCHW like PyTorch

    fwd = jax.jit(functools.partial(net_forward, factors=FACTORS))
    y = jax.block_until_ready(fwd(params, x))
    assert y.shape == (2, NCLS) and y.dtype == jnp.float32
    print("KERNEL_OK")
</pallas_src>

<mosaic_0001>
module attributes {stable_mosaic.version = 11 : i64} {
  func.func @_conv_s1_kernel(%arg0: i32, %arg1: memref<1x110x48xbf16, #tpu.memory_space<vmem>>, %arg2: memref<9x48x32xbf16, #tpu.memory_space<vmem>>, %arg3: memref<1x32xf32, #tpu.memory_space<vmem>>, %arg4: memref<1x32xf32, #tpu.memory_space<vmem>>, %arg5: memref<1x80x32xbf16, #tpu.memory_space<vmem>>) attributes {dimension_semantics = [#tpu.dimension_semantics<parallel>], iteration_bounds = array<i64: 2>, scalar_prefetch = 0 : i64, scratch_operands = 0 : i64, tpu.core_type = #tpu.core_type<tc>, window_params = [{transform_indices = @transform_0, window_bounds = array<i64: 1, 110, 48>}, {pipeline_mode = #tpu.pipeline_mode<synchronous>, transform_indices = @transform_1, window_bounds = array<i64: 9, 48, 32>}, {pipeline_mode = #tpu.pipeline_mode<synchronous>, transform_indices = @transform_2, window_bounds = array<i64: 1, 32>}, {pipeline_mode = #tpu.pipeline_mode<synchronous>, transform_indices = @transform_3, window_bounds = array<i64: 1, 32>}, {transform_indices = @transform_4, window_bounds = array<i64: 1, 80, 32>}]} {
    %cst = arith.constant 0.000000e+00 : f32
    %0 = vector.broadcast %cst : f32 to vector<80x32xf32>
    %c0 = arith.constant 0 : index
    %c0_0 = arith.constant 0 : index
    %c0_1 = arith.constant 0 : index
    %1 = vector.load %arg1[%c0, %c0_0, %c0_1] : memref<1x110x48xbf16, #tpu.memory_space<vmem>>, vector<1x80x48xbf16>
    %2 = vector.shape_cast %1 : vector<1x80x48xbf16> to vector<80x48xbf16>
    %c0_2 = arith.constant 0 : index
    %c0_3 = arith.constant 0 : index
    %c0_4 = arith.constant 0 : index
    %3 = vector.load %arg2[%c0_2, %c0_3, %c0_4] : memref<9x48x32xbf16, #tpu.memory_space<vmem>>, vector<1x48x32xbf16>
    %4 = vector.shape_cast %3 : vector<1x48x32xbf16> to vector<48x32xbf16>
    %cst_5 = arith.constant dense<0.000000e+00> : vector<80x32xf32>
    %5 = tpu.matmul %2, %4, %cst_5 {dimension_numbers = #tpu.dot_dimension_numbers<[1], [0], [0], [1], [0, 0, 1, 1], [], []>} : vector<80x48xbf16>, vector<48x32xbf16>, vector<80x32xf32> -> vector<80x32xf32>
    %6 = arith.addf %0, %5 : vector<80x32xf32>
    %c0_6 = arith.constant 0 : index
    %c1 = arith.constant 1 : index
    %c0_7 = arith.constant 0 : index
    %7 = vector.load %arg1[%c0_6, %c1, %c0_7] : memref<1x110x48xbf16, #tpu.memory_space<vmem>>, vector<1x80x48xbf16>
    %8 = vector.shape_cast %7 : vector<1x80x48xbf16> to vector<80x48xbf16>
    %c1_8 = arith.constant 1 : index
    %c0_9 = arith.constant 0 : index
    %c0_10 = arith.constant 0 : index
    %9 = vector.load %arg2[%c1_8, %c0_9, %c0_10] : memref<9x48x32xbf16, #tpu.memory_space<vmem>>, vector<1x48x32xbf16>
    %10 = vector.shape_cast %9 : vector<1x48x32xbf16> to vector<48x32xbf16>
    %cst_11 = arith.constant dense<0.000000e+00> : vector<80x32xf32>
    %11 = tpu.matmul %8, %10, %cst_11 {dimension_numbers = #tpu.dot_dimension_numbers<[1], [0], [0], [1], [0, 0, 1, 1], [], []>} : vector<80x48xbf16>, vector<48x32xbf16>, vector<80x32xf32> -> vector<80x32xf32>
    %12 = arith.addf %6, %11 : vector<80x32xf32>
    %c0_12 = arith.constant 0 : index
    %c2 = arith.constant 2 : index
    %c0_13 = arith.constant 0 : index
    %13 = vector.load %arg1[%c0_12, %c2, %c0_13] : memref<1x110x48xbf16, #tpu.memory_space<vmem>>, vector<1x80x48xbf16>
    %14 = vector.shape_cast %13 : vector<1x80x48xbf16> to vector<80x48xbf16>
    %c2_14 = arith.constant 2 : index
    %c0_15 = arith.constant 0 : index
    %c0_16 = arith.constant 0 : index
    %15 = vector.load %arg2[%c2_14, %c0_15, %c0_16] : memref<9x48x32xbf16, #tpu.memory_space<vmem>>, vector<1x48x32xbf16>
    %16 = vector.shape_cast %15 : vector<1x48x32xbf16> to vector<48x32xbf16>
    %cst_17 = arith.constant dense<0.000000e+00> : vector<80x32xf32>
    %17 = tpu.matmul %14, %16, %cst_17 {dimension_numbers = #tpu.dot_dimension_numbers<[1], [0], [0], [1], [0, 0, 1, 1], [], []>} : vector<80x48xbf16>, vector<48x32xbf16>, vector<80x32xf32> -> vector<80x32xf32>
    %18 = arith.addf %12, %17 : vector<80x32xf32>
    %c0_18 = arith.constant 0 : index
    %c10 = arith.constant 10 : index
    %c0_19 = arith.constant 0 : index
    %19 = vector.load %arg1[%c0_18, %c10, %c0_19] : memref<1x110x48xbf16, #tpu.memory_space<vmem>>, vector<1x80x48xbf16>
    %20 = vector.shape_cast %19 : vector<1x80x48xbf16> to vector<80x48xbf16>
    %c3 = arith.constant 3 : index
    %c0_20 = arith.constant 0 : index
    %c0_21 = arith.constant 0 : index
    %21 = vector.load %arg2[%c3, %c0_20, %c0_21] : memref<9x48x32xbf16, #tpu.memory_space<vmem>>, vector<1x48x32xbf16>
    %22 = vector.shape_cast %21 : vector<1x48x32xbf16> to vector<48x32xbf16>
    %cst_22 = arith.constant dense<0.000000e+00> : vector<80x32xf32>
    %23 = tpu.matmul %20, %22, %cst_22 {dimension_numbers = #tpu.dot_dimension_numbers<[1], [0], [0], [1], [0, 0, 1, 1], [], []>} : vector<80x48xbf16>, vector<48x32xbf16>, vector<80x32xf32> -> vector<80x32xf32>
    %24 = arith.addf %18, %23 : vector<80x32xf32>
    %c0_23 = arith.constant 0 : index
    %c11 = arith.constant 11 : index
    %c0_24 = arith.constant 0 : index
    %25 = vector.load %arg1[%c0_23, %c11, %c0_24] : memref<1x110x48xbf16, #tpu.memory_space<vmem>>, vector<1x80x48xbf16>
    %26 = vector.shape_cast %25 : vector<1x80x48xbf16> to vector<80x48xbf16>
    %c4 = arith.constant 4 : index
    %c0_25 = arith.constant 0 : index
    %c0_26 = arith.constant 0 : index
    %27 = vector.load %arg2[%c4, %c0_25, %c0_26] : memref<9x48x32xbf16, #tpu.memory_space<vmem>>, vector<1x48x32xbf16>
    %28 = vector.shape_cast %27 : vector<1x48x32xbf16> to vector<48x32xbf16>
    %cst_27 = arith.constant dense<0.000000e+00> : vector<80x32xf32>
    %29 = tpu.matmul %26, %28, %cst_27 {dimension_numbers = #tpu.dot_dimension_numbers<[1], [0], [0], [1], [0, 0, 1, 1], [], []>} : vector<80x48xbf16>, vector<48x32xbf16>, vector<80x32xf32> -> vector<80x32xf32>
    %30 = arith.addf %24, %29 : vector<80x32xf32>
    %c0_28 = arith.constant 0 : index
    %c12 = arith.constant 12 : index
    %c0_29 = arith.constant 0 : index
    %31 = vector.load %arg1[%c0_28, %c12, %c0_29] : memref<1x110x48xbf16, #tpu.memory_space<vmem>>, vector<1x80x48xbf16>
    %32 = vector.shape_cast %31 : vector<1x80x48xbf16> to vector<80x48xbf16>
    %c5 = arith.constant 5 : index
    %c0_30 = arith.constant 0 : index
    %c0_31 = arith.constant 0 : index
    %33 = vector.load %arg2[%c5, %c0_30, %c0_31] : memref<9x48x32xbf16, #tpu.memory_space<vmem>>, vector<1x48x32xbf16>
    %34 = vector.shape_cast %33 : vector<1x48x32xbf16> to vector<48x32xbf16>
    %cst_32 = arith.constant dense<0.000000e+00> : vector<80x32xf32>
    %35 = tpu.matmul %32, %34, %cst_32 {dimension_numbers = #tpu.dot_dimension_numbers<[1], [0], [0], [1], [0, 0, 1, 1], [], []>} : vector<80x48xbf16>, vector<48x32xbf16>, vector<80x32xf32> -> vector<80x32xf32>
    %36 = arith.addf %30, %35 : vector<80x32xf32>
    %c0_33 = arith.constant 0 : index
    %c20 = arith.constant 20 : index
    %c0_34 = arith.constant 0 : index
    %37 = vector.load %arg1[%c0_33, %c20, %c0_34] : memref<1x110x48xbf16, #tpu.memory_space<vmem>>, vector<1x80x48xbf16>
    %38 = vector.shape_cast %37 : vector<1x80x48xbf16> to vector<80x48xbf16>
    %c6 = arith.constant 6 : index
    %c0_35 = arith.constant 0 : index
    %c0_36 = arith.constant 0 : index
    %39 = vector.load %arg2[%c6, %c0_35, %c0_36] : memref<9x48x32xbf16, #tpu.memory_space<vmem>>, vector<1x48x32xbf16>
    %40 = vector.shape_cast %39 : vector<1x48x32xbf16> to vector<48x32xbf16>
    %cst_37 = arith.constant dense<0.000000e+00> : vector<80x32xf32>
    %41 = tpu.matmul %38, %40, %cst_37 {dimension_numbers = #tpu.dot_dimension_numbers<[1], [0], [0], [1], [0, 0, 1, 1], [], []>} : vector<80x48xbf16>, vector<48x32xbf16>, vector<80x32xf32> -> vector<80x32xf32>
    %42 = arith.addf %36, %41 : vector<80x32xf32>
    %c0_38 = arith.constant 0 : index
    %c21 = arith.constant 21 : index
    %c0_39 = arith.constant 0 : index
    %43 = vector.load %arg1[%c0_38, %c21, %c0_39] : memref<1x110x48xbf16, #tpu.memory_space<vmem>>, vector<1x80x48xbf16>
    %44 = vector.shape_cast %43 : vector<1x80x48xbf16> to vector<80x48xbf16>
    %c7 = arith.constant 7 : index
    %c0_40 = arith.constant 0 : index
    %c0_41 = arith.constant 0 : index
    %45 = vector.load %arg2[%c7, %c0_40, %c0_41] : memref<9x48x32xbf16, #tpu.memory_space<vmem>>, vector<1x48x32xbf16>
    %46 = vector.shape_cast %45 : vector<1x48x32xbf16> to vector<48x32xbf16>
    %cst_42 = arith.constant dense<0.000000e+00> : vector<80x32xf32>
    %47 = tpu.matmul %44, %46, %cst_42 {dimension_numbers = #tpu.dot_dimension_numbers<[1], [0], [0], [1], [0, 0, 1, 1], [], []>} : vector<80x48xbf16>, vector<48x32xbf16>, vector<80x32xf32> -> vector<80x32xf32>
    %48 = arith.addf %42, %47 : vector<80x32xf32>
    %c0_43 = arith.constant 0 : index
    %c22 = arith.constant 22 : index
    %c0_44 = arith.constant 0 : index
    %49 = vector.load %arg1[%c0_43, %c22, %c0_44] : memref<1x110x48xbf16, #tpu.memory_space<vmem>>, vector<1x80x48xbf16>
    %50 = vector.shape_cast %49 : vector<1x80x48xbf16> to vector<80x48xbf16>
    %c8 = arith.constant 8 : index
    %c0_45 = arith.constant 0 : index
    %c0_46 = arith.constant 0 : index
    %51 = vector.load %arg2[%c8, %c0_45, %c0_46] : memref<9x48x32xbf16, #tpu.memory_space<vmem>>, vector<1x48x32xbf16>
    %52 = vector.shape_cast %51 : vector<1x48x32xbf16> to vector<48x32xbf16>
    %cst_47 = arith.constant dense<0.000000e+00> : vector<80x32xf32>
    %53 = tpu.matmul %50, %52, %cst_47 {dimension_numbers = #tpu.dot_dimension_numbers<[1], [0], [0], [1], [0, 0, 1, 1], [], []>} : vector<80x48xbf16>, vector<48x32xbf16>, vector<80x32xf32> -> vector<80x32xf32>
    %54 = arith.addf %48, %53 : vector<80x32xf32>
    %c0_48 = arith.constant 0 : index
    %c0_49 = arith.constant 0 : index
    %55 = vector.load %arg3[%c0_48, %c0_49] : memref<1x32xf32, #tpu.memory_space<vmem>>, vector<1x32xf32>
    %56 = vector.broadcast %55 : vector<1x32xf32> to vector<80x32xf32>
    %57 = arith.mulf %54, %56 : vector<80x32xf32>
    %c0_50 = arith.constant 0 : index
    %c0_51 = arith.constant 0 : index
    %58 = vector.load %arg4[%c0_50, %c0_51] : memref<1x32xf32, #tpu.memory_space<vmem>>, vector<1x32xf32>
    %59 = vector.broadcast %58 : vector<1x32xf32> to vector<80x32xf32>
    %60 = arith.addf %57, %59 : vector<80x32xf32>
    %cst_52 = arith.constant 0.000000e+00 : f32
    %61 = vector.broadcast %cst_52 : f32 to vector<80x32xf32>
    %62 = arith.cmpf oge, %60, %61 : vector<80x32xf32>
    %cst_53 = arith.constant 2.000000e-01 : f32
    %63 = vector.broadcast %cst_53 : f32 to vector<80x32xf32>
    %64 = arith.mulf %63, %60 : vector<80x32xf32>
    %65 = arith.select %62, %60, %64 : vector<80x32xi1>, vector<80x32xf32>
    %66 = arith.truncf %65 : vector<80x32xf32> to vector<80x32xbf16>
    %c0_54 = arith.constant 0 : index
    %c0_55 = arith.constant 0 : index
    %c0_56 = arith.constant 0 : index
    %67 = vector.load %arg5[%c0_54, %c0_55, %c0_56] : memref<1x80x32xbf16, #tpu.memory_space<vmem>>, vector<1x80x32xbf16>
    %68 = vector.shape_cast %67 : vector<1x80x32xbf16> to vector<80x32xbf16>
    %69 = vector.shape_cast %66 : vector<80x32xbf16> to vector<1x80x32xbf16>
    tpu.vector_store %arg5[%c0_54, %c0_55, %c0_56], %69 {strides = array<i32>} : memref<1x80x32xbf16, #tpu.memory_space<vmem>>, vector<1x80x32xbf16>,
    return
  }
  func.func @transform_0(%arg0: i32) -> (i32, i32, i32) {
    %c0_i32 = arith.constant 0 : i32
    %c0_i32_0 = arith.constant 0 : i32
    %c0_i32_1 = arith.constant 0 : i32
    return %arg0, %c0_i32, %c0_i32_0 : i32, i32, i32
  }
  func.func @transform_1(%arg0: i32) -> (i32, i32, i32) {
    %c0_i32 = arith.constant 0 : i32
    %c0_i32_0 = arith.constant 0 : i32
    %c0_i32_1 = arith.constant 0 : i32
    %c0_i32_2 = arith.constant 0 : i32
    return %c0_i32, %c0_i32_0, %c0_i32_1 : i32, i32, i32
  }
  func.func @transform_2(%arg0: i32) -> (i32, i32) {
    %c0_i32 = arith.constant 0 : i32
    %c0_i32_0 = arith.constant 0 : i32
    %c0_i32_1 = arith.constant 0 : i32
    return %c0_i32, %c0_i32_0 : i32, i32
  }
  func.func @transform_3(%arg0: i32) -> (i32, i32) {
    %c0_i32 = arith.constant 0 : i32
    %c0_i32_0 = arith.constant 0 : i32
    %c0_i32_1 = arith.constant 0 : i32
    return %c0_i32, %c0_i32_0 : i32, i32
  }
  func.func @transform_4(%arg0: i32) -> (i32, i32, i32) {
    %c0_i32 = arith.constant 0 : i32
    %c0_i32_0 = arith.constant 0 : i32
    %c0_i32_1 = arith.constant 0 : i32
    return %arg0, %c0_i32, %c0_i32_0 : i32, i32, i32
  }
}

module attributes {stable_mosaic.version = 11 : i64} {
  func.func @_mm_epilogue_kernel(%arg0: i32, %arg1: i32, %arg2: i32, %arg3: memref<16x384xbf16, #tpu.memory_space<vmem>>, %arg4: memref<384x128xbf16, #tpu.memory_space<vmem>>, %arg5: memref<1x128xf32, #tpu.memory_space<vmem>>, %arg6: memref<1x128xf32, #tpu.memory_space<vmem>>, %arg7: memref<16x128xbf16, #tpu.memory_space<vmem>>, %arg8: memref<16x128xf32, #tpu.memory_space<vmem>>) attributes {dimension_semantics = [#tpu.dimension_semantics<parallel>, #tpu.dimension_semantics<parallel>, #tpu.dimension_semantics<arbitrary>], iteration_bounds = array<i64: 2, 1, 1>, scalar_prefetch = 0 : i64, scratch_operands = 1 : i64, tpu.core_type = #tpu.core_type<tc>, window_params = [{transform_indices = @transform_0, window_bounds = array<i64: 16, 384>}, {transform_indices = @transform_1, window_bounds = array<i64: 384, 128>}, {transform_indices = @transform_2, window_bounds = array<i64: 1, 128>}, {transform_indices = @transform_3, window_bounds = array<i64: 1, 128>}, {transform_indices = @transform_4, window_bounds = array<i64: 16, 128>}]} {
    %c0_i32 = arith.constant 0 : i32
    %0 = arith.cmpi eq, %arg2, %c0_i32 : i32
    %1 = arith.extui %0 : i1 to i32
    %c0_i32_0 = arith.constant 0 : i32
    %2 = arith.cmpi ne, %1, %c0_i32_0 : i32
    scf.if %2 {
      %cst_10 = arith.constant 0.000000e+00 : f32
      %12 = vector.broadcast %cst_10 : f32 to vector<16x128xf32>
      %c0_11 = arith.constant 0 : index
      %c0_12 = arith.constant 0 : index
      %13 = vector.load %arg8[%c0_11, %c0_12] : memref<16x128xf32, #tpu.memory_space<vmem>>, vector<16x128xf32>
      tpu.vector_store %arg8[%c0_11, %c0_12], %12 {strides = array<i32>} : memref<16x128xf32, #tpu.memory_space<vmem>>, vector<16x128xf32>,
    } else {
    }
    %c0 = arith.constant 0 : index
    %c0_1 = arith.constant 0 : index
    %3 = vector.load %arg8[%c0, %c0_1] : memref<16x128xf32, #tpu.memory_space<vmem>>, vector<16x128xf32>
    %c0_2 = arith.constant 0 : index
    %c0_3 = arith.constant 0 : index
    %4 = vector.load %arg3[%c0_2, %c0_3] : memref<16x384xbf16, #tpu.memory_space<vmem>>, vector<16x384xbf16>
    %c0_4 = arith.constant 0 : index
    %c0_5 = arith.constant 0 : index
    %5 = vector.load %arg4[%c0_4, %c0_5] : memref<384x128xbf16, #tpu.memory_space<vmem>>, vector<384x128xbf16>
    %cst = arith.constant dense<0.000000e+00> : vector<16x128xf32>
    %6 = tpu.matmul %4, %5, %cst {dimension_numbers = #tpu.dot_dimension_numbers<[1], [0], [0], [1], [0, 0, 1, 1], [], []>} : vector<16x384xbf16>, vector<384x128xbf16>, vector<16x128xf32> -> vector<16x128xf32>
    %7 = arith.addf %3, %6 : vector<16x128xf32>
    %c0_6 = arith.constant 0 : index
    %c0_7 = arith.constant 0 : index
    %8 = vector.load %arg8[%c0_6, %c0_7] : memref<16x128xf32, #tpu.memory_space<vmem>>, vector<16x128xf32>
    tpu.vector_store %arg8[%c0_6, %c0_7], %7 {strides = array<i32>} : memref<16x128xf32, #tpu.memory_space<vmem>>, vector<16x128xf32>,
    %c0_i32_8 = arith.constant 0 : i32
    %9 = arith.cmpi eq, %arg2, %c0_i32_8 : i32
    %10 = arith.extui %9 : i1 to i32
    %c0_i32_9 = arith.constant 0 : i32
    %11 = arith.cmpi ne, %10, %c0_i32_9 : i32
    scf.if %11 {
      %c0_10 = arith.constant 0 : index
      %c0_11 = arith.constant 0 : index
      %12 = vector.load %arg8[%c0_10, %c0_11] : memref<16x128xf32, #tpu.memory_space<vmem>>, vector<16x128xf32>
      %c0_12 = arith.constant 0 : index
      %c0_13 = arith.constant 0 : index
      %13 = vector.load %arg5[%c0_12, %c0_13] : memref<1x128xf32, #tpu.memory_space<vmem>>, vector<1x128xf32>
      %14 = vector.broadcast %13 : vector<1x128xf32> to vector<16x128xf32>
      %15 = arith.mulf %12, %14 : vector<16x128xf32>
      %c0_14 = arith.constant 0 : index
      %c0_15 = arith.constant 0 : index
      %16 = vector.load %arg6[%c0_14, %c0_15] : memref<1x128xf32, #tpu.memory_space<vmem>>, vector<1x128xf32>
      %17 = vector.broadcast %16 : vector<1x128xf32> to vector<16x128xf32>
      %18 = arith.addf %15, %17 : vector<16x128xf32>
      %cst_16 = arith.constant 0.000000e+00 : f32
      %19 = vector.broadcast %cst_16 : f32 to vector<16x128xf32>
      %20 = arith.cmpf oge, %18, %19 : vector<16x128xf32>
      %cst_17 = arith.constant 2.000000e-01 : f32
      %21 = vector.broadcast %cst_17 : f32 to vector<16x128xf32>
      %22 = arith.mulf %21, %18 : vector<16x128xf32>
      %23 = arith.select %20, %18, %22 : vector<16x128xi1>, vector<16x128xf32>
      %24 = arith.truncf %23 : vector<16x128xf32> to vector<16x128xbf16>
      %c0_18 = arith.constant 0 : index
      %c0_19 = arith.constant 0 : index
      %25 = vector.load %arg7[%c0_18, %c0_19] : memref<16x128xbf16, #tpu.memory_space<vmem>>, vector<16x128xbf16>
      tpu.vector_store %arg7[%c0_18, %c0_19], %24 {strides = array<i32>} : memref<16x128xbf16, #tpu.memory_space<vmem>>, vector<16x128xbf16>,
    } else {
    }
    return
  }
  func.func @transform_0(%arg0: i32, %arg1: i32, %arg2: i32) -> (i32, i32) {
    %c0_i32 = arith.constant 0 : i32
    return %arg0, %arg2 : i32, i32
  }
  func.func @transform_1(%arg0: i32, %arg1: i32, %arg2: i32) -> (i32, i32) {
    %c0_i32 = arith.constant 0 : i32
    return %arg2, %arg1 : i32, i32
  }
  func.func @transform_2(%arg0: i32, %arg1: i32, %arg2: i32) -> (i32, i32) {
    %c0_i32 = arith.constant 0 : i32
    %c0_i32_0 = arith.constant 0 : i32
    return %c0_i32, %arg1 : i32, i32
  }
  func.func @transform_3(%arg0: i32, %arg1: i32, %arg2: i32) -> (i32, i32) {
    %c0_i32 = arith.constant 0 : i32
    %c0_i32_0 = arith.constant 0 : i32
    return %c0_i32, %arg1 : i32, i32
  }
  func.func @transform_4(%arg0: i32, %arg1: i32, %arg2: i32) -> (i32, i32) {
    %c0_i32 = arith.constant 0 : i32
    return %arg0, %arg1 : i32, i32
  }
}

module attributes {stable_mosaic.version = 11 : i64} {
  func.func @_conv_s1_kernel(%arg0: i32, %arg1: memref<1x42x64xbf16, #tpu.memory_space<vmem>>, %arg2: memref<9x64x64xbf16, #tpu.memory_space<vmem>>, %arg3: memref<1x64xf32, #tpu.memory_space<vmem>>, %arg4: memref<1x64xf32, #tpu.memory_space<vmem>>, %arg5: memref<1x24x64xbf16, #tpu.memory_space<vmem>>) attributes {dimension_semantics = [#tpu.dimension_semantics<parallel>], iteration_bounds = array<i64: 2>, scalar_prefetch = 0 : i64, scratch_operands = 0 : i64, tpu.core_type = #tpu.core_type<tc>, window_params = [{transform_indices = @transform_0, window_bounds = array<i64: 1, 42, 64>}, {pipeline_mode = #tpu.pipeline_mode<synchronous>, transform_indices = @transform_1, window_bounds = array<i64: 9, 64, 64>}, {pipeline_mode = #tpu.pipeline_mode<synchronous>, transform_indices = @transform_2, window_bounds = array<i64: 1, 64>}, {pipeline_mode = #tpu.pipeline_mode<synchronous>, transform_indices = @transform_3, window_bounds = array<i64: 1, 64>}, {transform_indices = @transform_4, window_bounds = array<i64: 1, 24, 64>}]} {
    %cst = arith.constant 0.000000e+00 : f32
    %0 = vector.broadcast %cst : f32 to vector<24x64xf32>
    %c0 = arith.constant 0 : index
    %c0_0 = arith.constant 0 : index
    %c0_1 = arith.constant 0 : index
    %1 = vector.load %arg1[%c0, %c0_0, %c0_1] : memref<1x42x64xbf16, #tpu.memory_space<vmem>>, vector<1x24x64xbf16>
    %2 = vector.shape_cast %1 : vector<1x24x64xbf16> to vector<24x64xbf16>
    %c0_2 = arith.constant 0 : index
    %c0_3 = arith.constant 0 : index
    %c0_4 = arith.constant 0 : index
    %3 = vector.load %arg2[%c0_2, %c0_3, %c0_4] : memref<9x64x64xbf16, #tpu.memory_space<vmem>>, vector<1x64x64xbf16>
    %4 = vector.shape_cast %3 : vector<1x64x64xbf16> to vector<64x64xbf16>
    %cst_5 = arith.constant dense<0.000000e+00> : vector<24x64xf32>
    %5 = tpu.matmul %2, %4, %cst_5 {dimension_numbers = #tpu.dot_dimension_numbers<[1], [0], [0], [1], [0, 0, 1, 1], [], []>} : vector<24x64xbf16>, vector<64x64xbf16>, vector<24x64xf32> -> vector<24x64xf32>
    %6 = arith.addf %0, %5 : vector<24x64xf32>
    %c0_6 = arith.constant 0 : index
    %c1 = arith.constant 1 : index
    %c0_7 = arith.constant 0 : index
    %7 = vector.load %arg1[%c0_6, %c1, %c0_7] : memref<1x42x64xbf16, #tpu.memory_space<vmem>>, vector<1x24x64xbf16>
    %8 = vector.shape_cast %7 : vector<1x24x64xbf16> to vector<24x64xbf16>
    %c1_8 = arith.constant 1 : index
    %c0_9 = arith.constant 0 : index
    %c0_10 = arith.constant 0 : index
    %9 = vector.load %arg2[%c1_8, %c0_9, %c0_10] : memref<9x64x64xbf16, #tpu.memory_space<vmem>>, vector<1x64x64xbf16>
    %10 = vector.shape_cast %9 : vector<1x64x64xbf16> to vector<64x64xbf16>
    %cst_11 = arith.constant dense<0.000000e+00> : vector<24x64xf32>
    %11 = tpu.matmul %8, %10, %cst_11 {dimension_numbers = #tpu.dot_dimension_numbers<[1], [0], [0], [1], [0, 0, 1, 1], [], []>} : vector<24x64xbf16>, vector<64x64xbf16>, vector<24x64xf32> -> vector<24x64xf32>
    %12 = arith.addf %6, %11 : vector<24x64xf32>
    %c0_12 = arith.constant 0 : index
    %c2 = arith.constant 2 : index
    %c0_13 = arith.constant 0 : index
    %13 = vector.load %arg1[%c0_12, %c2, %c0_13] : memref<1x42x64xbf16, #tpu.memory_space<vmem>>, vector<1x24x64xbf16>
    %14 = vector.shape_cast %13 : vector<1x24x64xbf16> to vector<24x64xbf16>
    %c2_14 = arith.constant 2 : index
    %c0_15 = arith.constant 0 : index
    %c0_16 = arith.constant 0 : index
    %15 = vector.load %arg2[%c2_14, %c0_15, %c0_16] : memref<9x64x64xbf16, #tpu.memory_space<vmem>>, vector<1x64x64xbf16>
    %16 = vector.shape_cast %15 : vector<1x64x64xbf16> to vector<64x64xbf16>
    %cst_17 = arith.constant dense<0.000000e+00> : vector<24x64xf32>
    %17 = tpu.matmul %14, %16, %cst_17 {dimension_numbers = #tpu.dot_dimension_numbers<[1], [0], [0], [1], [0, 0, 1, 1], [], []>} : vector<24x64xbf16>, vector<64x64xbf16>, vector<24x64xf32> -> vector<24x64xf32>
    %18 = arith.addf %12, %17 : vector<24x64xf32>
    %c0_18 = arith.constant 0 : index
    %c6 = arith.constant 6 : index
    %c0_19 = arith.constant 0 : index
    %19 = vector.load %arg1[%c0_18, %c6, %c0_19] : memref<1x42x64xbf16, #tpu.memory_space<vmem>>, vector<1x24x64xbf16>
    %20 = vector.shape_cast %19 : vector<1x24x64xbf16> to vector<24x64xbf16>
    %c3 = arith.constant 3 : index
    %c0_20 = arith.constant 0 : index
    %c0_21 = arith.constant 0 : index
    %21 = vector.load %arg2[%c3, %c0_20, %c0_21] : memref<9x64x64xbf16, #tpu.memory_space<vmem>>, vector<1x64x64xbf16>
    %22 = vector.shape_cast %21 : vector<1x64x64xbf16> to vector<64x64xbf16>
    %cst_22 = arith.constant dense<0.000000e+00> : vector<24x64xf32>
    %23 = tpu.matmul %20, %22, %cst_22 {dimension_numbers = #tpu.dot_dimension_numbers<[1], [0], [0], [1], [0, 0, 1, 1], [], []>} : vector<24x64xbf16>, vector<64x64xbf16>, vector<24x64xf32> -> vector<24x64xf32>
    %24 = arith.addf %18, %23 : vector<24x64xf32>
    %c0_23 = arith.constant 0 : index
    %c7 = arith.constant 7 : index
    %c0_24 = arith.constant 0 : index
    %25 = vector.load %arg1[%c0_23, %c7, %c0_24] : memref<1x42x64xbf16, #tpu.memory_space<vmem>>, vector<1x24x64xbf16>
    %26 = vector.shape_cast %25 : vector<1x24x64xbf16> to vector<24x64xbf16>
    %c4 = arith.constant 4 : index
    %c0_25 = arith.constant 0 : index
    %c0_26 = arith.constant 0 : index
    %27 = vector.load %arg2[%c4, %c0_25, %c0_26] : memref<9x64x64xbf16, #tpu.memory_space<vmem>>, vector<1x64x64xbf16>
    %28 = vector.shape_cast %27 : vector<1x64x64xbf16> to vector<64x64xbf16>
    %cst_27 = arith.constant dense<0.000000e+00> : vector<24x64xf32>
    %29 = tpu.matmul %26, %28, %cst_27 {dimension_numbers = #tpu.dot_dimension_numbers<[1], [0], [0], [1], [0, 0, 1, 1], [], []>} : vector<24x64xbf16>, vector<64x64xbf16>, vector<24x64xf32> -> vector<24x64xf32>
    %30 = arith.addf %24, %29 : vector<24x64xf32>
    %c0_28 = arith.constant 0 : index
    %c8 = arith.constant 8 : index
    %c0_29 = arith.constant 0 : index
    %31 = vector.load %arg1[%c0_28, %c8, %c0_29] : memref<1x42x64xbf16, #tpu.memory_space<vmem>>, vector<1x24x64xbf16>
    %32 = vector.shape_cast %31 : vector<1x24x64xbf16> to vector<24x64xbf16>
    %c5 = arith.constant 5 : index
    %c0_30 = arith.constant 0 : index
    %c0_31 = arith.constant 0 : index
    %33 = vector.load %arg2[%c5, %c0_30, %c0_31] : memref<9x64x64xbf16, #tpu.memory_space<vmem>>, vector<1x64x64xbf16>
    %34 = vector.shape_cast %33 : vector<1x64x64xbf16> to vector<64x64xbf16>
    %cst_32 = arith.constant dense<0.000000e+00> : vector<24x64xf32>
    %35 = tpu.matmul %32, %34, %cst_32 {dimension_numbers = #tpu.dot_dimension_numbers<[1], [0], [0], [1], [0, 0, 1, 1], [], []>} : vector<24x64xbf16>, vector<64x64xbf16>, vector<24x64xf32> -> vector<24x64xf32>
    %36 = arith.addf %30, %35 : vector<24x64xf32>
    %c0_33 = arith.constant 0 : index
    %c12 = arith.constant 12 : index
    %c0_34 = arith.constant 0 : index
    %37 = vector.load %arg1[%c0_33, %c12, %c0_34] : memref<1x42x64xbf16, #tpu.memory_space<vmem>>, vector<1x24x64xbf16>
    %38 = vector.shape_cast %37 : vector<1x24x64xbf16> to vector<24x64xbf16>
    %c6_35 = arith.constant 6 : index
    %c0_36 = arith.constant 0 : index
    %c0_37 = arith.constant 0 : index
    %39 = vector.load %arg2[%c6_35, %c0_36, %c0_37] : memref<9x64x64xbf16, #tpu.memory_space<vmem>>, vector<1x64x64xbf16>
    %40 = vector.shape_cast %39 : vector<1x64x64xbf16> to vector<64x64xbf16>
    %cst_38 = arith.constant dense<0.000000e+00> : vector<24x64xf32>
    %41 = tpu.matmul %38, %40, %cst_38 {dimension_numbers = #tpu.dot_dimension_numbers<[1], [0], [0], [1], [0, 0, 1, 1], [], []>} : vector<24x64xbf16>, vector<64x64xbf16>, vector<24x64xf32> -> vector<24x64xf32>
    %42 = arith.addf %36, %41 : vector<24x64xf32>
    %c0_39 = arith.constant 0 : index
    %c13 = arith.constant 13 : index
    %c0_40 = arith.constant 0 : index
    %43 = vector.load %arg1[%c0_39, %c13, %c0_40] : memref<1x42x64xbf16, #tpu.memory_space<vmem>>, vector<1x24x64xbf16>
    %44 = vector.shape_cast %43 : vector<1x24x64xbf16> to vector<24x64xbf16>
    %c7_41 = arith.constant 7 : index
    %c0_42 = arith.constant 0 : index
    %c0_43 = arith.constant 0 : index
    %45 = vector.load %arg2[%c7_41, %c0_42, %c0_43] : memref<9x64x64xbf16, #tpu.memory_space<vmem>>, vector<1x64x64xbf16>
    %46 = vector.shape_cast %45 : vector<1x64x64xbf16> to vector<64x64xbf16>
    %cst_44 = arith.constant dense<0.000000e+00> : vector<24x64xf32>
    %47 = tpu.matmul %44, %46, %cst_44 {dimension_numbers = #tpu.dot_dimension_numbers<[1], [0], [0], [1], [0, 0, 1, 1], [], []>} : vector<24x64xbf16>, vector<64x64xbf16>, vector<24x64xf32> -> vector<24x64xf32>
    %48 = arith.addf %42, %47 : vector<24x64xf32>
    %c0_45 = arith.constant 0 : index
    %c14 = arith.constant 14 : index
    %c0_46 = arith.constant 0 : index
    %49 = vector.load %arg1[%c0_45, %c14, %c0_46] : memref<1x42x64xbf16, #tpu.memory_space<vmem>>, vector<1x24x64xbf16>
    %50 = vector.shape_cast %49 : vector<1x24x64xbf16> to vector<24x64xbf16>
    %c8_47 = arith.constant 8 : index
    %c0_48 = arith.constant 0 : index
    %c0_49 = arith.constant 0 : index
    %51 = vector.load %arg2[%c8_47, %c0_48, %c0_49] : memref<9x64x64xbf16, #tpu.memory_space<vmem>>, vector<1x64x64xbf16>
    %52 = vector.shape_cast %51 : vector<1x64x64xbf16> to vector<64x64xbf16>
    %cst_50 = arith.constant dense<0.000000e+00> : vector<24x64xf32>
    %53 = tpu.matmul %50, %52, %cst_50 {dimension_numbers = #tpu.dot_dimension_numbers<[1], [0], [0], [1], [0, 0, 1, 1], [], []>} : vector<24x64xbf16>, vector<64x64xbf16>, vector<24x64xf32> -> vector<24x64xf32>
    %54 = arith.addf %48, %53 : vector<24x64xf32>
    %c0_51 = arith.constant 0 : index
    %c0_52 = arith.constant 0 : index
    %55 = vector.load %arg3[%c0_51, %c0_52] : memref<1x64xf32, #tpu.memory_space<vmem>>, vector<1x64xf32>
    %56 = vector.broadcast %55 : vector<1x64xf32> to vector<24x64xf32>
    %57 = arith.mulf %54, %56 : vector<24x64xf32>
    %c0_53 = arith.constant 0 : index
    %c0_54 = arith.constant 0 : index
    %58 = vector.load %arg4[%c0_53, %c0_54] : memref<1x64xf32, #tpu.memory_space<vmem>>, vector<1x64xf32>
    %59 = vector.broadcast %58 : vector<1x64xf32> to vector<24x64xf32>
    %60 = arith.addf %57, %59 : vector<24x64xf32>
    %cst_55 = arith.constant 0.000000e+00 : f32
    %61 = vector.broadcast %cst_55 : f32 to vector<24x64xf32>
    %62 = arith.cmpf oge, %60, %61 : vector<24x64xf32>
    %cst_56 = arith.constant 2.000000e-01 : f32
    %63 = vector.broadcast %cst_56 : f32 to vector<24x64xf32>
    %64 = arith.mulf %63, %60 : vector<24x64xf32>
    %65 = arith.select %62, %60, %64 : vector<24x64xi1>, vector<24x64xf32>
    %66 = arith.truncf %65 : vector<24x64xf32> to vector<24x64xbf16>
    %c0_57 = arith.constant 0 : index
    %c0_58 = arith.constant 0 : index
    %c0_59 = arith.constant 0 : index
    %67 = vector.load %arg5[%c0_57, %c0_58, %c0_59] : memref<1x24x64xbf16, #tpu.memory_space<vmem>>, vector<1x24x64xbf16>
    %68 = vector.shape_cast %67 : vector<1x24x64xbf16> to vector<24x64xbf16>
    %69 = vector.shape_cast %66 : vector<24x64xbf16> to vector<1x24x64xbf16>
    tpu.vector_store %arg5[%c0_57, %c0_58, %c0_59], %69 {strides = array<i32>} : memref<1x24x64xbf16, #tpu.memory_space<vmem>>, vector<1x24x64xbf16>,
    return
  }
  func.func @transform_0(%arg0: i32) -> (i32, i32, i32) {
    %c0_i32 = arith.constant 0 : i32
    %c0_i32_0 = arith.constant 0 : i32
    %c0_i32_1 = arith.constant 0 : i32
    return %arg0, %c0_i32, %c0_i32_0 : i32, i32, i32
  }
  func.func @transform_1(%arg0: i32) -> (i32, i32, i32) {
    %c0_i32 = arith.constant 0 : i32
    %c0_i32_0 = arith.constant 0 : i32
    %c0_i32_1 = arith.constant 0 : i32
    %c0_i32_2 = arith.constant 0 : i32
    return %c0_i32, %c0_i32_0, %c0_i32_1 : i32, i32, i32
  }
  func.func @transform_2(%arg0: i32) -> (i32, i32) {
    %c0_i32 = arith.constant 0 : i32
    %c0_i32_0 = arith.constant 0 : i32
    %c0_i32_1 = arith.constant 0 : i32
    return %c0_i32, %c0_i32_0 : i32, i32
  }
  func.func @transform_3(%arg0: i32) -> (i32, i32) {
    %c0_i32 = arith.constant 0 : i32
    %c0_i32_0 = arith.constant 0 : i32
    %c0_i32_1 = arith.constant 0 : i32
    return %c0_i32, %c0_i32_0 : i32, i32
  }
  func.func @transform_4(%arg0: i32) -> (i32, i32, i32) {
    %c0_i32 = arith.constant 0 : i32
    %c0_i32_0 = arith.constant 0 : i32
    %c0_i32_1 = arith.constant 0 : i32
    return %arg0, %c0_i32, %c0_i32_0 : i32, i32, i32
  }
}

module attributes {stable_mosaic.version = 11 : i64} {
  func.func @_conv_s1_kernel(%arg0: i32, %arg1: memref<1x42x64xbf16, #tpu.memory_space<vmem>>, %arg2: memref<9x64x64xbf16, #tpu.memory_space<vmem>>, %arg3: memref<1x64xf32, #tpu.memory_space<vmem>>, %arg4: memref<1x64xf32, #tpu.memory_space<vmem>>, %arg5: memref<1x24x64xbf16, #tpu.memory_space<vmem>>, %arg6: memref<1x24x64xbf16, #tpu.memory_space<vmem>>) attributes {dimension_semantics = [#tpu.dimension_semantics<parallel>], iteration_bounds = array<i64: 2>, scalar_prefetch = 0 : i64, scratch_operands = 0 : i64, tpu.core_type = #tpu.core_type<tc>, window_params = [{transform_indices = @transform_0, window_bounds = array<i64: 1, 42, 64>}, {pipeline_mode = #tpu.pipeline_mode<synchronous>, transform_indices = @transform_1, window_bounds = array<i64: 9, 64, 64>}, {pipeline_mode = #tpu.pipeline_mode<synchronous>, transform_indices = @transform_2, window_bounds = array<i64: 1, 64>}, {pipeline_mode = #tpu.pipeline_mode<synchronous>, transform_indices = @transform_3, window_bounds = array<i64: 1, 64>}, {transform_indices = @transform_4, window_bounds = array<i64: 1, 24, 64>}, {transform_indices = @transform_5, window_bounds = array<i64: 1, 24, 64>}]} {
    %cst = arith.constant 0.000000e+00 : f32
    %0 = vector.broadcast %cst : f32 to vector<24x64xf32>
    %c0 = arith.constant 0 : index
    %c0_0 = arith.constant 0 : index
    %c0_1 = arith.constant 0 : index
    %1 = vector.load %arg1[%c0, %c0_0, %c0_1] : memref<1x42x64xbf16, #tpu.memory_space<vmem>>, vector<1x24x64xbf16>
    %2 = vector.shape_cast %1 : vector<1x24x64xbf16> to vector<24x64xbf16>
    %c0_2 = arith.constant 0 : index
    %c0_3 = arith.constant 0 : index
    %c0_4 = arith.constant 0 : index
    %3 = vector.load %arg2[%c0_2, %c0_3, %c0_4] : memref<9x64x64xbf16, #tpu.memory_space<vmem>>, vector<1x64x64xbf16>
    %4 = vector.shape_cast %3 : vector<1x64x64xbf16> to vector<64x64xbf16>
    %cst_5 = arith.constant dense<0.000000e+00> : vector<24x64xf32>
    %5 = tpu.matmul %2, %4, %cst_5 {dimension_numbers = #tpu.dot_dimension_numbers<[1], [0], [0], [1], [0, 0, 1, 1], [], []>} : vector<24x64xbf16>, vector<64x64xbf16>, vector<24x64xf32> -> vector<24x64xf32>
    %6 = arith.addf %0, %5 : vector<24x64xf32>
    %c0_6 = arith.constant 0 : index
    %c1 = arith.constant 1 : index
    %c0_7 = arith.constant 0 : index
    %7 = vector.load %arg1[%c0_6, %c1, %c0_7] : memref<1x42x64xbf16, #tpu.memory_space<vmem>>, vector<1x24x64xbf16>
    %8 = vector.shape_cast %7 : vector<1x24x64xbf16> to vector<24x64xbf16>
    %c1_8 = arith.constant 1 : index
    %c0_9 = arith.constant 0 : index
    %c0_10 = arith.constant 0 : index
    %9 = vector.load %arg2[%c1_8, %c0_9, %c0_10] : memref<9x64x64xbf16, #tpu.memory_space<vmem>>, vector<1x64x64xbf16>
    %10 = vector.shape_cast %9 : vector<1x64x64xbf16> to vector<64x64xbf16>
    %cst_11 = arith.constant dense<0.000000e+00> : vector<24x64xf32>
    %11 = tpu.matmul %8, %10, %cst_11 {dimension_numbers = #tpu.dot_dimension_numbers<[1], [0], [0], [1], [0, 0, 1, 1], [], []>} : vector<24x64xbf16>, vector<64x64xbf16>, vector<24x64xf32> -> vector<24x64xf32>
    %12 = arith.addf %6, %11 : vector<24x64xf32>
    %c0_12 = arith.constant 0 : index
    %c2 = arith.constant 2 : index
    %c0_13 = arith.constant 0 : index
    %13 = vector.load %arg1[%c0_12, %c2, %c0_13] : memref<1x42x64xbf16, #tpu.memory_space<vmem>>, vector<1x24x64xbf16>
    %14 = vector.shape_cast %13 : vector<1x24x64xbf16> to vector<24x64xbf16>
    %c2_14 = arith.constant 2 : index
    %c0_15 = arith.constant 0 : index
    %c0_16 = arith.constant 0 : index
    %15 = vector.load %arg2[%c2_14, %c0_15, %c0_16] : memref<9x64x64xbf16, #tpu.memory_space<vmem>>, vector<1x64x64xbf16>
    %16 = vector.shape_cast %15 : vector<1x64x64xbf16> to vector<64x64xbf16>
    %cst_17 = arith.constant dense<0.000000e+00> : vector<24x64xf32>
    %17 = tpu.matmul %14, %16, %cst_17 {dimension_numbers = #tpu.dot_dimension_numbers<[1], [0], [0], [1], [0, 0, 1, 1], [], []>} : vector<24x64xbf16>, vector<64x64xbf16>, vector<24x64xf32> -> vector<24x64xf32>
    %18 = arith.addf %12, %17 : vector<24x64xf32>
    %c0_18 = arith.constant 0 : index
    %c6 = arith.constant 6 : index
    %c0_19 = arith.constant 0 : index
    %19 = vector.load %arg1[%c0_18, %c6, %c0_19] : memref<1x42x64xbf16, #tpu.memory_space<vmem>>, vector<1x24x64xbf16>
    %20 = vector.shape_cast %19 : vector<1x24x64xbf16> to vector<24x64xbf16>
    %c3 = arith.constant 3 : index
    %c0_20 = arith.constant 0 : index
    %c0_21 = arith.constant 0 : index
    %21 = vector.load %arg2[%c3, %c0_20, %c0_21] : memref<9x64x64xbf16, #tpu.memory_space<vmem>>, vector<1x64x64xbf16>
    %22 = vector.shape_cast %21 : vector<1x64x64xbf16> to vector<64x64xbf16>
    %cst_22 = arith.constant dense<0.000000e+00> : vector<24x64xf32>
    %23 = tpu.matmul %20, %22, %cst_22 {dimension_numbers = #tpu.dot_dimension_numbers<[1], [0], [0], [1], [0, 0, 1, 1], [], []>} : vector<24x64xbf16>, vector<64x64xbf16>, vector<24x64xf32> -> vector<24x64xf32>
    %24 = arith.addf %18, %23 : vector<24x64xf32>
    %c0_23 = arith.constant 0 : index
    %c7 = arith.constant 7 : index
    %c0_24 = arith.constant 0 : index
    %25 = vector.load %arg1[%c0_23, %c7, %c0_24] : memref<1x42x64xbf16, #tpu.memory_space<vmem>>, vector<1x24x64xbf16>
    %26 = vector.shape_cast %25 : vector<1x24x64xbf16> to vector<24x64xbf16>
    %c4 = arith.constant 4 : index
    %c0_25 = arith.constant 0 : index
    %c0_26 = arith.constant 0 : index
    %27 = vector.load %arg2[%c4, %c0_25, %c0_26] : memref<9x64x64xbf16, #tpu.memory_space<vmem>>, vector<1x64x64xbf16>
    %28 = vector.shape_cast %27 : vector<1x64x64xbf16> to vector<64x64xbf16>
    %cst_27 = arith.constant dense<0.000000e+00> : vector<24x64xf32>
    %29 = tpu.matmul %26, %28, %cst_27 {dimension_numbers = #tpu.dot_dimension_numbers<[1], [0], [0], [1], [0, 0, 1, 1], [], []>} : vector<24x64xbf16>, vector<64x64xbf16>, vector<24x64xf32> -> vector<24x64xf32>
    %30 = arith.addf %24, %29 : vector<24x64xf32>
    %c0_28 = arith.constant 0 : index
    %c8 = arith.constant 8 : index
    %c0_29 = arith.constant 0 : index
    %31 = vector.load %arg1[%c0_28, %c8, %c0_29] : memref<1x42x64xbf16, #tpu.memory_space<vmem>>, vector<1x24x64xbf16>
    %32 = vector.shape_cast %31 : vector<1x24x64xbf16> to vector<24x64xbf16>
    %c5 = arith.constant 5 : index
    %c0_30 = arith.constant 0 : index
    %c0_31 = arith.constant 0 : index
    %33 = vector.load %arg2[%c5, %c0_30, %c0_31] : memref<9x64x64xbf16, #tpu.memory_space<vmem>>, vector<1x64x64xbf16>
    %34 = vector.shape_cast %33 : vector<1x64x64xbf16> to vector<64x64xbf16>
    %cst_32 = arith.constant dense<0.000000e+00> : vector<24x64xf32>
    %35 = tpu.matmul %32, %34, %cst_32 {dimension_numbers = #tpu.dot_dimension_numbers<[1], [0], [0], [1], [0, 0, 1, 1], [], []>} : vector<24x64xbf16>, vector<64x64xbf16>, vector<24x64xf32> -> vector<24x64xf32>
    %36 = arith.addf %30, %35 : vector<24x64xf32>
    %c0_33 = arith.constant 0 : index
    %c12 = arith.constant 12 : index
    %c0_34 = arith.constant 0 : index
    %37 = vector.load %arg1[%c0_33, %c12, %c0_34] : memref<1x42x64xbf16, #tpu.memory_space<vmem>>, vector<1x24x64xbf16>
    %38 = vector.shape_cast %37 : vector<1x24x64xbf16> to vector<24x64xbf16>
    %c6_35 = arith.constant 6 : index
    %c0_36 = arith.constant 0 : index
    %c0_37 = arith.constant 0 : index
    %39 = vector.load %arg2[%c6_35, %c0_36, %c0_37] : memref<9x64x64xbf16, #tpu.memory_space<vmem>>, vector<1x64x64xbf16>
    %40 = vector.shape_cast %39 : vector<1x64x64xbf16> to vector<64x64xbf16>
    %cst_38 = arith.constant dense<0.000000e+00> : vector<24x64xf32>
    %41 = tpu.matmul %38, %40, %cst_38 {dimension_numbers = #tpu.dot_dimension_numbers<[1], [0], [0], [1], [0, 0, 1, 1], [], []>} : vector<24x64xbf16>, vector<64x64xbf16>, vector<24x64xf32> -> vector<24x64xf32>
    %42 = arith.addf %36, %41 : vector<24x64xf32>
    %c0_39 = arith.constant 0 : index
    %c13 = arith.constant 13 : index
    %c0_40 = arith.constant 0 : index
    %43 = vector.load %arg1[%c0_39, %c13, %c0_40] : memref<1x42x64xbf16, #tpu.memory_space<vmem>>, vector<1x24x64xbf16>
    %44 = vector.shape_cast %43 : vector<1x24x64xbf16> to vector<24x64xbf16>
    %c7_41 = arith.constant 7 : index
    %c0_42 = arith.constant 0 : index
    %c0_43 = arith.constant 0 : index
    %45 = vector.load %arg2[%c7_41, %c0_42, %c0_43] : memref<9x64x64xbf16, #tpu.memory_space<vmem>>, vector<1x64x64xbf16>
    %46 = vector.shape_cast %45 : vector<1x64x64xbf16> to vector<64x64xbf16>
    %cst_44 = arith.constant dense<0.000000e+00> : vector<24x64xf32>
    %47 = tpu.matmul %44, %46, %cst_44 {dimension_numbers = #tpu.dot_dimension_numbers<[1], [0], [0], [1], [0, 0, 1, 1], [], []>} : vector<24x64xbf16>, vector<64x64xbf16>, vector<24x64xf32> -> vector<24x64xf32>
    %48 = arith.addf %42, %47 : vector<24x64xf32>
    %c0_45 = arith.constant 0 : index
    %c14 = arith.constant 14 : index
    %c0_46 = arith.constant 0 : index
    %49 = vector.load %arg1[%c0_45, %c14, %c0_46] : memref<1x42x64xbf16, #tpu.memory_space<vmem>>, vector<1x24x64xbf16>
    %50 = vector.shape_cast %49 : vector<1x24x64xbf16> to vector<24x64xbf16>
    %c8_47 = arith.constant 8 : index
    %c0_48 = arith.constant 0 : index
    %c0_49 = arith.constant 0 : index
    %51 = vector.load %arg2[%c8_47, %c0_48, %c0_49] : memref<9x64x64xbf16, #tpu.memory_space<vmem>>, vector<1x64x64xbf16>
    %52 = vector.shape_cast %51 : vector<1x64x64xbf16> to vector<64x64xbf16>
    %cst_50 = arith.constant dense<0.000000e+00> : vector<24x64xf32>
    %53 = tpu.matmul %50, %52, %cst_50 {dimension_numbers = #tpu.dot_dimension_numbers<[1], [0], [0], [1], [0, 0, 1, 1], [], []>} : vector<24x64xbf16>, vector<64x64xbf16>, vector<24x64xf32> -> vector<24x64xf32>
    %54 = arith.addf %48, %53 : vector<24x64xf32>
    %c0_51 = arith.constant 0 : index
    %c0_52 = arith.constant 0 : index
    %55 = vector.load %arg3[%c0_51, %c0_52] : memref<1x64xf32, #tpu.memory_space<vmem>>, vector<1x64xf32>
    %56 = vector.broadcast %55 : vector<1x64xf32> to vector<24x64xf32>
    %57 = arith.mulf %54, %56 : vector<24x64xf32>
    %c0_53 = arith.constant 0 : index
    %c0_54 = arith.constant 0 : index
    %58 = vector.load %arg4[%c0_53, %c0_54] : memref<1x64xf32, #tpu.memory_space<vmem>>, vector<1x64xf32>
    %59 = vector.broadcast %58 : vector<1x64xf32> to vector<24x64xf32>
    %60 = arith.addf %57, %59 : vector<24x64xf32>
    %c0_55 = arith.constant 0 : index
    %c0_56 = arith.constant 0 : index
    %c0_57 = arith.constant 0 : index
    %61 = vector.load %arg5[%c0_55, %c0_56, %c0_57] : memref<1x24x64xbf16, #tpu.memory_space<vmem>>, vector<1x24x64xbf16>
    %62 = vector.shape_cast %61 : vector<1x24x64xbf16> to vector<24x64xbf16>
    %63 = arith.extf %62 : vector<24x64xbf16> to vector<24x64xf32>
    %64 = arith.addf %60, %63 : vector<24x64xf32>
    %cst_58 = arith.constant 0.000000e+00 : f32
    %65 = vector.broadcast %cst_58 : f32 to vector<24x64xf32>
    %66 = arith.cmpf oge, %64, %65 : vector<24x64xf32>
    %cst_59 = arith.constant 2.000000e-01 : f32
    %67 = vector.broadcast %cst_59 : f32 to vector<24x64xf32>
    %68 = arith.mulf %67, %64 : vector<24x64xf32>
    %69 = arith.select %66, %64, %68 : vector<24x64xi1>, vector<24x64xf32>
    %70 = arith.truncf %69 : vector<24x64xf32> to vector<24x64xbf16>
    %c0_60 = arith.constant 0 : index
    %c0_61 = arith.constant 0 : index
    %c0_62 = arith.constant 0 : index
    %71 = vector.load %arg6[%c0_60, %c0_61, %c0_62] : memref<1x24x64xbf16, #tpu.memory_space<vmem>>, vector<1x24x64xbf16>
    %72 = vector.shape_cast %71 : vector<1x24x64xbf16> to vector<24x64xbf16>
    %73 = vector.shape_cast %70 : vector<24x64xbf16> to vector<1x24x64xbf16>
    tpu.vector_store %arg6[%c0_60, %c0_61, %c0_62], %73 {strides = array<i32>} : memref<1x24x64xbf16, #tpu.memory_space<vmem>>, vector<1x24x64xbf16>,
    return
  }
  func.func @transform_0(%arg0: i32) -> (i32, i32, i32) {
    %c0_i32 = arith.constant 0 : i32
    %c0_i32_0 = arith.constant 0 : i32
    %c0_i32_1 = arith.constant 0 : i32
    return %arg0, %c0_i32, %c0_i32_0 : i32, i32, i32
  }
  func.func @transform_1(%arg0: i32) -> (i32, i32, i32) {
    %c0_i32 = arith.constant 0 : i32
    %c0_i32_0 = arith.constant 0 : i32
    %c0_i32_1 = arith.constant 0 : i32
    %c0_i32_2 = arith.constant 0 : i32
    return %c0_i32, %c0_i32_0, %c0_i32_1 : i32, i32, i32
  }
  func.func @transform_2(%arg0: i32) -> (i32, i32) {
    %c0_i32 = arith.constant 0 : i32
    %c0_i32_0 = arith.constant 0 : i32
    %c0_i32_1 = arith.constant 0 : i32
    return %c0_i32, %c0_i32_0 : i32, i32
  }
  func.func @transform_3(%arg0: i32) -> (i32, i32) {
    %c0_i32 = arith.constant 0 : i32
    %c0_i32_0 = arith.constant 0 : i32
    %c0_i32_1 = arith.constant 0 : i32
    return %c0_i32, %c0_i32_0 : i32, i32
  }
  func.func @transform_4(%arg0: i32) -> (i32, i32, i32) {
    %c0_i32 = arith.constant 0 : i32
    %c0_i32_0 = arith.constant 0 : i32
    %c0_i32_1 = arith.constant 0 : i32
    return %arg0, %c0_i32, %c0_i32_0 : i32, i32, i32
  }
  func.func @transform_5(%arg0: i32) -> (i32, i32, i32) {
    %c0_i32 = arith.constant 0 : i32
    %c0_i32_0 = arith.constant 0 : i32
    %c0_i32_1 = arith.constant 0 : i32
    return %arg0, %c0_i32, %c0_i32_0 : i32, i32, i32
  }
}

module attributes {stable_mosaic.version = 11 : i64} {
  func.func @_conv_s1_kernel(%arg0: i32, %arg1: memref<1x110x64xbf16, #tpu.memory_space<vmem>>, %arg2: memref<9x64x64xbf16, #tpu.memory_space<vmem>>, %arg3: memref<1x64xf32, #tpu.memory_space<vmem>>, %arg4: memref<1x64xf32, #tpu.memory_space<vmem>>, %arg5: memref<1x40x64xbf16, #tpu.memory_space<vmem>>) attributes {dimension_semantics = [#tpu.dimension_semantics<parallel>], iteration_bounds = array<i64: 2>, scalar_prefetch = 0 : i64, scratch_operands = 0 : i64, tpu.core_type = #tpu.core_type<tc>, window_params = [{transform_indices = @transform_0, window_bounds = array<i64: 1, 110, 64>}, {pipeline_mode = #tpu.pipeline_mode<synchronous>, transform_indices = @transform_1, window_bounds = array<i64: 9, 64, 64>}, {pipeline_mode = #tpu.pipeline_mode<synchronous>, transform_indices = @transform_2, window_bounds = array<i64: 1, 64>}, {pipeline_mode = #tpu.pipeline_mode<synchronous>, transform_indices = @transform_3, window_bounds = array<i64: 1, 64>}, {transform_indices = @transform_4, window_bounds = array<i64: 1, 40, 64>}]} {
    %cst = arith.constant 0.000000e+00 : f32
    %0 = vector.broadcast %cst : f32 to vector<40x64xf32>
    %c0 = arith.constant 0 : index
    %c0_0 = arith.constant 0 : index
    %c0_1 = arith.constant 0 : index
    %1 = vector.load %arg1[%c0, %c0_0, %c0_1] : memref<1x110x64xbf16, #tpu.memory_space<vmem>>, vector<1x40x64xbf16>
    %2 = vector.shape_cast %1 : vector<1x40x64xbf16> to vector<40x64xbf16>
    %c0_2 = arith.constant 0 : index
    %c0_3 = arith.constant 0 : index
    %c0_4 = arith.constant 0 : index
    %3 = vector.load %arg2[%c0_2, %c0_3, %c0_4] : memref<9x64x64xbf16, #tpu.memory_space<vmem>>, vector<1x64x64xbf16>
    %4 = vector.shape_cast %3 : vector<1x64x64xbf16> to vector<64x64xbf16>
    %cst_5 = arith.constant dense<0.000000e+00> : vector<40x64xf32>
    %5 = tpu.matmul %2, %4, %cst_5 {dimension_numbers = #tpu.dot_dimension_numbers<[1], [0], [0], [1], [0, 0, 1, 1], [], []>} : vector<40x64xbf16>, vector<64x64xbf16>, vector<40x64xf32> -> vector<40x64xf32>
    %6 = arith.addf %0, %5 : vector<40x64xf32>
    %c0_6 = arith.constant 0 : index
    %c3 = arith.constant 3 : index
    %c0_7 = arith.constant 0 : index
    %7 = vector.load %arg1[%c0_6, %c3, %c0_7] : memref<1x110x64xbf16, #tpu.memory_space<vmem>>, vector<1x40x64xbf16>
    %8 = vector.shape_cast %7 : vector<1x40x64xbf16> to vector<40x64xbf16>
    %c1 = arith.constant 1 : index
    %c0_8 = arith.constant 0 : index
    %c0_9 = arith.constant 0 : index
    %9 = vector.load %arg2[%c1, %c0_8, %c0_9] : memref<9x64x64xbf16, #tpu.memory_space<vmem>>, vector<1x64x64xbf16>
    %10 = vector.shape_cast %9 : vector<1x64x64xbf16> to vector<64x64xbf16>
    %cst_10 = arith.constant dense<0.000000e+00> : vector<40x64xf32>
    %11 = tpu.matmul %8, %10, %cst_10 {dimension_numbers = #tpu.dot_dimension_numbers<[1], [0], [0], [1], [0, 0, 1, 1], [], []>} : vector<40x64xbf16>, vector<64x64xbf16>, vector<40x64xf32> -> vector<40x64xf32>
    %12 = arith.addf %6, %11 : vector<40x64xf32>
    %c0_11 = arith.constant 0 : index
    %c6 = arith.constant 6 : index
    %c0_12 = arith.constant 0 : index
    %13 = vector.load %arg1[%c0_11, %c6, %c0_12] : memref<1x110x64xbf16, #tpu.memory_space<vmem>>, vector<1x40x64xbf16>
    %14 = vector.shape_cast %13 : vector<1x40x64xbf16> to vector<40x64xbf16>
    %c2 = arith.constant 2 : index
    %c0_13 = arith.constant 0 : index
    %c0_14 = arith.constant 0 : index
    %15 = vector.load %arg2[%c2, %c0_13, %c0_14] : memref<9x64x64xbf16, #tpu.memory_space<vmem>>, vector<1x64x64xbf16>
    %16 = vector.shape_cast %15 : vector<1x64x64xbf16> to vector<64x64xbf16>
    %cst_15 = arith.constant dense<0.000000e+00> : vector<40x64xf32>
    %17 = tpu.matmul %14, %16, %cst_15 {dimension_numbers = #tpu.dot_dimension_numbers<[1], [0], [0], [1], [0, 0, 1, 1], [], []>} : vector<40x64xbf16>, vector<64x64xbf16>, vector<40x64xf32> -> vector<40x64xf32>
    %18 = arith.addf %12, %17 : vector<40x64xf32>
    %c0_16 = arith.constant 0 : index
    %c30 = arith.constant 30 : index
    %c0_17 = arith.constant 0 : index
    %19 = vector.load %arg1[%c0_16, %c30, %c0_17] : memref<1x110x64xbf16, #tpu.memory_space<vmem>>, vector<1x40x64xbf16>
    %20 = vector.shape_cast %19 : vector<1x40x64xbf16> to vector<40x64xbf16>
    %c3_18 = arith.constant 3 : index
    %c0_19 = arith.constant 0 : index
    %c0_20 = arith.constant 0 : index
    %21 = vector.load %arg2[%c3_18, %c0_19, %c0_20] : memref<9x64x64xbf16, #tpu.memory_space<vmem>>, vector<1x64x64xbf16>
    %22 = vector.shape_cast %21 : vector<1x64x64xbf16> to vector<64x64xbf16>
    %cst_21 = arith.constant dense<0.000000e+00> : vector<40x64xf32>
    %23 = tpu.matmul %20, %22, %cst_21 {dimension_numbers = #tpu.dot_dimension_numbers<[1], [0], [0], [1], [0, 0, 1, 1], [], []>} : vector<40x64xbf16>, vector<64x64xbf16>, vector<40x64xf32> -> vector<40x64xf32>
    %24 = arith.addf %18, %23 : vector<40x64xf32>
    %c0_22 = arith.constant 0 : index
    %c33 = arith.constant 33 : index
    %c0_23 = arith.constant 0 : index
    %25 = vector.load %arg1[%c0_22, %c33, %c0_23] : memref<1x110x64xbf16, #tpu.memory_space<vmem>>, vector<1x40x64xbf16>
    %26 = vector.shape_cast %25 : vector<1x40x64xbf16> to vector<40x64xbf16>
    %c4 = arith.constant 4 : index
    %c0_24 = arith.constant 0 : index
    %c0_25 = arith.constant 0 : index
    %27 = vector.load %arg2[%c4, %c0_24, %c0_25] : memref<9x64x64xbf16, #tpu.memory_space<vmem>>, vector<1x64x64xbf16>
    %28 = vector.shape_cast %27 : vector<1x64x64xbf16> to vector<64x64xbf16>
    %cst_26 = arith.constant dense<0.000000e+00> : vector<40x64xf32>
    %29 = tpu.matmul %26, %28, %cst_26 {dimension_numbers = #tpu.dot_dimension_numbers<[1], [0], [0], [1], [0, 0, 1, 1], [], []>} : vector<40x64xbf16>, vector<64x64xbf16>, vector<40x64xf32> -> vector<40x64xf32>
    %30 = arith.addf %24, %29 : vector<40x64xf32>
    %c0_27 = arith.constant 0 : index
    %c36 = arith.constant 36 : index
    %c0_28 = arith.constant 0 : index
    %31 = vector.load %arg1[%c0_27, %c36, %c0_28] : memref<1x110x64xbf16, #tpu.memory_space<vmem>>, vector<1x40x64xbf16>
    %32 = vector.shape_cast %31 : vector<1x40x64xbf16> to vector<40x64xbf16>
    %c5 = arith.constant 5 : index
    %c0_29 = arith.constant 0 : index
    %c0_30 = arith.constant 0 : index
    %33 = vector.load %arg2[%c5, %c0_29, %c0_30] : memref<9x64x64xbf16, #tpu.memory_space<vmem>>, vector<1x64x64xbf16>
    %34 = vector.shape_cast %33 : vector<1x64x64xbf16> to vector<64x64xbf16>
    %cst_31 = arith.constant dense<0.000000e+00> : vector<40x64xf32>
    %35 = tpu.matmul %32, %34, %cst_31 {dimension_numbers = #tpu.dot_dimension_numbers<[1], [0], [0], [1], [0, 0, 1, 1], [], []>} : vector<40x64xbf16>, vector<64x64xbf16>, vector<40x64xf32> -> vector<40x64xf32>
    %36 = arith.addf %30, %35 : vector<40x64xf32>
    %c0_32 = arith.constant 0 : index
    %c60 = arith.constant 60 : index
    %c0_33 = arith.constant 0 : index
    %37 = vector.load %arg1[%c0_32, %c60, %c0_33] : memref<1x110x64xbf16, #tpu.memory_space<vmem>>, vector<1x40x64xbf16>
    %38 = vector.shape_cast %37 : vector<1x40x64xbf16> to vector<40x64xbf16>
    %c6_34 = arith.constant 6 : index
    %c0_35 = arith.constant 0 : index
    %c0_36 = arith.constant 0 : index
    %39 = vector.load %arg2[%c6_34, %c0_35, %c0_36] : memref<9x64x64xbf16, #tpu.memory_space<vmem>>, vector<1x64x64xbf16>
    %40 = vector.shape_cast %39 : vector<1x64x64xbf16> to vector<64x64xbf16>
    %cst_37 = arith.constant dense<0.000000e+00> : vector<40x64xf32>
    %41 = tpu.matmul %38, %40, %cst_37 {dimension_numbers = #tpu.dot_dimension_numbers<[1], [0], [0], [1], [0, 0, 1, 1], [], []>} : vector<40x64xbf16>, vector<64x64xbf16>, vector<40x64xf32> -> vector<40x64xf32>
    %42 = arith.addf %36, %41 : vector<40x64xf32>
    %c0_38 = arith.constant 0 : index
    %c63 = arith.constant 63 : index
    %c0_39 = arith.constant 0 : index
    %43 = vector.load %arg1[%c0_38, %c63, %c0_39] : memref<1x110x64xbf16, #tpu.memory_space<vmem>>, vector<1x40x64xbf16>
    %44 = vector.shape_cast %43 : vector<1x40x64xbf16> to vector<40x64xbf16>
    %c7 = arith.constant 7 : index
    %c0_40 = arith.constant 0 : index
    %c0_41 = arith.constant 0 : index
    %45 = vector.load %arg2[%c7, %c0_40, %c0_41] : memref<9x64x64xbf16, #tpu.memory_space<vmem>>, vector<1x64x64xbf16>
    %46 = vector.shape_cast %45 : vector<1x64x64xbf16> to vector<64x64xbf16>
    %cst_42 = arith.constant dense<0.000000e+00> : vector<40x64xf32>
    %47 = tpu.matmul %44, %46, %cst_42 {dimension_numbers = #tpu.dot_dimension_numbers<[1], [0], [0], [1], [0, 0, 1, 1], [], []>} : vector<40x64xbf16>, vector<64x64xbf16>, vector<40x64xf32> -> vector<40x64xf32>
    %48 = arith.addf %42, %47 : vector<40x64xf32>
    %c0_43 = arith.constant 0 : index
    %c66 = arith.constant 66 : index
    %c0_44 = arith.constant 0 : index
    %49 = vector.load %arg1[%c0_43, %c66, %c0_44] : memref<1x110x64xbf16, #tpu.memory_space<vmem>>, vector<1x40x64xbf16>
    %50 = vector.shape_cast %49 : vector<1x40x64xbf16> to vector<40x64xbf16>
    %c8 = arith.constant 8 : index
    %c0_45 = arith.constant 0 : index
    %c0_46 = arith.constant 0 : index
    %51 = vector.load %arg2[%c8, %c0_45, %c0_46] : memref<9x64x64xbf16, #tpu.memory_space<vmem>>, vector<1x64x64xbf16>
    %52 = vector.shape_cast %51 : vector<1x64x64xbf16> to vector<64x64xbf16>
    %cst_47 = arith.constant dense<0.000000e+00> : vector<40x64xf32>
    %53 = tpu.matmul %50, %52, %cst_47 {dimension_numbers = #tpu.dot_dimension_numbers<[1], [0], [0], [1], [0, 0, 1, 1], [], []>} : vector<40x64xbf16>, vector<64x64xbf16>, vector<40x64xf32> -> vector<40x64xf32>
    %54 = arith.addf %48, %53 : vector<40x64xf32>
    %c0_48 = arith.constant 0 : index
    %c0_49 = arith.constant 0 : index
    %55 = vector.load %arg3[%c0_48, %c0_49] : memref<1x64xf32, #tpu.memory_space<vmem>>, vector<1x64xf32>
    %56 = vector.broadcast %55 : vector<1x64xf32> to vector<40x64xf32>
    %57 = arith.mulf %54, %56 : vector<40x64xf32>
    %c0_50 = arith.constant 0 : index
    %c0_51 = arith.constant 0 : index
    %58 = vector.load %arg4[%c0_50, %c0_51] : memref<1x64xf32, #tpu.memory_space<vmem>>, vector<1x64xf32>
    %59 = vector.broadcast %58 : vector<1x64xf32> to vector<40x64xf32>
    %60 = arith.addf %57, %59 : vector<40x64xf32>
    %cst_52 = arith.constant 0.000000e+00 : f32
    %61 = vector.broadcast %cst_52 : f32 to vector<40x64xf32>
    %62 = arith.cmpf oge, %60, %61 : vector<40x64xf32>
    %cst_53 = arith.constant 2.000000e-01 : f32
    %63 = vector.broadcast %cst_53 : f32 to vector<40x64xf32>
    %64 = arith.mulf %63, %60 : vector<40x64xf32>
    %65 = arith.select %62, %60, %64 : vector<40x64xi1>, vector<40x64xf32>
    %66 = arith.truncf %65 : vector<40x64xf32> to vector<40x64xbf16>
    %c0_54 = arith.constant 0 : index
    %c0_55 = arith.constant 0 : index
    %c0_56 = arith.constant 0 : index
    %67 = vector.load %arg5[%c0_54, %c0_55, %c0_56] : memref<1x40x64xbf16, #tpu.memory_space<vmem>>, vector<1x40x64xbf16>
    %68 = vector.shape_cast %67 : vector<1x40x64xbf16> to vector<40x64xbf16>
    %69 = vector.shape_cast %66 : vector<40x64xbf16> to vector<1x40x64xbf16>
    tpu.vector_store %arg5[%c0_54, %c0_55, %c0_56], %69 {strides = array<i32>} : memref<1x40x64xbf16, #tpu.memory_space<vmem>>, vector<1x40x64xbf16>,
    return
  }
  func.func @transform_0(%arg0: i32) -> (i32, i32, i32) {
    %c0_i32 = arith.constant 0 : i32
    %c0_i32_0 = arith.constant 0 : i32
    %c0_i32_1 = arith.constant 0 : i32
    return %arg0, %c0_i32, %c0_i32_0 : i32, i32, i32
  }
  func.func @transform_1(%arg0: i32) -> (i32, i32, i32) {
    %c0_i32 = arith.constant 0 : i32
    %c0_i32_0 = arith.constant 0 : i32
    %c0_i32_1 = arith.constant 0 : i32
    %c0_i32_2 = arith.constant 0 : i32
    return %c0_i32, %c0_i32_0, %c0_i32_1 : i32, i32, i32
  }
  func.func @transform_2(%arg0: i32) -> (i32, i32) {
    %c0_i32 = arith.constant 0 : i32
    %c0_i32_0 = arith.constant 0 : i32
    %c0_i32_1 = arith.constant 0 : i32
    return %c0_i32, %c0_i32_0 : i32, i32
  }
  func.func @transform_3(%arg0: i32) -> (i32, i32) {
    %c0_i32 = arith.constant 0 : i32
    %c0_i32_0 = arith.constant 0 : i32
    %c0_i32_1 = arith.constant 0 : i32
    return %c0_i32, %c0_i32_0 : i32, i32
  }
  func.func @transform_4(%arg0: i32) -> (i32, i32, i32) {
    %c0_i32 = arith.constant 0 : i32
    %c0_i32_0 = arith.constant 0 : i32
    %c0_i32_1 = arith.constant 0 : i32
    return %arg0, %c0_i32, %c0_i32_0 : i32, i32, i32
  }
}

module attributes {stable_mosaic.version = 11 : i64} {
  func.func @_dwpos_kernel(%arg0: i32, %arg1: memref<1x110x64xbf16, #tpu.memory_space<vmem>>, %arg2: memref<49x64xf32, #tpu.memory_space<vmem>>, %arg3: memref<1x64xf32, #tpu.memory_space<vmem>>, %arg4: memref<40x64xf32, #tpu.memory_space<vmem>>, %arg5: memref<1x40x64xbf16, #tpu.memory_space<vmem>>) attributes {dimension_semantics = [#tpu.dimension_semantics<parallel>], iteration_bounds = array<i64: 2>, scalar_prefetch = 0 : i64, scratch_operands = 0 : i64, tpu.core_type = #tpu.core_type<tc>, window_params = [{transform_indices = @transform_0, window_bounds = array<i64: 1, 110, 64>}, {pipeline_mode = #tpu.pipeline_mode<synchronous>, transform_indices = @transform_1, window_bounds = array<i64: 49, 64>}, {pipeline_mode = #tpu.pipeline_mode<synchronous>, transform_indices = @transform_2, window_bounds = array<i64: 1, 64>}, {pipeline_mode = #tpu.pipeline_mode<synchronous>, transform_indices = @transform_3, window_bounds = array<i64: 40, 64>}, {transform_indices = @transform_4, window_bounds = array<i64: 1, 40, 64>}]} {
    %cst = arith.constant 0.000000e+00 : f32
    %0 = vector.broadcast %cst : f32 to vector<40x64xf32>
    %c0 = arith.constant 0 : index
    %c0_0 = arith.constant 0 : index
    %c0_1 = arith.constant 0 : index
    %1 = vector.load %arg1[%c0, %c0_0, %c0_1] : memref<1x110x64xbf16, #tpu.memory_space<vmem>>, vector<1x40x64xbf16>
    %2 = vector.shape_cast %1 : vector<1x40x64xbf16> to vector<40x64xbf16>
    %3 = arith.extf %2 : vector<40x64xbf16> to vector<40x64xf32>
    %c0_2 = arith.constant 0 : index
    %c0_3 = arith.constant 0 : index
    %4 = vector.load %arg2[%c0_2, %c0_3] : memref<49x64xf32, #tpu.memory_space<vmem>>, vector<1x64xf32>
    %5 = vector.broadcast %4 : vector<1x64xf32> to vector<40x64xf32>
    %6 = arith.mulf %3, %5 : vector<40x64xf32>
    %7 = arith.addf %0, %6 : vector<40x64xf32>
    %c0_4 = arith.constant 0 : index
    %c1 = arith.constant 1 : index
    %c0_5 = arith.constant 0 : index
    %8 = vector.load %arg1[%c0_4, %c1, %c0_5] : memref<1x110x64xbf16, #tpu.memory_space<vmem>>, vector<1x40x64xbf16>
    %9 = vector.shape_cast %8 : vector<1x40x64xbf16> to vector<40x64xbf16>
    %10 = arith.extf %9 : vector<40x64xbf16> to vector<40x64xf32>
    %c1_6 = arith.constant 1 : index
    %c0_7 = arith.constant 0 : index
    %11 = vector.load %arg2[%c1_6, %c0_7] : memref<49x64xf32, #tpu.memory_space<vmem>>, vector<1x64xf32>
    %12 = vector.broadcast %11 : vector<1x64xf32> to vector<40x64xf32>
    %13 = arith.mulf %10, %12 : vector<40x64xf32>
    %14 = arith.addf %7, %13 : vector<40x64xf32>
    %c0_8 = arith.constant 0 : index
    %c2 = arith.constant 2 : index
    %c0_9 = arith.constant 0 : index
    %15 = vector.load %arg1[%c0_8, %c2, %c0_9] : memref<1x110x64xbf16, #tpu.memory_space<vmem>>, vector<1x40x64xbf16>
    %16 = vector.shape_cast %15 : vector<1x40x64xbf16> to vector<40x64xbf16>
    %17 = arith.extf %16 : vector<40x64xbf16> to vector<40x64xf32>
    %c2_10 = arith.constant 2 : index
    %c0_11 = arith.constant 0 : index
    %18 = vector.load %arg2[%c2_10, %c0_11] : memref<49x64xf32, #tpu.memory_space<vmem>>, vector<1x64xf32>
    %19 = vector.broadcast %18 : vector<1x64xf32> to vector<40x64xf32>
    %20 = arith.mulf %17, %19 : vector<40x64xf32>
    %21 = arith.addf %14, %20 : vector<40x64xf32>
    %c0_12 = arith.constant 0 : index
    %c3 = arith.constant 3 : index
    %c0_13 = arith.constant 0 : index
    %22 = vector.load %arg1[%c0_12, %c3, %c0_13] : memref<1x110x64xbf16, #tpu.memory_space<vmem>>, vector<1x40x64xbf16>
    %23 = vector.shape_cast %22 : vector<1x40x64xbf16> to vector<40x64xbf16>
    %24 = arith.extf %23 : vector<40x64xbf16> to vector<40x64xf32>
    %c3_14 = arith.constant 3 : index
    %c0_15 = arith.constant 0 : index
    %25 = vector.load %arg2[%c3_14, %c0_15] : memref<49x64xf32, #tpu.memory_space<vmem>>, vector<1x64xf32>
    %26 = vector.broadcast %25 : vector<1x64xf32> to vector<40x64xf32>
    %27 = arith.mulf %24, %26 : vector<40x64xf32>
    %28 = arith.addf %21, %27 : vector<40x64xf32>
    %c0_16 = arith.constant 0 : index
    %c4 = arith.constant 4 : index
    %c0_17 = arith.constant 0 : index
    %29 = vector.load %arg1[%c0_16, %c4, %c0_17] : memref<1x110x64xbf16, #tpu.memory_space<vmem>>, vector<1x40x64xbf16>
    %30 = vector.shape_cast %29 : vector<1x40x64xbf16> to vector<40x64xbf16>
    %31 = arith.extf %30 : vector<40x64xbf16> to vector<40x64xf32>
    %c4_18 = arith.constant 4 : index
    %c0_19 = arith.constant 0 : index
    %32 = vector.load %arg2[%c4_18, %c0_19] : memref<49x64xf32, #tpu.memory_space<vmem>>, vector<1x64xf32>
    %33 = vector.broadcast %32 : vector<1x64xf32> to vector<40x64xf32>
    %34 = arith.mulf %31, %33 : vector<40x64xf32>
    %35 = arith.addf %28, %34 : vector<40x64xf32>
    %c0_20 = arith.constant 0 : index
    %c5 = arith.constant 5 : index
    %c0_21 = arith.constant 0 : index
    %36 = vector.load %arg1[%c0_20, %c5, %c0_21] : memref<1x110x64xbf16, #tpu.memory_space<vmem>>, vector<1x40x64xbf16>
    %37 = vector.shape_cast %36 : vector<1x40x64xbf16> to vector<40x64xbf16>
    %38 = arith.extf %37 : vector<40x64xbf16> to vector<40x64xf32>
    %c5_22 = arith.constant 5 : index
    %c0_23 = arith.constant 0 : index
    %39 = vector.load %arg2[%c5_22, %c0_23] : memref<49x64xf32, #tpu.memory_space<vmem>>, vector<1x64xf32>
    %40 = vector.broadcast %39 : vector<1x64xf32> to vector<40x64xf32>
    %41 = arith.mulf %38, %40 : vector<40x64xf32>
    %42 = arith.addf %35, %41 : vector<40x64xf32>
    %c0_24 = arith.constant 0 : index
    %c6 = arith.constant 6 : index
    %c0_25 = arith.constant 0 : index
    %43 = vector.load %arg1[%c0_24, %c6, %c0_25] : memref<1x110x64xbf16, #tpu.memory_space<vmem>>, vector<1x40x64xbf16>
    %44 = vector.shape_cast %43 : vector<1x40x64xbf16> to vector<40x64xbf16>
    %45 = arith.extf %44 : vector<40x64xbf16> to vector<40x64xf32>
    %c6_26 = arith.constant 6 : index
    %c0_27 = arith.constant 0 : index
    %46 = vector.load %arg2[%c6_26, %c0_27] : memref<49x64xf32, #tpu.memory_space<vmem>>, vector<1x64xf32>
    %47 = vector.broadcast %46 : vector<1x64xf32> to vector<40x64xf32>
    %48 = arith.mulf %45, %47 : vector<40x64xf32>
    %49 = arith.addf %42, %48 : vector<40x64xf32>
    %c0_28 = arith.constant 0 : index
    %c10 = arith.constant 10 : index
    %c0_29 = arith.constant 0 : index
    %50 = vector.load %arg1[%c0_28, %c10, %c0_29] : memref<1x110x64xbf16, #tpu.memory_space<vmem>>, vector<1x40x64xbf16>
    %51 = vector.shape_cast %50 : vector<1x40x64xbf16> to vector<40x64xbf16>
    %52 = arith.extf %51 : vector<40x64xbf16> to vector<40x64xf32>
    %c7 = arith.constant 7 : index
    %c0_30 = arith.constant 0 : index
    %53 = vector.load %arg2[%c7, %c0_30] : memref<49x64xf32, #tpu.memory_space<vmem>>, vector<1x64xf32>
    %54 = vector.broadcast %53 : vector<1x64xf32> to vector<40x64xf32>
    %55 = arith.mulf %52, %54 : vector<40x64xf32>
    %56 = arith.addf %49, %55 : vector<40x64xf32>
    %c0_31 = arith.constant 0 : index
    %c11 = arith.constant 11 : index
    %c0_32 = arith.constant 0 : index
    %57 = vector.load %arg1[%c0_31, %c11, %c0_32] : memref<1x110x64xbf16, #tpu.memory_space<vmem>>, vector<1x40x64xbf16>
    %58 = vector.shape_cast %57 : vector<1x40x64xbf16> to vector<40x64xbf16>
    %59 = arith.extf %58 : vector<40x64xbf16> to vector<40x64xf32>
    %c8 = arith.constant 8 : index
    %c0_33 = arith.constant 0 : index
    %60 = vector.load %arg2[%c8, %c0_33] : memref<49x64xf32, #tpu.memory_space<vmem>>, vector<1x64xf32>
    %61 = vector.broadcast %60 : vector<1x64xf32> to vector<40x64xf32>
    %62 = arith.mulf %59, %61 : vector<40x64xf32>
    %63 = arith.addf %56, %62 : vector<40x64xf32>
    %c0_34 = arith.constant 0 : index
    %c12 = arith.constant 12 : index
    %c0_35 = arith.constant 0 : index
    %64 = vector.load %arg1[%c0_34, %c12, %c0_35] : memref<1x110x64xbf16, #tpu.memory_space<vmem>>, vector<1x40x64xbf16>
    %65 = vector.shape_cast %64 : vector<1x40x64xbf16> to vector<40x64xbf16>
    %66 = arith.extf %65 : vector<40x64xbf16> to vector<40x64xf32>
    %c9 = arith.constant 9 : index
    %c0_36 = arith.constant 0 : index
    %67 = vector.load %arg2[%c9, %c0_36] : memref<49x64xf32, #tpu.memory_space<vmem>>, vector<1x64xf32>
    %68 = vector.broadcast %67 : vector<1x64xf32> to vector<40x64xf32>
    %69 = arith.mulf %66, %68 : vector<40x64xf32>
    %70 = arith.addf %63, %69 : vector<40x64xf32>
    %c0_37 = arith.constant 0 : index
    %c13 = arith.constant 13 : index
    %c0_38 = arith.constant 0 : index
    %71 = vector.load %arg1[%c0_37, %c13, %c0_38] : memref<1x110x64xbf16, #tpu.memory_space<vmem>>, vector<1x40x64xbf16>
    %72 = vector.shape_cast %71 : vector<1x40x64xbf16> to vector<40x64xbf16>
    %73 = arith.extf %72 : vector<40x64xbf16> to vector<40x64xf32>
    %c10_39 = arith.constant 10 : index
    %c0_40 = arith.constant 0 : index
    %74 = vector.load %arg2[%c10_39, %c0_40] : memref<49x64xf32, #tpu.memory_space<vmem>>, vector<1x64xf32>
    %75 = vector.broadcast %74 : vector<1x64xf32> to vector<40x64xf32>
    %76 = arith.mulf %73, %75 : vector<40x64xf32>
    %77 = arith.addf %70, %76 : vector<40x64xf32>
    %c0_41 = arith.constant 0 : index
    %c14 = arith.constant 14 : index
    %c0_42 = arith.constant 0 : index
    %78 = vector.load %arg1[%c0_41, %c14, %c0_42] : memref<1x110x64xbf16, #tpu.memory_space<vmem>>, vector<1x40x64xbf16>
    %79 = vector.shape_cast %78 : vector<1x40x64xbf16> to vector<40x64xbf16>
    %80 = arith.extf %79 : vector<40x64xbf16> to vector<40x64xf32>
    %c11_43 = arith.constant 11 : index
    %c0_44 = arith.constant 0 : index
    %81 = vector.load %arg2[%c11_43, %c0_44] : memref<49x64xf32, #tpu.memory_space<vmem>>, vector<1x64xf32>
    %82 = vector.broadcast %81 : vector<1x64xf32> to vector<40x64xf32>
    %83 = arith.mulf %80, %82 : vector<40x64xf32>
    %84 = arith.addf %77, %83 : vector<40x64xf32>
    %c0_45 = arith.constant 0 : index
    %c15 = arith.constant 15 : index
    %c0_46 = arith.constant 0 : index
    %85 = vector.load %arg1[%c0_45, %c15, %c0_46] : memref<1x110x64xbf16, #tpu.memory_space<vmem>>, vector<1x40x64xbf16>
    %86 = vector.shape_cast %85 : vector<1x40x64xbf16> to vector<40x64xbf16>
    %87 = arith.extf %86 : vector<40x64xbf16> to vector<40x64xf32>
    %c12_47 = arith.constant 12 : index
    %c0_48 = arith.constant 0 : index
    %88 = vector.load %arg2[%c12_47, %c0_48] : memref<49x64xf32, #tpu.memory_space<vmem>>, vector<1x64xf32>
    %89 = vector.broadcast %88 : vector<1x64xf32> to vector<40x64xf32>
    %90 = arith.mulf %87, %89 : vector<40x64xf32>
    %91 = arith.addf %84, %90 : vector<40x64xf32>
    %c0_49 = arith.constant 0 : index
    %c16 = arith.constant 16 : index
    %c0_50 = arith.constant 0 : index
    %92 = vector.load %arg1[%c0_49, %c16, %c0_50] : memref<1x110x64xbf16, #tpu.memory_space<vmem>>, vector<1x40x64xbf16>
    %93 = vector.shape_cast %92 : vector<1x40x64xbf16> to vector<40x64xbf16>
    %94 = arith.extf %93 : vector<40x64xbf16> to vector<40x64xf32>
    %c13_51 = arith.constant 13 : index
    %c0_52 = arith.constant 0 : index
    %95 = vector.load %arg2[%c13_51, %c0_52] : memref<49x64xf32, #tpu.memory_space<vmem>>, vector<1x64xf32>
    %96 = vector.broadcast %95 : vector<1x64xf32> to vector<40x64xf32>
    %97 = arith.mulf %94, %96 : vector<40x64xf32>
    %98 = arith.addf %91, %97 : vector<40x64xf32>
    %c0_53 = arith.constant 0 : index
    %c20 = arith.constant 20 : index
    %c0_54 = arith.constant 0 : index
    %99 = vector.load %arg1[%c0_53, %c20, %c0_54] : memref<1x110x64xbf16, #tpu.memory_space<vmem>>, vector<1x40x64xbf16>
    %100 = vector.shape_cast %99 : vector<1x40x64xbf16> to vector<40x64xbf16>
    %101 = arith.extf %100 : vector<40x64xbf16> to vector<40x64xf32>
    %c14_55 = arith.constant 14 : index
    %c0_56 = arith.constant 0 : index
    %102 = vector.load %arg2[%c14_55, %c0_56] : memref<49x64xf32, #tpu.memory_space<vmem>>, vector<1x64xf32>
    %103 = vector.broadcast %102 : vector<1x64xf32> to vector<40x64xf32>
    %104 = arith.mulf %101, %103 : vector<40x64xf32>
    %105 = arith.addf %98, %104 : vector<40x64xf32>
    %c0_57 = arith.constant 0 : index
    %c21 = arith.constant 21 : index
    %c0_58 = arith.constant 0 : index
    %106 = vector.load %arg1[%c0_57, %c21, %c0_58] : memref<1x110x64xbf16, #tpu.memory_space<vmem>>, vector<1x40x64xbf16>
    %107 = vector.shape_cast %106 : vector<1x40x64xbf16> to vector<40x64xbf16>
    %108 = arith.extf %107 : vector<40x64xbf16> to vector<40x64xf32>
    %c15_59 = arith.constant 15 : index
    %c0_60 = arith.constant 0 : index
    %109 = vector.load %arg2[%c15_59, %c0_60] : memref<49x64xf32, #tpu.memory_space<vmem>>, vector<1x64xf32>
    %110 = vector.broadcast %109 : vector<1x64xf32> to vector<40x64xf32>
    %111 = arith.mulf %108, %110 : vector<40x64xf32>
    %112 = arith.addf %105, %111 : vector<40x64xf32>
    %c0_61 = arith.constant 0 : index
    %c22 = arith.constant 22 : index
    %c0_62 = arith.constant 0 : index
    %113 = vector.load %arg1[%c0_61, %c22, %c0_62] : memref<1x110x64xbf16, #tpu.memory_space<vmem>>, vector<1x40x64xbf16>
    %114 = vector.shape_cast %113 : vector<1x40x64xbf16> to vector<40x64xbf16>
    %115 = arith.extf %114 : vector<40x64xbf16> to vector<40x64xf32>
    %c16_63 = arith.constant 16 : index
    %c0_64 = arith.constant 0 : index
    %116 = vector.load %arg2[%c16_63, %c0_64] : memref<49x64xf32, #tpu.memory_space<vmem>>, vector<1x64xf32>
    %117 = vector.broadcast %116 : vector<1x64xf32> to vector<40x64xf32>
    %118 = arith.mulf %115, %117 : vector<40x64xf32>
    %119 = arith.addf %112, %118 : vector<40x64xf32>
    %c0_65 = arith.constant 0 : index
    %c23 = arith.constant 23 : index
    %c0_66 = arith.constant 0 : index
    %120 = vector.load %arg1[%c0_65, %c23, %c0_66] : memref<1x110x64xbf16, #tpu.memory_space<vmem>>, vector<1x40x64xbf16>
    %121 = vector.shape_cast %120 : vector<1x40x64xbf16> to vector<40x64xbf16>
    %122 = arith.extf %121 : vector<40x64xbf16> to vector<40x64xf32>
    %c17 = arith.constant 17 : index
    %c0_67 = arith.constant 0 : index
    %123 = vector.load %arg2[%c17, %c0_67] : memref<49x64xf32, #tpu.memory_space<vmem>>, vector<1x64xf32>
    %124 = vector.broadcast %123 : vector<1x64xf32> to vector<40x64xf32>
    %125 = arith.mulf %122, %124 : vector<40x64xf32>
    %126 = arith.addf %119, %125 : vector<40x64xf32>
    %c0_68 = arith.constant 0 : index
    %c24 = arith.constant 24 : index
    %c0_69 = arith.constant 0 : index
    %127 = vector.load %arg1[%c0_68, %c24, %c0_69] : memref<1x110x64xbf16, #tpu.memory_space<vmem>>, vector<1x40x64xbf16>
    %128 = vector.shape_cast %127 : vector<1x40x64xbf16> to vector<40x64xbf16>
    %129 = arith.extf %128 : vector<40x64xbf16> to vector<40x64xf32>
    %c18 = arith.constant 18 : index
    %c0_70 = arith.constant 0 : index
    %130 = vector.load %arg2[%c18, %c0_70] : memref<49x64xf32, #tpu.memory_space<vmem>>, vector<1x64xf32>
    %131 = vector.broadcast %130 : vector<1x64xf32> to vector<40x64xf32>
    %132 = arith.mulf %129, %131 : vector<40x64xf32>
    %133 = arith.addf %126, %132 : vector<40x64xf32>
    %c0_71 = arith.constant 0 : index
    %c25 = arith.constant 25 : index
    %c0_72 = arith.constant 0 : index
    %134 = vector.load %arg1[%c0_71, %c25, %c0_72] : memref<1x110x64xbf16, #tpu.memory_space<vmem>>, vector<1x40x64xbf16>
    %135 = vector.shape_cast %134 : vector<1x40x64xbf16> to vector<40x64xbf16>
    %136 = arith.extf %135 : vector<40x64xbf16> to vector<40x64xf32>
    %c19 = arith.constant 19 : index
    %c0_73 = arith.constant 0 : index
    %137 = vector.load %arg2[%c19, %c0_73] : memref<49x64xf32, #tpu.memory_space<vmem>>, vector<1x64xf32>
    %138 = vector.broadcast %137 : vector<1x64xf32> to vector<40x64xf32>
    %139 = arith.mulf %136, %138 : vector<40x64xf32>
    %140 = arith.addf %133, %139 : vector<40x64xf32>
    %c0_74 = arith.constant 0 : index
    %c26 = arith.constant 26 : index
    %c0_75 = arith.constant 0 : index
    %141 = vector.load %arg1[%c0_74, %c26, %c0_75] : memref<1x110x64xbf16, #tpu.memory_space<vmem>>, vector<1x40x64xbf16>
    %142 = vector.shape_cast %141 : vector<1x40x64xbf16> to vector<40x64xbf16>
    %143 = arith.extf %142 : vector<40x64xbf16> to vector<40x64xf32>
    %c20_76 = arith.constant 20 : index
    %c0_77 = arith.constant 0 : index
    %144 = vector.load %arg2[%c20_76, %c0_77] : memref<49x64xf32, #tpu.memory_space<vmem>>, vector<1x64xf32>
    %145 = vector.broadcast %144 : vector<1x64xf32> to vector<40x64xf32>
    %146 = arith.mulf %143, %145 : vector<40x64xf32>
    %147 = arith.addf %140, %146 : vector<40x64xf32>
    %c0_78 = arith.constant 0 : index
    %c30 = arith.constant 30 : index
    %c0_79 = arith.constant 0 : index
    %148 = vector.load %arg1[%c0_78, %c30, %c0_79] : memref<1x110x64xbf16, #tpu.memory_space<vmem>>, vector<1x40x64xbf16>
    %149 = vector.shape_cast %148 : vector<1x40x64xbf16> to vector<40x64xbf16>
    %150 = arith.extf %149 : vector<40x64xbf16> to vector<40x64xf32>
    %c21_80 = arith.constant 21 : index
    %c0_81 = arith.constant 0 : index
    %151 = vector.load %arg2[%c21_80, %c0_81] : memref<49x64xf32, #tpu.memory_space<vmem>>, vector<1x64xf32>
    %152 = vector.broadcast %151 : vector<1x64xf32> to vector<40x64xf32>
    %153 = arith.mulf %150, %152 : vector<40x64xf32>
    %154 = arith.addf %147, %153 : vector<40x64xf32>
    %c0_82 = arith.constant 0 : index
    %c31 = arith.constant 31 : index
    %c0_83 = arith.constant 0 : index
    %155 = vector.load %arg1[%c0_82, %c31, %c0_83] : memref<1x110x64xbf16, #tpu.memory_space<vmem>>, vector<1x40x64xbf16>
    %156 = vector.shape_cast %155 : vector<1x40x64xbf16> to vector<40x64xbf16>
    %157 = arith.extf %156 : vector<40x64xbf16> to vector<40x64xf32>
    %c22_84 = arith.constant 22 : index
    %c0_85 = arith.constant 0 : index
    %158 = vector.load %arg2[%c22_84, %c0_85] : memref<49x64xf32, #tpu.memory_space<vmem>>, vector<1x64xf32>
    %159 = vector.broadcast %158 : vector<1x64xf32> to vector<40x64xf32>
    %160 = arith.mulf %157, %159 : vector<40x64xf32>
    %161 = arith.addf %154, %160 : vector<40x64xf32>
    %c0_86 = arith.constant 0 : index
    %c32 = arith.constant 32 : index
    %c0_87 = arith.constant 0 : index
    %162 = vector.load %arg1[%c0_86, %c32, %c0_87] : memref<1x110x64xbf16, #tpu.memory_space<vmem>>, vector<1x40x64xbf16>
    %163 = vector.shape_cast %162 : vector<1x40x64xbf16> to vector<40x64xbf16>
    %164 = arith.extf %163 : vector<40x64xbf16> to vector<40x64xf32>
    %c23_88 = arith.constant 23 : index
    %c0_89 = arith.constant 0 : index
    %165 = vector.load %arg2[%c23_88, %c0_89] : memref<49x64xf32, #tpu.memory_space<vmem>>, vector<1x64xf32>
    %166 = vector.broadcast %165 : vector<1x64xf32> to vector<40x64xf32>
    %167 = arith.mulf %164, %166 : vector<40x64xf32>
    %168 = arith.addf %161, %167 : vector<40x64xf32>
    %c0_90 = arith.constant 0 : index
    %c33 = arith.constant 33 : index
    %c0_91 = arith.constant 0 : index
    %169 = vector.load %arg1[%c0_90, %c33, %c0_91] : memref<1x110x64xbf16, #tpu.memory_space<vmem>>, vector<1x40x64xbf16>
    %170 = vector.shape_cast %169 : vector<1x40x64xbf16> to vector<40x64xbf16>
    %171 = arith.extf %170 : vector<40x64xbf16> to vector<40x64xf32>
    %c24_92 = arith.constant 24 : index
    %c0_93 = arith.constant 0 : index
    %172 = vector.load %arg2[%c24_92, %c0_93] : memref<49x64xf32, #tpu.memory_space<vmem>>, vector<1x64xf32>
    %173 = vector.broadcast %172 : vector<1x64xf32> to vector<40x64xf32>
    %174 = arith.mulf %171, %173 : vector<40x64xf32>
    %175 = arith.addf %168, %174 : vector<40x64xf32>
    %c0_94 = arith.constant 0 : index
    %c34 = arith.constant 34 : index
    %c0_95 = arith.constant 0 : index
    %176 = vector.load %arg1[%c0_94, %c34, %c0_95] : memref<1x110x64xbf16, #tpu.memory_space<vmem>>, vector<1x40x64xbf16>
    %177 = vector.shape_cast %176 : vector<1x40x64xbf16> to vector<40x64xbf16>
    %178 = arith.extf %177 : vector<40x64xbf16> to vector<40x64xf32>
    %c25_96 = arith.constant 25 : index
    %c0_97 = arith.constant 0 : index
    %179 = vector.load %arg2[%c25_96, %c0_97] : memref<49x64xf32, #tpu.memory_space<vmem>>, vector<1x64xf32>
    %180 = vector.broadcast %179 : vector<1x64xf32> to vector<40x64xf32>
    %181 = arith.mulf %178, %180 : vector<40x64xf32>
    %182 = arith.addf %175, %181 : vector<40x64xf32>
    %c0_98 = arith.constant 0 : index
    %c35 = arith.constant 35 : index
    %c0_99 = arith.constant 0 : index
    %183 = vector.load %arg1[%c0_98, %c35, %c0_99] : memref<1x110x64xbf16, #tpu.memory_space<vmem>>, vector<1x40x64xbf16>
    %184 = vector.shape_cast %183 : vector<1x40x64xbf16> to vector<40x64xbf16>
    %185 = arith.extf %184 : vector<40x64xbf16> to vector<40x64xf32>
    %c26_100 = arith.constant 26 : index
    %c0_101 = arith.constant 0 : index
    %186 = vector.load %arg2[%c26_100, %c0_101] : memref<49x64xf32, #tpu.memory_space<vmem>>, vector<1x64xf32>
    %187 = vector.broadcast %186 : vector<1x64xf32> to vector<40x64xf32>
    %188 = arith.mulf %185, %187 : vector<40x64xf32>
    %189 = arith.addf %182, %188 : vector<40x64xf32>
    %c0_102 = arith.constant 0 : index
    %c36 = arith.constant 36 : index
    %c0_103 = arith.constant 0 : index
    %190 = vector.load %arg1[%c0_102, %c36, %c0_103] : memref<1x110x64xbf16, #tpu.memory_space<vmem>>, vector<1x40x64xbf16>
    %191 = vector.shape_cast %190 : vector<1x40x64xbf16> to vector<40x64xbf16>
    %192 = arith.extf %191 : vector<40x64xbf16> to vector<40x64xf32>
    %c27 = arith.constant 27 : index
    %c0_104 = arith.constant 0 : index
    %193 = vector.load %arg2[%c27, %c0_104] : memref<49x64xf32, #tpu.memory_space<vmem>>, vector<1x64xf32>
    %194 = vector.broadcast %193 : vector<1x64xf32> to vector<40x64xf32>
    %195 = arith.mulf %192, %194 : vector<40x64xf32>
    %196 = arith.addf %189, %195 : vector<40x64xf32>
    %c0_105 = arith.constant 0 : index
    %c40 = arith.constant 40 : index
    %c0_106 = arith.constant 0 : index
    %197 = vector.load %arg1[%c0_105, %c40, %c0_106] : memref<1x110x64xbf16, #tpu.memory_space<vmem>>, vector<1x40x64xbf16>
    %198 = vector.shape_cast %197 : vector<1x40x64xbf16> to vector<40x64xbf16>
    %199 = arith.extf %198 : vector<40x64xbf16> to vector<40x64xf32>
    %c28 = arith.constant 28 : index
    %c0_107 = arith.constant 0 : index
    %200 = vector.load %arg2[%c28, %c0_107] : memref<49x64xf32, #tpu.memory_space<vmem>>, vector<1x64xf32>
    %201 = vector.broadcast %200 : vector<1x64xf32> to vector<40x64xf32>
    %202 = arith.mulf %199, %201 : vector<40x64xf32>
    %203 = arith.addf %196, %202 : vector<40x64xf32>
    %c0_108 = arith.constant 0 : index
    %c41 = arith.constant 41 : index
    %c0_109 = arith.constant 0 : index
    %204 = vector.load %arg1[%c0_108, %c41, %c0_109] : memref<1x110x64xbf16, #tpu.memory_space<vmem>>, vector<1x40x64xbf16>
    %205 = vector.shape_cast %204 : vector<1x40x64xbf16> to vector<40x64xbf16>
    %206 = arith.extf %205 : vector<40x64xbf16> to vector<40x64xf32>
    %c29 = arith.constant 29 : index
    %c0_110 = arith.constant 0 : index
    %207 = vector.load %arg2[%c29, %c0_110] : memref<49x64xf32, #tpu.memory_space<vmem>>, vector<1x64xf32>
    %208 = vector.broadcast %207 : vector<1x64xf32> to vector<40x64xf32>
    %209 = arith.mulf %206, %208 : vector<40x64xf32>
    %210 = arith.addf %203, %209 : vector<40x64xf32>
    %c0_111 = arith.constant 0 : index
    %c42 = arith.constant 42 : index
    %c0_112 = arith.constant 0 : index
    %211 = vector.load %arg1[%c0_111, %c42, %c0_112] : memref<1x110x64xbf16, #tpu.memory_space<vmem>>, vector<1x40x64xbf16>
    %212 = vector.shape_cast %211 : vector<1x40x64xbf16> to vector<40x64xbf16>
    %213 = arith.extf %212 : vector<40x64xbf16> to vector<40x64xf32>
    %c30_113 = arith.constant 30 : index
    %c0_114 = arith.constant 0 : index
    %214 = vector.load %arg2[%c30_113, %c0_114] : memref<49x64xf32, #tpu.memory_space<vmem>>, vector<1x64xf32>
    %215 = vector.broadcast %214 : vector<1x64xf32> to vector<40x64xf32>
    %216 = arith.mulf %213, %215 : vector<40x64xf32>
    %217 = arith.addf %210, %216 : vector<40x64xf32>
    %c0_115 = arith.constant 0 : index
    %c43 = arith.constant 43 : index
    %c0_116 = arith.constant 0 : index
    %218 = vector.load %arg1[%c0_115, %c43, %c0_116] : memref<1x110x64xbf16, #tpu.memory_space<vmem>>, vector<1x40x64xbf16>
    %219 = vector.shape_cast %218 : vector<1x40x64xbf16> to vector<40x64xbf16>
    %220 = arith.extf %219 : vector<40x64xbf16> to vector<40x64xf32>
    %c31_117 = arith.constant 31 : index
    %c0_118 = arith.constant 0 : index
    %221 = vector.load %arg2[%c31_117, %c0_118] : memref<49x64xf32, #tpu.memory_space<vmem>>, vector<1x64xf32>
    %222 = vector.broadcast %221 : vector<1x64xf32> to vector<40x64xf32>
    %223 = arith.mulf %220, %222 : vector<40x64xf32>
    %224 = arith.addf %217, %223 : vector<40x64xf32>
    %c0_119 = arith.constant 0 : index
    %c44 = arith.constant 44 : index
    %c0_120 = arith.constant 0 : index
    %225 = vector.load %arg1[%c0_119, %c44, %c0_120] : memref<1x110x64xbf16, #tpu.memory_space<vmem>>, vector<1x40x64xbf16>
    %226 = vector.shape_cast %225 : vector<1x40x64xbf16> to vector<40x64xbf16>
    %227 = arith.extf %226 : vector<40x64xbf16> to vector<40x64xf32>
    %c32_121 = arith.constant 32 : index
    %c0_122 = arith.constant 0 : index
    %228 = vector.load %arg2[%c32_121, %c0_122] : memref<49x64xf32, #tpu.memory_space<vmem>>, vector<1x64xf32>
    %229 = vector.broadcast %228 : vector<1x64xf32> to vector<40x64xf32>
    %230 = arith.mulf %227, %229 : vector<40x64xf32>
    %231 = arith.addf %224, %230 : vector<40x64xf32>
    %c0_123 = arith.constant 0 : index
    %c45 = arith.constant 45 : index
    %c0_124 = arith.constant 0 : index
    %232 = vector.load %arg1[%c0_123, %c45, %c0_124] : memref<1x110x64xbf16, #tpu.memory_space<vmem>>, vector<1x40x64xbf16>
    %233 = vector.shape_cast %232 : vector<1x40x64xbf16> to vector<40x64xbf16>
    %234 = arith.extf %233 : vector<40x64xbf16> to vector<40x64xf32>
    %c33_125 = arith.constant 33 : index
    %c0_126 = arith.constant 0 : index
    %235 = vector.load %arg2[%c33_125, %c0_126] : memref<49x64xf32, #tpu.memory_space<vmem>>, vector<1x64xf32>
    %236 = vector.broadcast %235 : vector<1x64xf32> to vector<40x64xf32>
    %237 = arith.mulf %234, %236 : vector<40x64xf32>
    %238 = arith.addf %231, %237 : vector<40x64xf32>
    %c0_127 = arith.constant 0 : index
    %c46 = arith.constant 46 : index
    %c0_128 = arith.constant 0 : index
    %239 = vector.load %arg1[%c0_127, %c46, %c0_128] : memref<1x110x64xbf16, #tpu.memory_space<vmem>>, vector<1x40x64xbf16>
    %240 = vector.shape_cast %239 : vector<1x40x64xbf16> to vector<40x64xbf16>
    %241 = arith.extf %240 : vector<40x64xbf16> to vector<40x64xf32>
    %c34_129 = arith.constant 34 : index
    %c0_130 = arith.constant 0 : index
    %242 = vector.load %arg2[%c34_129, %c0_130] : memref<49x64xf32, #tpu.memory_space<vmem>>, vector<1x64xf32>
    %243 = vector.broadcast %242 : vector<1x64xf32> to vector<40x64xf32>
    %244 = arith.mulf %241, %243 : vector<40x64xf32>
    %245 = arith.addf %238, %244 : vector<40x64xf32>
    %c0_131 = arith.constant 0 : index
    %c50 = arith.constant 50 : index
    %c0_132 = arith.constant 0 : index
    %246 = vector.load %arg1[%c0_131, %c50, %c0_132] : memref<1x110x64xbf16, #tpu.memory_space<vmem>>, vector<1x40x64xbf16>
    %247 = vector.shape_cast %246 : vector<1x40x64xbf16> to vector<40x64xbf16>
    %248 = arith.extf %247 : vector<40x64xbf16> to vector<40x64xf32>
    %c35_133 = arith.constant 35 : index
    %c0_134 = arith.constant 0 : index
    %249 = vector.load %arg2[%c35_133, %c0_134] : memref<49x64xf32, #tpu.memory_space<vmem>>, vector<1x64xf32>
    %250 = vector.broadcast %249 : vector<1x64xf32> to vector<40x64xf32>
    %251 = arith.mulf %248, %250 : vector<40x64xf32>
    %252 = arith.addf %245, %251 : vector<40x64xf32>
    %c0_135 = arith.constant 0 : index
    %c51 = arith.constant 51 : index
    %c0_136 = arith.constant 0 : index
    %253 = vector.load %arg1[%c0_135, %c51, %c0_136] : memref<1x110x64xbf16, #tpu.memory_space<vmem>>, vector<1x40x64xbf16>
    %254 = vector.shape_cast %253 : vector<1x40x64xbf16> to vector<40x64xbf16>
    %255 = arith.extf %254 : vector<40x64xbf16> to vector<40x64xf32>
    %c36_137 = arith.constant 36 : index
    %c0_138 = arith.constant 0 : index
    %256 = vector.load %arg2[%c36_137, %c0_138] : memref<49x64xf32, #tpu.memory_space<vmem>>, vector<1x64xf32>
    %257 = vector.broadcast %256 : vector<1x64xf32> to vector<40x64xf32>
    %258 = arith.mulf %255, %257 : vector<40x64xf32>
    %259 = arith.addf %252, %258 : vector<40x64xf32>
    %c0_139 = arith.constant 0 : index
    %c52 = arith.constant 52 : index
    %c0_140 = arith.constant 0 : index
    %260 = vector.load %arg1[%c0_139, %c52, %c0_140] : memref<1x110x64xbf16, #tpu.memory_space<vmem>>, vector<1x40x64xbf16>
    %261 = vector.shape_cast %260 : vector<1x40x64xbf16> to vector<40x64xbf16>
    %262 = arith.extf %261 : vector<40x64xbf16> to vector<40x64xf32>
    %c37 = arith.constant 37 : index
    %c0_141 = arith.constant 0 : index
    %263 = vector.load %arg2[%c37, %c0_141] : memref<49x64xf32, #tpu.memory_space<vmem>>, vector<1x64xf32>
    %264 = vector.broadcast %263 : vector<1x64xf32> to vector<40x64xf32>
    %265 = arith.mulf %262, %264 : vector<40x64xf32>
    %266 = arith.addf %259, %265 : vector<40x64xf32>
    %c0_142 = arith.constant 0 : index
    %c53 = arith.constant 53 : index
    %c0_143 = arith.constant 0 : index
    %267 = vector.load %arg1[%c0_142, %c53, %c0_143] : memref<1x110x64xbf16, #tpu.memory_space<vmem>>, vector<1x40x64xbf16>
    %268 = vector.shape_cast %267 : vector<1x40x64xbf16> to vector<40x64xbf16>
    %269 = arith.extf %268 : vector<40x64xbf16> to vector<40x64xf32>
    %c38 = arith.constant 38 : index
    %c0_144 = arith.constant 0 : index
    %270 = vector.load %arg2[%c38, %c0_144] : memref<49x64xf32, #tpu.memory_space<vmem>>, vector<1x64xf32>
    %271 = vector.broadcast %270 : vector<1x64xf32> to vector<40x64xf32>
    %272 = arith.mulf %269, %271 : vector<40x64xf32>
    %273 = arith.addf %266, %272 : vector<40x64xf32>
    %c0_145 = arith.constant 0 : index
    %c54 = arith.constant 54 : index
    %c0_146 = arith.constant 0 : index
    %274 = vector.load %arg1[%c0_145, %c54, %c0_146] : memref<1x110x64xbf16, #tpu.memory_space<vmem>>, vector<1x40x64xbf16>
    %275 = vector.shape_cast %274 : vector<1x40x64xbf16> to vector<40x64xbf16>
    %276 = arith.extf %275 : vector<40x64xbf16> to vector<40x64xf32>
    %c39 = arith.constant 39 : index
    %c0_147 = arith.constant 0 : index
    %277 = vector.load %arg2[%c39, %c0_147] : memref<49x64xf32, #tpu.memory_space<vmem>>, vector<1x64xf32>
    %278 = vector.broadcast %277 : vector<1x64xf32> to vector<40x64xf32>
    %279 = arith.mulf %276, %278 : vector<40x64xf32>
    %280 = arith.addf %273, %279 : vector<40x64xf32>
    %c0_148 = arith.constant 0 : index
    %c55 = arith.constant 55 : index
    %c0_149 = arith.constant 0 : index
    %281 = vector.load %arg1[%c0_148, %c55, %c0_149] : memref<1x110x64xbf16, #tpu.memory_space<vmem>>, vector<1x40x64xbf16>
    %282 = vector.shape_cast %281 : vector<1x40x64xbf16> to vector<40x64xbf16>
    %283 = arith.extf %282 : vector<40x64xbf16> to vector<40x64xf32>
    %c40_150 = arith.constant 40 : index
    %c0_151 = arith.constant 0 : index
    %284 = vector.load %arg2[%c40_150, %c0_151] : memref<49x64xf32, #tpu.memory_space<vmem>>, vector<1x64xf32>
    %285 = vector.broadcast %284 : vector<1x64xf32> to vector<40x64xf32>
    %286 = arith.mulf %283, %285 : vector<40x64xf32>
    %287 = arith.addf %280, %286 : vector<40x64xf32>
    %c0_152 = arith.constant 0 : index
    %c56 = arith.constant 56 : index
    %c0_153 = arith.constant 0 : index
    %288 = vector.load %arg1[%c0_152, %c56, %c0_153] : memref<1x110x64xbf16, #tpu.memory_space<vmem>>, vector<1x40x64xbf16>
    %289 = vector.shape_cast %288 : vector<1x40x64xbf16> to vector<40x64xbf16>
    %290 = arith.extf %289 : vector<40x64xbf16> to vector<40x64xf32>
    %c41_154 = arith.constant 41 : index
    %c0_155 = arith.constant 0 : index
    %291 = vector.load %arg2[%c41_154, %c0_155] : memref<49x64xf32, #tpu.memory_space<vmem>>, vector<1x64xf32>
    %292 = vector.broadcast %291 : vector<1x64xf32> to vector<40x64xf32>
    %293 = arith.mulf %290, %292 : vector<40x64xf32>
    %294 = arith.addf %287, %293 : vector<40x64xf32>
    %c0_156 = arith.constant 0 : index
    %c60 = arith.constant 60 : index
    %c0_157 = arith.constant 0 : index
    %295 = vector.load %arg1[%c0_156, %c60, %c0_157] : memref<1x110x64xbf16, #tpu.memory_space<vmem>>, vector<1x40x64xbf16>
    %296 = vector.shape_cast %295 : vector<1x40x64xbf16> to vector<40x64xbf16>
    %297 = arith.extf %296 : vector<40x64xbf16> to vector<40x64xf32>
    %c42_158 = arith.constant 42 : index
    %c0_159 = arith.constant 0 : index
    %298 = vector.load %arg2[%c42_158, %c0_159] : memref<49x64xf32, #tpu.memory_space<vmem>>, vector<1x64xf32>
    %299 = vector.broadcast %298 : vector<1x64xf32> to vector<40x64xf32>
    %300 = arith.mulf %297, %299 : vector<40x64xf32>
    %301 = arith.addf %294, %300 : vector<40x64xf32>
    %c0_160 = arith.constant 0 : index
    %c61 = arith.constant 61 : index
    %c0_161 = arith.constant 0 : index
    %302 = vector.load %arg1[%c0_160, %c61, %c0_161] : memref<1x110x64xbf16, #tpu.memory_space<vmem>>, vector<1x40x64xbf16>
    %303 = vector.shape_cast %302 : vector<1x40x64xbf16> to vector<40x64xbf16>
    %304 = arith.extf %303 : vector<40x64xbf16> to vector<40x64xf32>
    %c43_162 = arith.constant 43 : index
    %c0_163 = arith.constant 0 : index
    %305 = vector.load %arg2[%c43_162, %c0_163] : memref<49x64xf32, #tpu.memory_space<vmem>>, vector<1x64xf32>
    %306 = vector.broadcast %305 : vector<1x64xf32> to vector<40x64xf32>
    %307 = arith.mulf %304, %306 : vector<40x64xf32>
    %308 = arith.addf %301, %307 : vector<40x64xf32>
    %c0_164 = arith.constant 0 : index
    %c62 = arith.constant 62 : index
    %c0_165 = arith.constant 0 : index
    %309 = vector.load %arg1[%c0_164, %c62, %c0_165] : memref<1x110x64xbf16, #tpu.memory_space<vmem>>, vector<1x40x64xbf16>
    %310 = vector.shape_cast %309 : vector<1x40x64xbf16> to vector<40x64xbf16>
    %311 = arith.extf %310 : vector<40x64xbf16> to vector<40x64xf32>
    %c44_166 = arith.constant 44 : index
    %c0_167 = arith.constant 0 : index
    %312 = vector.load %arg2[%c44_166, %c0_167] : memref<49x64xf32, #tpu.memory_space<vmem>>, vector<1x64xf32>
    %313 = vector.broadcast %312 : vector<1x64xf32> to vector<40x64xf32>
    %314 = arith.mulf %311, %313 : vector<40x64xf32>
    %315 = arith.addf %308, %314 : vector<40x64xf32>
    %c0_168 = arith.constant 0 : index
    %c63 = arith.constant 63 : index
    %c0_169 = arith.constant 0 : index
    %316 = vector.load %arg1[%c0_168, %c63, %c0_169] : memref<1x110x64xbf16, #tpu.memory_space<vmem>>, vector<1x40x64xbf16>
    %317 = vector.shape_cast %316 : vector<1x40x64xbf16> to vector<40x64xbf16>
    %318 = arith.extf %317 : vector<40x64xbf16> to vector<40x64xf32>
    %c45_170 = arith.constant 45 : index
    %c0_171 = arith.constant 0 : index
    %319 = vector.load %arg2[%c45_170, %c0_171] : memref<49x64xf32, #tpu.memory_space<vmem>>, vector<1x64xf32>
    %320 = vector.broadcast %319 : vector<1x64xf32> to vector<40x64xf32>
    %321 = arith.mulf %318, %320 : vector<40x64xf32>
    %322 = arith.addf %315, %321 : vector<40x64xf32>
    %c0_172 = arith.constant 0 : index
    %c64 = arith.constant 64 : index
    %c0_173 = arith.constant 0 : index
    %323 = vector.load %arg1[%c0_172, %c64, %c0_173] : memref<1x110x64xbf16, #tpu.memory_space<vmem>>, vector<1x40x64xbf16>
    %324 = vector.shape_cast %323 : vector<1x40x64xbf16> to vector<40x64xbf16>
    %325 = arith.extf %324 : vector<40x64xbf16> to vector<40x64xf32>
    %c46_174 = arith.constant 46 : index
    %c0_175 = arith.constant 0 : index
    %326 = vector.load %arg2[%c46_174, %c0_175] : memref<49x64xf32, #tpu.memory_space<vmem>>, vector<1x64xf32>
    %327 = vector.broadcast %326 : vector<1x64xf32> to vector<40x64xf32>
    %328 = arith.mulf %325, %327 : vector<40x64xf32>
    %329 = arith.addf %322, %328 : vector<40x64xf32>
    %c0_176 = arith.constant 0 : index
    %c65 = arith.constant 65 : index
    %c0_177 = arith.constant 0 : index
    %330 = vector.load %arg1[%c0_176, %c65, %c0_177] : memref<1x110x64xbf16, #tpu.memory_space<vmem>>, vector<1x40x64xbf16>
    %331 = vector.shape_cast %330 : vector<1x40x64xbf16> to vector<40x64xbf16>
    %332 = arith.extf %331 : vector<40x64xbf16> to vector<40x64xf32>
    %c47 = arith.constant 47 : index
    %c0_178 = arith.constant 0 : index
    %333 = vector.load %arg2[%c47, %c0_178] : memref<49x64xf32, #tpu.memory_space<vmem>>, vector<1x64xf32>
    %334 = vector.broadcast %333 : vector<1x64xf32> to vector<40x64xf32>
    %335 = arith.mulf %332, %334 : vector<40x64xf32>
    %336 = arith.addf %329, %335 : vector<40x64xf32>
    %c0_179 = arith.constant 0 : index
    %c66 = arith.constant 66 : index
    %c0_180 = arith.constant 0 : index
    %337 = vector.load %arg1[%c0_179, %c66, %c0_180] : memref<1x110x64xbf16, #tpu.memory_space<vmem>>, vector<1x40x64xbf16>
    %338 = vector.shape_cast %337 : vector<1x40x64xbf16> to vector<40x64xbf16>
    %339 = arith.extf %338 : vector<40x64xbf16> to vector<40x64xf32>
    %c48 = arith.constant 48 : index
    %c0_181 = arith.constant 0 : index
    %340 = vector.load %arg2[%c48, %c0_181] : memref<49x64xf32, #tpu.memory_space<vmem>>, vector<1x64xf32>
    %341 = vector.broadcast %340 : vector<1x64xf32> to vector<40x64xf32>
    %342 = arith.mulf %339, %341 : vector<40x64xf32>
    %343 = arith.addf %336, %342 : vector<40x64xf32>
    %c0_182 = arith.constant 0 : index
    %c0_183 = arith.constant 0 : index
    %344 = vector.load %arg3[%c0_182, %c0_183] : memref<1x64xf32, #tpu.memory_space<vmem>>, vector<1x64xf32>
    %345 = vector.broadcast %344 : vector<1x64xf32> to vector<40x64xf32>
    %346 = arith.addf %343, %345 : vector<40x64xf32>
    %c0_184 = arith.constant 0 : index
    %c0_185 = arith.constant 0 : index
    %347 = vector.load %arg4[%c0_184, %c0_185] : memref<40x64xf32, #tpu.memory_space<vmem>>, vector<40x64xf32>
    %348 = arith.addf %346, %347 : vector<40x64xf32>
    %349 = arith.truncf %348 : vector<40x64xf32> to vector<40x64xbf16>
    %c0_186 = arith.constant 0 : index
    %c0_187 = arith.constant 0 : index
    %c0_188 = arith.constant 0 : index
    %350 = vector.load %arg5[%c0_186, %c0_187, %c0_188] : memref<1x40x64xbf16, #tpu.memory_space<vmem>>, vector<1x40x64xbf16>
    %351 = vector.shape_cast %350 : vector<1x40x64xbf16> to vector<40x64xbf16>
    %352 = vector.shape_cast %349 : vector<40x64xbf16> to vector<1x40x64xbf16>
    tpu.vector_store %arg5[%c0_186, %c0_187, %c0_188], %352 {strides = array<i32>} : memref<1x40x64xbf16, #tpu.memory_space<vmem>>, vector<1x40x64xbf16>,
    return
  }
  func.func @transform_0(%arg0: i32) -> (i32, i32, i32) {
    %c0_i32 = arith.constant 0 : i32
    %c0_i32_0 = arith.constant 0 : i32
    %c0_i32_1 = arith.constant 0 : i32
    return %arg0, %c0_i32, %c0_i32_0 : i32, i32, i32
  }
  func.func @transform_1(%arg0: i32) -> (i32, i32) {
    %c0_i32 = arith.constant 0 : i32
    %c0_i32_0 = arith.constant 0 : i32
    %c0_i32_1 = arith.constant 0 : i32
    return %c0_i32, %c0_i32_0 : i32, i32
  }
  func.func @transform_2(%arg0: i32) -> (i32, i32) {
    %c0_i32 = arith.constant 0 : i32
    %c0_i32_0 = arith.constant 0 : i32
    %c0_i32_1 = arith.constant 0 : i32
    return %c0_i32, %c0_i32_0 : i32, i32
  }
  func.func @transform_3(%arg0: i32) -> (i32, i32) {
    %c0_i32 = arith.constant 0 : i32
    %c0_i32_0 = arith.constant 0 : i32
    %c0_i32_1 = arith.constant 0 : i32
    return %c0_i32, %c0_i32_0 : i32, i32
  }
  func.func @transform_4(%arg0: i32) -> (i32, i32, i32) {
    %c0_i32 = arith.constant 0 : i32
    %c0_i32_0 = arith.constant 0 : i32
    %c0_i32_1 = arith.constant 0 : i32
    return %arg0, %c0_i32, %c0_i32_0 : i32, i32, i32
  }
}

module attributes {stable_mosaic.version = 11 : i64} {
  func.func @_head_kernel(%arg0: i32, %arg1: memref<2x16x64xbf16, #tpu.memory_space<vmem>>, %arg2: memref<1x64xf32, #tpu.memory_space<vmem>>, %arg3: memref<1x64xf32, #tpu.memory_space<vmem>>, %arg4: memref<64x10xf32, #tpu.memory_space<vmem>>, %arg5: memref<1x10xf32, #tpu.memory_space<vmem>>, %arg6: memref<2x10xf32, #tpu.memory_space<vmem>>) attributes {dimension_semantics = [#tpu.dimension_semantics<arbitrary>], iteration_bounds = array<i64: 1>, scalar_prefetch = 0 : i64, scratch_operands = 0 : i64, tpu.core_type = #tpu.core_type<tc>, window_params = [{pipeline_mode = #tpu.pipeline_mode<synchronous>, transform_indices = @transform_0, window_bounds = array<i64: 2, 16, 64>}, {pipeline_mode = #tpu.pipeline_mode<synchronous>, transform_indices = @transform_1, window_bounds = array<i64: 1, 64>}, {pipeline_mode = #tpu.pipeline_mode<synchronous>, transform_indices = @transform_2, window_bounds = array<i64: 1, 64>}, {pipeline_mode = #tpu.pipeline_mode<synchronous>, transform_indices = @transform_3, window_bounds = array<i64: 64, 10>}, {pipeline_mode = #tpu.pipeline_mode<synchronous>, transform_indices = @transform_4, window_bounds = array<i64: 1, 10>}, {pipeline_mode = #tpu.pipeline_mode<synchronous>, transform_indices = @transform_5, window_bounds = array<i64: 2, 10>}]} {
    %c0 = arith.constant 0 : index
    %c0_0 = arith.constant 0 : index
    %c0_1 = arith.constant 0 : index
    %0 = vector.load %arg1[%c0, %c0_0, %c0_1] : memref<2x16x64xbf16, #tpu.memory_space<vmem>>, vector<2x16x64xbf16>
    %1 = arith.extf %0 : vector<2x16x64xbf16> to vector<2x16x64xf32>
    %cst = arith.constant dense<0.000000e+00> : vector<2x16xf32>
    %2 = vector.multi_reduction <add>, %1, %cst [2] : vector<2x16x64xf32> to vector<2x16xf32>
    %3 = vector.shape_cast %2 : vector<2x16xf32> to vector<2x16x1xf32>
    %cst_2 = arith.constant 6.400000e+01 : f32
    %4 = vector.broadcast %cst_2 : f32 to vector<2x16x1xf32>
    %5 = arith.divf %3, %4 : vector<2x16x1xf32>
    %6 = vector.broadcast %5 : vector<2x16x1xf32> to vector<2x16x64xf32>
    %7 = arith.subf %1, %6 : vector<2x16x64xf32>
    %8 = arith.mulf %7, %7 : vector<2x16x64xf32>
    %cst_3 = arith.constant dense<0.000000e+00> : vector<2x16xf32>
    %9 = vector.multi_reduction <add>, %8, %cst_3 [2] : vector<2x16x64xf32> to vector<2x16xf32>
    %10 = vector.shape_cast %9 : vector<2x16xf32> to vector<2x16x1xf32>
    %cst_4 = arith.constant 6.400000e+01 : f32
    %11 = vector.broadcast %cst_4 : f32 to vector<2x16x1xf32>
    %12 = arith.divf %10, %11 : vector<2x16x1xf32>
    %cst_5 = arith.constant 9.99999974E-6 : f32
    %13 = vector.broadcast %cst_5 : f32 to vector<2x16x1xf32>
    %14 = arith.addf %12, %13 : vector<2x16x1xf32>
    %15 = math.rsqrt %14 : vector<2x16x1xf32>
    %16 = vector.broadcast %15 : vector<2x16x1xf32> to vector<2x16x64xf32>
    %17 = arith.mulf %7, %16 : vector<2x16x64xf32>
    %c0_6 = arith.constant 0 : index
    %c0_7 = arith.constant 0 : index
    %18 = vector.load %arg2[%c0_6, %c0_7] : memref<1x64xf32, #tpu.memory_space<vmem>>, vector<1x64xf32>
    %19 = vector.shape_cast %18 : vector<1x64xf32> to vector<1x1x64xf32>
    %20 = vector.broadcast %19 : vector<1x1x64xf32> to vector<2x16x64xf32>
    %21 = arith.mulf %17, %20 : vector<2x16x64xf32>
    %c0_8 = arith.constant 0 : index
    %c0_9 = arith.constant 0 : index
    %22 = vector.load %arg3[%c0_8, %c0_9] : memref<1x64xf32, #tpu.memory_space<vmem>>, vector<1x64xf32>
    %23 = vector.shape_cast %22 : vector<1x64xf32> to vector<1x1x64xf32>
    %24 = vector.broadcast %23 : vector<1x1x64xf32> to vector<2x16x64xf32>
    %25 = arith.addf %21, %24 : vector<2x16x64xf32>
    %cst_10 = arith.constant dense<0.000000e+00> : vector<2x64xf32>
    %26 = vector.multi_reduction <add>, %25, %cst_10 [1] : vector<2x16x64xf32> to vector<2x64xf32>
    %cst_11 = arith.constant 1.600000e+01 : f32
    %27 = vector.broadcast %cst_11 : f32 to vector<2x64xf32>
    %28 = arith.divf %26, %27 : vector<2x64xf32>
    %c0_12 = arith.constant 0 : index
    %c0_13 = arith.constant 0 : index
    %29 = vector.load %arg4[%c0_12, %c0_13] : memref<64x10xf32, #tpu.memory_space<vmem>>, vector<64x10xf32>
    %cst_14 = arith.constant dense<0.000000e+00> : vector<2x10xf32>
    %30 = tpu.matmul %28, %29, %cst_14 {dimension_numbers = #tpu.dot_dimension_numbers<[1], [0], [0], [1], [0, 0, 1, 1], [], []>} : vector<2x64xf32>, vector<64x10xf32>, vector<2x10xf32> -> vector<2x10xf32>
    %c0_15 = arith.constant 0 : index
    %c0_16 = arith.constant 0 : index
    %31 = vector.load %arg5[%c0_15, %c0_16] : memref<1x10xf32, #tpu.memory_space<vmem>>, vector<1x10xf32>
    %32 = vector.broadcast %31 : vector<1x10xf32> to vector<2x10xf32>
    %33 = arith.addf %30, %32 : vector<2x10xf32>
    %c0_17 = arith.constant 0 : index
    %c0_18 = arith.constant 0 : index
    %34 = vector.load %arg6[%c0_17, %c0_18] : memref<2x10xf32, #tpu.memory_space<vmem>>, vector<2x10xf32>
    tpu.vector_store %arg6[%c0_17, %c0_18], %33 {strides = array<i32>} : memref<2x10xf32, #tpu.memory_space<vmem>>, vector<2x10xf32>,
    return
  }
  func.func @transform_0(%arg0: i32) -> (i32, i32, i32) {
    %c0_i32 = arith.constant 0 : i32
    %c0_i32_0 = arith.constant 0 : i32
    %c0_i32_1 = arith.constant 0 : i32
    %c0_i32_2 = arith.constant 0 : i32
    return %c0_i32, %c0_i32_0, %c0_i32_1 : i32, i32, i32
  }
  func.func @transform_1(%arg0: i32) -> (i32, i32) {
    %c0_i32 = arith.constant 0 : i32
    %c0_i32_0 = arith.constant 0 : i32
    %c0_i32_1 = arith.constant 0 : i32
    return %c0_i32, %c0_i32_0 : i32, i32
  }
  func.func @transform_2(%arg0: i32) -> (i32, i32) {
    %c0_i32 = arith.constant 0 : i32
    %c0_i32_0 = arith.constant 0 : i32
    %c0_i32_1 = arith.constant 0 : i32
    return %c0_i32, %c0_i32_0 : i32, i32
  }
  func.func @transform_3(%arg0: i32) -> (i32, i32) {
    %c0_i32 = arith.constant 0 : i32
    %c0_i32_0 = arith.constant 0 : i32
    %c0_i32_1 = arith.constant 0 : i32
    return %c0_i32, %c0_i32_0 : i32, i32
  }
  func.func @transform_4(%arg0: i32) -> (i32, i32) {
    %c0_i32 = arith.constant 0 : i32
    %c0_i32_0 = arith.constant 0 : i32
    %c0_i32_1 = arith.constant 0 : i32
    return %c0_i32, %c0_i32_0 : i32, i32
  }
  func.func @transform_5(%arg0: i32) -> (i32, i32) {
    %c0_i32 = arith.constant 0 : i32
    %c0_i32_0 = arith.constant 0 : i32
    %c0_i32_1 = arith.constant 0 : i32
    return %c0_i32, %c0_i32_0 : i32, i32
  }
}

module attributes {stable_mosaic.version = 11 : i64} {
  func.func @_encoder_kernel(%arg0: i32, %arg1: memref<1x16x64xbf16, #tpu.memory_space<vmem>>, %arg2: memref<64x192xbf16, #tpu.memory_space<vmem>>, %arg3: memref<1x192xf32, #tpu.memory_space<vmem>>, %arg4: memref<64x64xbf16, #tpu.memory_space<vmem>>, %arg5: memref<1x64xf32, #tpu.memory_space<vmem>>, %arg6: memref<1x64xf32, #tpu.memory_space<vmem>>, %arg7: memref<1x64xf32, #tpu.memory_space<vmem>>, %arg8: memref<64x256xbf16, #tpu.memory_space<vmem>>, %arg9: memref<1x256xf32, #tpu.memory_space<vmem>>, %arg10: memref<256x64xbf16, #tpu.memory_space<vmem>>, %arg11: memref<1x64xf32, #tpu.memory_space<vmem>>, %arg12: memref<1x64xf32, #tpu.memory_space<vmem>>, %arg13: memref<1x64xf32, #tpu.memory_space<vmem>>, %arg14: memref<1x16x64xbf16, #tpu.memory_space<vmem>>) attributes {dimension_semantics = [#tpu.dimension_semantics<parallel>], iteration_bounds = array<i64: 2>, scalar_prefetch = 0 : i64, scratch_operands = 0 : i64, tpu.core_type = #tpu.core_type<tc>, window_params = [{transform_indices = @transform_0, window_bounds = array<i64: 1, 16, 64>}, {pipeline_mode = #tpu.pipeline_mode<synchronous>, transform_indices = @transform_1, window_bounds = array<i64: 64, 192>}, {pipeline_mode = #tpu.pipeline_mode<synchronous>, transform_indices = @transform_2, window_bounds = array<i64: 1, 192>}, {pipeline_mode = #tpu.pipeline_mode<synchronous>, transform_indices = @transform_3, window_bounds = array<i64: 64, 64>}, {pipeline_mode = #tpu.pipeline_mode<synchronous>, transform_indices = @transform_4, window_bounds = array<i64: 1, 64>}, {pipeline_mode = #tpu.pipeline_mode<synchronous>, transform_indices = @transform_5, window_bounds = array<i64: 1, 64>}, {pipeline_mode = #tpu.pipeline_mode<synchronous>, transform_indices = @transform_6, window_bounds = array<i64: 1, 64>}, {pipeline_mode = #tpu.pipeline_mode<synchronous>, transform_indices = @transform_7, window_bounds = array<i64: 64, 256>}, {pipeline_mode = #tpu.pipeline_mode<synchronous>, transform_indices = @transform_8, window_bounds = array<i64: 1, 256>}, {pipeline_mode = #tpu.pipeline_mode<synchronous>, transform_indices = @transform_9, window_bounds = array<i64: 256, 64>}, {pipeline_mode = #tpu.pipeline_mode<synchronous>, transform_indices = @transform_10, window_bounds = array<i64: 1, 64>}, {pipeline_mode = #tpu.pipeline_mode<synchronous>, transform_indices = @transform_11, window_bounds = array<i64: 1, 64>}, {pipeline_mode = #tpu.pipeline_mode<synchronous>, transform_indices = @transform_12, window_bounds = array<i64: 1, 64>}, {transform_indices = @transform_13, window_bounds = array<i64: 1, 16, 64>}]} {
    %c0 = arith.constant 0 : index
    %c0_0 = arith.constant 0 : index
    %c0_1 = arith.constant 0 : index
    %0 = vector.load %arg1[%c0, %c0_0, %c0_1] : memref<1x16x64xbf16, #tpu.memory_space<vmem>>, vector<1x16x64xbf16>
    %1 = vector.shape_cast %0 : vector<1x16x64xbf16> to vector<16x64xbf16>
    %2 = arith.extf %1 : vector<16x64xbf16> to vector<16x64xf32>
    %c0_2 = arith.constant 0 : index
    %c0_3 = arith.constant 0 : index
    %c0_4 = arith.constant 0 : index
    %3 = vector.load %arg1[%c0_2, %c0_3, %c0_4] : memref<1x16x64xbf16, #tpu.memory_space<vmem>>, vector<1x16x64xbf16>
    %4 = vector.shape_cast %3 : vector<1x16x64xbf16> to vector<16x64xbf16>
    %c0_5 = arith.constant 0 : index
    %c0_6 = arith.constant 0 : index
    %5 = vector.load %arg2[%c0_5, %c0_6] : memref<64x192xbf16, #tpu.memory_space<vmem>>, vector<64x192xbf16>
    %cst = arith.constant dense<0.000000e+00> : vector<16x192xf32>
    %6 = tpu.matmul %4, %5, %cst {dimension_numbers = #tpu.dot_dimension_numbers<[1], [0], [0], [1], [0, 0, 1, 1], [], []>} : vector<16x64xbf16>, vector<64x192xbf16>, vector<16x192xf32> -> vector<16x192xf32>
    %c0_7 = arith.constant 0 : index
    %c0_8 = arith.constant 0 : index
    %7 = vector.load %arg3[%c0_7, %c0_8] : memref<1x192xf32, #tpu.memory_space<vmem>>, vector<1x192xf32>
    %8 = vector.broadcast %7 : vector<1x192xf32> to vector<16x192xf32>
    %9 = arith.addf %6, %8 : vector<16x192xf32>
    %10 = arith.truncf %9 : vector<16x192xf32> to vector<16x192xbf16>
    %11 = vector.extract_strided_slice %10 {offsets = [0, 0], sizes = [16, 32], strides = [1, 1]} : vector<16x192xbf16> to vector<16x32xbf16>
    %12 = vector.extract_strided_slice %10 {offsets = [0, 64], sizes = [16, 32], strides = [1, 1]} : vector<16x192xbf16> to vector<16x32xbf16>
    %13 = vector.extract_strided_slice %10 {offsets = [0, 128], sizes = [16, 32], strides = [1, 1]} : vector<16x192xbf16> to vector<16x32xbf16>
    %cst_9 = arith.constant dense<0.000000e+00> : vector<16x16xf32>
    %14 = tpu.matmul %11, %12, %cst_9 {dimension_numbers = #tpu.dot_dimension_numbers<[1], [1], [0], [0], [0, 0, 1, 0], [], []>} : vector<16x32xbf16>, vector<16x32xbf16>, vector<16x16xf32> -> vector<16x16xf32>
    %cst_10 = arith.constant 0.176776692 : f32
    %15 = vector.broadcast %cst_10 : f32 to vector<16x16xf32>
    %16 = arith.mulf %14, %15 : vector<16x16xf32>
    %cst_11 = arith.constant dense<0xFF800000> : vector<16xf32>
    %17 = vector.multi_reduction <maximumf>, %16, %cst_11 [1] : vector<16x16xf32> to vector<16xf32>
    %18 = vector.shape_cast %17 : vector<16xf32> to vector<16x1xf32>
    %19 = vector.broadcast %18 : vector<16x1xf32> to vector<16x16xf32>
    %20 = arith.subf %16, %19 : vector<16x16xf32>
    %21 = math.exp %20 : vector<16x16xf32>
    %cst_12 = arith.constant dense<0.000000e+00> : vector<16xf32>
    %22 = vector.multi_reduction <add>, %21, %cst_12 [1] : vector<16x16xf32> to vector<16xf32>
    %23 = vector.shape_cast %22 : vector<16xf32> to vector<16x1xf32>
    %24 = vector.broadcast %23 : vector<16x1xf32> to vector<16x16xf32>
    %25 = arith.divf %21, %24 : vector<16x16xf32>
    %26 = arith.truncf %25 : vector<16x16xf32> to vector<16x16xbf16>
    %cst_13 = arith.constant dense<0.000000e+00> : vector<16x32xf32>
    %27 = tpu.matmul %26, %13, %cst_13 {dimension_numbers = #tpu.dot_dimension_numbers<[1], [0], [0], [1], [0, 0, 1, 1], [], []>} : vector<16x16xbf16>, vector<16x32xbf16>, vector<16x32xf32> -> vector<16x32xf32>
    %28 = vector.extract_strided_slice %10 {offsets = [0, 32], sizes = [16, 32], strides = [1, 1]} : vector<16x192xbf16> to vector<16x32xbf16>
    %29 = vector.extract_strided_slice %10 {offsets = [0, 96], sizes = [16, 32], strides = [1, 1]} : vector<16x192xbf16> to vector<16x32xbf16>
    %30 = vector.extract_strided_slice %10 {offsets = [0, 160], sizes = [16, 32], strides = [1, 1]} : vector<16x192xbf16> to vector<16x32xbf16>
    %cst_14 = arith.constant dense<0.000000e+00> : vector<16x16xf32>
    %31 = tpu.matmul %28, %29, %cst_14 {dimension_numbers = #tpu.dot_dimension_numbers<[1], [1], [0], [0], [0, 0, 1, 0], [], []>} : vector<16x32xbf16>, vector<16x32xbf16>, vector<16x16xf32> -> vector<16x16xf32>
    %cst_15 = arith.constant 0.176776692 : f32
    %32 = vector.broadcast %cst_15 : f32 to vector<16x16xf32>
    %33 = arith.mulf %31, %32 : vector<16x16xf32>
    %cst_16 = arith.constant dense<0xFF800000> : vector<16xf32>
    %34 = vector.multi_reduction <maximumf>, %33, %cst_16 [1] : vector<16x16xf32> to vector<16xf32>
    %35 = vector.shape_cast %34 : vector<16xf32> to vector<16x1xf32>
    %36 = vector.broadcast %35 : vector<16x1xf32> to vector<16x16xf32>
    %37 = arith.subf %33, %36 : vector<16x16xf32>
    %38 = math.exp %37 : vector<16x16xf32>
    %cst_17 = arith.constant dense<0.000000e+00> : vector<16xf32>
    %39 = vector.multi_reduction <add>, %38, %cst_17 [1] : vector<16x16xf32> to vector<16xf32>
    %40 = vector.shape_cast %39 : vector<16xf32> to vector<16x1xf32>
    %41 = vector.broadcast %40 : vector<16x1xf32> to vector<16x16xf32>
    %42 = arith.divf %38, %41 : vector<16x16xf32>
    %43 = arith.truncf %42 : vector<16x16xf32> to vector<16x16xbf16>
    %cst_18 = arith.constant dense<0.000000e+00> : vector<16x32xf32>
    %44 = tpu.matmul %43, %30, %cst_18 {dimension_numbers = #tpu.dot_dimension_numbers<[1], [0], [0], [1], [0, 0, 1, 1], [], []>} : vector<16x16xbf16>, vector<16x32xbf16>, vector<16x32xf32> -> vector<16x32xf32>
    %45 = tpu.concatenate %27, %44 in 1 : vector<16x32xf32>, vector<16x32xf32> -> vector<16x64xf32>
    %46 = arith.truncf %45 : vector<16x64xf32> to vector<16x64xbf16>
    %c0_19 = arith.constant 0 : index
    %c0_20 = arith.constant 0 : index
    %47 = vector.load %arg4[%c0_19, %c0_20] : memref<64x64xbf16, #tpu.memory_space<vmem>>, vector<64x64xbf16>
    %cst_21 = arith.constant dense<0.000000e+00> : vector<16x64xf32>
    %48 = tpu.matmul %46, %47, %cst_21 {dimension_numbers = #tpu.dot_dimension_numbers<[1], [0], [0], [1], [0, 0, 1, 1], [], []>} : vector<16x64xbf16>, vector<64x64xbf16>, vector<16x64xf32> -> vector<16x64xf32>
    %c0_22 = arith.constant 0 : index
    %c0_23 = arith.constant 0 : index
    %49 = vector.load %arg5[%c0_22, %c0_23] : memref<1x64xf32, #tpu.memory_space<vmem>>, vector<1x64xf32>
    %50 = vector.broadcast %49 : vector<1x64xf32> to vector<16x64xf32>
    %51 = arith.addf %48, %50 : vector<16x64xf32>
    %52 = arith.addf %2, %51 : vector<16x64xf32>
    %c0_24 = arith.constant 0 : index
    %c0_25 = arith.constant 0 : index
    %53 = vector.load %arg6[%c0_24, %c0_25] : memref<1x64xf32, #tpu.memory_space<vmem>>, vector<1x64xf32>
    %54 = vector.broadcast %53 : vector<1x64xf32> to vector<16x64xf32>
    %55 = arith.mulf %52, %54 : vector<16x64xf32>
    %c0_26 = arith.constant 0 : index
    %c0_27 = arith.constant 0 : index
    %56 = vector.load %arg7[%c0_26, %c0_27] : memref<1x64xf32, #tpu.memory_space<vmem>>, vector<1x64xf32>
    %57 = vector.broadcast %56 : vector<1x64xf32> to vector<16x64xf32>
    %58 = arith.addf %55, %57 : vector<16x64xf32>
    %59 = arith.truncf %58 : vector<16x64xf32> to vector<16x64xbf16>
    %c0_28 = arith.constant 0 : index
    %c0_29 = arith.constant 0 : index
    %60 = vector.load %arg8[%c0_28, %c0_29] : memref<64x256xbf16, #tpu.memory_space<vmem>>, vector<64x256xbf16>
    %cst_30 = arith.constant dense<0.000000e+00> : vector<16x256xf32>
    %61 = tpu.matmul %59, %60, %cst_30 {dimension_numbers = #tpu.dot_dimension_numbers<[1], [0], [0], [1], [0, 0, 1, 1], [], []>} : vector<16x64xbf16>, vector<64x256xbf16>, vector<16x256xf32> -> vector<16x256xf32>
    %c0_31 = arith.constant 0 : index
    %c0_32 = arith.constant 0 : index
    %62 = vector.load %arg9[%c0_31, %c0_32] : memref<1x256xf32, #tpu.memory_space<vmem>>, vector<1x256xf32>
    %63 = vector.broadcast %62 : vector<1x256xf32> to vector<16x256xf32>
    %64 = arith.addf %61, %63 : vector<16x256xf32>
    %cst_33 = arith.constant 0.000000e+00 : f32
    %65 = vector.broadcast %cst_33 : f32 to vector<16x256xf32>
    %66 = arith.maximumf %64, %65 : vector<16x256xf32>
    %67 = arith.truncf %66 : vector<16x256xf32> to vector<16x256xbf16>
    %c0_34 = arith.constant 0 : index
    %c0_35 = arith.constant 0 : index
    %68 = vector.load %arg10[%c0_34, %c0_35] : memref<256x64xbf16, #tpu.memory_space<vmem>>, vector<256x64xbf16>
    %cst_36 = arith.constant dense<0.000000e+00> : vector<16x64xf32>
    %69 = tpu.matmul %67, %68, %cst_36 {dimension_numbers = #tpu.dot_dimension_numbers<[1], [0], [0], [1], [0, 0, 1, 1], [], []>} : vector<16x256xbf16>, vector<256x64xbf16>, vector<16x64xf32> -> vector<16x64xf32>
    %c0_37 = arith.constant 0 : index
    %c0_38 = arith.constant 0 : index
    %70 = vector.load %arg11[%c0_37, %c0_38] : memref<1x64xf32, #tpu.memory_space<vmem>>, vector<1x64xf32>
    %71 = vector.broadcast %70 : vector<1x64xf32> to vector<16x64xf32>
    %72 = arith.addf %69, %71 : vector<16x64xf32>
    %73 = arith.addf %58, %72 : vector<16x64xf32>
    %c0_39 = arith.constant 0 : index
    %c0_40 = arith.constant 0 : index
    %74 = vector.load %arg12[%c0_39, %c0_40] : memref<1x64xf32, #tpu.memory_space<vmem>>, vector<1x64xf32>
    %75 = vector.broadcast %74 : vector<1x64xf32> to vector<16x64xf32>
    %76 = arith.mulf %73, %75 : vector<16x64xf32>
    %c0_41 = arith.constant 0 : index
    %c0_42 = arith.constant 0 : index
    %77 = vector.load %arg13[%c0_41, %c0_42] : memref<1x64xf32, #tpu.memory_space<vmem>>, vector<1x64xf32>
    %78 = vector.broadcast %77 : vector<1x64xf32> to vector<16x64xf32>
    %79 = arith.addf %76, %78 : vector<16x64xf32>
    %80 = arith.truncf %79 : vector<16x64xf32> to vector<16x64xbf16>
    %c0_43 = arith.constant 0 : index
    %c0_44 = arith.constant 0 : index
    %c0_45 = arith.constant 0 : index
    %81 = vector.load %arg14[%c0_43, %c0_44, %c0_45] : memref<1x16x64xbf16, #tpu.memory_space<vmem>>, vector<1x16x64xbf16>
    %82 = vector.shape_cast %81 : vector<1x16x64xbf16> to vector<16x64xbf16>
    %83 = vector.shape_cast %80 : vector<16x64xbf16> to vector<1x16x64xbf16>
    tpu.vector_store %arg14[%c0_43, %c0_44, %c0_45], %83 {strides = array<i32>} : memref<1x16x64xbf16, #tpu.memory_space<vmem>>, vector<1x16x64xbf16>,
    return
  }
  func.func @transform_0(%arg0: i32) -> (i32, i32, i32) {
    %c0_i32 = arith.constant 0 : i32
    %c0_i32_0 = arith.constant 0 : i32
    %c0_i32_1 = arith.constant 0 : i32
    return %arg0, %c0_i32, %c0_i32_0 : i32, i32, i32
  }
  func.func @transform_1(%arg0: i32) -> (i32, i32) {
    %c0_i32 = arith.constant 0 : i32
    %c0_i32_0 = arith.constant 0 : i32
    %c0_i32_1 = arith.constant 0 : i32
    return %c0_i32, %c0_i32_0 : i32, i32
  }
  func.func @transform_2(%arg0: i32) -> (i32, i32) {
    %c0_i32 = arith.constant 0 : i32
    %c0_i32_0 = arith.constant 0 : i32
    %c0_i32_1 = arith.constant 0 : i32
    return %c0_i32, %c0_i32_0 : i32, i32
  }
  func.func @transform_3(%arg0: i32) -> (i32, i32) {
    %c0_i32 = arith.constant 0 : i32
    %c0_i32_0 = arith.constant 0 : i32
    %c0_i32_1 = arith.constant 0 : i32
    return %c0_i32, %c0_i32_0 : i32, i32
  }
  func.func @transform_4(%arg0: i32) -> (i32, i32) {
    %c0_i32 = arith.constant 0 : i32
    %c0_i32_0 = arith.constant 0 : i32
    %c0_i32_1 = arith.constant 0 : i32
    return %c0_i32, %c0_i32_0 : i32, i32
  }
  func.func @transform_5(%arg0: i32) -> (i32, i32) {
    %c0_i32 = arith.constant 0 : i32
    %c0_i32_0 = arith.constant 0 : i32
    %c0_i32_1 = arith.constant 0 : i32
    return %c0_i32, %c0_i32_0 : i32, i32
  }
  func.func @transform_6(%arg0: i32) -> (i32, i32) {
    %c0_i32 = arith.constant 0 : i32
    %c0_i32_0 = arith.constant 0 : i32
    %c0_i32_1 = arith.constant 0 : i32
    return %c0_i32, %c0_i32_0 : i32, i32
  }
  func.func @transform_7(%arg0: i32) -> (i32, i32) {
    %c0_i32 = arith.constant 0 : i32
    %c0_i32_0 = arith.constant 0 : i32
    %c0_i32_1 = arith.constant 0 : i32
    return %c0_i32, %c0_i32_0 : i32, i32
  }
  func.func @transform_8(%arg0: i32) -> (i32, i32) {
    %c0_i32 = arith.constant 0 : i32
    %c0_i32_0 = arith.constant 0 : i32
    %c0_i32_1 = arith.constant 0 : i32
    return %c0_i32, %c0_i32_0 : i32, i32
  }
  func.func @transform_9(%arg0: i32) -> (i32, i32) {
    %c0_i32 = arith.constant 0 : i32
    %c0_i32_0 = arith.constant 0 : i32
    %c0_i32_1 = arith.constant 0 : i32
    return %c0_i32, %c0_i32_0 : i32, i32
  }
  func.func @transform_10(%arg0: i32) -> (i32, i32) {
    %c0_i32 = arith.constant 0 : i32
    %c0_i32_0 = arith.constant 0 : i32
    %c0_i32_1 = arith.constant 0 : i32
    return %c0_i32, %c0_i32_0 : i32, i32
  }
  func.func @transform_11(%arg0: i32) -> (i32, i32) {
    %c0_i32 = arith.constant 0 : i32
    %c0_i32_0 = arith.constant 0 : i32
    %c0_i32_1 = arith.constant 0 : i32
    return %c0_i32, %c0_i32_0 : i32, i32
  }
  func.func @transform_12(%arg0: i32) -> (i32, i32) {
    %c0_i32 = arith.constant 0 : i32
    %c0_i32_0 = arith.constant 0 : i32
    %c0_i32_1 = arith.constant 0 : i32
    return %c0_i32, %c0_i32_0 : i32, i32
  }
  func.func @transform_13(%arg0: i32) -> (i32, i32, i32) {
    %c0_i32 = arith.constant 0 : i32
    %c0_i32_0 = arith.constant 0 : i32
    %c0_i32_1 = arith.constant 0 : i32
    return %arg0, %c0_i32, %c0_i32_0 : i32, i32, i32
  }
}

</mosaic_0001>

<bundles_post_ra>
// kernel: net_forward.13
= control target key start
LH: loop header
LB: loop body
LE: loop exit
PB: predicated region body
PF: predicated region fallthrough
CT: control target
= control target key end

     0   :  { %s957_s15 = smov 0   ;;  %s959_s16 = smov 0   ;;  %s1075_s0 = inlined_call_operand.vmem [shape: bf16[32,384], index: 0, kind: input, shape index: {}]   ;;  %s1076_s1 = inlined_call_operand.vmem [shape: bf16[384,128], index: 1, kind: input, shape index: {}]   ;;  %s1077_s2 = inlined_call_operand.vmem [shape: f32[1,128], index: 2, kind: input, shape index: {}]   ;;  %s1078_s3 = inlined_call_operand.vmem [shape: f32[1,128], index: 3, kind: input, shape index: {}]   ;;  %s1079_s4 = inlined_call_operand.vmem [shape: bf16[32,128], index: 4, kind: output, shape index: {}]  }
   0x1   :  { %s961_s17 = smov 0  }
   0x2 LB: > { %s33_s18 = sadd.s32 1, %s926_s16  ;;  %p734_p0 = scmp.ge.s32.totalorder %s930_s17, 1  ;;  %s930_s17 = sphi %s961_s17, %s14_s17   ;;  %s926_s16 = sphi %s959_s16, %s1081_s16   ;;  %s922_s15 = sphi %s957_s15, %s1080_s15  }
   0x3   : > { %p35_p1 = scmp.ge.s32.totalorder %s33_s18, 2  ;;  %p224_p2 = scmp.lt.s32.totalorder %s930_s17, 3 }
   0x5   : > { %s1083_s18 = smov (%p35_p1, %s33_s18), 0  ;;  %p225_p3 = pnand %p734_p0, %p224_p2 }
   0x6   : > { %s735_s11 = sshll.u32 (!%p225_p3), %s922_s15, 1 }
   0x7   : > { %228 = sbr.rel (%p225_p3) target bundleno = 198 (0xc6), region = 36  ;;  %p274_p4 = scmp.lt.s32.totalorder (!%p225_p3), %s735_s11, 3 }
   0xc   : > { %v859_v0 = vld [vmem:[%s1076_s1 + $0x38] sm:$0xff]  ;;  %v858_v3 = vld [vmem:[%s1076_s1 + $0x30] sm:$0xff]  ;;  %v857_v6 = vld [vmem:[%s1076_s1 + $0x28] sm:$0xff]  ;;  %s1085_s11 = smov (!%p274_p4, %s735_s11), 3 }
   0xd   : > { %v867_v1 = vld [vmem:[%s1076_s1 + $0x78] sm:$0xff]  ;;  %528 = vmatpush.bf16.msra.mxu0 %v859_v0  ;;  %v866_v4 = vld [vmem:[%s1076_s1 + $0x70] sm:$0xff]  ;;  %v865_v7 = vld [vmem:[%s1076_s1 + $0x68] sm:$0xff]  ;;  %s881_s5 = smul.u32 12, %s1085_s11 }
   0xe   : > { %v875_v2 = vld [vmem:[%s1076_s1 + $0xb8] sm:$0xff]  ;;  %542 = vmatpush.bf16.msra.mxu1 %v867_v1  ;;  %v874_v5 = vld [vmem:[%s1076_s1 + $0xb0] sm:$0xff]  ;;  %v873_v8 = vld [vmem:[%s1076_s1 + $0xa8] sm:$0xff] }
   0xf   : > { %556 = vmatpush.bf16.msra.mxu2 %v875_v2  ;;  %v856_v9 = vld [vmem:[%s1076_s1 + $0x20] sm:$0xff]  ;;  %v855_v12 = vld [vmem:[%s1076_s1 + $0x18] sm:$0xff]  ;;  %v854_v15 = vld [vmem:[%s1076_s1 + $0x10] sm:$0xff]  ;;  %s281_s19 = scalar_lea.vmem %s1075_s0, %s881_s5  ;;  %s738_s5 = sshll.u32 %s1085_s11, 2 }
  0x10   : > { %v864_v10 = vld [vmem:[%s1076_s1 + $0x60] sm:$0xff]  ;;  %v863_v13 = vld [vmem:[%s1076_s1 + $0x58] sm:$0xff]  ;;  %v862_v16 = vld [vmem:[%s1076_s1 + $0x50] sm:$0xff]  ;;  %s306_s8 = scalar_lea.vmem %s1079_s4, %s738_s5 }
  0x11   : > { %529 = vmatpush.bf16.msra.mxu0 %v858_v3  ;;  %v872_v11 = vld [vmem:[%s1076_s1 + $0xa0] sm:$0xff]  ;;  %v871_v14 = vld [vmem:[%s1076_s1 + $0x98] sm:$0xff]  ;;  %v870_v17 = vld [vmem:[%s1076_s1 + $0x90] sm:$0xff] }
  0x12   : > { %543 = vmatpush.bf16.msra.mxu1 %v866_v4  ;;  %v853_v18 = vld [vmem:[%s1076_s1 + $0x8] sm:$0xff]  ;;  %v852_v21 = vld [vmem:[%s1076_s1] sm:$0xff]  ;;  %v743_v26 = vld [vmem:[%s281_s19 + $0xc] sm:$0xf0] }
  0x13   : > { %557 = vmatpush.bf16.msra.mxu2 %v874_v5  ;;  %v861_v19 = vld [vmem:[%s1076_s1 + $0x48] sm:$0xff]  ;;  %v860_v22 = vld [vmem:[%s1076_s1 + $0x40] sm:$0xff]  ;;  %v851_v29 = vld [vmem:[%s281_s19 + $0x10] sm:$0xf0] }
  0x14   : > { %v869_v20 = vld [vmem:[%s1076_s1 + $0x88] sm:$0xff]  ;;  %v741_v23 = vld [vmem:[%s281_s19] sm:$0xf]  ;;  %v849_v25 = vld [vmem:[%s281_s19 + $0x4] sm:$0xf] }
  0x15   : > { %530 = vmatpush.bf16.msra.mxu0 %v857_v6  ;;  %v850_v24 = vld [vmem:[%s281_s19 + $0x8] sm:$0xf0]  ;;  %v868_v27 = vld [vmem:[%s1076_s1 + $0x80] sm:$0xff]  ;;  %v749_v28 = vld [vmem:[%s281_s19 + $0x8] sm:$0xf]  ;;  %v746_v31 = vor.u32 %v849_v25, %v743_v26 }
  0x16   : > { %544 = vmatpush.bf16.msra.mxu1 %v865_v7  ;;  %v742_v30 = vor.u32 %v850_v24, %v741_v23  ;;  %v750_v32 = vor.u32 %v851_v29, %v749_v28  ;;  %v906_v38 = vld [vmem:[%s1077_s2] ss:$0 sm:$0xff] }
  0x17   : > { %558 = vmatpush.bf16.msra.mxu2 %v873_v8  ;;  %v907_v42 = vld [vmem:[%s1078_s3] ss:$0 sm:$0xff] }
  0x19   : > { %531 = vmatpush.bf16.msra.mxu0 %v856_v9 }
  0x1a   : > { %545 = vmatpush.bf16.msra.mxu1 %v864_v10 }
  0x1b   : > { %559 = vmatpush.bf16.msra.mxu2 %v872_v11 }
  0x1d   : > { %532 = vmatpush.bf16.msra.mxu0 %v855_v12 }
  0x1e   : > { %546 = vmatpush.bf16.msra.mxu1 %v863_v13 }
  0x1f   : > { %560 = vmatpush.bf16.msra.mxu2 %v871_v14 }
  0x21   : > { %533 = vmatpush.bf16.msra.mxu0 %v854_v15 }
  0x22   : > { %547 = vmatpush.bf16.msra.mxu1 %v862_v16 }
  0x23   : > { %561 = vmatpush.bf16.msra.mxu2 %v870_v17 }
  0x25   : > { %534 = vmatpush.bf16.msra.mxu0 %v853_v18 }
  0x26   : > { %548 = vmatpush.bf16.msra.mxu1 %v861_v19 }
  0x27   : > { %562 = vmatpush.bf16.msra.mxu2 %v869_v20 }
  0x29   : > { %535 = vmatpush.bf16.msra.mxu0 %v852_v21 }
  0x2a   : > { %549 = vmatpush.bf16.msra.mxu1 %v860_v22 }
  0x2b   : > { %563 = vmatpush.bf16.msra.mxu2 %v868_v27 }
  0x2c   : > { %536 = vmatmul.bf16.vlgmr.msra.gmra.mxu0 %v742_v30 }
  0x2d   : > { %550 = vmatmul.bf16.vlgmr.msra.gmra.mxu1 %v746_v31 }
  0x2e   : > { %564 = vmatmul.bf16.vlgmr.msra.gmra.mxu2 %v750_v32 }
  0xa9   : > { %v537_v33 = vpop.f32.mrf.mxu0 }
  0xaa   : > { %v551_v34 = vpop.f32.mrf.mxu1 }
  0xab   : > { %v552_v35 = vadd.f32 %v551_v34, %v537_v33 }
  0xb1   : > { %v565_v36 = vpop.f32.mrf.mxu2  ;;  %v539_v39 = vpop.f32.mrf.mxu0 }
  0xb2   : > { %v566_v37 = vadd.f32 %v565_v36, %v552_v35  ;;  %v553_v40 = vpop.f32.mrf.mxu1 }
  0xb3   : > { %v554_v43 = vadd.f32 %v553_v40, %v539_v39 }
  0xb4   : > { %v583_v41 = vmul.f32 %v906_v38, %v566_v37 }
  0xb6   : > { %v589_v45 = vadd.f32 %v907_v42, %v583_v41 }
  0xb8   : > { %v593_v48 = vmul.f32 0.2, %v589_v45  ;;  %vm591_vm0 = vcmp.ge.f32.partialorder %v589_v45, 0.0 }
  0xb9   : > { %v567_v44 = vpop.f32.mrf.mxu2 }
  0xba   : > { %v568_v46 = vadd.f32 %v567_v44, %v554_v43  ;;  %v595_v51 = vsel %vm591_vm0, %v589_v45, %v593_v48 }
  0xbc   : > { %v584_v47 = vmul.f32 %v906_v38, %v568_v46 }
  0xbe   : > { %v590_v49 = vadd.f32 %v907_v42, %v584_v47 }
  0xc0   : > { %vm592_vm1 = vcmp.ge.f32.partialorder %v590_v49, 0.0  ;;  %v594_v50 = vmul.f32 0.2, %v590_v49 }
  0xc2   : > { %v596_v52 = vsel %vm592_vm1, %v590_v49, %v594_v50 }
  0xc3   : > { %v879_v53 = vpack.c.bf16 %v596_v52, %v595_v51 }
  0xc5   : > { %880 = vst [vmem:[%s306_s8] sm:$0xff] %v879_v53  }
  0xc6 PF: > { %s14_s17 = sadd.s32 1, %s930_s17   ;;  %s1080_s15 = smov %s926_s16 }
  0xc7   : > { %p11_p5 = scmp.ge.s32.totalorder %s14_s17, 4   ;;  %s1081_s16 = smov %s1083_s18 }
  0xc9   :  { %13 = sbr.rel (!%p11_p5) target bundleno = 2 (0x2), region = 83 }

// kernel: net_forward.12
= control target key start
LH: loop header
LB: loop body
LE: loop exit
PB: predicated region body
PF: predicated region fallthrough
CT: control target
= control target key end

     0   :  { %s1770_s15 = smov 0   ;;  %s2167_s0 = inlined_call_operand.vmem [shape: bf16[2,110,48], index: 0, kind: input, shape index: {}]   ;;  %s2168_s1 = inlined_call_operand.vmem [shape: bf16[9,48,32], index: 1, kind: input, shape index: {}]   ;;  %s2169_s2 = inlined_call_operand.vmem [shape: f32[1,32], index: 2, kind: input, shape index: {}]   ;;  %s2170_s3 = inlined_call_operand.vmem [shape: f32[1,32], index: 3, kind: input, shape index: {}]   ;;  %s2171_s4 = inlined_call_operand.vmem [shape: bf16[2,80,32], index: 4, kind: output, shape index: {}]  }
   0x1 LB: > { %s1412_s16 = sadd.s32 4294967295, %s1743_s15   ;;  %p1416_p0 = scmp.ge.s32.totalorder %s1743_s15, 1  ;;  %s1743_s15 = sphi %s1770_s15, %s14_s15  }
   0x2   : > { %p162_p1 = scmp.lt.s32.totalorder %s1743_s15, 3 }
   0x4   : > { %p163_p2 = pnand %p1416_p0, %p162_p1 }
   0x5   : > { %p188_p3 = scmp.lt.s32.totalorder (!%p163_p2), %s1412_s16, 1 }
   0x6   : > { %166 = sbr.rel (%p163_p2) target bundleno = 355 (0x163), region = 36 }
   0xb   : > { %v1679_v0 = vld [vmem:[%s2168_s1 + $0x28] sm:$0xff]  ;;  %v1678_v1 = vld [vmem:[%s2168_s1 + $0x20] sm:$0xff]  ;;  %s2173_s16 = smov (!%p188_p3, %s1412_s16), 1  ;;  %v1677_v2 = vld [vmem:[%s2168_s1 + $0x18] sm:$0xff]  ;;  %vm251_vm0 = vsmask.f32 7424 }
   0xc   : > { %1716 = vmatpush.bf16.msra.mxu1 %v1679_v0  ;;  %1717 = vmatpush.bf16.msra.mxu2 %v1679_v0  ;;  %s1725_s21 = smul.u32 56, %s2173_s16  ;;  %v1682_v3 = vld [vmem:[%s2168_s1 + $0x40] sm:$0xff]  ;;  %v1676_v4 = vld [vmem:[%s2168_s1 + $0x10] sm:$0xff]  ;;  %v1689_v10 = vld [vmem:[%s2168_s1 + $0x58] sm:$0xff]  ;;  %vm314_vm1 = vcmask 392192   ;;  %vm437_vm2 = vcmask 1046528  }
   0xd   : > { %1718 = vmatpush.bf16.msra.mxu3 %v1679_v0  ;;  %335 = vmatpush.bf16.msra.mxu0 %v1679_v0  ;;  %v1692_v16 = vld [vmem:[%s2168_s1 + $0x70] sm:$0xff]  ;;  %v1675_v23 = vld [vmem:[%s2168_s1 + $0x8] sm:$0xff]  ;;  %v1681_v24 = vld [vmem:[%s2168_s1 + $0x38] sm:$0xff]  ;;  %vm671_vm3 = vsmask.f32 6400  ;;  %vm813_vm4 = vcmask 1045504  }
   0xe   : > { %s1793_s26 = scalar_lea.vmem %s2167_s0, %s1725_s21  ;;  %v1688_v34 = vld [vmem:[%s2168_s1 + $0x50] sm:$0xff]  ;;  %v1691_v35 = vld [vmem:[%s2168_s1 + $0x68] sm:$0xff]  ;;  %v1674_v41 = vld [vmem:[%s2168_s1] sm:$0xff]  ;;  %vm1047_vm5 = vsmask.f32 5376  ;;  %vm1189_vm6 = vcmask 1044480  }
   0xf   : > { %v1802_v5 = vld [vmem:[%s1793_s26 + $0x8] sm:$0xff]  ;;  %v1805_v6 = vld [vmem:[%s1793_s26 + $0x10] sm:$0xff]  ;;  %v1808_v7 = vld [vmem:[%s1793_s26 + $0x18] sm:$0xff]  ;;  %s1726_s6 = smul.u32 40, %s2173_s16  ;;  %vm1346_vm8 = vcmask 257024  }
  0x10   : > { %1719 = vmatpush.bf16.msra.mxu1 %v1678_v1  ;;  %1720 = vmatpush.bf16.msra.mxu2 %v1678_v1  ;;  %v1811_v8 = vld [vmem:[%s1793_s26 + $0x20] sm:$0xff]  ;;  %v215_v9 = vld [vmem:[%s1793_s26 + $0x28] sm:$0x1]  ;;  %v260_v11 = vshll.u32 %v1802_v5, 16  ;;  %v264_v12 = vshrl.u32 %v1802_v5, 16  ;;  %v268_v13 = vshll.u32 %v1805_v6, 16 }
  0x11   : > { %1721 = vmatpush.bf16.msra.mxu3 %v1678_v1  ;;  %336 = vmatpush.bf16.msra.mxu0 %v1678_v1  ;;  %v272_v14 = vshrl.u32 %v1805_v6, 16  ;;  %v1822_v15 = vld [vmem:[%s1793_s26] sm:$0xff]   ;;  %v276_v17 = vshll.u32 %v1808_v7, 16  ;;  %v244_v18 = vunpack.c.l.b16 %v215_v9  ;;  %v284_v19 = vshll.u32 %v1811_v8, 16  ;;  %v1842_v31 = vld [vmem:[%s1793_s26 + $0x8] sm:$0xff]   ;;  %v1680_v46 = vld [vmem:[%s2168_s1 + $0x30] sm:$0xff]  ;;  %s2116_s9 = scalar_lea.vmem %s2171_s4, %s1726_s6 }
  0x12   : > { %v288_v20 = vshrl.u32 %v1811_v8, 16  ;;  %v262_v21 = vrot.slane %v260_v11, 1  ;;  %v270_v22 = vrot.slane %v268_v13, 1  ;;  %v253_v25 = vshrl.u32 %v1822_v15, 16  ;;  %v526_v30 = vld [vmem:[%s1793_s26 + $0x4] sm:$0xe] }
  0x13   : > { %v278_v26 = vrot.slane %v276_v17, 1  ;;  %v1837_v27 = vpack.c.b16 %v244_v18, %v244_v18  ;;  %v286_v28 = vrot.slane %v284_v19, 1  ;;  %v255_v29 = vshll.u32 %v1822_v15, 16  ;;  %v1687_v47 = vld [vmem:[%s2168_s1 + $0x48] sm:$0xff]  ;;  %v1690_v48 = vld [vmem:[%s2168_s1 + $0x60] sm:$0xff]  ;;  %v1705_v52 = vld [vmem:[%s2168_s1 + $0xb8] sm:$0xff] }
  0x14   : > { %1722 = vmatpush.bf16.msra.mxu1 %v1677_v2  ;;  %1723 = vmatpush.bf16.msra.mxu2 %v1677_v2  ;;  %v266_v32 = vor.u32 %v264_v12, %v262_v21  ;;  %v274_v33 = vor.u32 %v272_v14, %v270_v22  ;;  %v555_v42 = vunpack.c.l.b16 %v526_v30  ;;  %v556_v43 = vunpack.c.l.b16 %v1842_v31  ;;  %v1702_v51 = vld [vmem:[%s2168_s1 + $0xa0] sm:$0xff]  ;;  %v1878_v53 = vld [vmem:[%s1793_s26 + $0xc] sm:$0xff]  ;;  %v1902_v17 = vld [vmem:[%s1793_s26 + $0x14] sm:$0xff] }
  0x15   : > { %1724 = vmatpush.bf16.msra.mxu3 %v1677_v2  ;;  %337 = vmatpush.bf16.msra.mxu0 %v1677_v2  ;;  %v290_v36 = vor.u32 %v288_v20, %v286_v28  ;;  %v292_v37 = vshll.u32 %v1837_v27, 16  ;;  %v257_v38 = vrot.slane %v255_v29, 1  ;;  %v1695_v55 = vld [vmem:[%s2168_s1 + $0x88] sm:$0xff]  ;;  %v1708_v56 = vld [vmem:[%s2168_s1 + $0xd0] sm:$0xff]  ;;  %v280_v57 = vshrl.u32 %v1808_v7, 16  ;;  %v1701_v18 = vld [vmem:[%s2168_s1 + $0x98] sm:$0xff] }
  0x16   : > { %v271_v39 = vsel %vm251_vm0, %v266_v32, %v270_v22  ;;  %v279_v40 = vsel %vm251_vm0, %v274_v33, %v278_v26  ;;  %v566_v54 = vpack.c.b16 %v556_v43, %v555_v42  ;;  %v681_v60 = vshrl.u32 %v1878_v53, 16  ;;  %v1713_v14 = vld [vmem:[%s1793_s26] sm:$0xf0]  ;;  %v1704_v19 = vld [vmem:[%s2168_s1 + $0xb0] sm:$0xff]  ;;  %v1707_v33 = vld [vmem:[%s2168_s1 + $0xc8] sm:$0xff] }
  0x17   : > { %1454 = vmatmul.msk.bf16.vlgmr.msra.gmra.mxu1 %vm314_vm1, %v271_v39  ;;  %1455 = vmatmul.msk.bf16.vlgmr.msra.gmra.mxu2 %vm314_vm1, %v279_v40  ;;  %v294_v44 = vrot.slane %v292_v37, 1  ;;  %v258_v45 = vor.u32 %v257_v38, %v253_v25  ;;  %v684_v61 = vshll.u32 %v1878_v53, 16  ;;  %v282_v62 = vor.u32 %v280_v57, %v278_v26 }
  0x18   : > { %487 = vmatpush.bf16.msrb.mxu2 %v1682_v3  ;;  %397 = vmatpush.bf16.msrb.mxu1 %v1676_v4  ;;  %v673_v58 = vshrl.u32 %v566_v54, 16  ;;  %v676_v59 = vshll.u32 %v566_v54, 16  ;;  %v683_v1 = vrot.slane %v681_v60, 1  ;;  %v572_v3 = vrot.slane %v566_v54, 1  ;;  %v660_v60 = vld [vmem:[%s1793_s26 + $0x2c] sm:$0x3] }
  0x19   : > { %621 = vmatpush.bf16.msrb.mxu3 %v1689_v10  ;;  %763 = vmatpush.bf16.msrb.mxu0 %v1692_v16  ;;  %v295_v49 = vsel %vm251_vm0, %v290_v36, %v294_v44  ;;  %v263_v50 = vsel %vm251_vm0, %v258_v45, %v262_v21  ;;  %v686_v2 = vrot.slane %v684_v61, 2  ;;  %v573_v4 = vrot.slane %v1878_v53, 1  ;;  %v1714_v16 = vld [vmem:[%s1793_s26] sm:$0xe]  ;;  %v1700_v45 = vld [vmem:[%s2168_s1 + $0x90] sm:$0xff] }
  0x1a   : > { %1457 = vmatmul.msk.bf16.vlgmr.msra.gmra.mxu3 %vm314_vm1, %v295_v49  ;;  %1453 = vmatmul.msk.bf16.vlgmr.msra.gmra.mxu0 %vm314_vm1, %v263_v50  ;;  %v675_v63 = vrot.slane %v673_v58, 1  ;;  %v678_v0 = vrot.slane %v676_v59, 2  ;;  %v287_v9 = vsel %vm251_vm0, %v282_v62, %v286_v28  ;;  %v1715_v20 = vor.u32 %v1714_v16, %v1713_v14  ;;  %v1693_v49 = vld [vmem:[%s2168_s1 + $0x78] sm:$0xff] }
  0x1b   : > { %v687_v11 = vor.u32 %v686_v2, %v683_v1  ;;  %v574_v12 = vsel %vm437_vm2, %v572_v3, %v573_v4  ;;  %v690_v21 = vshrl.u32 %v1902_v17, 16  ;;  %v693_v22 = vshll.u32 %v1902_v17, 16 }
  0x1c   : > { %398 = vmatpush.bf16.msrb.mxu1 %v1675_v23  ;;  %488 = vmatpush.bf16.msrb.mxu2 %v1681_v24  ;;  %v679_v10 = vor.u32 %v678_v0, %v675_v63  ;;  %v438_v23 = vrot.slane %v1715_v20, 1  ;;  %v439_v24 = vrot.slane %v1802_v5, 1  ;;  %v575_v28 = vrot.slane %v1902_v17, 1 }
  0x1d   : > { %622 = vmatpush.bf16.msrb.mxu3 %v1688_v34  ;;  %764 = vmatpush.bf16.msrb.mxu0 %v1691_v35  ;;  %v692_v25 = vrot.slane %v690_v21, 1  ;;  %v695_v26 = vrot.slane %v693_v22, 2  ;;  %v1930_v35 = vld [vmem:[%s1793_s26 + $0x1c] sm:$0xff]  ;;  %v441_v37 = vrot.slane %v1805_v6, 1  ;;  %v447_v50 = vrot.slane %v1837_v27, 1 }
  0x1e   : > { %v688_v13 = vsel %vm671_vm3, %v679_v10, %v687_v11  ;;  %v440_v29 = vsel %vm437_vm2, %v438_v23, %v439_v24  ;;  %v576_v32 = vsel %vm437_vm2, %v573_v4, %v575_v28  ;;  %v699_v36 = vshrl.u32 %v1930_v35, 16  ;;  %v536_v10 = vld [vmem:[%s1793_s26 + $0x2c] sm:$0x1] }
  0x1f   : > { %v696_v30 = vor.u32 %v695_v26, %v692_v25  ;;  %v577_v40 = vrot.slane %v1930_v35, 1  ;;  %v815_v1 = vrot.slane %v1878_v53, 2  ;;  %v669_v2 = vunpack.c.l.b16 %v660_v60  ;;  %v1696_v26 = vld [vmem:[%s1793_s26 + $0x10] sm:$0xff] }
  0x20   : > { %399 = vmatpush.bf16.msrb.mxu1 %v1674_v41  ;;  %489 = vmatpush.bf16.msrb.mxu2 %v1680_v46  ;;  %v701_v38 = vrot.slane %v699_v36, 1  ;;  %v442_v41 = vsel %vm437_vm2, %v439_v24, %v441_v37  ;;  %v1703_v46 = vld [vmem:[%s2168_s1 + $0xa8] sm:$0xff]  ;;  %v932_v22 = vunpack.c.h.b16 %v1842_v31 }
  0x21   : > { %623 = vmatpush.bf16.msrb.mxu3 %v1687_v47  ;;  %765 = vmatpush.bf16.msrb.mxu0 %v1690_v48  ;;  %v697_v34 = vsel %vm671_vm3, %v687_v11, %v696_v30  ;;  %v578_v44 = vsel %vm437_vm2, %v575_v28, %v577_v40  ;;  %v445_v48 = vrot.slane %v1811_v8, 1  ;;  %v1982_v53 = vpack.c.b16 %v669_v2, %v669_v2 }
  0x22   : > { %v817_v11 = vrot.slane %v1902_v17, 2 }
  0x23   : > { %v1962_v54 = vsel %vm437_vm2, %v445_v48, %v447_v50 }
  0x24   : > { %997 = vmatpush.bf16.msra.mxu2 %v1702_v51  ;;  %863 = vmatpush.bf16.msra.mxu1 %v1695_v55  ;;  %v443_v55 = vrot.slane %v1808_v7, 1  ;;  %v818_v14 = vsel %vm813_vm4, %v815_v1, %v817_v11 }
  0x25   : > { %1139 = vmatpush.bf16.msra.mxu3 %v1705_v52  ;;  %1239 = vmatpush.bf16.msra.mxu0 %v1708_v56  ;;  %v802_v56 = vld [vmem:[%s1793_s26 + $0x4] sm:$0xc] }
  0x26   : > { %v811_v59 = vunpack.c.l.b16 %v802_v56  ;;  %v444_v61 = vsel %vm437_vm2, %v441_v37, %v443_v55  ;;  %v446_v23 = vsel %vm437_vm2, %v443_v55, %v445_v48  ;;  %v949_v55 = vrot.slane %v1696_v26, 2 }
  0x27   : > { %1456 = vmatmul.msk.bf16.gmra.mxu2 %vm314_vm1, %v287_v9  ;;  %1470 = vmatmul.msk.bf16.vlgmr.msrb.gmra.mxu1 %vm314_vm1, %v1822_v15  ;;  %v1694_v15 = vld [vmem:[%s2168_s1 + $0x80] sm:$0xff] }
  0x28   : > { %998 = vmatpush.bf16.msra.mxu2 %v1701_v18  ;;  %864 = vmatpush.bf16.msra.mxu1 %v1694_v15  ;;  %v812_v27 = vpack.c.b16 %v556_v43, %v811_v59  ;;  %v1706_v43 = vld [vmem:[%s2168_s1 + $0xc0] sm:$0xff]  ;;  %v902_v15 = vld [vmem:[%s1793_s26 + $0x8] sm:$0xc] }
  0x29   : > { %1140 = vmatpush.bf16.msra.mxu3 %v1704_v19  ;;  %1240 = vmatpush.bf16.msra.mxu0 %v1707_v33  ;;  %v931_v21 = vunpack.c.l.b16 %v902_v15  ;;  %v1057_v33 = vshrl.u32 %v1696_v26, 16  ;;  %v2017_v59 = vld [vmem:[%s1793_s26 + $0x20] sm:$0xff] }
  0x2a   : > { %1532 = vmatmul.msk.bf16.vlgmr.msrb.gmra.mxu3 %vm314_vm1, %v574_v12  ;;  %1555 = vmatmul.msk.bf16.vlgmr.msrb.gmra.mxu0 %vm314_vm1, %v688_v13  ;;  %v814_v0 = vrot.slane %v812_v27, 2  ;;  %v717_v12 = vshrl.u32 %v1982_v53, 16  ;;  %v720_v13 = vshll.u32 %v1982_v53, 16  ;;  %v1075_v27 = vshrl.u32 %v2017_v59, 16 }
  0x2b   : > { %v942_v28 = vpack.c.b16 %v932_v22, %v931_v21  ;;  %v1059_v37 = vrot.slane %v1057_v33, 2 }
  0x2c   : > { %999 = vmatpush.bf16.msra.mxu2 %v1700_v45  ;;  %865 = vmatpush.bf16.msra.mxu1 %v1693_v49  ;;  %v816_v3 = vsel %vm813_vm4, %v814_v0, %v815_v1  ;;  %v719_v18 = vrot.slane %v717_v12, 1  ;;  %v722_v19 = vrot.slane %v720_v13, 2  ;;  %v819_v0 = vrot.slane %v1930_v35, 2 }
  0x2d   : > { %1141 = vmatpush.bf16.msra.mxu3 %v1703_v46  ;;  %1241 = vmatpush.bf16.msra.mxu0 %v1706_v43  ;;  %v1049_v31 = vshrl.u32 %v942_v28, 16  ;;  %v1697_v46 = vld [vmem:[%s1793_s26 + $0x18] sm:$0xff] }
  0x2e   : > { %v723_v24 = vor.u32 %v722_v19, %v719_v18  ;;  %v1066_v48 = vshrl.u32 %v1697_v46, 16  ;;  %v1069_v49 = vshll.u32 %v1697_v46, 16  ;;  %v951_v1 = vrot.slane %v1697_v46, 2 }
  0x30   : > { %v1068_v50 = vrot.slane %v1066_v48, 2  ;;  %v952_v43 = vsel %vm813_vm4, %v949_v55, %v951_v1 }
  0x37   : > { %1471 = vmatmul.msk.bf16.gmra.mxu1 %vm314_vm1, %v1802_v5  ;;  %1493 = vmatmul.msk.bf16.vlgmr.msrb.gmra.mxu2 %vm314_vm1, %v440_v29  ;;  %v702_v5 = vshll.u32 %v1930_v35, 16 }
  0x39   : > { %v704_v39 = vrot.slane %v702_v5, 2 }
  0x3a   : > { %1533 = vmatmul.msk.bf16.gmra.mxu3 %vm314_vm1, %v576_v32  ;;  %1556 = vmatmul.msk.bf16.gmra.mxu0 %vm314_vm1, %v697_v34  ;;  %v1052_v32 = vshll.u32 %v942_v28, 16  ;;  %v1060_v34 = vshll.u32 %v1696_v26, 16 }
  0x3b   : > { %v705_v42 = vor.u32 %v704_v39, %v701_v38 }
  0x3c   : > { %v1054_v5 = vrot.slane %v1052_v32, 3  ;;  %v1062_v38 = vrot.slane %v1060_v34, 3 }
  0x3d   : > { %v706_v47 = vsel %vm671_vm3, %v696_v30, %v705_v42  ;;  %v1178_v30 = vld [vmem:[%s1793_s26 + $0x8] sm:$0x8] }
  0x3e   : > { %v1187_v36 = vunpack.c.l.b16 %v1178_v30 }
  0x40   : > { %v1188_v39 = vpack.c.b16 %v932_v22, %v1187_v36  ;;  %v1036_v22 = vld [vmem:[%s1793_s26 + $0x30] sm:$0x7] }
  0x47   : > { %1472 = vmatmul.msk.bf16.gmra.mxu1 %vm314_vm1, %v1805_v6  ;;  %1494 = vmatmul.msk.bf16.gmra.mxu2 %vm314_vm1, %v442_v41  ;;  %v1951_v6 = vld [vmem:[%s1793_s26 + $0x24] sm:$0xff]  ;;  %v1063_v41 = vor.u32 %v1062_v38, %v1059_v37 }
  0x48   : > { %v708_v51 = vshrl.u32 %v1951_v6, 16  ;;  %v711_v52 = vshll.u32 %v1951_v6, 16  ;;  %v579_v62 = vrot.slane %v1951_v6, 1  ;;  %v821_v15 = vrot.slane %v1951_v6, 2 }
  0x4a   : > { %1534 = vmatmul.msk.bf16.gmra.mxu3 %vm314_vm1, %v578_v44  ;;  %1557 = vmatmul.msk.bf16.gmra.mxu0 %vm314_vm1, %v706_v47  ;;  %v710_v57 = vrot.slane %v708_v51, 1  ;;  %v713_v58 = vrot.slane %v711_v52, 2  ;;  %v580_v4 = vsel %vm437_vm2, %v577_v40, %v579_v62  ;;  %v1191_v44 = vrot.slane %v1696_v26, 3 }
  0x4b   : > { %v1071_v51 = vrot.slane %v1069_v49, 3  ;;  %v948_v52 = vrot.slane %v942_v28, 2  ;;  %v822_v28 = vsel %vm813_vm4, %v819_v0, %v821_v15 }
  0x4c   : > { %v714_v63 = vor.u32 %v713_v58, %v710_v57  ;;  %v1193_v57 = vrot.slane %v1697_v46, 3 }
  0x4d   : > { %v1072_v56 = vor.u32 %v1071_v51, %v1068_v50 }
  0x4e   : > { %v715_v9 = vsel %vm671_vm3, %v705_v42, %v714_v63  ;;  %v724_v29 = vsel %vm671_vm3, %v714_v63, %v723_v24  ;;  %v1190_v42 = vrot.slane %v1188_v39, 3  ;;  %v1194_v60 = vsel %vm1189_vm6, %v1191_v44, %v1193_v57 }
  0x4f   : > { %v1073_v58 = vsel %vm1047_vm5, %v1063_v41, %v1072_v56 }
  0x50   : > { %v1192_v47 = vsel %vm1189_vm6, %v1190_v42, %v1191_v44  ;;  %v823_v44 = vrot.slane %v1982_v53, 2 }
  0x52   : > { %v824_v50 = vsel %vm813_vm4, %v821_v15, %v823_v44 }
  0x57   : > { %1473 = vmatmul.msk.bf16.gmra.mxu1 %vm314_vm1, %v1808_v7  ;;  %1495 = vmatmul.msk.bf16.gmra.mxu2 %vm314_vm1, %v444_v61  ;;  %v565_v7 = vunpack.c.l.b16 %v536_v10  ;;  %v1078_v61 = vshll.u32 %v2017_v59, 16 }
  0x59   : > { %v571_v16 = vpack.c.b16 %v565_v7, %v565_v7  ;;  %v1080_v63 = vrot.slane %v1078_v61, 3  ;;  %v2034_v7 = vld [vmem:[%s1793_s26 + $0x28] sm:$0xff] }
  0x5a   : > { %1535 = vmatmul.msk.bf16.gmra.mxu3 %vm314_vm1, %v580_v4  ;;  %1558 = vmatmul.msk.bf16.gmra.mxu0 %vm314_vm1, %v715_v9  ;;  %v820_v4 = vsel %vm813_vm4, %v817_v11, %v819_v0  ;;  %v1195_v9 = vrot.slane %v2017_v59, 3  ;;  %v1084_v17 = vshrl.u32 %v2034_v7, 16  ;;  %v1087_v11 = vshll.u32 %v2034_v7, 16 }
  0x5b   : > { %v581_v20 = vrot.slane %v571_v16, 1  ;;  %v1197_v30 = vrot.slane %v2034_v7, 3 }
  0x5c   : > { %v1196_v12 = vsel %vm1189_vm6, %v1193_v57, %v1195_v9  ;;  %v1086_v18 = vrot.slane %v1084_v17, 2  ;;  %v1089_v19 = vrot.slane %v1087_v11, 3 }
  0x5d   : > { %v582_v25 = vsel %vm437_vm2, %v579_v62, %v581_v20  ;;  %v1077_v62 = vrot.slane %v1075_v27, 2  ;;  %v953_v20 = vrot.slane %v2017_v59, 2  ;;  %v1198_v36 = vsel %vm1189_vm6, %v1195_v9, %v1197_v30 }
  0x5e   : > { %v1090_v24 = vor.u32 %v1089_v19, %v1086_v18 }
  0x5f   : > { %v1081_v2 = vor.u32 %v1080_v63, %v1077_v62 }
  0x61   : > { %v1082_v10 = vsel %vm1047_vm5, %v1072_v56, %v1081_v2  ;;  %v1091_v6 = vsel %vm1047_vm5, %v1081_v2, %v1090_v24 }
  0x67   : > { %1474 = vmatmul.msk.bf16.gmra.mxu1 %vm314_vm1, %v1811_v8  ;;  %1496 = vmatmul.msk.bf16.gmra.mxu2 %vm314_vm1, %v446_v23  ;;  %v1051_v8 = vrot.slane %v1049_v31, 2 }
  0x69   : > { %v1055_v40 = vor.u32 %v1054_v5, %v1051_v8 }
  0x6a   : > { %1536 = vmatmul.msk.bf16.gmra.mxu3 %vm314_vm1, %v582_v25  ;;  %1559 = vmatmul.msk.bf16.gmra.mxu0 %vm314_vm1, %v724_v29  ;;  %v1045_v25 = vunpack.c.l.b16 %v1036_v22  ;;  %v954_v29 = vsel %vm813_vm4, %v951_v1, %v953_v20 }
  0x6b   : > { %v1064_v45 = vsel %vm1047_vm5, %v1055_v40, %v1063_v41 }
  0x6c   : > { %v1046_v33 = vpack.c.b16 %v1045_v25, %v1045_v25 }
  0x6e   : > { %v1093_v5 = vshrl.u32 %v1046_v33, 16  ;;  %v1096_v37 = vshll.u32 %v1046_v33, 16 }
  0x70   : > { %v1095_v41 = vrot.slane %v1093_v5, 2  ;;  %v1098_v42 = vrot.slane %v1096_v37, 3 }
  0x72   : > { %v1099_v48 = vor.u32 %v1098_v42, %v1095_v41 }
  0x74   : > { %v1100_v53 = vsel %vm1047_vm5, %v1090_v24, %v1099_v48 }
  0x77   : > { %1497 = vmatmul.msk.bf16.gmra.mxu2 %vm314_vm1, %v1962_v54  ;;  %1578 = vmatmul.msk.bf16.vlgmr.msra.gmra.mxu1 %vm314_vm1, %v816_v3  ;;  %v950_v54 = vsel %vm813_vm4, %v948_v52, %v949_v55  ;;  %v1199_v52 = vrot.slane %v1046_v33, 3 }
  0x79   : > { %v1200_v59 = vsel %vm1189_vm6, %v1197_v30, %v1199_v52 }
  0x7a   : > { %1640 = vmatmul.msk.bf16.vlgmr.msra.gmra.mxu3 %vm314_vm1, %v1064_v45  ;;  %1663 = vmatmul.msk.bf16.vlgmr.msra.gmra.mxu0 %vm314_vm1, %v1192_v47  ;;  %v955_v45 = vrot.slane %v2034_v7, 2 }
  0x7c   : > { %v956_v51 = vsel %vm813_vm4, %v953_v20, %v955_v45 }
  0x87   : > { %1579 = vmatmul.msk.bf16.gmra.mxu1 %vm314_vm1, %v818_v14  ;;  %1617 = vmatmul.msk.bf16.vlgmr.msra.gmra.mxu2 %vm314_vm1, %v950_v54  ;;  %v912_v54 = vld [vmem:[%s1793_s26 + $0x30] sm:$0x3] }
  0x8a   : > { %1641 = vmatmul.msk.bf16.gmra.mxu3 %vm314_vm1, %v1073_v58  ;;  %1664 = vmatmul.msk.bf16.gmra.mxu0 %vm314_vm1, %v1194_v60  ;;  %v941_v58 = vunpack.c.l.b16 %v912_v54 }
  0x8c   : > { %v947_v62 = vpack.c.b16 %v941_v58, %v941_v58 }
  0x94   : > { %v344_v3 = vpop.f32.mrf.mxu1 }
  0x97   : > { %1580 = vmatmul.msk.bf16.gmra.mxu1 %vm314_vm1, %v820_v4  ;;  %1618 = vmatmul.msk.bf16.gmra.mxu2 %vm314_vm1, %v952_v43  ;;  %v339_v35 = vpop.f32.mrf.mxu0 }
  0x9a   : > { %v2037_v13 = vpop.f32.mrf.mxu2  ;;  %1642 = vmatmul.msk.bf16.gmra.mxu3 %vm314_vm1, %v1082_v10  ;;  %1665 = vmatmul.msk.bf16.gmra.mxu0 %vm314_vm1, %v1196_v12 }
  0x9c   : > { %v346_v14 = vpop.f32.mrf.mxu1 }
  0x9d   : > { %v2043_v16 = vpop.f32.mrf.mxu3 }
  0x9f   : > { %v341_v21 = vpop.f32.mrf.mxu0 }
  0xa2   : > { %v2048_v23 = vpop.f32.mrf.mxu2 }
  0xa4   : > { %v401_v26 = vpop.f32.mrf.mxu1 }
  0xa5   : > { %v402_v31 = vadd.f32 %v401_v26, %v339_v35  ;;  %v2053_v32 = vpop.f32.mrf.mxu3 }
  0xa7   : > { %1581 = vmatmul.msk.bf16.gmra.mxu1 %vm314_vm1, %v822_v28  ;;  %1619 = vmatmul.msk.bf16.gmra.mxu2 %vm314_vm1, %v954_v29  ;;  %v767_v34 = vpop.f32.mrf.mxu0 }
  0xaa   : > { %v354_v8 = vpop.f32.mrf.mxu2  ;;  %1643 = vmatmul.msk.bf16.gmra.mxu3 %vm314_vm1, %v1091_v6  ;;  %1666 = vmatmul.msk.bf16.gmra.mxu0 %vm314_vm1, %v1198_v36 }
  0xac   : > { %v403_v38 = vpop.f32.mrf.mxu1 }
  0xad   : > { %v404_v39 = vadd.f32 %v403_v38, %v341_v21  ;;  %v625_v40 = vpop.f32.mrf.mxu3 }
  0xaf   : > { %v769_v46 = vpop.f32.mrf.mxu0 }
  0xb2   : > { %v356_v47 = vpop.f32.mrf.mxu2 }
  0xb4   : > { %v406_v49 = vpop.f32.mrf.mxu1 }
  0xb5   : > { %v407_v55 = vadd.f32 %v406_v49, %v344_v3  ;;  %v627_v56 = vpop.f32.mrf.mxu3  ;;  %v957_v3 = vrot.slane %v947_v62, 2 }
  0xb7   : > { %1582 = vmatmul.msk.bf16.gmra.mxu1 %vm314_vm1, %v824_v50  ;;  %1620 = vmatmul.msk.bf16.gmra.mxu2 %vm314_vm1, %v956_v51  ;;  %v772_v57 = vpop.f32.mrf.mxu0  ;;  %v958_v7 = vsel %vm813_vm4, %v955_v45, %v957_v3 }
  0xba   : > { %v491_v60 = vpop.f32.mrf.mxu2  ;;  %1644 = vmatmul.msk.bf16.gmra.mxu3 %vm314_vm1, %v1100_v53  ;;  %1667 = vmatmul.msk.bf16.gmra.mxu0 %vm314_vm1, %v1200_v59 }
  0xbb   : > { %v516_v27 = vadd.f32 %v491_v60, %v402_v31 }
  0xbc   : > { %v408_v61 = vpop.f32.mrf.mxu1 }
  0xbd   : > { %v650_v63 = vadd.f32 %v625_v40, %v516_v27  ;;  %v409_v0 = vadd.f32 %v408_v61, %v346_v14  ;;  %v630_v1 = vpop.f32.mrf.mxu3 }
  0xbf   : > { %v2072_v2 = vadd.f32 %v767_v34, %v650_v63  ;;  %v774_v4 = vpop.f32.mrf.mxu0 }
  0xc2   : > { %v493_v43 = vpop.f32.mrf.mxu2 }
  0xc3   : > { %v517_v9 = vadd.f32 %v493_v43, %v404_v39 }
  0xc4   : > { %v411_v10 = vpop.f32.mrf.mxu1 }
  0xc5   : > { %v651_v35 = vadd.f32 %v627_v56, %v517_v9  ;;  %v412_v12 = vadd.f32 %v411_v10, %v2037_v13  ;;  %v632_v17 = vpop.f32.mrf.mxu3 }
  0xc7   : > { %1621 = vmatmul.msk.bf16.gmra.mxu2 %vm314_vm1, %v958_v7  ;;  %v2077_v11 = vadd.f32 %v769_v46, %v651_v35  ;;  %v777_v18 = vpop.f32.mrf.mxu0 }
  0xca   : > { %v496_v14 = vpop.f32.mrf.mxu2 }
  0xcb   : > { %v518_v19 = vadd.f32 %v496_v14, %v407_v55 }
  0xcc   : > { %v413_v15 = vpop.f32.mrf.mxu1 }
  0xcd   : > { %v652_v20 = vadd.f32 %v630_v1, %v518_v19  ;;  %v414_v21 = vadd.f32 %v413_v15, %v2048_v23  ;;  %v635_v22 = vpop.f32.mrf.mxu3  ;;  %v2102_v15 = vld [vmem:[%s2169_s2] ss:$0 sm:$0xff] }
  0xcf   : > { %v2080_v24 = vadd.f32 %v772_v57, %v652_v20  ;;  %v779_v25 = vpop.f32.mrf.mxu0 }
  0xd2   : > { %v498_v26 = vpop.f32.mrf.mxu2 }
  0xd3   : > { %v519_v28 = vadd.f32 %v498_v26, %v409_v0 }
  0xd4   : > { %v416_v29 = vpop.f32.mrf.mxu1 }
  0xd5   : > { %v653_v13 = vadd.f32 %v632_v17, %v519_v28  ;;  %v417_v30 = vadd.f32 %v416_v29, %v354_v8  ;;  %v637_v31 = vpop.f32.mrf.mxu3 }
  0xd7   : > { %v2082_v6 = vadd.f32 %v774_v4, %v653_v13  ;;  %v782_v33 = vpop.f32.mrf.mxu0 }
  0xda   : > { %v501_v34 = vpop.f32.mrf.mxu2 }
  0xdb   : > { %v520_v36 = vadd.f32 %v501_v34, %v412_v12 }
  0xdc   : > { %v418_v5 = vpop.f32.mrf.mxu1 }
  0xdd   : > { %v654_v37 = vadd.f32 %v635_v22, %v520_v36  ;;  %v419_v38 = vadd.f32 %v418_v5, %v356_v47  ;;  %v640_v39 = vpop.f32.mrf.mxu3  ;;  %v2107_v22 = vld [vmem:[%s2170_s3] ss:$0 sm:$0xff] }
  0xdf   : > { %v2084_v23 = vadd.f32 %v777_v18, %v654_v37  ;;  %v784_v40 = vpop.f32.mrf.mxu0 }
  0xe2   : > { %v503_v41 = vpop.f32.mrf.mxu2 }
  0xe3   : > { %v521_v42 = vadd.f32 %v503_v41, %v414_v21 }
  0xe4   : > { %v421_v44 = vpop.f32.mrf.mxu1 }
  0xe5   : > { %v655_v45 = vadd.f32 %v637_v31, %v521_v42  ;;  %v422_v46 = vadd.f32 %v421_v44, %v2043_v16  ;;  %v642_v8 = vpop.f32.mrf.mxu3 }
  0xe7   : > { %v2087_v48 = vadd.f32 %v779_v25, %v655_v45  ;;  %v787_v49 = vpop.f32.mrf.mxu0 }
  0xea   : > { %v506_v50 = vpop.f32.mrf.mxu2 }
  0xeb   : > { %v522_v51 = vadd.f32 %v506_v50, %v417_v30 }
  0xec   : > { %v423_v52 = vpop.f32.mrf.mxu1 }
  0xed   : > { %v656_v55 = vadd.f32 %v640_v39, %v522_v51  ;;  %v424_v47 = vadd.f32 %v423_v52, %v2053_v32  ;;  %v645_v56 = vpop.f32.mrf.mxu3 }
  0xef   : > { %v2090_v54 = vadd.f32 %v782_v33, %v656_v55  ;;  %v789_v57 = vpop.f32.mrf.mxu0 }
  0xf2   : > { %v508_v53 = vpop.f32.mrf.mxu2 }
  0xf3   : > { %v523_v58 = vadd.f32 %v508_v53, %v419_v38 }
  0xf4   : > { %v867_v59 = vpop.f32.mrf.mxu1 }
  0xf5   : > { %v657_v60 = vadd.f32 %v642_v8, %v523_v58  ;;  %v647_v27 = vpop.f32.mrf.mxu3  ;;  %v892_v17 = vadd.f32 %v867_v59, %v2072_v2 }
  0xf7   : > { %v2092_v16 = vadd.f32 %v784_v40, %v657_v60  ;;  %v1243_v63 = vpop.f32.mrf.mxu0 }
  0xfa   : > { %v511_v61 = vpop.f32.mrf.mxu2 }
  0xfb   : > { %v524_v62 = vadd.f32 %v511_v61, %v422_v46 }
  0xfc   : > { %v869_v3 = vpop.f32.mrf.mxu1 }
  0xfd   : > { %v658_v0 = vadd.f32 %v645_v56, %v524_v62  ;;  %v1143_v1 = vpop.f32.mrf.mxu3  ;;  %v893_v26 = vadd.f32 %v869_v3, %v2077_v11 }
  0xff   : > { %v2094_v4 = vadd.f32 %v787_v49, %v658_v0  ;;  %v1245_v7 = vpop.f32.mrf.mxu0 }
 0x102   : > { %v513_v32 = vpop.f32.mrf.mxu2 }
 0x103   : > { %v525_v43 = vadd.f32 %v513_v32, %v424_v47 }
 0x104   : > { %v872_v12 = vpop.f32.mrf.mxu1 }
 0x105   : > { %v659_v9 = vadd.f32 %v647_v27, %v525_v43  ;;  %v1145_v10 = vpop.f32.mrf.mxu3  ;;  %v894_v37 = vadd.f32 %v872_v12, %v2080_v24 }
 0x107   : > { %v2096_v35 = vadd.f32 %v789_v57, %v659_v9  ;;  %v1248_v25 = vpop.f32.mrf.mxu0 }
 0x10a   : > { %v1001_v18 = vpop.f32.mrf.mxu2 }
 0x10b   : > { %v1026_v14 = vadd.f32 %v1001_v18, %v892_v17 }
 0x10c   : > { %v874_v28 = vpop.f32.mrf.mxu1 }
 0x10d   : > { %v1168_v19 = vadd.f32 %v1143_v1, %v1026_v14  ;;  %v1148_v20 = vpop.f32.mrf.mxu3  ;;  %v895_v51 = vadd.f32 %v874_v28, %v2082_v6 }
 0x10f   : > { %v1268_v21 = vadd.f32 %v1243_v63, %v1168_v19  ;;  %v1250_v40 = vpop.f32.mrf.mxu0 }
 0x111   : > { %v1282_v2 = vmul.f32 %v2102_v15, %v1268_v21 }
 0x112   : > { %v1003_v29 = vpop.f32.mrf.mxu2 }
 0x113   : > { %v1296_v13 = vadd.f32 %v2107_v22, %v1282_v2  ;;  %v1027_v30 = vadd.f32 %v1003_v29, %v893_v26 }
 0x114   : > { %v877_v44 = vpop.f32.mrf.mxu1 }
 0x115   : > { %vm1306_vm7 = vcmp.ge.f32.partialorder %v1296_v13, 0.0  ;;  %v1316_v31 = vmul.f32 0.2, %v1296_v13  ;;  %v1169_v33 = vadd.f32 %v1145_v10, %v1027_v30  ;;  %v1150_v5 = vpop.f32.mrf.mxu3  ;;  %v896_v6 = vadd.f32 %v877_v44, %v2084_v23 }
 0x117   : > { %v1326_v34 = vsel %vm1306_vm7, %v1296_v13, %v1316_v31  ;;  %v1269_v11 = vadd.f32 %v1245_v7, %v1169_v33  ;;  %v1253_v53 = vpop.f32.mrf.mxu0 }
 0x118   : > { %v1336_v36 = vpack.c.bf16 %v1326_v34, %v1326_v34 }
 0x119   : > { %v1283_v38 = vmul.f32 %v2102_v15, %v1269_v11 }
 0x11a   : > { %1347 = vst.msk [vmem:[%s2116_s9] sm:$0xf] %vm1346_vm8, %v1336_v36  ;;  %v1006_v39 = vpop.f32.mrf.mxu2 }
 0x11b   : > { %v1297_v41 = vadd.f32 %v2107_v22, %v1283_v38  ;;  %v1028_v42 = vadd.f32 %v1006_v39, %v894_v37 }
 0x11c   : > { %v879_v59 = vpop.f32.mrf.mxu1 }
 0x11d   : > { %vm1307_vm9 = vcmp.ge.f32.partialorder %v1297_v41, 0.0  ;;  %v1317_v45 = vmul.f32 0.2, %v1297_v41  ;;  %v1170_v46 = vadd.f32 %v1148_v20, %v1028_v42  ;;  %v1153_v55 = vpop.f32.mrf.mxu3  ;;  %v897_v23 = vadd.f32 %v879_v59, %v2087_v48 }
 0x11f   : > { %v1327_v8 = vsel %vm1307_vm9, %v1297_v41, %v1317_v45  ;;  %v1270_v49 = vadd.f32 %v1248_v25, %v1170_v46  ;;  %v1255_v9 = vpop.f32.mrf.mxu0 }
 0x120   : > { %v1337_v50 = vpack.c.bf16 %v1327_v8, %v1327_v8 }
 0x121   : > { %v1284_v24 = vmul.f32 %v2102_v15, %v1270_v49 }
 0x122   : > { %1348 = vst.msk [vmem:[%s2116_s9 + $0x4] sm:$0xf] %vm1346_vm8, %v1337_v50  ;;  %v1008_v52 = vpop.f32.mrf.mxu2 }
 0x123   : > { %v1298_v47 = vadd.f32 %v2107_v22, %v1284_v24  ;;  %v1029_v56 = vadd.f32 %v1008_v52, %v895_v51 }
 0x124   : > { %v882_v17 = vpop.f32.mrf.mxu1 }
 0x125   : > { %vm1308_vm10 = vcmp.ge.f32.partialorder %v1298_v47, 0.0  ;;  %v1318_v57 = vmul.f32 0.2, %v1298_v47  ;;  %v1171_v58 = vadd.f32 %v1150_v5, %v1029_v56  ;;  %v1155_v3 = vpop.f32.mrf.mxu3  ;;  %v898_v30 = vadd.f32 %v882_v17, %v2090_v54 }
 0x127   : > { %v1328_v60 = vsel %vm1308_vm10, %v1298_v47, %v1318_v57  ;;  %v1271_v27 = vadd.f32 %v1250_v40, %v1171_v58  ;;  %v1258_v13 = vpop.f32.mrf.mxu0 }
 0x128   : > { %v1338_v61 = vpack.c.bf16 %v1328_v60, %v1328_v60 }
 0x129   : > { %v1285_v62 = vmul.f32 %v2102_v15, %v1271_v27 }
 0x12a   : > { %1349 = vst.msk [vmem:[%s2116_s9 + $0x8] sm:$0xf] %vm1346_vm8, %v1338_v61  ;;  %v1011_v63 = vpop.f32.mrf.mxu2 }
 0x12b   : > { %v1299_v0 = vadd.f32 %v2107_v22, %v1285_v62  ;;  %v1030_v1 = vadd.f32 %v1011_v63, %v896_v6 }
 0x12c   : > { %v884_v31 = vpop.f32.mrf.mxu1 }
 0x12d   : > { %vm1309_vm11 = vcmp.ge.f32.partialorder %v1299_v0, 0.0  ;;  %v1319_v32 = vmul.f32 0.2, %v1299_v0  ;;  %v1172_v43 = vadd.f32 %v1153_v55, %v1030_v1  ;;  %v1158_v26 = vpop.f32.mrf.mxu3  ;;  %v899_v41 = vadd.f32 %v884_v31, %v2092_v16 }
 0x12f   : > { %v1329_v10 = vsel %vm1309_vm11, %v1299_v0, %v1319_v32  ;;  %v1272_v7 = vadd.f32 %v1253_v53, %v1172_v43  ;;  %v1260_v42 = vpop.f32.mrf.mxu0 }
 0x130   : > { %v1339_v12 = vpack.c.bf16 %v1329_v10, %v1329_v10 }
 0x131   : > { %v1286_v18 = vmul.f32 %v2102_v15, %v1272_v7 }
 0x132   : > { %1350 = vst.msk [vmem:[%s2116_s9 + $0xc] sm:$0xf] %vm1346_vm8, %v1339_v12  ;;  %v1013_v14 = vpop.f32.mrf.mxu2 }
 0x133   : > { %v1300_v19 = vadd.f32 %v2107_v22, %v1286_v18  ;;  %v1031_v20 = vadd.f32 %v1013_v14, %v897_v23 }
 0x134   : > { %v887_v8 = vpop.f32.mrf.mxu1 }
 0x135   : > { %vm1310_vm12 = vcmp.ge.f32.partialorder %v1300_v19, 0.0  ;;  %v1320_v21 = vmul.f32 0.2, %v1300_v19  ;;  %v1173_v25 = vadd.f32 %v1155_v3, %v1031_v20  ;;  %v1160_v40 = vpop.f32.mrf.mxu3  ;;  %v900_v55 = vadd.f32 %v887_v8, %v2094_v4 }
 0x137   : > { %v1330_v2 = vsel %vm1310_vm12, %v1300_v19, %v1320_v21  ;;  %v1273_v28 = vadd.f32 %v1255_v9, %v1173_v25  ;;  %v1263_v58 = vpop.f32.mrf.mxu0 }
 0x138   : > { %v1340_v29 = vpack.c.bf16 %v1330_v2, %v1330_v2 }
 0x139   : > { %v1287_v48 = vmul.f32 %v2102_v15, %v1273_v28 }
 0x13a   : > { %1351 = vst.msk [vmem:[%s2116_s9 + $0x10] sm:$0xf] %vm1346_vm8, %v1340_v29  ;;  %v1016_v33 = vpop.f32.mrf.mxu2 }
 0x13b   : > { %v1301_v34 = vadd.f32 %v2107_v22, %v1287_v48  ;;  %v1032_v11 = vadd.f32 %v1016_v33, %v898_v30 }
 0x13c   : > { %v889_v27 = vpop.f32.mrf.mxu1 }
 0x13d   : > { %vm1311_vm13 = vcmp.ge.f32.partialorder %v1301_v34, 0.0  ;;  %v1321_v36 = vmul.f32 0.2, %v1301_v34  ;;  %v1174_v5 = vadd.f32 %v1158_v26, %v1032_v11  ;;  %v1163_v47 = vpop.f32.mrf.mxu3  ;;  %v901_v4 = vadd.f32 %v889_v27, %v2096_v35 }
 0x13f   : > { %v1331_v37 = vsel %vm1311_vm13, %v1301_v34, %v1321_v36  ;;  %v1274_v38 = vadd.f32 %v1258_v13, %v1174_v5  ;;  %v1265_v10 = vpop.f32.mrf.mxu0 }
 0x140   : > { %v1341_v39 = vpack.c.bf16 %v1331_v37, %v1331_v37 }
 0x141   : > { %v1288_v54 = vmul.f32 %v2102_v15, %v1274_v38 }
 0x142   : > { %1352 = vst.msk [vmem:[%s2116_s9 + $0x14] sm:$0xf] %vm1346_vm8, %v1341_v39  ;;  %v1018_v44 = vpop.f32.mrf.mxu2 }
 0x143   : > { %v1302_v45 = vadd.f32 %v2107_v22, %v1288_v54  ;;  %v1033_v46 = vadd.f32 %v1018_v44, %v899_v41 }
 0x145   : > { %vm1312_vm14 = vcmp.ge.f32.partialorder %v1302_v45, 0.0  ;;  %v1322_v49 = vmul.f32 0.2, %v1302_v45  ;;  %v1175_v50 = vadd.f32 %v1160_v40, %v1033_v46  ;;  %v1165_v32 = vpop.f32.mrf.mxu3 }
 0x147   : > { %v1332_v51 = vsel %vm1312_vm14, %v1302_v45, %v1322_v49  ;;  %v1275_v24 = vadd.f32 %v1260_v42, %v1175_v50 }
 0x148   : > { %v1342_v52 = vpack.c.bf16 %v1332_v51, %v1332_v51 }
 0x149   : > { %v1289_v16 = vmul.f32 %v2102_v15, %v1275_v24 }
 0x14a   : > { %1353 = vst.msk [vmem:[%s2116_s9 + $0x18] sm:$0xf] %vm1346_vm8, %v1342_v52  ;;  %v1021_v56 = vpop.f32.mrf.mxu2 }
 0x14b   : > { %v1303_v53 = vadd.f32 %v2107_v22, %v1289_v16  ;;  %v1034_v57 = vadd.f32 %v1021_v56, %v900_v55 }
 0x14d   : > { %vm1313_vm15 = vcmp.ge.f32.partialorder %v1303_v53, 0.0  ;;  %v1323_v59 = vmul.f32 0.2, %v1303_v53  ;;  %v1176_v60 = vadd.f32 %v1163_v47, %v1034_v57 }
 0x14f   : > { %v1333_v61 = vsel %vm1313_vm15, %v1303_v53, %v1323_v59  ;;  %v1276_v6 = vadd.f32 %v1263_v58, %v1176_v60 }
 0x150   : > { %v1343_v62 = vpack.c.bf16 %v1333_v61, %v1333_v61 }
 0x151   : > { %v1290_v63 = vmul.f32 %v2102_v15, %v1276_v6 }
 0x152   : > { %1354 = vst.msk [vmem:[%s2116_s9 + $0x1c] sm:$0xf] %vm1346_vm8, %v1343_v62  ;;  %v1023_v0 = vpop.f32.mrf.mxu2 }
 0x153   : > { %v1304_v1 = vadd.f32 %v2107_v22, %v1290_v63  ;;  %v1035_v3 = vadd.f32 %v1023_v0, %v901_v4 }
 0x155   : > { %vm1314_vm0 = vcmp.ge.f32.partialorder %v1304_v1, 0.0  ;;  %v1324_v43 = vmul.f32 0.2, %v1304_v1  ;;  %v1177_v9 = vadd.f32 %v1165_v32, %v1035_v3 }
 0x157   : > { %v1334_v7 = vsel %vm1314_vm0, %v1304_v1, %v1324_v43  ;;  %v1277_v12 = vadd.f32 %v1265_v10, %v1177_v9 }
 0x158   : > { %v1344_v17 = vpack.c.bf16 %v1334_v7, %v1334_v7 }
 0x159   : > { %v1291_v23 = vmul.f32 %v2102_v15, %v1277_v12 }
 0x15a   : > { %1355 = vst.msk [vmem:[%s2116_s9 + $0x20] sm:$0xf] %vm1346_vm8, %v1344_v17 }
 0x15b   : > { %v1305_v35 = vadd.f32 %v2107_v22, %v1291_v23 }
 0x15d   : > { %vm1315_vm1 = vcmp.ge.f32.partialorder %v1305_v35, 0.0  ;;  %v1325_v18 = vmul.f32 0.2, %v1305_v35 }
 0x15f   : > { %v1335_v14 = vsel %vm1315_vm1, %v1305_v35, %v1325_v18 }
 0x160   : > { %v1345_v19 = vpack.c.bf16 %v1335_v14, %v1335_v14 }
 0x162   : > { %1356 = vst.msk [vmem:[%s2116_s9 + $0x24] sm:$0xf] %vm1346_vm8, %v1345_v19 }
 0x163 PF: > { %s14_s15 = sadd.s32 1, %s1743_s15  }
 0x164   : > { %p11_p4 = scmp.ge.s32.totalorder %s14_s15, 4  }
 0x166   :  { %13 = sbr.rel (!%p11_p4) target bundleno = 1 (0x1), region = 74 }

// kernel: net_forward.14
= control target key start
LH: loop header
LB: loop body
LE: loop exit
PB: predicated region body
PF: predicated region fallthrough
CT: control target
= control target key end

     0   :  { %s1268_s15 = smov 0   ;;  %s1487_s0 = inlined_call_operand.vmem [shape: bf16[2,42,64], index: 0, kind: input, shape index: {}]   ;;  %s1488_s1 = inlined_call_operand.vmem [shape: bf16[9,64,64], index: 1, kind: input, shape index: {}]   ;;  %s1489_s2 = inlined_call_operand.vmem [shape: f32[1,64], index: 2, kind: input, shape index: {}]   ;;  %s1490_s3 = inlined_call_operand.vmem [shape: f32[1,64], index: 3, kind: input, shape index: {}]   ;;  %s1491_s4 = inlined_call_operand.vmem [shape: bf16[2,24,64], index: 4, kind: output, shape index: {}]  }
   0x1 LB: > { %s939_s16 = sadd.s32 4294967295, %s1241_s15   ;;  %p943_p0 = scmp.ge.s32.totalorder %s1241_s15, 1  ;;  %s1241_s15 = sphi %s1268_s15, %s14_s15  }
   0x2   : > { %p162_p1 = scmp.lt.s32.totalorder %s1241_s15, 3 }
   0x4   : > { %p163_p2 = pnand %p943_p0, %p162_p1 }
   0x5   : > { %p188_p3 = scmp.lt.s32.totalorder (!%p163_p2), %s939_s16, 1 }
   0x6   : > { %166 = sbr.rel (%p163_p2) target bundleno = 236 (0xec), region = 36 }
   0xb   : > { %v1181_v0 = vld [vmem:[%s1488_s1 + $0x38] sm:$0xff]  ;;  %v1180_v3 = vld [vmem:[%s1488_s1 + $0x30] sm:$0xff]  ;;  %s1493_s16 = smov (!%p188_p3, %s939_s16), 1  ;;  %v1179_v6 = vld [vmem:[%s1488_s1 + $0x28] sm:$0xff]  ;;  %vm356_vm0 = vcmask 1046528   ;;  %vm270_vm2 = vcmask 523264  }
   0xc   : > { %v1185_v1 = vld [vmem:[%s1488_s1 + $0x58] sm:$0xff]  ;;  %281 = vmatpush.bf16.msra.mxu0 %v1181_v0  ;;  %1219 = vmatpush.bf16.msra.mxu1 %v1181_v0  ;;  %v1184_v4 = vld [vmem:[%s1488_s1 + $0x50] sm:$0xff]  ;;  %s1223_s29 = smul.u32 24, %s1493_s16  ;;  %v1183_v7 = vld [vmem:[%s1488_s1 + $0x48] sm:$0xff]  ;;  %vm230_vm1 = vsmask.f32 7424 }
   0xd   : > { %v1189_v2 = vld [vmem:[%s1488_s1 + $0x78] sm:$0xff]  ;;  %394 = vmatpush.bf16.msra.mxu2 %v1185_v1  ;;  %v1188_v5 = vld [vmem:[%s1488_s1 + $0x70] sm:$0xff]  ;;  %v1187_v8 = vld [vmem:[%s1488_s1 + $0x68] sm:$0xff]  ;;  %vm428_vm3 = vcmask 1044480   ;;  %vm496_vm4 = vsmask.f32 4352 }
   0xe   : > { %466 = vmatpush.bf16.msra.mxu3 %v1189_v2  ;;  %s1309_s12 = scalar_lea.vmem %s1487_s0, %s1223_s29  ;;  %v1178_v22 = vld [vmem:[%s1488_s1 + $0x20] sm:$0xff]  ;;  %v1177_v27 = vld [vmem:[%s1488_s1 + $0x18] sm:$0xff]  ;;  %v1176_v42 = vld [vmem:[%s1488_s1 + $0x10] sm:$0xff]  ;;  %vm650_vm5 = vcmask 1045504   ;;  %vm718_vm6 = vsmask.f32 5376 }
   0xf   : > { %v1312_v9 = vld [vmem:[%s1309_s12] sm:$0xff]   ;;  %v1315_v10 = vld [vmem:[%s1309_s12 + $0x8] sm:$0xff]   ;;  %v1193_v34 = vld [vmem:[%s1488_s1 + $0x98] sm:$0xff]  ;;  %s1224_s26 = smul.u32 12, %s1493_s16  ;;  %vm880_vm8 = vcmask 519168  }
  0x10   : > { %282 = vmatpush.bf16.msra.mxu0 %v1180_v3  ;;  %1220 = vmatpush.bf16.msra.mxu1 %v1180_v3  ;;  %v210_v11 = vld [vmem:[%s1309_s12 + $0xc] sm:$0x1]  ;;  %v1319_v12 = vunpack.c.l.b16 %v1315_v10  ;;  %v232_v14 = vshrl.u32 %v1312_v9, 16  ;;  %v234_v15 = vshll.u32 %v1312_v9, 16  ;;  %v343_v16 = vld [vmem:[%s1309_s12] sm:$0xe]  ;;  %v1326_v18 = vunpack.c.h.b16 %v1312_v9 }
  0x11   : > { %395 = vmatpush.bf16.msra.mxu2 %v1184_v4  ;;  %v227_v13 = vunpack.c.l.b16 %v210_v11  ;;  %v411_v17 = vld [vmem:[%s1309_s12] sm:$0x8]  ;;  %v354_v19 = vunpack.c.l.b16 %v343_v16  ;;  %v412_v20 = vld [vmem:[%s1309_s12 + $0xc] sm:$0x7]  ;;  %v494_v26 = vunpack.c.h.b16 %v1315_v10  ;;  %v1201_v40 = vld [vmem:[%s1488_s1 + $0xd8] sm:$0xff]  ;;  %v506_v53 = vshrl.u32 %v1315_v10, 16  ;;  %s197_s29 = scalar_lea.vmem %s1491_s4, %s1224_s26 }
  0x12   : > { %467 = vmatpush.bf16.msra.mxu3 %v1188_v5  ;;  %v424_v21 = vunpack.c.l.b16 %v411_v17  ;;  %v236_v24 = vrot.slane %v234_v15, 1  ;;  %v425_v25 = vunpack.c.l.b16 %v412_v20  ;;  %v1182_v28 = vld [vmem:[%s1488_s1 + $0x40] sm:$0xff]  ;;  %v1192_v47 = vld [vmem:[%s1488_s1 + $0x90] sm:$0xff]  ;;  %v1205_v48 = vld [vmem:[%s1488_s1 + $0xf8] sm:$0xff]  ;;  %v509_v54 = vshll.u32 %v1315_v10, 16 }
  0x13   : > { %v1333_v23 = vpack.c.b16 %v227_v13, %v1319_v12  ;;  %v355_v29 = vpack.c.b16 %v1326_v18, %v354_v19  ;;  %v1186_v35 = vld [vmem:[%s1488_s1 + $0x60] sm:$0xff]  ;;  %v1200_v50 = vld [vmem:[%s1488_s1 + $0xd0] sm:$0xff]  ;;  %v1175_v55 = vld [vmem:[%s1488_s1 + $0x8] sm:$0xff]  ;;  %v508_v61 = vrot.slane %v506_v53, 3  ;;  %v575_v53 = vpack.c.b16 %v494_v26, %v494_v26 }
  0x14   : > { %283 = vmatpush.bf16.msra.mxu0 %v1179_v6  ;;  %1221 = vmatpush.bf16.msra.mxu1 %v1179_v6  ;;  %v426_v30 = vpack.c.b16 %v1326_v18, %v424_v21  ;;  %v237_v31 = vor.u32 %v236_v24, %v232_v14  ;;  %v1354_v38 = vpack.c.b16 %v425_v25, %v1319_v12  ;;  %v1191_v56 = vld [vmem:[%s1488_s1 + $0x88] sm:$0xff]  ;;  %v1204_v57 = vld [vmem:[%s1488_s1 + $0xf0] sm:$0xff]  ;;  %v511_v62 = vrot.slane %v509_v54, 4  ;;  %v1174_v63 = vld [vmem:[%s1488_s1] sm:$0xff] }
  0x15   : > { %396 = vmatpush.bf16.msra.mxu2 %v1183_v7  ;;  %v239_v32 = vshll.u32 %v1333_v23, 16  ;;  %v243_v33 = vshrl.u32 %v1333_v23, 16  ;;  %v358_v36 = vrot.slane %v1333_v23, 1  ;;  %v357_v37 = vrot.slane %v355_v29, 1  ;;  %v1199_v58 = vld [vmem:[%s1488_s1 + $0xc8] sm:$0xff]  ;;  %v1190_v0 = vld [vmem:[%s1488_s1 + $0x80] sm:$0xff] }
  0x16   : > { %468 = vmatpush.bf16.msra.mxu3 %v1187_v8  ;;  %v429_v39 = vrot.slane %v426_v30, 3  ;;  %v430_v44 = vrot.slane %v1354_v38, 3  ;;  %v498_v51 = vshrl.u32 %v426_v30, 16  ;;  %v501_v52 = vshll.u32 %v426_v30, 16  ;;  %v1197_v1 = vld [vmem:[%s1488_s1 + $0xb8] sm:$0xff]  ;;  %v1203_v3 = vld [vmem:[%s1488_s1 + $0xe8] sm:$0xff] }
  0x17   : > { %v241_v41 = vrot.slane %v239_v32, 1  ;;  %v359_v43 = vsel %vm356_vm0, %v357_v37, %v358_v36  ;;  %v1209_v2 = vld [vmem:[%s1488_s1 + $0x118] sm:$0xff]  ;;  %v627_v4 = vld [vmem:[%s1309_s12 + $0x4] sm:$0xc]  ;;  %v1413_v5 = vld [vmem:[%s1309_s12 + $0x8] sm:$0xff]   ;;  %v512_v8 = vor.u32 %v511_v62, %v508_v61 }
  0x18   : > { %284 = vmatpush.bf16.msra.mxu0 %v1178_v22  ;;  %1222 = vmatpush.bf16.msra.mxu1 %v1178_v22  ;;  %v431_v49 = vsel %vm428_vm3, %v429_v39, %v430_v44  ;;  %v500_v59 = vrot.slane %v498_v51, 3  ;;  %v503_v60 = vrot.slane %v501_v52, 4  ;;  %v705_v6 = vld [vmem:[%s1309_s12 + $0x10] sm:$0x7]  ;;  %v1198_v11 = vld [vmem:[%s1488_s1 + $0xc0] sm:$0xff]  ;;  %v1216_v14 = vunpack.c.l.b16 %v1413_v5  ;;  %v1195_v22 = vld [vmem:[%s1488_s1 + $0xa8] sm:$0xff] }
  0x19   : > { %397 = vmatpush.bf16.msra.mxu2 %v1182_v28  ;;  %v242_v45 = vsel %vm230_vm1, %v237_v31, %v241_v41  ;;  %v245_v46 = vor.u32 %v243_v33, %v241_v41  ;;  %v1196_v13 = vld [vmem:[%s1488_s1 + $0xb0] sm:$0xff]  ;;  %v1217_v15 = vunpack.c.h.b16 %v1413_v5  ;;  %v644_v16 = vunpack.c.l.b16 %v627_v4  ;;  %v1202_v19 = vld [vmem:[%s1488_s1 + $0xe0] sm:$0xff]  ;;  %v1207_v29 = vld [vmem:[%s1488_s1 + $0x108] sm:$0xff] }
  0x1a   : > { %469 = vmatpush.bf16.msra.mxu3 %v1186_v35  ;;  %v504_v7 = vor.u32 %v503_v60, %v500_v59  ;;  %v716_v17 = vunpack.c.l.b16 %v705_v6  ;;  %v1208_v21 = vld [vmem:[%s1488_s1 + $0x110] sm:$0xff]  ;;  %v574_v51 = vpack.c.b16 %v1319_v12, %v1326_v18 }
  0x1b   : > { %970 = vmatmul.msk.bf16.vlgmr.msra.gmra.mxu0 %vm270_vm2, %v242_v45  ;;  %971 = vmatmul.msk.bf16.vlgmr.msra.gmra.mxu1 %vm270_vm2, %v245_v46  ;;  %v630_v24 = vld [vmem:[%s1309_s12 + $0x10] sm:$0x3]  ;;  %v648_v25 = vpack.c.b16 %v1216_v14, %v644_v16  ;;  %v787_v45 = vld [vmem:[%s1309_s12 + $0x4] sm:$0x8] }
  0x1c   : > { %329 = vmatpush.bf16.msrb.mxu1 %v1177_v27  ;;  %548 = vmatpush.bf16.msrb.mxu0 %v1193_v34  ;;  %v513_v20 = vsel %vm496_vm4, %v504_v7, %v512_v8  ;;  %v717_v27 = vpack.c.b16 %v716_v17, %v1217_v15  ;;  %v647_v28 = vunpack.c.l.b16 %v630_v24  ;;  %v1206_v34 = vld [vmem:[%s1488_s1 + $0x100] sm:$0xff] }
  0x1d   : > { %688 = vmatpush.bf16.msrb.mxu2 %v1201_v40  ;;  %1040 = vmatmul.msk.bf16.vlgmr.msra.gmra.mxu3 %vm270_vm2, %v431_v49  ;;  %v720_v30 = vshrl.u32 %v648_v25, 16  ;;  %v723_v31 = vshll.u32 %v648_v25, 16  ;;  %v651_v39 = vrot.slane %v648_v25, 2 }
  0x1e   : > { %1014 = vmatmul.msk.bf16.vlgmr.msra.gmra.mxu2 %vm270_vm2, %v359_v43  ;;  %770 = vmatpush.bf16.msrb.mxu3 %v1205_v48  ;;  %v728_v32 = vshrl.u32 %v717_v27, 16  ;;  %v731_v33 = vshll.u32 %v717_v27, 16  ;;  %v649_v23 = vpack.c.b16 %v647_v28, %v1217_v15  ;;  %v295_v43 = vpack.c.b16 %v1319_v12, %v1319_v12 }
  0x1f   : > { %v722_v35 = vrot.slane %v720_v30, 2 }
  0x20   : > { %330 = vmatpush.bf16.msrb.mxu1 %v1176_v42  ;;  %549 = vmatpush.bf16.msrb.mxu0 %v1192_v47  ;;  %v730_v37 = vrot.slane %v728_v32, 2  ;;  %v733_v38 = vrot.slane %v731_v33, 3  ;;  %v652_v40 = vrot.slane %v649_v23, 2  ;;  %v798_v47 = vunpack.c.l.b16 %v787_v45 }
  0x21   : > { %689 = vmatpush.bf16.msrb.mxu2 %v1200_v50  ;;  %v801_v50 = vrot.slane %v717_v27, 3 }
  0x22   : > { %771 = vmatpush.bf16.msrb.mxu3 %v1204_v57  ;;  %v734_v42 = vor.u32 %v733_v38, %v730_v37  ;;  %v799_v48 = vpack.c.b16 %v1216_v14, %v798_v47 }
  0x24   : > { %331 = vmatpush.bf16.msrb.mxu1 %v1175_v55  ;;  %550 = vmatpush.bf16.msrb.mxu0 %v1191_v56  ;;  %v800_v49 = vrot.slane %v799_v48, 3 }
  0x25   : > { %690 = vmatpush.bf16.msrb.mxu2 %v1199_v58 }
  0x26   : > { %772 = vmatpush.bf16.msrb.mxu3 %v1203_v3  ;;  %v802_v52 = vsel %vm428_vm3, %v800_v49, %v801_v50 }
  0x28   : > { %332 = vmatpush.bf16.msrb.mxu1 %v1174_v63  ;;  %551 = vmatpush.bf16.msrb.mxu0 %v1190_v0 }
  0x29   : > { %691 = vmatpush.bf16.msrb.mxu2 %v1198_v11 }
  0x2a   : > { %773 = vmatpush.bf16.msrb.mxu3 %v1202_v19 }
  0x2b   : > { %1066 = vmatmul.msk.bf16.vlgmr.msrb.gmra.mxu0 %vm270_vm2, %v513_v20  ;;  %988 = vmatmul.msk.bf16.vlgmr.msrb.gmra.mxu1 %vm270_vm2, %v1312_v9  ;;  %v1194_v9 = vld [vmem:[%s1488_s1 + $0xa0] sm:$0xff] }
  0x2c   : > { %610 = vmatpush.bf16.msra.mxu1 %v1197_v1  ;;  %837 = vmatpush.bf16.msra.mxu0 %v1209_v2 }
  0x2d   : > { %1041 = vmatmul.msk.bf16.gmra.mxu3 %vm270_vm2, %v430_v44  ;;  %v653_v44 = vsel %vm650_vm5, %v651_v39, %v652_v40 }
  0x2e   : > { %1015 = vmatmul.msk.bf16.gmra.mxu2 %vm270_vm2, %v358_v36  ;;  %v725_v36 = vrot.slane %v723_v31, 3 }
  0x30   : > { %611 = vmatpush.bf16.msra.mxu1 %v1196_v13  ;;  %838 = vmatpush.bf16.msra.mxu0 %v1208_v21  ;;  %v726_v41 = vor.u32 %v725_v36, %v722_v35 }
  0x32   : > { %v735_v46 = vsel %vm718_vm6, %v726_v41, %v734_v42 }
  0x34   : > { %612 = vmatpush.bf16.msra.mxu1 %v1195_v22  ;;  %839 = vmatpush.bf16.msra.mxu0 %v1207_v29  ;;  %v1233_v29 = vld [vmem:[%s1489_s2] ss:$0 sm:$0xff] }
  0x38   : > { %613 = vmatpush.bf16.msra.mxu1 %v1194_v9  ;;  %840 = vmatpush.bf16.msra.mxu0 %v1206_v34  ;;  %v1234_v9 = vld [vmem:[%s1490_s3] ss:$0 sm:$0xff] }
  0x3b   : > { %1067 = vmatmul.msk.bf16.gmra.mxu0 %vm270_vm2, %v512_v8  ;;  %989 = vmatmul.msk.bf16.gmra.mxu1 %vm270_vm2, %v295_v43 }
  0x3d   : > { %1144 = vmatmul.msk.bf16.vlgmr.msrb.gmra.mxu3 %vm270_vm2, %v735_v46 }
  0x3e   : > { %1118 = vmatmul.msk.bf16.vlgmr.msrb.gmra.mxu2 %vm270_vm2, %v653_v44 }
  0x4b   : > { %1170 = vmatmul.msk.bf16.vlgmr.msra.gmra.mxu0 %vm270_vm2, %v802_v52  ;;  %1092 = vmatmul.msk.bf16.vlgmr.msra.gmra.mxu1 %vm270_vm2, %v574_v51 }
  0x4d   : > { %1145 = vmatmul.msk.bf16.gmra.mxu3 %vm270_vm2, %v734_v42 }
  0x4e   : > { %1119 = vmatmul.msk.bf16.gmra.mxu2 %vm270_vm2, %v652_v40 }
  0x5b   : > { %1171 = vmatmul.msk.bf16.gmra.mxu0 %vm270_vm2, %v801_v50  ;;  %1093 = vmatmul.msk.bf16.gmra.mxu1 %vm270_vm2, %v575_v53 }
  0x98   : > { %v286_v54 = vpop.f32.mrf.mxu0  ;;  %v291_v12 = vpop.f32.mrf.mxu1 }
  0xa0   : > { %v288_v55 = vpop.f32.mrf.mxu0  ;;  %v471_v56 = vpop.f32.mrf.mxu3 }
  0xa1   : > { %v399_v18 = vpop.f32.mrf.mxu2  ;;  %v293_v57 = vpop.f32.mrf.mxu1 }
  0xa8   : > { %v553_v59 = vpop.f32.mrf.mxu0  ;;  %v473_v60 = vpop.f32.mrf.mxu3 }
  0xa9   : > { %v401_v58 = vpop.f32.mrf.mxu2  ;;  %v334_v61 = vpop.f32.mrf.mxu1 }
  0xaa   : > { %v335_v4 = vadd.f32 %v334_v61, %v286_v54 }
  0xac   : > { %v408_v6 = vadd.f32 %v399_v18, %v335_v4 }
  0xae   : > { %v480_v13 = vadd.f32 %v471_v56, %v408_v6 }
  0xb0   : > { %v555_v63 = vpop.f32.mrf.mxu0  ;;  %v476_v0 = vpop.f32.mrf.mxu3  ;;  %v562_v16 = vadd.f32 %v553_v59, %v480_v13 }
  0xb1   : > { %v404_v62 = vpop.f32.mrf.mxu2  ;;  %v336_v10 = vpop.f32.mrf.mxu1 }
  0xb2   : > { %v337_v14 = vadd.f32 %v336_v10, %v288_v55 }
  0xb4   : > { %v409_v17 = vadd.f32 %v401_v58, %v337_v14 }
  0xb6   : > { %v481_v24 = vadd.f32 %v473_v60, %v409_v17 }
  0xb8   : > { %v558_v26 = vpop.f32.mrf.mxu0  ;;  %v478_v2 = vpop.f32.mrf.mxu3  ;;  %v563_v31 = vadd.f32 %v555_v63, %v481_v24 }
  0xb9   : > { %v406_v1 = vpop.f32.mrf.mxu2  ;;  %v339_v3 = vpop.f32.mrf.mxu1 }
  0xba   : > { %v340_v25 = vadd.f32 %v339_v3, %v291_v12 }
  0xbc   : > { %v410_v32 = vadd.f32 %v404_v62, %v340_v25 }
  0xbe   : > { %v482_v38 = vadd.f32 %v476_v0, %v410_v32 }
  0xc0   : > { %v560_v7 = vpop.f32.mrf.mxu0  ;;  %v775_v8 = vpop.f32.mrf.mxu3  ;;  %v564_v44 = vadd.f32 %v558_v26, %v482_v38 }
  0xc1   : > { %v693_v5 = vpop.f32.mrf.mxu2  ;;  %v341_v11 = vpop.f32.mrf.mxu1 }
  0xc8   : > { %v842_v19 = vpop.f32.mrf.mxu0  ;;  %v777_v20 = vpop.f32.mrf.mxu3 }
  0xc9   : > { %v695_v15 = vpop.f32.mrf.mxu2  ;;  %v615_v21 = vpop.f32.mrf.mxu1 }
  0xca   : > { %v624_v22 = vadd.f32 %v615_v21, %v562_v16 }
  0xcc   : > { %v702_v27 = vadd.f32 %v693_v5, %v624_v22 }
  0xce   : > { %v784_v28 = vadd.f32 %v775_v8, %v702_v27 }
  0xd0   : > { %v851_v33 = vadd.f32 %v842_v19, %v784_v28  ;;  %v844_v23 = vpop.f32.mrf.mxu0  ;;  %v780_v34 = vpop.f32.mrf.mxu3 }
  0xd1   : > { %v698_v30 = vpop.f32.mrf.mxu2  ;;  %v617_v35 = vpop.f32.mrf.mxu1 }
  0xd2   : > { %v858_v36 = vmul.f32 %v1233_v29, %v851_v33  ;;  %v625_v37 = vadd.f32 %v617_v35, %v563_v31 }
  0xd4   : > { %v865_v39 = vadd.f32 %v1234_v9, %v858_v36  ;;  %v703_v40 = vadd.f32 %v695_v15, %v625_v37 }
  0xd6   : > { %vm868_vm7 = vcmp.ge.f32.partialorder %v865_v39, 0.0  ;;  %v871_v41 = vmul.f32 0.2, %v865_v39  ;;  %v785_v42 = vadd.f32 %v777_v20, %v703_v40 }
  0xd8   : > { %v874_v45 = vsel %vm868_vm7, %v865_v39, %v871_v41  ;;  %v852_v46 = vadd.f32 %v844_v23, %v785_v42  ;;  %v847_v47 = vpop.f32.mrf.mxu0  ;;  %v782_v48 = vpop.f32.mrf.mxu3 }
  0xd9   : > { %v700_v43 = vpop.f32.mrf.mxu2  ;;  %v877_v49 = vpack.c.bf16 %v874_v45, %v874_v45  ;;  %v620_v50 = vpop.f32.mrf.mxu1 }
  0xda   : > { %v859_v51 = vmul.f32 %v1233_v29, %v852_v46  ;;  %v626_v52 = vadd.f32 %v620_v50, %v564_v44 }
  0xdb   : > { %881 = vst.msk [vmem:[%s197_s29] sm:$0xf] %vm880_vm8, %v877_v49 }
  0xdc   : > { %v866_v53 = vadd.f32 %v1234_v9, %v859_v51  ;;  %v704_v54 = vadd.f32 %v698_v30, %v626_v52 }
  0xde   : > { %vm869_vm9 = vcmp.ge.f32.partialorder %v866_v53, 0.0  ;;  %v872_v12 = vmul.f32 0.2, %v866_v53  ;;  %v786_v18 = vadd.f32 %v780_v34, %v704_v54 }
  0xe0   : > { %v875_v55 = vsel %vm869_vm9, %v866_v53, %v872_v12  ;;  %v853_v56 = vadd.f32 %v847_v47, %v786_v18  ;;  %v849_v57 = vpop.f32.mrf.mxu0 }
  0xe1   : > { %v878_v58 = vpack.c.bf16 %v875_v55, %v875_v55  ;;  %v622_v59 = vpop.f32.mrf.mxu1 }
  0xe2   : > { %v860_v60 = vmul.f32 %v1233_v29, %v853_v56 }
  0xe3   : > { %882 = vst.msk [vmem:[%s197_s29 + $0x4] sm:$0xf] %vm880_vm8, %v878_v58 }
  0xe4   : > { %v867_v61 = vadd.f32 %v1234_v9, %v860_v60 }
  0xe6   : > { %vm870_vm10 = vcmp.ge.f32.partialorder %v867_v61, 0.0  ;;  %v873_v62 = vmul.f32 0.2, %v867_v61 }
  0xe8   : > { %v876_v63 = vsel %vm870_vm10, %v867_v61, %v873_v62 }
  0xe9   : > { %v879_v0 = vpack.c.bf16 %v876_v63, %v876_v63 }
  0xeb   : > { %883 = vst.msk [vmem:[%s197_s29 + $0x8] sm:$0xf] %vm880_vm8, %v879_v0 }
  0xec PF: > { %s14_s15 = sadd.s32 1, %s1241_s15  }
  0xed   : > { %p11_p4 = scmp.ge.s32.totalorder %s14_s15, 4  }
  0xef   :  { %13 = sbr.rel (!%p11_p4) target bundleno = 1 (0x1), region = 74 }

// kernel: net_forward.15
= control target key start
LH: loop header
LB: loop body
LE: loop exit
PB: predicated region body
PF: predicated region fallthrough
CT: control target
= control target key end

     0   :  { %s1346_s18 = smov 0   ;;  %s1576_s0 = inlined_call_operand.vmem [shape: bf16[2,42,64], index: 0, kind: input, shape index: {}]   ;;  %s1577_s1 = inlined_call_operand.vmem [shape: bf16[9,64,64], index: 1, kind: input, shape index: {}]   ;;  %s1578_s2 = inlined_call_operand.vmem [shape: f32[1,64], index: 2, kind: input, shape index: {}]   ;;  %s1579_s3 = inlined_call_operand.vmem [shape: f32[1,64], index: 3, kind: input, shape index: {}]   ;;  %s1580_s4 = inlined_call_operand.vmem [shape: bf16[2,24,64], index: 4, kind: input, shape index: {}]   ;;  %s1581_s5 = inlined_call_operand.vmem [shape: bf16[2,24,64], index: 5, kind: output, shape index: {}]  }
   0x1 LB: > { %s1007_s19 = sadd.s32 4294967295, %s1314_s18   ;;  %p1011_p0 = scmp.ge.s32.totalorder %s1314_s18, 1  ;;  %s1314_s18 = sphi %s1346_s18, %s15_s18  }
   0x2   : > { %p197_p1 = scmp.lt.s32.totalorder %s1314_s18, 3 }
   0x4   : > { %p198_p2 = pnand %p1011_p0, %p197_p1 }
   0x5   : > { %p230_p3 = scmp.lt.s32.totalorder (!%p198_p2), %s1007_s19, 1 }
   0x6   : > { %201 = sbr.rel (%p198_p2) target bundleno = 238 (0xee), region = 40 }
   0xb   : > { %v1250_v0 = vld [vmem:[%s1577_s1 + $0x38] sm:$0xff]  ;;  %v1249_v3 = vld [vmem:[%s1577_s1 + $0x30] sm:$0xff]  ;;  %s1583_s19 = smov (!%p230_p3, %s1007_s19), 1  ;;  %v1248_v6 = vld [vmem:[%s1577_s1 + $0x28] sm:$0xff]  ;;  %vm403_vm0 = vcmask 1046528   ;;  %vm317_vm2 = vcmask 523264  }
   0xc   : > { %v1254_v1 = vld [vmem:[%s1577_s1 + $0x58] sm:$0xff]  ;;  %328 = vmatpush.bf16.msra.mxu0 %v1250_v0  ;;  %1292 = vmatpush.bf16.msra.mxu1 %v1250_v0  ;;  %v1253_v4 = vld [vmem:[%s1577_s1 + $0x50] sm:$0xff]  ;;  %s1296_s7 = smul.u32 24, %s1583_s19  ;;  %v1252_v7 = vld [vmem:[%s1577_s1 + $0x48] sm:$0xff]  ;;  %vm277_vm1 = vsmask.f32 7424 }
   0xd   : > { %v1258_v2 = vld [vmem:[%s1577_s1 + $0x78] sm:$0xff]  ;;  %441 = vmatpush.bf16.msra.mxu2 %v1254_v1  ;;  %v1257_v5 = vld [vmem:[%s1577_s1 + $0x70] sm:$0xff]  ;;  %v1256_v8 = vld [vmem:[%s1577_s1 + $0x68] sm:$0xff]  ;;  %vm475_vm3 = vcmask 1044480   ;;  %vm543_vm4 = vsmask.f32 4352 }
   0xe   : > { %513 = vmatpush.bf16.msra.mxu3 %v1258_v2  ;;  %s1387_s16 = scalar_lea.vmem %s1576_s0, %s1296_s7  ;;  %v1247_v22 = vld [vmem:[%s1577_s1 + $0x20] sm:$0xff]  ;;  %v1246_v27 = vld [vmem:[%s1577_s1 + $0x18] sm:$0xff]  ;;  %v1245_v42 = vld [vmem:[%s1577_s1 + $0x10] sm:$0xff]  ;;  %vm697_vm5 = vcmask 1045504   ;;  %vm765_vm6 = vsmask.f32 5376 }
   0xf   : > { %v1390_v9 = vld [vmem:[%s1387_s16] sm:$0xff]   ;;  %v1393_v10 = vld [vmem:[%s1387_s16 + $0x8] sm:$0xff]   ;;  %v1262_v34 = vld [vmem:[%s1577_s1 + $0x98] sm:$0xff]  ;;  %vm936_vm8 = vcmask 519168  }
  0x10   : > { %329 = vmatpush.bf16.msra.mxu0 %v1249_v3  ;;  %1293 = vmatpush.bf16.msra.mxu1 %v1249_v3  ;;  %v257_v11 = vld [vmem:[%s1387_s16 + $0xc] sm:$0x1]  ;;  %v1397_v12 = vunpack.c.l.b16 %v1393_v10  ;;  %v279_v14 = vshrl.u32 %v1390_v9, 16  ;;  %v281_v15 = vshll.u32 %v1390_v9, 16  ;;  %v390_v16 = vld [vmem:[%s1387_s16] sm:$0xe]  ;;  %v1404_v18 = vunpack.c.h.b16 %v1390_v9 }
  0x11   : > { %442 = vmatpush.bf16.msra.mxu2 %v1253_v4  ;;  %v274_v13 = vunpack.c.l.b16 %v257_v11  ;;  %v458_v17 = vld [vmem:[%s1387_s16] sm:$0x8]  ;;  %v401_v19 = vunpack.c.l.b16 %v390_v16  ;;  %v459_v20 = vld [vmem:[%s1387_s16 + $0xc] sm:$0x7]  ;;  %v541_v26 = vunpack.c.h.b16 %v1393_v10  ;;  %v1270_v40 = vld [vmem:[%s1577_s1 + $0xd8] sm:$0xff]  ;;  %v553_v53 = vshrl.u32 %v1393_v10, 16 }
  0x12   : > { %514 = vmatpush.bf16.msra.mxu3 %v1257_v5  ;;  %v471_v21 = vunpack.c.l.b16 %v458_v17  ;;  %v283_v24 = vrot.slane %v281_v15, 1  ;;  %v472_v25 = vunpack.c.l.b16 %v459_v20  ;;  %v1251_v28 = vld [vmem:[%s1577_s1 + $0x40] sm:$0xff]  ;;  %v1261_v47 = vld [vmem:[%s1577_s1 + $0x90] sm:$0xff]  ;;  %v1274_v48 = vld [vmem:[%s1577_s1 + $0xf8] sm:$0xff]  ;;  %v556_v54 = vshll.u32 %v1393_v10, 16 }
  0x13   : > { %v1411_v23 = vpack.c.b16 %v274_v13, %v1397_v12  ;;  %v402_v29 = vpack.c.b16 %v1404_v18, %v401_v19  ;;  %v1255_v35 = vld [vmem:[%s1577_s1 + $0x60] sm:$0xff]  ;;  %v1269_v50 = vld [vmem:[%s1577_s1 + $0xd0] sm:$0xff]  ;;  %v1244_v55 = vld [vmem:[%s1577_s1 + $0x8] sm:$0xff]  ;;  %v555_v61 = vrot.slane %v553_v53, 3  ;;  %v622_v53 = vpack.c.b16 %v541_v26, %v541_v26 }
  0x14   : > { %330 = vmatpush.bf16.msra.mxu0 %v1248_v6  ;;  %1294 = vmatpush.bf16.msra.mxu1 %v1248_v6  ;;  %v473_v30 = vpack.c.b16 %v1404_v18, %v471_v21  ;;  %v284_v31 = vor.u32 %v283_v24, %v279_v14  ;;  %v1432_v38 = vpack.c.b16 %v472_v25, %v1397_v12  ;;  %v1260_v56 = vld [vmem:[%s1577_s1 + $0x88] sm:$0xff]  ;;  %v1273_v57 = vld [vmem:[%s1577_s1 + $0xf0] sm:$0xff]  ;;  %v558_v62 = vrot.slane %v556_v54, 4  ;;  %v1243_v63 = vld [vmem:[%s1577_s1] sm:$0xff] }
  0x15   : > { %443 = vmatpush.bf16.msra.mxu2 %v1252_v7  ;;  %v286_v32 = vshll.u32 %v1411_v23, 16  ;;  %v290_v33 = vshrl.u32 %v1411_v23, 16  ;;  %v405_v36 = vrot.slane %v1411_v23, 1  ;;  %v404_v37 = vrot.slane %v402_v29, 1  ;;  %v1268_v58 = vld [vmem:[%s1577_s1 + $0xc8] sm:$0xff]  ;;  %v1259_v0 = vld [vmem:[%s1577_s1 + $0x80] sm:$0xff] }
  0x16   : > { %515 = vmatpush.bf16.msra.mxu3 %v1256_v8  ;;  %v476_v39 = vrot.slane %v473_v30, 3  ;;  %v477_v44 = vrot.slane %v1432_v38, 3  ;;  %v545_v51 = vshrl.u32 %v473_v30, 16  ;;  %v548_v52 = vshll.u32 %v473_v30, 16  ;;  %v1266_v1 = vld [vmem:[%s1577_s1 + $0xb8] sm:$0xff]  ;;  %v1272_v3 = vld [vmem:[%s1577_s1 + $0xe8] sm:$0xff] }
  0x17   : > { %v288_v41 = vrot.slane %v286_v32, 1  ;;  %v406_v43 = vsel %vm403_vm0, %v404_v37, %v405_v36  ;;  %v1278_v2 = vld [vmem:[%s1577_s1 + $0x118] sm:$0xff]  ;;  %v674_v4 = vld [vmem:[%s1387_s16 + $0x4] sm:$0xc]  ;;  %v1491_v5 = vld [vmem:[%s1387_s16 + $0x8] sm:$0xff]   ;;  %v559_v8 = vor.u32 %v558_v62, %v555_v61 }
  0x18   : > { %331 = vmatpush.bf16.msra.mxu0 %v1247_v22  ;;  %1295 = vmatpush.bf16.msra.mxu1 %v1247_v22  ;;  %v478_v49 = vsel %vm475_vm3, %v476_v39, %v477_v44  ;;  %v547_v59 = vrot.slane %v545_v51, 3  ;;  %v550_v60 = vrot.slane %v548_v52, 4  ;;  %v752_v6 = vld [vmem:[%s1387_s16 + $0x10] sm:$0x7]  ;;  %v1267_v11 = vld [vmem:[%s1577_s1 + $0xc0] sm:$0xff]  ;;  %v1285_v14 = vunpack.c.l.b16 %v1491_v5  ;;  %v1264_v22 = vld [vmem:[%s1577_s1 + $0xa8] sm:$0xff] }
  0x19   : > { %444 = vmatpush.bf16.msra.mxu2 %v1251_v28  ;;  %v289_v45 = vsel %vm277_vm1, %v284_v31, %v288_v41  ;;  %v292_v46 = vor.u32 %v290_v33, %v288_v41  ;;  %v1265_v13 = vld [vmem:[%s1577_s1 + $0xb0] sm:$0xff]  ;;  %v1286_v15 = vunpack.c.h.b16 %v1491_v5  ;;  %v691_v16 = vunpack.c.l.b16 %v674_v4  ;;  %v1271_v19 = vld [vmem:[%s1577_s1 + $0xe0] sm:$0xff]  ;;  %v1276_v29 = vld [vmem:[%s1577_s1 + $0x108] sm:$0xff] }
  0x1a   : > { %516 = vmatpush.bf16.msra.mxu3 %v1255_v35  ;;  %v551_v7 = vor.u32 %v550_v60, %v547_v59  ;;  %v763_v17 = vunpack.c.l.b16 %v752_v6  ;;  %v1277_v21 = vld [vmem:[%s1577_s1 + $0x110] sm:$0xff]  ;;  %v621_v51 = vpack.c.b16 %v1397_v12, %v1404_v18 }
  0x1b   : > { %1039 = vmatmul.msk.bf16.vlgmr.msra.gmra.mxu0 %vm317_vm2, %v289_v45  ;;  %1040 = vmatmul.msk.bf16.vlgmr.msra.gmra.mxu1 %vm317_vm2, %v292_v46  ;;  %v677_v24 = vld [vmem:[%s1387_s16 + $0x10] sm:$0x3]  ;;  %v695_v25 = vpack.c.b16 %v1285_v14, %v691_v16  ;;  %v834_v45 = vld [vmem:[%s1387_s16 + $0x4] sm:$0x8]  ;;  %s1297_s16 = smul.u32 12, %s1583_s19 }
  0x1c   : > { %376 = vmatpush.bf16.msrb.mxu1 %v1246_v27  ;;  %595 = vmatpush.bf16.msrb.mxu0 %v1262_v34  ;;  %v560_v20 = vsel %vm543_vm4, %v551_v7, %v559_v8  ;;  %v764_v27 = vpack.c.b16 %v763_v17, %v1286_v15  ;;  %v694_v28 = vunpack.c.l.b16 %v677_v24  ;;  %v1275_v34 = vld [vmem:[%s1577_s1 + $0x100] sm:$0xff] }
  0x1d   : > { %735 = vmatpush.bf16.msrb.mxu2 %v1270_v40  ;;  %1109 = vmatmul.msk.bf16.vlgmr.msra.gmra.mxu3 %vm317_vm2, %v478_v49  ;;  %v767_v30 = vshrl.u32 %v695_v25, 16  ;;  %v770_v31 = vshll.u32 %v695_v25, 16  ;;  %v698_v39 = vrot.slane %v695_v25, 2  ;;  %s1555_s6 = scalar_lea.vmem %s1580_s4, %s1297_s16  ;;  %s244_s13 = scalar_lea.vmem %s1581_s5, %s1297_s16 }
  0x1e   : > { %1083 = vmatmul.msk.bf16.vlgmr.msra.gmra.mxu2 %vm317_vm2, %v406_v43  ;;  %817 = vmatpush.bf16.msrb.mxu3 %v1274_v48  ;;  %v775_v32 = vshrl.u32 %v764_v27, 16  ;;  %v778_v33 = vshll.u32 %v764_v27, 16  ;;  %v696_v23 = vpack.c.b16 %v694_v28, %v1286_v15  ;;  %v342_v43 = vpack.c.b16 %v1397_v12, %v1397_v12 }
  0x1f   : > { %v769_v35 = vrot.slane %v767_v30, 2  ;;  %v1288_v30 = vld [vmem:[%s1555_s6] sm:$0xff]  }
  0x20   : > { %377 = vmatpush.bf16.msrb.mxu1 %v1245_v42  ;;  %596 = vmatpush.bf16.msrb.mxu0 %v1261_v47  ;;  %v777_v37 = vrot.slane %v775_v32, 2  ;;  %v780_v38 = vrot.slane %v778_v33, 3  ;;  %v699_v40 = vrot.slane %v696_v23, 2  ;;  %v845_v47 = vunpack.c.l.b16 %v834_v45  ;;  %v1307_v23 = vld [vmem:[%s1579_s3] ss:$0 sm:$0xff] }
  0x21   : > { %736 = vmatpush.bf16.msrb.mxu2 %v1269_v50  ;;  %v848_v50 = vrot.slane %v764_v27, 3 }
  0x22   : > { %818 = vmatpush.bf16.msrb.mxu3 %v1273_v57  ;;  %v781_v42 = vor.u32 %v780_v38, %v777_v37  ;;  %v846_v48 = vpack.c.b16 %v1285_v14, %v845_v47  ;;  %v1289_v38 = vunpack.c.l.bf16 %v1288_v30 }
  0x24   : > { %378 = vmatpush.bf16.msrb.mxu1 %v1244_v55  ;;  %597 = vmatpush.bf16.msrb.mxu0 %v1260_v56  ;;  %v847_v49 = vrot.slane %v846_v48, 3 }
  0x25   : > { %737 = vmatpush.bf16.msrb.mxu2 %v1268_v58 }
  0x26   : > { %819 = vmatpush.bf16.msrb.mxu3 %v1272_v3  ;;  %v849_v52 = vsel %vm475_vm3, %v847_v49, %v848_v50 }
  0x28   : > { %379 = vmatpush.bf16.msrb.mxu1 %v1243_v63  ;;  %598 = vmatpush.bf16.msrb.mxu0 %v1259_v0 }
  0x29   : > { %738 = vmatpush.bf16.msrb.mxu2 %v1267_v11 }
  0x2a   : > { %820 = vmatpush.bf16.msrb.mxu3 %v1271_v19 }
  0x2b   : > { %1135 = vmatmul.msk.bf16.vlgmr.msrb.gmra.mxu0 %vm317_vm2, %v560_v20  ;;  %1057 = vmatmul.msk.bf16.vlgmr.msrb.gmra.mxu1 %vm317_vm2, %v1390_v9  ;;  %v1263_v9 = vld [vmem:[%s1577_s1 + $0xa0] sm:$0xff] }
  0x2c   : > { %657 = vmatpush.bf16.msra.mxu1 %v1266_v1  ;;  %884 = vmatpush.bf16.msra.mxu0 %v1278_v2 }
  0x2d   : > { %1110 = vmatmul.msk.bf16.gmra.mxu3 %vm317_vm2, %v477_v44  ;;  %v700_v44 = vsel %vm697_vm5, %v698_v39, %v699_v40 }
  0x2e   : > { %1084 = vmatmul.msk.bf16.gmra.mxu2 %vm317_vm2, %v405_v36  ;;  %v772_v36 = vrot.slane %v770_v31, 3 }
  0x30   : > { %658 = vmatpush.bf16.msra.mxu1 %v1265_v13  ;;  %885 = vmatpush.bf16.msra.mxu0 %v1277_v21  ;;  %v773_v41 = vor.u32 %v772_v36, %v769_v35 }
  0x32   : > { %v782_v46 = vsel %vm765_vm6, %v773_v41, %v781_v42 }
  0x34   : > { %659 = vmatpush.bf16.msra.mxu1 %v1264_v22  ;;  %886 = vmatpush.bf16.msra.mxu0 %v1276_v29  ;;  %v1306_v29 = vld [vmem:[%s1578_s2] ss:$0 sm:$0xff] }
  0x38   : > { %660 = vmatpush.bf16.msra.mxu1 %v1263_v9  ;;  %887 = vmatpush.bf16.msra.mxu0 %v1275_v34 }
  0x3b   : > { %1136 = vmatmul.msk.bf16.gmra.mxu0 %vm317_vm2, %v559_v8  ;;  %1058 = vmatmul.msk.bf16.gmra.mxu1 %vm317_vm2, %v342_v43 }
  0x3d   : > { %1213 = vmatmul.msk.bf16.vlgmr.msrb.gmra.mxu3 %vm317_vm2, %v782_v46 }
  0x3e   : > { %1187 = vmatmul.msk.bf16.vlgmr.msrb.gmra.mxu2 %vm317_vm2, %v700_v44 }
  0x4b   : > { %1239 = vmatmul.msk.bf16.vlgmr.msra.gmra.mxu0 %vm317_vm2, %v849_v52  ;;  %1161 = vmatmul.msk.bf16.vlgmr.msra.gmra.mxu1 %vm317_vm2, %v621_v51 }
  0x4d   : > { %1214 = vmatmul.msk.bf16.gmra.mxu3 %vm317_vm2, %v781_v42 }
  0x4e   : > { %1188 = vmatmul.msk.bf16.gmra.mxu2 %vm317_vm2, %v699_v40 }
  0x5b   : > { %1240 = vmatmul.msk.bf16.gmra.mxu0 %vm317_vm2, %v848_v50  ;;  %1162 = vmatmul.msk.bf16.gmra.mxu1 %vm317_vm2, %v622_v53 }
  0x98   : > { %v333_v54 = vpop.f32.mrf.mxu0  ;;  %v338_v12 = vpop.f32.mrf.mxu1 }
  0xa0   : > { %v335_v55 = vpop.f32.mrf.mxu0  ;;  %v518_v56 = vpop.f32.mrf.mxu3 }
  0xa1   : > { %v446_v18 = vpop.f32.mrf.mxu2  ;;  %v340_v57 = vpop.f32.mrf.mxu1 }
  0xa8   : > { %v600_v59 = vpop.f32.mrf.mxu0  ;;  %v520_v60 = vpop.f32.mrf.mxu3 }
  0xa9   : > { %v448_v58 = vpop.f32.mrf.mxu2  ;;  %v381_v61 = vpop.f32.mrf.mxu1 }
  0xaa   : > { %v382_v4 = vadd.f32 %v381_v61, %v333_v54  ;;  %v1290_v54 = vunpack.c.h.bf16 %v1288_v30 }
  0xac   : > { %v455_v6 = vadd.f32 %v446_v18, %v382_v4 }
  0xae   : > { %v527_v13 = vadd.f32 %v518_v56, %v455_v6 }
  0xb0   : > { %v602_v63 = vpop.f32.mrf.mxu0  ;;  %v523_v0 = vpop.f32.mrf.mxu3  ;;  %v609_v16 = vadd.f32 %v600_v59, %v527_v13  ;;  %v917_v59 = vld [vmem:[%s1555_s6 + $0x8] sm:$0xf] }
  0xb1   : > { %v451_v62 = vpop.f32.mrf.mxu2  ;;  %v383_v10 = vpop.f32.mrf.mxu1 }
  0xb2   : > { %v384_v14 = vadd.f32 %v383_v10, %v335_v55 }
  0xb4   : > { %v456_v17 = vadd.f32 %v448_v58, %v384_v14 }
  0xb6   : > { %v528_v24 = vadd.f32 %v520_v60, %v456_v17 }
  0xb8   : > { %v605_v1 = vpop.f32.mrf.mxu0  ;;  %v525_v2 = vpop.f32.mrf.mxu3  ;;  %v610_v32 = vadd.f32 %v602_v63, %v528_v24 }
  0xb9   : > { %v453_v26 = vpop.f32.mrf.mxu2  ;;  %v386_v3 = vpop.f32.mrf.mxu1 }
  0xba   : > { %v387_v25 = vadd.f32 %v386_v3, %v338_v12  ;;  %v920_v26 = vunpack.c.l.bf16 %v917_v59 }
  0xbc   : > { %v457_v33 = vadd.f32 %v451_v62, %v387_v25 }
  0xbe   : > { %v529_v40 = vadd.f32 %v523_v0, %v457_v33 }
  0xc0   : > { %v607_v7 = vpop.f32.mrf.mxu0  ;;  %v822_v8 = vpop.f32.mrf.mxu3  ;;  %v611_v46 = vadd.f32 %v605_v1, %v529_v40 }
  0xc1   : > { %v740_v5 = vpop.f32.mrf.mxu2  ;;  %v388_v11 = vpop.f32.mrf.mxu1 }
  0xc8   : > { %v889_v19 = vpop.f32.mrf.mxu0  ;;  %v824_v20 = vpop.f32.mrf.mxu3 }
  0xc9   : > { %v742_v15 = vpop.f32.mrf.mxu2  ;;  %v662_v21 = vpop.f32.mrf.mxu1 }
  0xca   : > { %v671_v22 = vadd.f32 %v662_v21, %v609_v16 }
  0xcc   : > { %v749_v27 = vadd.f32 %v740_v5, %v671_v22 }
  0xce   : > { %v831_v28 = vadd.f32 %v822_v8, %v749_v27 }
  0xd0   : > { %v898_v9 = vadd.f32 %v889_v19, %v831_v28  ;;  %v891_v34 = vpop.f32.mrf.mxu0  ;;  %v827_v35 = vpop.f32.mrf.mxu3 }
  0xd1   : > { %v745_v31 = vpop.f32.mrf.mxu2  ;;  %v664_v36 = vpop.f32.mrf.mxu1 }
  0xd2   : > { %v905_v37 = vmul.f32 %v1306_v29, %v898_v9  ;;  %v672_v39 = vadd.f32 %v664_v36, %v610_v32 }
  0xd4   : > { %v912_v41 = vadd.f32 %v1307_v23, %v905_v37  ;;  %v750_v42 = vadd.f32 %v742_v15, %v672_v39 }
  0xd6   : > { %v921_v43 = vadd.f32 %v1289_v38, %v912_v41  ;;  %v832_v44 = vadd.f32 %v824_v20, %v750_v42 }
  0xd8   : > { %vm924_vm7 = vcmp.ge.f32.partialorder %v921_v43, 0.0  ;;  %v927_v47 = vmul.f32 0.2, %v921_v43  ;;  %v899_v48 = vadd.f32 %v891_v34, %v832_v44  ;;  %v894_v49 = vpop.f32.mrf.mxu0  ;;  %v829_v50 = vpop.f32.mrf.mxu3 }
  0xd9   : > { %v747_v45 = vpop.f32.mrf.mxu2  ;;  %v667_v51 = vpop.f32.mrf.mxu1 }
  0xda   : > { %v930_v52 = vsel %vm924_vm7, %v921_v43, %v927_v47  ;;  %v906_v53 = vmul.f32 %v1306_v29, %v899_v48  ;;  %v673_v12 = vadd.f32 %v667_v51, %v611_v46 }
  0xdb   : > { %v933_v18 = vpack.c.bf16 %v930_v52, %v930_v52 }
  0xdc   : > { %v913_v55 = vadd.f32 %v1307_v23, %v906_v53  ;;  %v751_v56 = vadd.f32 %v745_v31, %v673_v12 }
  0xdd   : > { %937 = vst.msk [vmem:[%s244_s13] sm:$0xf] %vm936_vm8, %v933_v18 }
  0xde   : > { %v922_v57 = vadd.f32 %v1290_v54, %v913_v55  ;;  %v833_v58 = vadd.f32 %v827_v35, %v751_v56 }
  0xe0   : > { %vm925_vm9 = vcmp.ge.f32.partialorder %v922_v57, 0.0  ;;  %v928_v60 = vmul.f32 0.2, %v922_v57  ;;  %v900_v61 = vadd.f32 %v894_v49, %v833_v58  ;;  %v896_v62 = vpop.f32.mrf.mxu0 }
  0xe1   : > { %v669_v63 = vpop.f32.mrf.mxu1 }
  0xe2   : > { %v931_v0 = vsel %vm925_vm9, %v922_v57, %v928_v60  ;;  %v907_v10 = vmul.f32 %v1306_v29, %v900_v61 }
  0xe3   : > { %v934_v1 = vpack.c.bf16 %v931_v0, %v931_v0 }
  0xe4   : > { %v914_v2 = vadd.f32 %v1307_v23, %v907_v10 }
  0xe5   : > { %938 = vst.msk [vmem:[%s244_s13 + $0x4] sm:$0xf] %vm936_vm8, %v934_v1 }
  0xe6   : > { %v923_v3 = vadd.f32 %v920_v26, %v914_v2 }
  0xe8   : > { %vm926_vm10 = vcmp.ge.f32.partialorder %v923_v3, 0.0  ;;  %v929_v4 = vmul.f32 0.2, %v923_v3 }
  0xea   : > { %v932_v5 = vsel %vm926_vm10, %v923_v3, %v929_v4 }
  0xeb   : > { %v935_v6 = vpack.c.bf16 %v932_v5, %v932_v5 }
  0xed   : > { %939 = vst.msk [vmem:[%s244_s13 + $0x8] sm:$0xf] %vm936_vm8, %v935_v6 }
  0xee PF: > { %s15_s18 = sadd.s32 1, %s1314_s18  }
  0xef   : > { %p12_p4 = scmp.ge.s32.totalorder %s15_s18, 4  }
  0xf1   :  { %14 = sbr.rel (!%p12_p4) target bundleno = 1 (0x1), region = 81 }

// kernel: net_forward.16
= control target key start
LH: loop header
LB: loop body
LE: loop exit
PB: predicated region body
PF: predicated region fallthrough
CT: control target
= control target key end

     0   :  { %s1552_s15 = smov 0   ;;  %s1851_s0 = inlined_call_operand.vmem [shape: bf16[2,110,64], index: 0, kind: input, shape index: {}]   ;;  %s1852_s1 = inlined_call_operand.vmem [shape: bf16[9,64,64], index: 1, kind: input, shape index: {}]   ;;  %s1853_s2 = inlined_call_operand.vmem [shape: f32[1,64], index: 2, kind: input, shape index: {}]   ;;  %s1854_s3 = inlined_call_operand.vmem [shape: f32[1,64], index: 3, kind: input, shape index: {}]   ;;  %s1855_s4 = inlined_call_operand.vmem [shape: bf16[2,40,64], index: 4, kind: output, shape index: {}]  }
   0x1 LB: > { %s1157_s16 = sadd.s32 4294967295, %s1525_s15   ;;  %p1161_p0 = scmp.ge.s32.totalorder %s1525_s15, 1  ;;  %s1525_s15 = sphi %s1552_s15, %s14_s15  }
   0x2   : > { %p162_p1 = scmp.lt.s32.totalorder %s1525_s15, 3 }
   0x4   : > { %p163_p2 = pnand %p1161_p0, %p162_p1 }
   0x5   : > { %p188_p3 = scmp.lt.s32.totalorder (!%p163_p2), %s1157_s16, 1 }
   0x6   : > { %166 = sbr.rel (%p163_p2) target bundleno = 271 (0x10f), region = 36 }
   0xb   : > { %v1445_v0 = vld [vmem:[%s1852_s1 + $0x38] sm:$0xff]  ;;  %v1444_v2 = vld [vmem:[%s1852_s1 + $0x30] sm:$0xff]  ;;  %s1857_s16 = smov (!%p188_p3, %s1157_s16), 1  ;;  %v1443_v4 = vld [vmem:[%s1852_s1 + $0x28] sm:$0xff]  ;;  %vm289_vm0 = vcmask 523264   ;;  %vm398_vm1 = vcmask 1044480  }
   0xc   : > { %v1456_v1 = vld [vmem:[%s1852_s1 + $0x78] sm:$0xff]  ;;  %1495 = vmatpush.bf16.msra.mxu2 %v1445_v0  ;;  %1494 = vmatpush.bf16.msra.mxu1 %v1445_v0  ;;  %v1455_v3 = vld [vmem:[%s1852_s1 + $0x70] sm:$0xff]  ;;  %s1502_s25 = smul.u32 56, %s1857_s16  ;;  %v1454_v5 = vld [vmem:[%s1852_s1 + $0x68] sm:$0xff]  ;;  %vm238_vm2 = vsmask.f32 6400 }
   0xd   : > { %303 = vmatpush.bf16.msra.mxu0 %v1445_v0  ;;  %537 = vmatpush.bf16.msra.mxu3 %v1456_v1  ;;  %v1442_v20 = vld [vmem:[%s1852_s1 + $0x20] sm:$0xff]  ;;  %v1449_v23 = vld [vmem:[%s1852_s1 + $0x58] sm:$0xff]  ;;  %v1448_v42 = vld [vmem:[%s1852_s1 + $0x50] sm:$0xff]  ;;  %vm591_vm3 = vsmask.f32 7424  ;;  %vm693_vm5 = vcmask 1045504  }
   0xe   : > { %s1581_s30 = scalar_lea.vmem %s1851_s0, %s1502_s25  ;;  %v1441_v29 = vld [vmem:[%s1852_s1 + $0x18] sm:$0xff]  ;;  %v1453_v33 = vld [vmem:[%s1852_s1 + $0x60] sm:$0xff]  ;;  %v1440_v43 = vld [vmem:[%s1852_s1 + $0x10] sm:$0xff]  ;;  %vm873_vm4 = vsmask.f32 4352  ;;  %vm991_vm6 = vcmask 1046528  }
   0xf   : > { %v203_v6 = vld [vmem:[%s1581_s30 + $0x10] sm:$0xf]  ;;  %v213_v7 = vld [vmem:[%s1581_s30 + $0x14] sm:$0x3]  ;;  %v1589_v8 = vld [vmem:[%s1581_s30 + $0x8] sm:$0xff]  ;;  %s1503_s26 = smul.u32 20, %s1857_s16 }
  0x10   : > { %1497 = vmatpush.bf16.msra.mxu2 %v1444_v2  ;;  %1496 = vmatpush.bf16.msra.mxu1 %v1444_v2  ;;  %v1591_v9 = vunpack.c.l.b16 %v203_v6  ;;  %v234_v10 = vunpack.c.l.b16 %v213_v7  ;;  %v1594_v11 = vld [vmem:[%s1581_s30] sm:$0xff]   ;;  %v1251_v13 = vld [vmem:[%s1581_s30 + $0xc] sm:$0x8]  ;;  %v248_v14 = vshrl.u32 %v1589_v8, 16  ;;  %v251_v15 = vshll.u32 %v1589_v8, 16  ;;  %v1603_v19 = vld [vmem:[%s1581_s30 + $0x14] sm:$0xff] }
  0x11   : > { %304 = vmatpush.bf16.msra.mxu0 %v1444_v2  ;;  %538 = vmatpush.bf16.msra.mxu3 %v1455_v3  ;;  %v212_v12 = vld [vmem:[%s1581_s30] sm:$0xe]  ;;  %v1485_v16 = vunpack.c.h.b16 %v1594_v11  ;;  %v1450_v18 = vld [vmem:[%s1581_s30 + $0xc] sm:$0xf0]  ;;  %v1461_v30 = vld [vmem:[%s1852_s1 + $0x98] sm:$0xff]  ;;  %v496_v34 = vrot.slane %v1603_v19, 3  ;;  %s1822_s29 = scalar_lea.vmem %s1855_s4, %s1503_s26 }
  0x12   : > { %v229_v17 = vunpack.c.l.b16 %v212_v12  ;;  %v237_v21 = vpack.c.b16 %v234_v10, %v1591_v9  ;;  %v1252_v22 = vor.u32 %v1450_v18, %v1251_v13  ;;  %v250_v24 = vrot.slane %v248_v14, 1  ;;  %v1474_v39 = vld [vmem:[%s1852_s1 + $0xf8] sm:$0xff]  ;;  %v381_v45 = vld [vmem:[%s1581_s30] sm:$0x8]  ;;  %v1460_v47 = vld [vmem:[%s1852_s1 + $0x90] sm:$0xff] }
  0x13   : > { %v253_v25 = vrot.slane %v251_v15, 2  ;;  %v1490_v50 = vld [vmem:[%s1581_s30 + $0x10] sm:$0xff]   ;;  %v1447_v53 = vld [vmem:[%s1852_s1 + $0x48] sm:$0xff]  ;;  %v394_v54 = vunpack.c.l.b16 %v381_v45  ;;  %v1660_v57 = vld [vmem:[%s1581_s30 + $0x18] sm:$0xff]  ;;  %v400_v13 = vrot.slane %v1589_v8, 3  ;;  %vm1096_vm8 = vcmask 519168  }
  0x14   : > { %1499 = vmatpush.bf16.msra.mxu2 %v1443_v4  ;;  %1498 = vmatpush.bf16.msra.mxu1 %v1443_v4  ;;  %v235_v26 = vpack.c.b16 %v1485_v16, %v229_v17  ;;  %v257_v27 = vshrl.u32 %v237_v21, 16  ;;  %v260_v28 = vshll.u32 %v237_v21, 16  ;;  %v495_v38 = vrot.slane %v1252_v22, 3  ;;  %v1473_v51 = vld [vmem:[%s1852_s1 + $0xf0] sm:$0xff]  ;;  %v1439_v55 = vld [vmem:[%s1852_s1 + $0x8] sm:$0xff]  ;;  %v1446_v60 = vld [vmem:[%s1852_s1 + $0x40] sm:$0xff] }
  0x15   : > { %305 = vmatpush.bf16.msra.mxu0 %v1443_v4  ;;  %539 = vmatpush.bf16.msra.mxu3 %v1454_v5  ;;  %v254_v37 = vor.u32 %v253_v25, %v250_v24  ;;  %v1459_v56 = vld [vmem:[%s1852_s1 + $0x88] sm:$0xff]  ;;  %v595_v58 = vshll.u32 %v1490_v50, 16  ;;  %v396_v61 = vpack.c.b16 %v1485_v16, %v394_v54  ;;  %v1259_v62 = vld [vmem:[%s1581_s30 + $0x1c] sm:$0xf]  ;;  %v1452_v63 = vld [vmem:[%s1581_s30 + $0x1c] sm:$0x70] }
  0x16   : > { %v240_v31 = vshrl.u32 %v235_v26, 16  ;;  %v243_v32 = vshll.u32 %v235_v26, 16  ;;  %v259_v35 = vrot.slane %v257_v27, 1  ;;  %v262_v36 = vrot.slane %v260_v28, 2  ;;  %v1472_v59 = vld [vmem:[%s1852_s1 + $0xe8] sm:$0xff]  ;;  %v1438_v0 = vld [vmem:[%s1852_s1] sm:$0xff] }
  0x17   : > { %v497_v49 = vsel %vm398_vm1, %v495_v38, %v496_v34  ;;  %v1470_v1 = vld [vmem:[%s1852_s1 + $0xd8] sm:$0xff]  ;;  %v1458_v2 = vld [vmem:[%s1852_s1 + $0x80] sm:$0xff]  ;;  %v593_v3 = vshrl.u32 %v1490_v50, 16  ;;  %v597_v4 = vrot.slane %v595_v58, 1  ;;  %v600_v5 = vshll.u32 %v1660_v57, 16  ;;  %v1469_v14 = vld [vmem:[%s1852_s1 + $0xd0] sm:$0xff] }
  0x18   : > { %1501 = vmatpush.bf16.msra.mxu2 %v1442_v20  ;;  %1500 = vmatpush.bf16.msra.mxu1 %v1442_v20  ;;  %v242_v40 = vrot.slane %v240_v31, 1  ;;  %v245_v41 = vrot.slane %v243_v32, 2  ;;  %v263_v44 = vor.u32 %v262_v36, %v259_v35  ;;  %v1465_v6 = vld [vmem:[%s1852_s1 + $0xb8] sm:$0xff]  ;;  %v1260_v7 = vor.u32 %v1452_v63, %v1259_v62  ;;  %v1464_v17 = vld [vmem:[%s1852_s1 + $0xb0] sm:$0xff]  ;;  %v566_v21 = vld [vmem:[%s1581_s30 + $0x24] sm:$0x1] }
  0x19   : > { %306 = vmatpush.bf16.msra.mxu0 %v1442_v20  ;;  %540 = vmatpush.bf16.msra.mxu3 %v1453_v33  ;;  %v1481_v10 = vld [vmem:[%s1852_s1 + $0x118] sm:$0xff]  ;;  %v399_v12 = vrot.slane %v396_v61, 3  ;;  %v598_v15 = vor.u32 %v597_v4, %v593_v3  ;;  %v602_v16 = vrot.slane %v600_v5, 1  ;;  %v1696_v20 = vld [vmem:[%s1581_s30 + $0x20] sm:$0xf]  ;;  %v1480_v22 = vld [vmem:[%s1852_s1 + $0x110] sm:$0xff]  ;;  %v587_v28 = vunpack.c.l.b16 %v566_v21 }
  0x1a   : > { %v246_v46 = vor.u32 %v245_v41, %v242_v40  ;;  %v264_v48 = vsel %vm238_vm2, %v254_v37, %v263_v44  ;;  %v498_v18 = vrot.slane %v1260_v7, 3  ;;  %v382_v24 = vld [vmem:[%s1581_s30 + $0x14] sm:$0x7]  ;;  %v1468_v25 = vld [vmem:[%s1852_s1 + $0xc8] sm:$0xff]  ;;  %v586_v27 = vunpack.c.l.b16 %v1696_v20  ;;  %v1467_v33 = vld [vmem:[%s1852_s1 + $0xc0] sm:$0xff] }
  0x1b   : > { %1194 = vmatmul.msk.bf16.vlgmr.msra.gmra.mxu2 %vm289_vm0, %v263_v44  ;;  %1193 = vmatmul.msk.bf16.vlgmr.msra.gmra.mxu1 %vm289_vm0, %v264_v48  ;;  %v603_v26 = vsel %vm591_vm3, %v598_v15, %v602_v16  ;;  %v395_v31 = vunpack.c.l.b16 %v382_v24  ;;  %v1479_v32 = vld [vmem:[%s1852_s1 + $0x108] sm:$0xff]  ;;  %v1471_v19 = vld [vmem:[%s1852_s1 + $0xe0] sm:$0xff]  ;;  %v856_v41 = vld [vmem:[%s1581_s30 + $0x1c] sm:$0x8]  ;;  %v325_v63 = vpack.c.b16 %v1591_v9, %v1591_v9 }
  0x1c   : > { %441 = vmatpush.bf16.msrb.mxu2 %v1449_v23  ;;  %362 = vmatpush.bf16.msrb.mxu1 %v1441_v29  ;;  %v255_v52 = vsel %vm238_vm2, %v246_v46, %v254_v37  ;;  %v401_v23 = vsel %vm398_vm1, %v399_v12, %v400_v13  ;;  %v1463_v29 = vld [vmem:[%s1852_s1 + $0xa8] sm:$0xff]  ;;  %v1478_v35 = vld [vmem:[%s1852_s1 + $0x100] sm:$0xff]  ;;  %v604_v37 = vshrl.u32 %v1660_v57, 16  ;;  %v869_v45 = vunpack.c.l.b16 %v856_v41  ;;  %v1491_v4 = vld [vmem:[%s1581_s30 + $0x10] sm:$0xf0] }
  0x1d   : > { %652 = vmatpush.bf16.msrb.mxu0 %v1461_v30  ;;  %937 = vmatpush.bf16.msrb.mxu3 %v1474_v39  ;;  %v499_v30 = vsel %vm398_vm1, %v496_v34, %v498_v18  ;;  %v1462_v34 = vld [vmem:[%s1852_s1 + $0xa0] sm:$0xff]  ;;  %v397_v36 = vpack.c.b16 %v395_v31, %v1591_v9  ;;  %v1492_v5 = vld [vmem:[%s1581_s30 + $0x10] sm:$0xc] }
  0x1e   : > { %1192 = vmatmul.msk.bf16.vlgmr.msra.gmra.mxu0 %vm289_vm0, %v255_v52  ;;  %1277 = vmatmul.msk.bf16.vlgmr.msra.gmra.mxu3 %vm289_vm0, %v497_v49  ;;  %v761_v40 = vld [vmem:[%s1581_s30 + $0x20] sm:$0xf]  ;;  %v1745_v48 = vld [vmem:[%s1581_s30 + $0x24] sm:$0xff] }
  0x1f   : > { %v402_v39 = vrot.slane %v397_v36, 3  ;;  %v782_v44 = vunpack.c.l.b16 %v761_v40  ;;  %v883_v52 = vshrl.u32 %v1745_v48, 16  ;;  %v1475_v7 = vld [vmem:[%s1581_s30 + $0x20] sm:$0xf0]  ;;  %v791_v21 = vrot.slane %v1745_v48, 2 }
  0x20   : > { %442 = vmatpush.bf16.msrb.mxu2 %v1448_v42  ;;  %363 = vmatpush.bf16.msrb.mxu1 %v1440_v43  ;;  %v606_v42 = vor.u32 %v604_v37, %v602_v16 }
  0x21   : > { %653 = vmatpush.bf16.msrb.mxu0 %v1460_v47  ;;  %938 = vmatpush.bf16.msrb.mxu3 %v1473_v51  ;;  %v403_v46 = vsel %vm398_vm1, %v400_v13, %v402_v39  ;;  %v871_v49 = vpack.c.b16 %v782_v44, %v869_v45  ;;  %v1493_v13 = vor.u32 %v1492_v5, %v1491_v4 }
  0x23   : > { %v875_v50 = vshrl.u32 %v871_v49, 16  ;;  %v878_v51 = vshll.u32 %v871_v49, 16 }
  0x24   : > { %443 = vmatpush.bf16.msrb.mxu2 %v1447_v53  ;;  %364 = vmatpush.bf16.msrb.mxu1 %v1439_v55  ;;  %v886_v53 = vshll.u32 %v1745_v48, 16 }
  0x25   : > { %654 = vmatpush.bf16.msrb.mxu0 %v1459_v56  ;;  %939 = vmatpush.bf16.msrb.mxu3 %v1472_v59  ;;  %v877_v54 = vrot.slane %v875_v50, 3  ;;  %v880_v55 = vrot.slane %v878_v51, 4  ;;  %v885_v56 = vrot.slane %v883_v52, 3  ;;  %v764_v59 = vld [vmem:[%s1581_s30 + $0x2c] sm:$0xff]  }
  0x26   : > { %v888_v58 = vrot.slane %v886_v53, 4  ;;  %v892_v9 = vshrl.u32 %v764_v59, 16 }
  0x27   : > { %v881_v61 = vor.u32 %v880_v55, %v877_v54 }
  0x28   : > { %444 = vmatpush.bf16.msrb.mxu2 %v1446_v60  ;;  %365 = vmatpush.bf16.msrb.mxu1 %v1438_v0  ;;  %v1516_v60 = vld [vmem:[%s1581_s30 + $0x2c] sm:$0xf]   ;;  %v889_v62 = vor.u32 %v888_v58, %v885_v56  ;;  %v894_v16 = vrot.slane %v892_v9, 3 }
  0x29   : > { %655 = vmatpush.bf16.msrb.mxu0 %v1458_v2  ;;  %940 = vmatpush.bf16.msrb.mxu3 %v1471_v19  ;;  %v1414_v19 = vld [vmem:[%s1581_s30 + $0x30] sm:$0xf] }
  0x2a   : > { %v890_v2 = vsel %vm873_vm4, %v881_v61, %v889_v62 }
  0x2b   : > { %1238 = vmatmul.msk.bf16.vlgmr.msrb.gmra.mxu2 %vm289_vm0, %v401_v23  ;;  %1211 = vmatmul.msk.bf16.vlgmr.msrb.gmra.mxu1 %vm289_vm0, %v1594_v11  ;;  %v590_v11 = vpack.c.b16 %v587_v28, %v586_v27  ;;  %v695_v23 = vrot.slane %v1660_v57, 2 }
  0x2c   : > { %832 = vmatpush.bf16.msra.mxu2 %v1470_v1  ;;  %736 = vmatpush.bf16.msra.mxu1 %v1465_v6  ;;  %v760_v1 = vld [vmem:[%s1581_s30 + $0x1c] sm:$0xc]  ;;  %v1406_v6 = vld [vmem:[%s1581_s30 + $0x20] sm:$0xe] }
  0x2d   : > { %1034 = vmatpush.bf16.msra.mxu0 %v1481_v10  ;;  %v608_v38 = vshll.u32 %v590_v11, 16  ;;  %v781_v3 = vunpack.c.l.b16 %v760_v1  ;;  %v895_v10 = vshll.u32 %v764_v59, 16  ;;  %v1407_v15 = vor.u32 %v1475_v7, %v1406_v6 }
  0x2e   : > { %1308 = vmatmul.msk.bf16.vlgmr.msrb.gmra.mxu0 %vm289_vm0, %v603_v26  ;;  %1278 = vmatmul.msk.bf16.gmra.mxu3 %vm289_vm0, %v499_v30  ;;  %v1522_v30 = vld [vmem:[%s1581_s30 + $0x2c] sm:$0x30] }
  0x2f   : > { %v610_v43 = vrot.slane %v608_v38, 1  ;;  %v787_v12 = vpack.c.b16 %v782_v44, %v781_v3  ;;  %v992_v24 = vrot.slane %v1407_v15, 1 }
  0x30   : > { %833 = vmatpush.bf16.msra.mxu2 %v1469_v14  ;;  %737 = vmatpush.bf16.msra.mxu1 %v1464_v17  ;;  %v1476_v14 = vld [vmem:[%s1581_s30 + $0x28] sm:$0xff]  ;;  %v897_v17 = vrot.slane %v895_v10, 4 }
  0x31   : > { %1035 = vmatpush.bf16.msra.mxu0 %v1480_v22  ;;  %v611_v47 = vsel %vm591_vm3, %v606_v42, %v610_v43  ;;  %v694_v22 = vrot.slane %v1493_v13, 2 }
  0x32   : > { %v898_v26 = vor.u32 %v897_v17, %v894_v16 }
  0x34   : > { %834 = vmatpush.bf16.msra.mxu2 %v1468_v25  ;;  %738 = vmatpush.bf16.msra.mxu1 %v1463_v29  ;;  %v993_v25 = vrot.slane %v1476_v14, 1  ;;  %v696_v29 = vsel %vm693_vm5, %v694_v22, %v695_v23 }
  0x35   : > { %1036 = vmatpush.bf16.msra.mxu0 %v1479_v32  ;;  %v677_v32 = vld [vmem:[%s1581_s30 + $0x24] sm:$0x3] }
  0x36   : > { %v994_v31 = vsel %vm991_vm6, %v992_v24, %v993_v25  ;;  %v690_v57 = vunpack.c.l.b16 %v677_v32 }
  0x38   : > { %835 = vmatpush.bf16.msra.mxu2 %v1467_v33  ;;  %739 = vmatpush.bf16.msra.mxu1 %v1462_v34  ;;  %v899_v33 = vsel %vm873_vm4, %v889_v62, %v898_v26  ;;  %v1517_v34 = vor.u32 %v1522_v30, %v1516_v60 }
  0x39   : > { %1037 = vmatpush.bf16.msra.mxu0 %v1478_v35  ;;  %v692_v35 = vpack.c.b16 %v690_v57, %v586_v27  ;;  %v1814_v57 = vld [vmem:[%s1854_s3] ss:$0 sm:$0xff] }
  0x3a   : > { %v793_v37 = vrot.slane %v1517_v34, 2 }
  0x3b   : > { %1239 = vmatmul.msk.bf16.gmra.mxu2 %vm289_vm0, %v403_v46  ;;  %1212 = vmatmul.msk.bf16.gmra.mxu1 %vm289_vm0, %v1589_v8  ;;  %v612_v8 = vshrl.u32 %v590_v11, 16  ;;  %v1477_v11 = vld [vmem:[%s1581_s30 + $0x30] sm:$0x10]  ;;  %v697_v38 = vrot.slane %v692_v35, 2 }
  0x3c   : > { %v1415_v36 = vor.u32 %v1477_v11, %v1414_v19  ;;  %v794_v40 = vsel %vm693_vm5, %v791_v21, %v793_v37 }
  0x3d   : > { %v614_v0 = vor.u32 %v612_v8, %v610_v43  ;;  %v698_v41 = vsel %vm693_vm5, %v695_v23, %v697_v38 }
  0x3e   : > { %1309 = vmatmul.msk.bf16.gmra.mxu0 %vm289_vm0, %v611_v47  ;;  %1279 = vmatmul.msk.bf16.gmra.mxu3 %vm289_vm0, %v498_v18  ;;  %v790_v18 = vrot.slane %v787_v12, 2 }
  0x40   : > { %v792_v28 = vsel %vm693_vm5, %v790_v18, %v791_v21 }
  0x4b   : > { %1240 = vmatmul.msk.bf16.gmra.mxu2 %vm289_vm0, %v402_v39  ;;  %1213 = vmatmul.msk.bf16.gmra.mxu1 %vm289_vm0, %v325_v63  ;;  %v995_v39 = vrot.slane %v1415_v36, 1 }
  0x4d   : > { %v996_v42 = vsel %vm991_vm6, %v993_v25, %v995_v39 }
  0x4e   : > { %1310 = vmatmul.msk.bf16.gmra.mxu0 %vm289_vm0, %v614_v0  ;;  %1393 = vmatmul.msk.bf16.vlgmr.msrb.gmra.mxu3 %vm289_vm0, %v890_v2 }
  0x5b   : > { %1366 = vmatmul.msk.bf16.vlgmr.msra.gmra.mxu2 %vm289_vm0, %v792_v28  ;;  %1335 = vmatmul.msk.bf16.vlgmr.msra.gmra.mxu1 %vm289_vm0, %v696_v29  ;;  %v1809_v28 = vld [vmem:[%s1853_s2] ss:$0 sm:$0xff] }
  0x5e   : > { %1432 = vmatmul.msk.bf16.vlgmr.msra.gmra.mxu0 %vm289_vm0, %v994_v31  ;;  %1394 = vmatmul.msk.bf16.gmra.mxu3 %vm289_vm0, %v899_v33 }
  0x6b   : > { %1367 = vmatmul.msk.bf16.gmra.mxu2 %vm289_vm0, %v794_v40  ;;  %1336 = vmatmul.msk.bf16.gmra.mxu1 %vm289_vm0, %v698_v41 }
  0x6e   : > { %1433 = vmatmul.msk.bf16.gmra.mxu0 %vm289_vm0, %v996_v42  ;;  %1395 = vmatmul.msk.bf16.gmra.mxu3 %vm289_vm0, %v898_v26 }
  0x7b   : > { %1368 = vmatmul.msk.bf16.gmra.mxu2 %vm289_vm0, %v793_v37  ;;  %1337 = vmatmul.msk.bf16.gmra.mxu1 %vm289_vm0, %v697_v38 }
  0x7e   : > { %1434 = vmatmul.msk.bf16.gmra.mxu0 %vm289_vm0, %v995_v39 }
  0x98   : > { %v313_v20 = vpop.f32.mrf.mxu1 }
  0x9b   : > { %v308_v27 = vpop.f32.mrf.mxu0 }
  0x9e   : > { %v1794_v43 = vpop.f32.mrf.mxu2 }
  0xa0   : > { %v315_v44 = vpop.f32.mrf.mxu1 }
  0xa1   : > { %v542_v45 = vpop.f32.mrf.mxu3 }
  0xa3   : > { %v310_v46 = vpop.f32.mrf.mxu0 }
  0xa6   : > { %v320_v47 = vpop.f32.mrf.mxu2 }
  0xa8   : > { %v367_v48 = vpop.f32.mrf.mxu1 }
  0xa9   : > { %v544_v49 = vpop.f32.mrf.mxu3  ;;  %v368_v4 = vadd.f32 %v367_v48, %v308_v27 }
  0xab   : > { %v657_v50 = vpop.f32.mrf.mxu0 }
  0xae   : > { %v446_v51 = vpop.f32.mrf.mxu2 }
  0xaf   : > { %v460_v9 = vadd.f32 %v446_v51, %v368_v4 }
  0xb0   : > { %v369_v52 = vpop.f32.mrf.mxu1 }
  0xb1   : > { %v547_v53 = vpop.f32.mrf.mxu3  ;;  %v556_v12 = vadd.f32 %v542_v45, %v460_v9  ;;  %v370_v13 = vadd.f32 %v369_v52, %v310_v46 }
  0xb3   : > { %v659_v54 = vpop.f32.mrf.mxu0  ;;  %v671_v18 = vadd.f32 %v657_v50, %v556_v12 }
  0xb6   : > { %v448_v55 = vpop.f32.mrf.mxu2 }
  0xb7   : > { %v461_v17 = vadd.f32 %v448_v55, %v370_v13 }
  0xb8   : > { %v372_v56 = vpop.f32.mrf.mxu1 }
  0xb9   : > { %v1796_v58 = vpop.f32.mrf.mxu3  ;;  %v557_v23 = vadd.f32 %v544_v49, %v461_v17  ;;  %v373_v25 = vadd.f32 %v372_v56, %v313_v20 }
  0xbb   : > { %v662_v59 = vpop.f32.mrf.mxu0  ;;  %v672_v19 = vadd.f32 %v659_v54, %v557_v23 }
  0xbe   : > { %v451_v60 = vpop.f32.mrf.mxu2 }
  0xbf   : > { %v462_v31 = vadd.f32 %v451_v60, %v373_v25 }
  0xc0   : > { %v374_v8 = vpop.f32.mrf.mxu1 }
  0xc1   : > { %v1798_v61 = vpop.f32.mrf.mxu3  ;;  %v558_v35 = vadd.f32 %v547_v53, %v462_v31  ;;  %v375_v39 = vadd.f32 %v374_v8, %v315_v44 }
  0xc3   : > { %v1800_v62 = vpop.f32.mrf.mxu0  ;;  %v673_v27 = vadd.f32 %v662_v59, %v558_v35 }
  0xc6   : > { %v453_v63 = vpop.f32.mrf.mxu2 }
  0xc7   : > { %v463_v46 = vadd.f32 %v453_v63, %v375_v39 }
  0xc8   : > { %v377_v0 = vpop.f32.mrf.mxu1 }
  0xc9   : > { %v554_v1 = vpop.f32.mrf.mxu3  ;;  %v559_v52 = vadd.f32 %v1796_v58, %v463_v46  ;;  %v378_v55 = vadd.f32 %v377_v0, %v1794_v43 }
  0xcb   : > { %v1802_v2 = vpop.f32.mrf.mxu0 }
  0xce   : > { %v1804_v3 = vpop.f32.mrf.mxu2 }
  0xcf   : > { %v464_v1 = vadd.f32 %v1804_v3, %v378_v55 }
  0xd0   : > { %v379_v5 = vpop.f32.mrf.mxu1 }
  0xd1   : > { %v942_v6 = vpop.f32.mrf.mxu3  ;;  %v560_v43 = vadd.f32 %v1798_v61, %v464_v1 }
  0xd3   : > { %v669_v7 = vpop.f32.mrf.mxu0 }
  0xd6   : > { %v458_v10 = vpop.f32.mrf.mxu2 }
  0xd8   : > { %v741_v14 = vpop.f32.mrf.mxu1 }
  0xd9   : > { %v944_v15 = vpop.f32.mrf.mxu3  ;;  %v755_v21 = vadd.f32 %v741_v14, %v671_v18  ;;  %v675_v18 = vadd.f32 %v1802_v2, %v560_v43 }
  0xdb   : > { %v1039_v16 = vpop.f32.mrf.mxu0 }
  0xde   : > { %v837_v22 = vpop.f32.mrf.mxu2 }
  0xdf   : > { %v851_v24 = vadd.f32 %v837_v22, %v755_v21 }
  0xe0   : > { %v743_v29 = vpop.f32.mrf.mxu1 }
  0xe1   : > { %v956_v26 = vadd.f32 %v942_v6, %v851_v24  ;;  %v947_v30 = vpop.f32.mrf.mxu3  ;;  %v756_v34 = vadd.f32 %v743_v29, %v672_v19  ;;  %v674_v6 = vadd.f32 %v1800_v62, %v559_v52 }
  0xe3   : > { %v1041_v32 = vpop.f32.mrf.mxu0  ;;  %v1053_v33 = vadd.f32 %v1039_v16, %v956_v26 }
  0xe5   : > { %v1062_v11 = vmul.f32 %v1809_v28, %v1053_v33 }
  0xe6   : > { %v839_v36 = vpop.f32.mrf.mxu2 }
  0xe7   : > { %v1071_v37 = vadd.f32 %v1814_v57, %v1062_v11  ;;  %v852_v38 = vadd.f32 %v839_v36, %v756_v34 }
  0xe8   : > { %v746_v42 = vpop.f32.mrf.mxu1 }
  0xe9   : > { %vm1076_vm7 = vcmp.ge.f32.partialorder %v1071_v37, 0.0  ;;  %v1081_v40 = vmul.f32 0.2, %v1071_v37  ;;  %v957_v41 = vadd.f32 %v944_v15, %v852_v38  ;;  %v949_v20 = vpop.f32.mrf.mxu3  ;;  %v757_v50 = vadd.f32 %v746_v42, %v673_v27 }
  0xeb   : > { %v1044_v45 = vpop.f32.mrf.mxu0  ;;  %v1086_v47 = vsel %vm1076_vm7, %v1071_v37, %v1081_v40  ;;  %v1054_v48 = vadd.f32 %v1041_v32, %v957_v41 }
  0xec   : > { %v1091_v49 = vpack.c.bf16 %v1086_v47, %v1086_v47 }
  0xed   : > { %v1063_v44 = vmul.f32 %v1809_v28, %v1054_v48 }
  0xee   : > { %1097 = vst.msk [vmem:[%s1822_s29] sm:$0xf] %vm1096_vm8, %v1091_v49  ;;  %v842_v51 = vpop.f32.mrf.mxu2 }
  0xef   : > { %v1072_v53 = vadd.f32 %v1814_v57, %v1063_v44  ;;  %v853_v54 = vadd.f32 %v842_v51, %v757_v50 }
  0xf0   : > { %v748_v60 = vpop.f32.mrf.mxu1 }
  0xf1   : > { %vm1077_vm9 = vcmp.ge.f32.partialorder %v1072_v53, 0.0  ;;  %v1082_v56 = vmul.f32 0.2, %v1072_v53  ;;  %v958_v59 = vadd.f32 %v947_v30, %v853_v54  ;;  %v952_v8 = vpop.f32.mrf.mxu3  ;;  %v758_v9 = vadd.f32 %v748_v60, %v674_v6 }
  0xf3   : > { %v1046_v63 = vpop.f32.mrf.mxu0  ;;  %v1087_v4 = vsel %vm1077_vm9, %v1072_v53, %v1082_v56  ;;  %v1055_v5 = vadd.f32 %v1044_v45, %v958_v59 }
  0xf4   : > { %v1092_v7 = vpack.c.bf16 %v1087_v4, %v1087_v4 }
  0xf5   : > { %v1064_v58 = vmul.f32 %v1809_v28, %v1055_v5 }
  0xf6   : > { %1098 = vst.msk [vmem:[%s1822_s29 + $0x4] sm:$0xf] %vm1096_vm8, %v1092_v7  ;;  %v844_v10 = vpop.f32.mrf.mxu2 }
  0xf7   : > { %v1073_v0 = vadd.f32 %v1814_v57, %v1064_v58  ;;  %v854_v12 = vadd.f32 %v844_v10, %v758_v9 }
  0xf8   : > { %v751_v14 = vpop.f32.mrf.mxu1 }
  0xf9   : > { %vm1078_vm10 = vcmp.ge.f32.partialorder %v1073_v0, 0.0  ;;  %v1083_v13 = vmul.f32 0.2, %v1073_v0  ;;  %v959_v3 = vadd.f32 %v949_v20, %v854_v12  ;;  %v954_v15 = vpop.f32.mrf.mxu3  ;;  %v759_v23 = vadd.f32 %v751_v14, %v675_v18 }
  0xfb   : > { %v1049_v16 = vpop.f32.mrf.mxu0  ;;  %v1088_v62 = vsel %vm1078_vm10, %v1073_v0, %v1083_v13  ;;  %v1056_v17 = vadd.f32 %v1046_v63, %v959_v3 }
  0xfc   : > { %v1093_v21 = vpack.c.bf16 %v1088_v62, %v1088_v62 }
  0xfd   : > { %v1065_v22 = vmul.f32 %v1809_v28, %v1056_v17 }
  0xfe   : > { %1099 = vst.msk [vmem:[%s1822_s29 + $0x8] sm:$0xf] %vm1096_vm8, %v1093_v21  ;;  %v847_v61 = vpop.f32.mrf.mxu2 }
  0xff   : > { %v1074_v24 = vadd.f32 %v1814_v57, %v1065_v22  ;;  %v855_v25 = vadd.f32 %v847_v61, %v759_v23 }
 0x100   : > { %v753_v30 = vpop.f32.mrf.mxu1 }
 0x101   : > { %vm1079_vm11 = vcmp.ge.f32.partialorder %v1074_v24, 0.0  ;;  %v1084_v26 = vmul.f32 0.2, %v1074_v24  ;;  %v960_v29 = vadd.f32 %v952_v8, %v855_v25 }
 0x103   : > { %v1051_v31 = vpop.f32.mrf.mxu0  ;;  %v1089_v32 = vsel %vm1079_vm11, %v1074_v24, %v1084_v26  ;;  %v1057_v33 = vadd.f32 %v1049_v16, %v960_v29 }
 0x104   : > { %v1094_v2 = vpack.c.bf16 %v1089_v32, %v1089_v32 }
 0x105   : > { %v1066_v19 = vmul.f32 %v1809_v28, %v1057_v33 }
 0x106   : > { %1100 = vst.msk [vmem:[%s1822_s29 + $0xc] sm:$0xf] %vm1096_vm8, %v1094_v2  ;;  %v849_v11 = vpop.f32.mrf.mxu2 }
 0x107   : > { %v1075_v34 = vadd.f32 %v1814_v57, %v1066_v19 }
 0x109   : > { %vm1080_vm12 = vcmp.ge.f32.partialorder %v1075_v34, 0.0  ;;  %v1085_v35 = vmul.f32 0.2, %v1075_v34 }
 0x10b   : > { %v1090_v36 = vsel %vm1080_vm12, %v1075_v34, %v1085_v35 }
 0x10c   : > { %v1095_v37 = vpack.c.bf16 %v1090_v36, %v1090_v36 }
 0x10e   : > { %1101 = vst.msk [vmem:[%s1822_s29 + $0x10] sm:$0xf] %vm1096_vm8, %v1095_v37 }
 0x10f PF: > { %s14_s15 = sadd.s32 1, %s1525_s15  }
 0x110   : > { %p11_p4 = scmp.ge.s32.totalorder %s14_s15, 4  }
 0x112   :  { %13 = sbr.rel (!%p11_p4) target bundleno = 1 (0x1), region = 74 }

// kernel: net_forward.23
= control target key start
LH: loop header
LB: loop body
LE: loop exit
PB: predicated region body
PF: predicated region fallthrough
CT: control target
= control target key end

     0   :  { %vm29_vm0 = vcmask 523264   ;;  %s386_s0 = inlined_call_operand.vmem [shape: bf16[2,16,64], index: 0, kind: input, shape index: {}]   ;;  %s387_s1 = inlined_call_operand.vmem [shape: f32[1,64], index: 1, kind: input, shape index: {}]   ;;  %s388_s2 = inlined_call_operand.vmem [shape: f32[1,64], index: 2, kind: input, shape index: {}]   ;;  %s389_s3 = inlined_call_operand.vmem [shape: f32[64,10], index: 3, kind: input, shape index: {}]   ;;  %s390_s4 = inlined_call_operand.vmem [shape: f32[1,10], index: 4, kind: input, shape index: {}]   ;;  %s391_s5 = inlined_call_operand.hbm [shape: f32[2,10], index: 5, kind: output, shape index: {}]  }
   0x1   :  { %v233_v0 = vld [vmem:[%s386_s0 + $0x8] sm:$0xff]   ;;  %v226_v1 = vld [vmem:[%s386_s0] sm:$0xff]  }
   0x2   :  { %v231_v2 = vunpack.c.l.bf16 %v233_v0  ;;  %v227_v3 = vunpack.c.l.bf16 %v226_v1 }
   0x3   :  { %10 = vsyncpa [#allocation3], 0  ;;  %v232_v6 = vunpack.c.h.bf16 %v233_v0  ;;  %v228_v7 = vunpack.c.h.bf16 %v226_v1  ;;  %v278_v10 = vmov 64.0   ;;  %v175_v43 = vld [vmem:[%s389_s3 + $0x38] sm:$0xff]  ;;  %v174_v44 = vld [vmem:[%s389_s3 + $0x30] sm:$0xff]  ;;  %vm182_vm15 = vcmask 1041409  }
   0x4   :  { %v36_v4 = vsel %vm29_vm0, %v231_v2, 0.0  ;;  %v30_v5 = vsel %vm29_vm0, %v227_v3, 0.0  ;;  %240 = vrcp.f32 %v278_v10  ;;  %194 = vmatpush.msra.mxu0 %v175_v43  ;;  %v173_v45 = vld [vmem:[%s389_s3 + $0x28] sm:$0xff]  ;;  %v172_v48 = vld [vmem:[%s389_s3 + $0x20] sm:$0xff]  ;;  %v171_v51 = vld [vmem:[%s389_s3 + $0x18] sm:$0xff]  ;;  %s280_s15 = smov [#allocation2]  }
   0x5   :  { %37 = vadd.xlane.f32.xlu1 %v36_v4  ;;  %31 = vadd.xlane.f32.xlu0 %v30_v5  ;;  %v39_v8 = vsel %vm29_vm0, %v232_v6, 0.0  ;;  %v33_v9 = vsel %vm29_vm0, %v228_v7, 0.0  ;;  %v170_v57 = vld [vmem:[%s389_s3 + $0x10] sm:$0xff]  ;;  %v169_v60 = vld [vmem:[%s389_s3 + $0x8] sm:$0xff]  ;;  %v168_v63 = vld [vmem:[%s389_s3] sm:$0xff]  ;;  %s213_s16 = sshll.u32 %s280_s15, 4  ;;  %s214_s16 = int_to_ptr.vmem [resolvable:$true] %s213_s16 }
   0x6   :  { %195 = vmatpush.msra.mxu0 %v174_v44  ;;  %s215_s19 = sshll.u32 %s391_s5, 4  ;;  %s216_s19 = int_to_ptr.hbm [resolvable:$true] %s215_s19 }
   0x8   :  { %196 = vmatpush.msra.mxu0 %v173_v45 }
   0xa   :  { %v241_v11 = vpop.eup %240  ;;  %197 = vmatpush.msra.mxu0 %v172_v48 }
   0xb   :  { %v43_v12 = vmul.f32 64.0, %v241_v11  ;;  %vm47_vm1 = vweird.f32 %v241_v11 }
   0xc   :  { %198 = vmatpush.msra.mxu0 %v171_v51 }
   0xd   :  { %40 = vadd.xlane.f32.xlu1 %v39_v8  ;;  %34 = vadd.xlane.f32.xlu0 %v33_v9  ;;  %v44_v13 = vsub.f32 1.0, %v43_v12 }
   0xe   :  { %199 = vmatpush.msra.mxu0 %v170_v57 }
   0xf   :  { %v45_v14 = vmul.f32 %v241_v11, %v44_v13 }
  0x10   :  { %200 = vmatpush.msra.mxu0 %v169_v60 }
  0x11   :  { %v46_v15 = vadd.f32 %v241_v11, %v45_v14  ;;  %v279_v14 = vmov 16.0  }
  0x12   :  { %201 = vmatpush.msra.mxu0 %v168_v63  ;;  %v239_v63 = vld [vmem:[%s390_s4] ss:$0 sm:$0xff] }
  0x13   :  { %v48_v16 = vsel %vm47_vm1, %v241_v11, %v46_v15  ;;  %v237_v15 = vld [vmem:[%s387_s1] ss:$0 sm:$0xff]  ;;  %vm206_vm1 = vcmask 74752  }
  0x78   :  { %v38_v17 = vpop.xlane.xlu1 %37  ;;  %v32_v18 = vpop.xlane.xlu0 %31 }
  0x79   :  { %v51_v19 = vmul.f32 %v48_v16, %v38_v17  ;;  %v49_v20 = vmul.f32 %v48_v16, %v32_v18 }
  0x7b   :  { %v321_v21 = vsub.f32 %v231_v2, %v51_v19  ;;  %v323_v22 = vsub.f32 %v227_v3, %v49_v20 }
  0x7d   :  { %v59_v23 = vmul.f32 %v321_v21, %v321_v21  ;;  %v57_v24 = vmul.f32 %v323_v22, %v323_v22 }
  0x7f   :  { %v67_v25 = vsel %vm29_vm0, %v59_v23, 0.0  ;;  %v61_v26 = vsel %vm29_vm0, %v57_v24, 0.0  ;;  %v238_v24 = vld [vmem:[%s388_s2] ss:$0 sm:$0xff] }
  0x80   :  { %v41_v27 = vpop.xlane.xlu1 %40  ;;  %68 = vadd.xlane.f32.xlu0 %v67_v25  ;;  %62 = vadd.xlane.f32.xlu2 %v61_v26  ;;  %v35_v28 = vpop.xlane.xlu0 %34 }
  0x81   :  { %v52_v29 = vmul.f32 %v48_v16, %v41_v27  ;;  %v50_v30 = vmul.f32 %v48_v16, %v35_v28 }
  0x83   :  { %v331_v31 = vsub.f32 %v232_v6, %v52_v29  ;;  %v333_v32 = vsub.f32 %v228_v7, %v50_v30 }
  0x85   :  { %v60_v33 = vmul.f32 %v331_v31, %v331_v31  ;;  %v58_v34 = vmul.f32 %v333_v32, %v333_v32 }
  0x87   :  { %v70_v35 = vsel %vm29_vm0, %v60_v33, 0.0  ;;  %v64_v36 = vsel %vm29_vm0, %v58_v34, 0.0 }
  0x88   :  { %71 = vadd.xlane.f32.xlu1 %v70_v35  ;;  %65 = vadd.xlane.f32.xlu2 %v64_v36 }
  0xf3   :  { %v63_v37 = vpop.xlane.xlu2 %62  ;;  %v69_v38 = vpop.xlane.xlu0 %68 }
  0xf4   :  { %v73_v39 = vmul.f32 %v63_v37, %v48_v16  ;;  %v75_v40 = vmul.f32 %v69_v38, %v48_v16 }
  0xf6   :  { %v77_v41 = vadd.f32 1e-05, %v73_v39  ;;  %v79_v42 = vadd.f32 1e-05, %v75_v40 }
  0xf8   :  { %242 = vrsqrt.f32 %v77_v41  ;;  %vm87_vm4 = vweird.f32 %v77_v41  ;;  %vm107_vm6 = vweird.f32 %v79_v42 }
  0xf9   :  { %244 = vrsqrt.f32 %v79_v42 }
  0xfb   :  { %v72_v46 = vpop.xlane.xlu1 %71  ;;  %v66_v47 = vpop.xlane.xlu2 %65 }
  0xfc   :  { %v76_v49 = vmul.f32 %v72_v46, %v48_v16  ;;  %v74_v50 = vmul.f32 %v66_v47, %v48_v16 }
  0xfe   :  { %v243_v52 = vpop.eup %242  ;;  %v80_v53 = vadd.f32 1e-05, %v76_v49  ;;  %v78_v54 = vadd.f32 1e-05, %v74_v50 }
  0xff   :  { %v245_v55 = vpop.eup %244  ;;  %v82_v56 = vmul.f32 %v243_v52, %v77_v41  ;;  %vm88_vm2 = vweird.f32 %v243_v52 }
 0x100   :  { %v102_v58 = vmul.f32 %v245_v55, %v79_v42  ;;  %246 = vrsqrt.f32 %v80_v53  ;;  %vm108_vm3 = vweird.f32 %v245_v55  ;;  %vm89_vm5 = vmor %vm87_vm4, %vm88_vm2  ;;  %vm117_vm10 = vweird.f32 %v80_v53 }
 0x101   :  { %v83_v59 = vmul.f32 %v243_v52, %v82_v56  ;;  %248 = vrsqrt.f32 %v78_v54  ;;  %vm109_vm7 = vmor %vm107_vm6, %vm108_vm3  ;;  %vm97_vm12 = vweird.f32 %v78_v54 }
 0x102   :  { %v103_v61 = vmul.f32 %v245_v55, %v102_v58  ;;  %250 = vrcp.f32 %v279_v14 }
 0x103   :  { %v84_v62 = vmul.f32 0.5, %v83_v59 }
 0x104   :  { %v104_v0 = vmul.f32 0.5, %v103_v61 }
 0x105   :  { %v85_v1 = vsub.f32 1.5, %v84_v62 }
 0x106   :  { %v247_v2 = vpop.eup %246  ;;  %v105_v3 = vsub.f32 1.5, %v104_v0 }
 0x107   :  { %v249_v4 = vpop.eup %248  ;;  %v86_v5 = vmul.f32 %v243_v52, %v85_v1  ;;  %v112_v6 = vmul.f32 %v247_v2, %v80_v53  ;;  %vm118_vm8 = vweird.f32 %v247_v2 }
 0x108   :  { %v106_v7 = vmul.f32 %v245_v55, %v105_v3  ;;  %v92_v8 = vmul.f32 %v249_v4, %v78_v54  ;;  %vm98_vm9 = vweird.f32 %v249_v4  ;;  %vm119_vm11 = vmor %vm117_vm10, %vm118_vm8  ;;  %v251_v27 = vpop.eup %250 }
 0x109   :  { %v113_v9 = vmul.f32 %v247_v2, %v112_v6  ;;  %v90_v10 = vsel %vm89_vm5, %v243_v52, %v86_v5  ;;  %vm99_vm13 = vmor %vm97_vm12, %vm98_vm9  ;;  %v160_v35 = vmul.f32 16.0, %v251_v27  ;;  %vm164_vm14 = vweird.f32 %v251_v27 }
 0x10a   :  { %v110_v11 = vsel %vm109_vm7, %v245_v55, %v106_v7  ;;  %v93_v12 = vmul.f32 %v249_v4, %v92_v8  ;;  %v121_v18 = vmul.f32 %v90_v10, %v323_v22 }
 0x10b   :  { %v114_v13 = vmul.f32 0.5, %v113_v9  ;;  %v123_v16 = vmul.f32 %v110_v11, %v321_v21  ;;  %v161_v42 = vsub.f32 1.0, %v160_v35 }
 0x10c   :  { %v94_v17 = vmul.f32 0.5, %v93_v12  ;;  %v129_v28 = vmul.f32 %v237_v15, %v121_v18 }
 0x10d   :  { %v115_v19 = vsub.f32 1.5, %v114_v13  ;;  %v131_v25 = vmul.f32 %v237_v15, %v123_v16  ;;  %v162_v47 = vmul.f32 %v251_v27, %v161_v42 }
 0x10e   :  { %v95_v20 = vsub.f32 1.5, %v94_v17  ;;  %v137_v36 = vadd.f32 %v238_v24, %v129_v28 }
 0x10f   :  { %v116_v23 = vmul.f32 %v247_v2, %v115_v19  ;;  %v139_v33 = vadd.f32 %v238_v24, %v131_v25  ;;  %v163_v52 = vadd.f32 %v251_v27, %v162_v47 }
 0x110   :  { %v96_v26 = vmul.f32 %v249_v4, %v95_v20  ;;  %v141_v43 = vsel %vm29_vm0, %v137_v36, 0.0 }
 0x111   :  { %v120_v21 = vsel %vm119_vm11, %v247_v2, %v116_v23  ;;  %v150_v40 = vsel %vm29_vm0, %v139_v33, 0.0  ;;  %v165_v57 = vsel %vm164_vm14, %v251_v27, %v163_v52 }
 0x112   :  { %v124_v22 = vmul.f32 %v120_v21, %v331_v31  ;;  %v100_v29 = vsel %vm99_vm13, %v249_v4, %v96_v26 }
 0x113   :  { %v122_v30 = vmul.f32 %v100_v29, %v333_v32 }
 0x114   :  { %v132_v34 = vmul.f32 %v237_v15, %v124_v22 }
 0x115   :  { %v130_v37 = vmul.f32 %v237_v15, %v122_v30 }
 0x116   :  { %v140_v38 = vadd.f32 %v238_v24, %v132_v34 }
 0x117   :  { %v138_v39 = vadd.f32 %v238_v24, %v130_v37 }
 0x118   :  { %v151_v41 = vsel %vm29_vm0, %v140_v38, 0.0 }
 0x119   :  { %v142_v44 = vsel %vm29_vm0, %v138_v39, 0.0  ;;  %v152_v31 = vadd.f32 %v151_v41, %v150_v40 }
 0x11a   :  { %v143_v45 = vadd.f32 %v142_v44, %v141_v43 }
 0x11b   :  { %v153_v46 = vrot.slane %v152_v31, 4 }
 0x11c   :  { %v144_v32 = vrot.slane %v143_v45, 4 }
 0x11d   :  { %v154_v48 = vadd.f32 %v153_v46, %v152_v31 }
 0x11e   :  { %v145_v49 = vadd.f32 %v144_v32, %v143_v45 }
 0x11f   :  { %v155_v50 = vrot.slane %v154_v48, 2 }
 0x120   :  { %v146_v51 = vrot.slane %v145_v49, 2 }
 0x121   :  { %v156_v53 = vadd.f32 %v155_v50, %v154_v48 }
 0x122   :  { %v147_v54 = vadd.f32 %v146_v51, %v145_v49 }
 0x123   :  { %v157_v55 = vrot.slane %v156_v53, 1 }
 0x124   :  { %v148_v56 = vrot.slane %v147_v54, 1 }
 0x125   :  { %v158_v58 = vadd.f32 %v157_v55, %v156_v53 }
 0x126   :  { %v149_v59 = vadd.f32 %v148_v56, %v147_v54 }
 0x127   :  { %v167_v60 = vmul.f32 %v165_v57, %v158_v58 }
 0x128   :  { %v166_v61 = vmul.f32 %v165_v57, %v149_v59 }
 0x12a   :  { %v183_v62 = vsel %vm182_vm15, %v167_v60, %v166_v61 }
 0x12b   :  { %224 = vmatmul.msk.f32.vlgmr.msra.gmra.mxu0 %vm29_vm0, %v183_v62 }
 0x1a8   :  { %v203_v0 = vpop.f32.mrf.mxu0 }
 0x1a9   :  { %v204_v1 = vadd.f32 %v239_v63, %v203_v0 }
 0x1ab   :  { %207 = vst.msk [vmem:[#allocation2] sm:$0x3] %vm206_vm1, %v204_v1 }
 0x1ac   :  { %218 = dma.vmem_to_hbm [thread:$0]  %s214_s16, 32, %s216_s19, [#allocation3]  }
 0x1ad   :  { %276 = dma.done.wait [#allocation3], 32  }
 0x1ae   :  { %277 = vsyncadd [#allocation3], 4294967264 }
 0x1af   :  { %223 = vsyncpa [#allocation3], 1 }

// kernel: net_forward.19
= control target key start
LH: loop header
LB: loop body
LE: loop exit
PB: predicated region body
PF: predicated region fallthrough
CT: control target
= control target key end

     0   :  { %s1465_s25 = smov 0   ;;  %s1708_s0 = inlined_call_operand.vmem [shape: bf16[2,16,64], index: 0, kind: input, shape index: {}]   ;;  %s1709_s1 = inlined_call_operand.vmem [shape: bf16[64,192], index: 1, kind: input, shape index: {}]   ;;  %s1710_s2 = inlined_call_operand.vmem [shape: f32[1,192], index: 2, kind: input, shape index: {}]   ;;  %s1711_s3 = inlined_call_operand.vmem [shape: bf16[64,64], index: 3, kind: input, shape index: {}]   ;;  %s1712_s4 = inlined_call_operand.vmem [shape: f32[1,64], index: 4, kind: input, shape index: {}]   ;;  %s1713_s5 = inlined_call_operand.vmem [shape: f32[1,64], index: 5, kind: input, shape index: {}]   ;;  %s1714_s6 = inlined_call_operand.vmem [shape: f32[1,64], index: 6, kind: input, shape index: {}]   ;;  %s1715_s7 = inlined_call_operand.vmem [shape: bf16[64,256], index: 7, kind: input, shape index: {}]   ;;  %s1716_s8 = inlined_call_operand.vmem [shape: f32[1,256], index: 8, kind: input, shape index: {}]   ;;  %s1717_s9 = inlined_call_operand.vmem [shape: bf16[256,64], index: 9, kind: input, shape index: {}]   ;;  %s1718_s10 = inlined_call_operand.vmem [shape: f32[1,64], index: 10, kind: input, shape index: {}]   ;;  %s1719_s11 = inlined_call_operand.vmem [shape: f32[1,64], index: 11, kind: input, shape index: {}]   ;;  %s1720_s12 = inlined_call_operand.vmem [shape: f32[1,64], index: 12, kind: input, shape index: {}]   ;;  %s1721_s13 = inlined_call_operand.vmem [shape: bf16[2,16,64], index: 13, kind: output, shape index: {}]  }
   0x1 LB: > { %s1139_s26 = sadd.s32 4294967295, %s1390_s25   ;;  %p1143_p0 = scmp.ge.s32.totalorder %s1390_s25, 1  ;;  %s1390_s25 = sphi %s1465_s25, %s23_s25  }
   0x2   : > { %p387_p1 = scmp.lt.s32.totalorder %s1390_s25, 3 }
   0x4   : > { %p388_p2 = pnand %p1143_p0, %p387_p1 }
   0x5   : > { %p431_p3 = scmp.lt.s32.totalorder (!%p388_p2), %s1139_s26, 1  ;;  %s1392_s20 = smov (!%p388_p2), 64  }
   0x6   : > { %391 = sbr.rel (%p388_p2) target bundleno = 1818 (0x71a), region = 72  ;;  %s1393_s21 = smov (!%p388_p2), 96  }
   0x7   : > { %s1394_s22 = smov (!%p388_p2), 32  }
   0xb   : > { %v1178_v0 = vld [vmem:[%s1709_s1 + $0x30] sm:$0xf]  ;;  %v1317_v1 = vld [vmem:[%s1709_s1 + $0x34] sm:$0xf0]  ;;  %v1170_v2 = vld [vmem:[%s1709_s1 + $0x20] sm:$0xf] }
   0xc   : > { %v1179_v3 = vor.u32 %v1317_v1, %v1178_v0  ;;  %v1315_v4 = vld [vmem:[%s1709_s1 + $0x24] sm:$0xf0]  ;;  %v1162_v6 = vld [vmem:[%s1709_s1 + $0x10] sm:$0xf]  ;;  %v1313_v7 = vld [vmem:[%s1709_s1 + $0x14] sm:$0xf0] }
   0xd   : > { %v1171_v5 = vor.u32 %v1315_v4, %v1170_v2  ;;  %s1723_s26 = smov (!%p431_p3, %s1139_s26), 1  ;;  %v1154_v8 = vld [vmem:[%s1709_s1] sm:$0xf]  ;;  %v1163_v9 = vor.u32 %v1313_v7, %v1162_v6  ;;  %v1311_v10 = vld [vmem:[%s1709_s1 + $0x4] sm:$0xf0]  ;;  %vm505_vm0 = vcmask 523264  }
   0xe   : > { %513 = vmatpush.bf16.msra.mxu1 %v1179_v3  ;;  %s1307_s28 = sshll.u32 %s1723_s26, 3  ;;  %v1316_v11 = vld [vmem:[%s1709_s1 + $0x34] sm:$0xf]  ;;  %v1180_v12 = vld [vmem:[%s1709_s1 + $0x38] sm:$0xf0]  ;;  %v1155_v13 = vor.u32 %v1311_v10, %v1154_v8  ;;  %vm546_vm1 = vcmask 261120  }
   0xf   : > { %s1511_s18 = scalar_lea.vmem %s1708_s0, %s1307_s28  ;;  %v1183_v14 = vor.u32 %v1316_v11, %v1180_v12  ;;  %v1314_v15 = vld [vmem:[%s1709_s1 + $0x24] sm:$0xf]  ;;  %v1172_v16 = vld [vmem:[%s1709_s1 + $0x28] sm:$0xf0]  ;;  %v1312_v19 = vld [vmem:[%s1709_s1 + $0x14] sm:$0xf] }
  0x10   : > { %v1309_v17 = vld [vmem:[%s1511_s18] sm:$0xff]  ;;  %v1175_v18 = vor.u32 %v1314_v15, %v1172_v16  ;;  %v1164_v20 = vld [vmem:[%s1709_s1 + $0x18] sm:$0xf0]  ;;  %v1156_v23 = vld [vmem:[%s1709_s1 + $0x8] sm:$0xf0]  ;;  %vm569_vm2 = vcmask 130048  }
  0x11   : > { %v1167_v21 = vor.u32 %v1312_v19, %v1164_v20  ;;  %v1310_v22 = vld [vmem:[%s1709_s1 + $0x4] sm:$0xf]  ;;  %v454_v27 = vld [vmem:[%s1710_s2] sm:$0x3] }
  0x12   : > { %514 = vmatpush.bf16.msra.mxu1 %v1171_v5  ;;  %v1159_v24 = vor.u32 %v1310_v22, %v1156_v23  ;;  %v457_v29 = vperm.slane %v454_v27, 1  ;;  %v456_v30 = vperm.slane %v454_v27, 0 }
  0x16   : > { %515 = vmatpush.bf16.msra.mxu1 %v1163_v9 }
  0x1a   : > { %516 = vmatpush.bf16.msra.mxu1 %v1155_v13 }
  0x1d   : > { %1184 = vmatmul.msk.bf16.vlgmr.msra.gmra.mxu1 %vm505_vm0, %v1309_v17 }
  0x1e   : > { %527 = vmatpush.bf16.msrb.mxu1 %v1183_v14 }
  0x22   : > { %528 = vmatpush.bf16.msrb.mxu1 %v1175_v18 }
  0x26   : > { %529 = vmatpush.bf16.msrb.mxu1 %v1167_v21 }
  0x2a   : > { %530 = vmatpush.bf16.msrb.mxu1 %v1159_v24 }
  0x2d   : > { %1185 = vmatmul.msk.bf16.vlgmr.msrb.gmra.mxu1 %vm505_vm0, %v1309_v17 }
  0x9a   : > { %v518_v25 = vpop.f32.mrf.mxu1 }
  0x9b   : > { %v519_v32 = vadd.f32 %v518_v25, %v456_v30 }
  0xa2   : > { %v520_v26 = vpop.f32.mrf.mxu1 }
  0xa3   : > { %v521_v34 = vadd.f32 %v520_v26, %v456_v30 }
  0xaa   : > { %v532_v28 = vpop.f32.mrf.mxu1 }
  0xab   : > { %v533_v31 = vadd.f32 %v532_v28, %v457_v29 }
  0xad   : > { %v537_v35 = vpack.c.bf16 %v533_v31, %v519_v32 }
  0xaf   : > { %v541_v38 = vunpack.c.l.b16 %v537_v35  ;;  %v619_v40 = vunpack.c.h.b16 %v537_v35 }
  0xb2   : > { %v534_v33 = vpop.f32.mrf.mxu1 }
  0xb3   : > { %v535_v36 = vadd.f32 %v534_v33, %v457_v29 }
  0xb5   : > { %v538_v37 = vpack.c.bf16 %v535_v36, %v521_v34 }
  0xb7   : > { %v542_v39 = vunpack.c.l.b16 %v538_v37  ;;  %v620_v41 = vunpack.c.h.b16 %v538_v37 }
  0xb9   : > { %v543_v42 = vpack.c.b16 %v542_v39, %v541_v38  ;;  %v1537_v43 = vpack.c.b16 %v620_v41, %v619_v40 }
  0xbb   : > { %633 = vmatpush.bf16.msra.mxu3 %v1537_v43  ;;  %544 = vrot.lane.b32.xlu0 %v543_v42, %s1392_s20 }
 0x12d   : > { %v545_v44 = vpop.permute.xlu0 %544 }
 0x12e   : > { %v551_v45 = vsel %vm546_vm1, %v545_v44, 0 }
 0x12f   : > { %560 = vmatpush.bf16.xpose.msra.mxu2 %v551_v45 }
 0x136   : > { %1186 = vmatmul.msk.bf16.vlgmr.msra.gmra.mxu2 %vm546_vm1, %v543_v42 }
 0x1b9   : > { %v562_v46 = vpop.f32.mrf.mxu2 }
 0x1ba   : > { %v567_v47 = vmul.f32 0.17677669, %v562_v46 }
 0x1bc   : > { %v570_v48 = vsel %vm569_vm2, %v567_v47, -inf }
 0x1bd   : > { %571 = vmax.xlane.f32.xlu0 %v570_v48 }
 0x1c1   : > { %v564_v49 = vpop.f32.mrf.mxu2 }
 0x1c2   : > { %v568_v50 = vmul.f32 0.17677669, %v564_v49 }
 0x1c4   : > { %v573_v51 = vsel %vm569_vm2, %v568_v50, -inf }
 0x1c5   : > { %574 = vmax.xlane.f32.xlu1 %v573_v51 }
 0x230   : > { %v572_v52 = vpop.xlane.xlu0 %571 }
 0x231   : > { %v576_v53 = vsub.f32 %v567_v47, %v572_v52 }
 0x233   : > { %v578_v54 = vmul.f32 1.442695, %v576_v53 }
 0x235   : > { %1368 = vpow2.f32 %v578_v54 }
 0x238   : > { %v575_v55 = vpop.xlane.xlu1 %574 }
 0x239   : > { %v577_v56 = vsub.f32 %v568_v50, %v575_v55 }
 0x23b   : > { %v1369_v57 = vpop.eup %1368  ;;  %v580_v58 = vmul.f32 1.442695, %v577_v56 }
 0x23c   : > { %v582_v59 = vsel %vm569_vm2, %v1369_v57, 0.0 }
 0x23d   : > { %1370 = vpow2.f32 %v580_v58  ;;  %583 = vadd.xlane.f32.xlu1 %v582_v59 }
 0x243   : > { %v1371_v60 = vpop.eup %1370 }
 0x244   : > { %v585_v61 = vsel %vm569_vm2, %v1371_v60, 0.0 }
 0x245   : > { %586 = vadd.xlane.f32.xlu2 %v585_v61 }
 0x256   : > { %640 = vrot.lane.b32.xlu1 %v543_v42, %s1393_s21 }
 0x25d   : > { %642 = vrot.lane.b32.xlu2 %v543_v42, %s1394_s22 }
 0x2b0   : > { %v584_v62 = vpop.xlane.xlu1 %583 }
 0x2b1   : > { %1372 = vrcp.f32 %v584_v62  ;;  %v599_v8 = vand.u32 2147483648, %v584_v62  ;;  %vm593_vm4 = vweird.f32 %v584_v62  ;;  %v597_v10 = vand.u32 2147483647, %v584_v62 }
 0x2b3   : > { %v600_v16 = vor.u32 1.1754944e-38, %v599_v8  ;;  %vm598_vm7 = vcmp.eq.f32.partialorder %v597_v10, 8.507059e+37  ;;  %v1319_v8 = vld [vmem:[%s1711_s3 + $0x8] sm:$0xff] }
 0x2b7   : > { %v1373_v63 = vpop.eup %1372 }
 0x2b8   : > { %v589_v0 = vmul.f32 %v1373_v63, %v584_v62  ;;  %v587_v1 = vpop.xlane.xlu2 %586  ;;  %vm594_vm3 = vweird.f32 %v1373_v63 }
 0x2b9   : > { %1374 = vrcp.f32 %v587_v1  ;;  %vm595_vm5 = vmor %vm593_vm4, %vm594_vm3  ;;  %v614_v12 = vand.u32 2147483648, %v587_v1  ;;  %v612_v14 = vand.u32 2147483647, %v587_v1  ;;  %vm608_vm8 = vweird.f32 %v587_v1 }
 0x2ba   : > { %v590_v2 = vsub.f32 1.0, %v589_v0 }
 0x2bb   : > { %v615_v18 = vor.u32 1.1754944e-38, %v614_v12  ;;  %vm613_vm10 = vcmp.eq.f32.partialorder %v612_v14, 8.507059e+37  ;;  %v1318_v12 = vld [vmem:[%s1711_s3] sm:$0xff] }
 0x2bc   : > { %v591_v3 = vmul.f32 %v1373_v63, %v590_v2 }
 0x2be   : > { %v592_v5 = vadd.f32 %v1373_v63, %v591_v3 }
 0x2bf   : > { %v1375_v4 = vpop.eup %1374 }
 0x2c0   : > { %v604_v6 = vmul.f32 %v1375_v4, %v587_v1  ;;  %v643_v7 = vpop.permute.xlu2 %642  ;;  %vm609_vm6 = vweird.f32 %v1375_v4  ;;  %v596_v15 = vsel %vm595_vm5, %v1373_v63, %v592_v5 }
 0x2c1   : > { %v648_v9 = vsel %vm546_vm1, %v643_v7, 0  ;;  %vm610_vm9 = vmor %vm608_vm8, %vm609_vm6  ;;  %v601_v19 = vsel %vm598_vm7, %v600_v16, %v596_v15  ;;  %v1320_v7 = vld [vmem:[%s1711_s3 + $0x10] sm:$0xff] }
 0x2c2   : > { %v605_v11 = vsub.f32 1.0, %v604_v6  ;;  %657 = vmatpush.bf16.xpose.msrb.mxu3 %v648_v9  ;;  %v602_v22 = vmul.f32 %v1369_v57, %v601_v19  ;;  %v1321_v6 = vld [vmem:[%s1711_s3 + $0x18] sm:$0xff]  ;;  %v1233_v19 = vld [vmem:[%s1715_s7 + $0x30] sm:$0xf] }
 0x2c3   : > { %789 = vmatpush.bf16.msra.mxu0 %v1321_v6  ;;  %v1341_v6 = vld [vmem:[%s1717_s9 + $0x58] sm:$0xff] }
 0x2c4   : > { %v606_v13 = vmul.f32 %v1375_v4, %v605_v11 }
 0x2c6   : > { %v607_v17 = vadd.f32 %v1375_v4, %v606_v13 }
 0x2c7   : > { %790 = vmatpush.bf16.msra.mxu0 %v1320_v7  ;;  %v1331_v7 = vld [vmem:[%s1717_s9 + $0x8] sm:$0xff] }
 0x2c8   : > { %v611_v20 = vsel %vm610_vm9, %v1375_v4, %v607_v17  ;;  %v641_v25 = vpop.permute.xlu1 %640 }
 0x2c9   : > { %v616_v21 = vsel %vm613_vm10, %v615_v18, %v611_v20  ;;  %v1329_v20 = vld [vmem:[%s1715_s7 + $0x34] sm:$0xf0] }
 0x2ca   : > { %v617_v23 = vmul.f32 %v1371_v60, %v616_v21  ;;  %v1328_v21 = vld [vmem:[%s1715_s7 + $0x34] sm:$0xf] }
 0x2cb   : > { %791 = vmatpush.bf16.msra.mxu0 %v1319_v8  ;;  %v1340_v8 = vld [vmem:[%s1717_s9 + $0x50] sm:$0xff] }
 0x2cc   : > { %v618_v24 = vpack.c.bf16 %v617_v23, %v602_v22  ;;  %v1234_v22 = vor.u32 %v1329_v20, %v1233_v19  ;;  %v1235_v23 = vld [vmem:[%s1715_s7 + $0x38] sm:$0xf0] }
 0x2ce   : > { %1187 = vmatmul.msk.bf16.vlgmr.msra.gmra.mxu3 %vm569_vm2, %v618_v24  ;;  %v1238_v24 = vor.u32 %v1328_v21, %v1235_v23  ;;  %875 = vmatpush.bf16.msra.mxu1 %v1234_v22 }
 0x2cf   : > { %792 = vmatpush.bf16.msra.mxu0 %v1318_v12  ;;  %v822_v12 = vld [vmem:[%s1716_s8] sm:$0x3] }
 0x2de   : > { %1188 = vmatmul.msk.bf16.vlgmr.msrb.gmra.mxu3 %vm546_vm1, %v641_v25  ;;  %v1225_v25 = vld [vmem:[%s1715_s7 + $0x20] sm:$0xf] }
 0x351   : > { %v1551_v26 = vpop.f32.mrf.mxu3 }
 0x359   : > { %v1553_v27 = vpop.f32.mrf.mxu3 }
 0x361   : > { %v659_v28 = vpop.f32.mrf.mxu3 }
 0x362   : > { %v664_v29 = vmul.f32 0.17677669, %v659_v28  ;;  %v1326_v28 = vld [vmem:[%s1715_s7 + $0x24] sm:$0xf] }
 0x364   : > { %v666_v30 = vsel %vm569_vm2, %v664_v29, -inf }
 0x365   : > { %667 = vmax.xlane.f32.xlu2 %v666_v30 }
 0x369   : > { %v661_v31 = vpop.f32.mrf.mxu3 }
 0x36a   : > { %v665_v32 = vmul.f32 0.17677669, %v661_v31  ;;  %v1217_v31 = vld [vmem:[%s1715_s7 + $0x10] sm:$0xf] }
 0x36c   : > { %v669_v33 = vsel %vm569_vm2, %v665_v32, -inf }
 0x36d   : > { %670 = vmax.xlane.f32.xlu1 %v669_v33  ;;  %v1324_v33 = vld [vmem:[%s1715_s7 + $0x14] sm:$0xf] }
 0x3d8   : > { %v668_v34 = vpop.xlane.xlu2 %667 }
 0x3d9   : > { %v672_v35 = vsub.f32 %v664_v29, %v668_v34  ;;  %v1227_v29 = vld [vmem:[%s1715_s7 + $0x28] sm:$0xf0] }
 0x3da   : > { %v1230_v30 = vor.u32 %v1326_v28, %v1227_v29  ;;  %v1365_v29 = vld [vmem:[%s1718_s10] ss:$0 sm:$0xff] }
 0x3db   : > { %v674_v36 = vmul.f32 1.442695, %v672_v35  ;;  %v1219_v35 = vld [vmem:[%s1715_s7 + $0x18] sm:$0xf0] }
 0x3dd   : > { %1376 = vpow2.f32 %v674_v36  ;;  %v1222_v36 = vor.u32 %v1324_v33, %v1219_v35 }
 0x3e0   : > { %v671_v37 = vpop.xlane.xlu1 %670 }
 0x3e1   : > { %v673_v38 = vsub.f32 %v665_v32, %v671_v37  ;;  %v1325_v32 = vld [vmem:[%s1715_s7 + $0x14] sm:$0xf0]  ;;  %v1209_v37 = vld [vmem:[%s1715_s7] sm:$0xf] }
 0x3e2   : > { %v1218_v34 = vor.u32 %v1325_v32, %v1217_v31 }
 0x3e3   : > { %v1377_v39 = vpop.eup %1376  ;;  %v676_v40 = vmul.f32 1.442695, %v673_v38  ;;  %v1323_v38 = vld [vmem:[%s1715_s7 + $0x4] sm:$0xf0] }
 0x3e4   : > { %v678_v41 = vsel %vm569_vm2, %v1377_v39, 0.0 }
 0x3e5   : > { %1378 = vpow2.f32 %v676_v40  ;;  %679 = vadd.xlane.f32.xlu0 %v678_v41  ;;  %v1210_v40 = vor.u32 %v1323_v38, %v1209_v37  ;;  %v1211_v41 = vld [vmem:[%s1715_s7 + $0x8] sm:$0xf0] }
 0x3eb   : > { %v1379_v42 = vpop.eup %1378 }
 0x3ec   : > { %v681_v44 = vsel %vm569_vm2, %v1379_v42, 0.0 }
 0x3ed   : > { %682 = vadd.xlane.f32.xlu0 %v681_v44  ;;  %v1337_v44 = vld [vmem:[%s1717_s9 + $0x38] sm:$0xff] }
 0x3ee   : > { %1037 = vmatpush.bf16.msrb.mxu2 %v1337_v44 }
 0x401   : > { %715 = vrot.lane.b32.xlu0 %v1537_v43, %s1393_s21 }
 0x458   : > { %v680_v45 = vpop.xlane.xlu0 %679 }
 0x459   : > { %1380 = vrcp.f32 %v680_v45  ;;  %v695_v54 = vand.u32 2147483648, %v680_v45  ;;  %vm689_vm12 = vweird.f32 %v680_v45  ;;  %v693_v55 = vand.u32 2147483647, %v680_v45 }
 0x45b   : > { %v696_v60 = vor.u32 1.1754944e-38, %v695_v54  ;;  %vm694_vm15 = vcmp.eq.f32.partialorder %v693_v55, 8.507059e+37 }
 0x45f   : > { %v1381_v46 = vpop.eup %1380 }
 0x460   : > { %v685_v47 = vmul.f32 %v1381_v46, %v680_v45  ;;  %v683_v48 = vpop.xlane.xlu0 %682  ;;  %vm690_vm11 = vweird.f32 %v1381_v46  ;;  %v1345_v45 = vld [vmem:[%s1717_s9 + $0x78] sm:$0xff] }
 0x461   : > { %1382 = vrcp.f32 %v683_v48  ;;  %vm691_vm13 = vmor %vm689_vm12, %vm690_vm11  ;;  %v710_v57 = vand.u32 2147483648, %v683_v48  ;;  %v708_v59 = vand.u32 2147483647, %v683_v48  ;;  %vm704_vm3 = vweird.f32 %v683_v48  ;;  %1051 = vmatpush.bf16.msrb.mxu0 %v1345_v45 }
 0x462   : > { %v686_v49 = vsub.f32 1.0, %v685_v47  ;;  %v1344_v47 = vld [vmem:[%s1717_s9 + $0x70] sm:$0xff] }
 0x463   : > { %v711_v63 = vor.u32 1.1754944e-38, %v710_v57  ;;  %vm709_vm5 = vcmp.eq.f32.partialorder %v708_v59, 8.507059e+37  ;;  %v1363_v57 = vld [vmem:[%s1713_s5] ss:$0 sm:$0xff] }
 0x464   : > { %v687_v50 = vmul.f32 %v1381_v46, %v686_v49  ;;  %v1343_v49 = vld [vmem:[%s1717_s9 + $0x68] sm:$0xff] }
 0x465   : > { %1052 = vmatpush.bf16.msrb.mxu0 %v1344_v47 }
 0x466   : > { %v688_v52 = vadd.f32 %v1381_v46, %v687_v50  ;;  %v1334_v50 = vld [vmem:[%s1717_s9 + $0x20] sm:$0xff] }
 0x467   : > { %v1383_v51 = vpop.eup %1382 }
 0x468   : > { %v700_v53 = vmul.f32 %v1383_v51, %v683_v48  ;;  %v692_v58 = vsel %vm691_vm13, %v1381_v46, %v688_v52  ;;  %vm705_vm14 = vweird.f32 %v1383_v51  ;;  %v1336_v46 = vld [vmem:[%s1717_s9 + $0x30] sm:$0xff]  ;;  %v1335_v48 = vld [vmem:[%s1717_s9 + $0x28] sm:$0xff]  ;;  %v442_v52 = vld [vmem:[%s1511_s18] sm:$0xff]   ;;  %s440_s18 = scalar_lea.vmem %s1721_s13, %s1307_s28 }
 0x469   : > { %v697_v62 = vsel %vm694_vm15, %v696_v60, %v692_v58  ;;  %vm706_vm4 = vmor %vm704_vm3, %vm705_vm14  ;;  %1038 = vmatpush.bf16.msrb.mxu2 %v1336_v46  ;;  %1053 = vmatpush.bf16.msrb.mxu0 %v1343_v49  ;;  %v444_v54 = vunpack.c.l.bf16 %v442_v52  ;;  %v445_v58 = vunpack.c.h.bf16 %v442_v52 }
 0x46a   : > { %v701_v56 = vsub.f32 1.0, %v700_v53  ;;  %v698_v2 = vmul.f32 %v1377_v39, %v697_v62  ;;  %v1322_v39 = vld [vmem:[%s1715_s7 + $0x4] sm:$0xf] }
 0x46c   : > { %v702_v43 = vmul.f32 %v1383_v51, %v701_v56 }
 0x46d   : > { %1039 = vmatpush.bf16.msrb.mxu2 %v1335_v48 }
 0x46e   : > { %v703_v61 = vadd.f32 %v1383_v51, %v702_v43 }
 0x470   : > { %v707_v0 = vsel %vm706_vm4, %v1383_v51, %v703_v61  ;;  %v1362_v51 = vld [vmem:[%s1712_s4] ss:$0 sm:$0xff] }
 0x471   : > { %v712_v1 = vsel %vm709_vm5, %v711_v63, %v707_v0  ;;  %1040 = vmatpush.bf16.msrb.mxu2 %v1334_v50  ;;  %v1364_v61 = vld [vmem:[%s1714_s6] ss:$0 sm:$0xff] }
 0x472   : > { %v713_v3 = vmul.f32 %v1379_v42, %v712_v1  ;;  %v1214_v42 = vor.u32 %v1322_v39, %v1211_v41 }
 0x473   : > { %v716_v4 = vpop.permute.xlu0 %715 }
 0x474   : > { %728 = vmatpush.bf16.msra.mxu3 %v716_v4  ;;  %v714_v5 = vpack.c.bf16 %v713_v3, %v698_v2  ;;  %v1333_v3 = vld [vmem:[%s1717_s9 + $0x18] sm:$0xff]  ;;  %v1342_v4 = vld [vmem:[%s1717_s9 + $0x60] sm:$0xff] }
 0x475   : > { %1041 = vmatpush.bf16.msrb.mxu2 %v1333_v3  ;;  %1054 = vmatpush.bf16.msrb.mxu0 %v1342_v4 }
 0x477   : > { %1189 = vmatmul.msk.bf16.vlgmr.msra.gmra.mxu3 %vm569_vm2, %v714_v5  ;;  %v1332_v5 = vld [vmem:[%s1717_s9 + $0x10] sm:$0xff] }
 0x478   : > { %889 = vmatpush.bf16.msrb.mxu3 %v1238_v24 }
 0x479   : > { %1042 = vmatpush.bf16.msrb.mxu2 %v1332_v5  ;;  %1055 = vmatpush.bf16.msrb.mxu0 %v1341_v6 }
 0x47c   : > { %890 = vmatpush.bf16.msrb.mxu3 %v1230_v30 }
 0x47d   : > { %1043 = vmatpush.bf16.msrb.mxu2 %v1331_v7  ;;  %1056 = vmatpush.bf16.msrb.mxu0 %v1340_v8 }
 0x480   : > { %891 = vmatpush.bf16.msrb.mxu3 %v1222_v36  ;;  %v1367_v36 = vld [vmem:[%s1720_s12] ss:$0 sm:$0xff] }
 0x484   : > { %892 = vmatpush.bf16.msrb.mxu3 %v1214_v42 }
 0x4fa   : > { %v730_v9 = vpop.f32.mrf.mxu3 }
 0x502   : > { %v732_v10 = vpop.f32.mrf.mxu3 }
 0x503   : > { %v1357_v11 = vpack.i.bf16 %v732_v10, %v730_v9  ;;  %v1330_v9 = vld [vmem:[%s1717_s9] sm:$0xff]  ;;  %v1339_v10 = vld [vmem:[%s1717_s9 + $0x48] sm:$0xff] }
 0x504   : > { %1044 = vmatpush.bf16.msrb.mxu2 %v1330_v9  ;;  %1057 = vmatpush.bf16.msrb.mxu0 %v1339_v10 }
 0x505   : > { %1358 = vrot.lane.b32.xlu2 %v1357_v11, %s1394_s22  ;;  %v1338_v11 = vld [vmem:[%s1717_s9 + $0x40] sm:$0xff] }
 0x508   : > { %1058 = vmatpush.bf16.msrb.mxu0 %v1338_v11 }
 0x55f   : > { %v1359_v13 = vpop.permute.xlu2 %1358 }
 0x560   : > { %v1361_v14 = vunpack.i.h.bf16 %v1359_v13  ;;  %v1360_v15 = vunpack.i.l.bf16 %v1359_v13 }
 0x562   : > { %v743_v16 = vsel %vm546_vm1, %v1551_v26, %v1360_v15  ;;  %v744_v17 = vsel %vm546_vm1, %v1553_v27, %v1361_v14  ;;  %v1327_v26 = vld [vmem:[%s1715_s7 + $0x24] sm:$0xf0]  ;;  %v824_v14 = vperm.slane %v822_v12, 0 }
 0x563   : > { %v745_v18 = vpack.c.bf16 %v744_v17, %v743_v16  ;;  %v1226_v27 = vor.u32 %v1327_v26, %v1225_v25 }
 0x565   : > { %1206 = vmatmul.msk.bf16.vlgmr.msra.gmra.mxu0 %vm505_vm0, %v745_v18  ;;  %876 = vmatpush.bf16.msra.mxu1 %v1226_v27  ;;  %v825_v18 = vperm.slane %v822_v12, 1 }
 0x569   : > { %877 = vmatpush.bf16.msra.mxu1 %v1218_v34  ;;  %v1366_v34 = vld [vmem:[%s1719_s11] ss:$0 sm:$0xff] }
 0x56d   : > { %878 = vmatpush.bf16.msra.mxu1 %v1210_v40 }
 0x5e2   : > { %v794_v53 = vpop.f32.mrf.mxu0 }
 0x5e3   : > { %v795_v55 = vadd.f32 %v1362_v51, %v794_v53 }
 0x5e5   : > { %v799_v56 = vadd.f32 %v795_v55, %v444_v54 }
 0x5e7   : > { %v805_v60 = vmul.f32 %v1363_v57, %v799_v56 }
 0x5e9   : > { %v811_v0 = vadd.f32 %v1364_v61, %v805_v60 }
 0x5ea   : > { %v796_v43 = vpop.f32.mrf.mxu0 }
 0x5eb   : > { %v797_v59 = vadd.f32 %v1362_v51, %v796_v43 }
 0x5ed   : > { %v800_v62 = vadd.f32 %v797_v59, %v445_v58 }
 0x5ef   : > { %v806_v63 = vmul.f32 %v1363_v57, %v800_v62 }
 0x5f1   : > { %v812_v1 = vadd.f32 %v1364_v61, %v806_v63 }
 0x5f3   : > { %v813_v2 = vpack.c.bf16 %v812_v1, %v811_v0 }
 0x5f5   : > { %1239 = vmatmul.msk.bf16.vlgmr.msra.gmra.mxu1 %vm505_vm0, %v813_v2  ;;  %1240 = vmatmul.msk.bf16.vlgmr.msrb.gmra.mxu3 %vm505_vm0, %v813_v2  ;;  %vm1081_vm0 = vcmask 519168  }
 0x672   : > { %v880_v13 = vpop.f32.mrf.mxu1 }
 0x673   : > { %v881_v16 = vadd.f32 %v880_v13, %v824_v14 }
 0x675   : > { %v899_v20 = vmax.f32 %v881_v16, 0.0 }
 0x678   : > { %v894_v15 = vpop.f32.mrf.mxu3 }
 0x679   : > { %v895_v22 = vadd.f32 %v894_v15, %v825_v18 }
 0x67a   : > { %v882_v17 = vpop.f32.mrf.mxu1 }
 0x67b   : > { %v883_v19 = vadd.f32 %v882_v17, %v824_v14  ;;  %v900_v26 = vmax.f32 %v895_v22, 0.0 }
 0x67d   : > { %v901_v21 = vmax.f32 %v883_v19, 0.0 }
 0x67f   : > { %v903_v23 = vpack.c.bf16 %v901_v21, %v899_v20 }
 0x680   : > { %v896_v24 = vpop.f32.mrf.mxu3 }
 0x681   : > { %v897_v25 = vadd.f32 %v896_v24, %v825_v18  ;;  %1045 = vmatmul.bf16.vlgmr.msrb.gmra.mxu2 %v903_v23 }
 0x683   : > { %v902_v27 = vmax.f32 %v897_v25, 0.0 }
 0x685   : > { %v904_v28 = vpack.c.bf16 %v902_v27, %v900_v26 }
 0x687   : > { %1059 = vmatmul.bf16.vlgmr.msrb.gmra.mxu0 %v904_v28 }
 0x704   : > { %v1046_v30 = vpop.f32.mrf.mxu2  ;;  %v1060_v31 = vpop.f32.mrf.mxu0 }
 0x705   : > { %v1047_v32 = vadd.f32 %v1365_v29, %v1046_v30 }
 0x707   : > { %v1061_v33 = vadd.f32 %v1060_v31, %v1047_v32 }
 0x709   : > { %v1065_v35 = vadd.f32 %v1061_v33, %v811_v0 }
 0x70b   : > { %v1071_v37 = vmul.f32 %v1366_v34, %v1065_v35 }
 0x70c   : > { %v1048_v38 = vpop.f32.mrf.mxu2  ;;  %v1062_v41 = vpop.f32.mrf.mxu0 }
 0x70d   : > { %v1077_v39 = vadd.f32 %v1367_v36, %v1071_v37  ;;  %v1049_v40 = vadd.f32 %v1365_v29, %v1048_v38 }
 0x70f   : > { %v1079_v42 = vpack.c.bf16 %v1077_v39, %v1077_v39  ;;  %v1063_v44 = vadd.f32 %v1062_v41, %v1049_v40 }
 0x711   : > { %1082 = vst.msk [vmem:[%s440_s18] sm:$0xf] %vm1081_vm0, %v1079_v42  ;;  %v1066_v45 = vadd.f32 %v1063_v44, %v812_v1 }
 0x713   : > { %v1072_v46 = vmul.f32 %v1366_v34, %v1066_v45 }
 0x715   : > { %v1078_v47 = vadd.f32 %v1367_v36, %v1072_v46 }
 0x717   : > { %v1080_v48 = vpack.c.bf16 %v1078_v47, %v1078_v47 }
 0x719   : > { %1083 = vst.msk [vmem:[%s440_s18 + $0x4] sm:$0xf] %vm1081_vm0, %v1080_v48 }
 0x71a PF: > { %s23_s25 = sadd.s32 1, %s1390_s25  }
 0x71b   : > { %p20_p4 = scmp.ge.s32.totalorder %s23_s25, 4  }
 0x71d   :  { %22 = sbr.rel (!%p20_p4) target bundleno = 1 (0x1), region = 102 }

// kernel: net_forward.18
= control target key start
LH: loop header
LB: loop body
LE: loop exit
PB: predicated region body
PF: predicated region fallthrough
CT: control target
= control target key end

     0   :  { %s2065_s15 = smov 0   ;;  %s2770_s0 = inlined_call_operand.vmem [shape: bf16[2,110,64], index: 0, kind: input, shape index: {}]   ;;  %s2771_s1 = inlined_call_operand.vmem [shape: f32[49,64], index: 1, kind: input, shape index: {}]   ;;  %s2772_s2 = inlined_call_operand.vmem [shape: f32[1,64], index: 2, kind: input, shape index: {}]   ;;  %s2773_s3 = inlined_call_operand.vmem [shape: f32[40,64], index: 3, kind: input, shape index: {}]   ;;  %s2774_s4 = inlined_call_operand.vmem [shape: bf16[2,40,64], index: 4, kind: output, shape index: {}]  }
   0x1 LB: > { %s1954_s16 = sadd.s32 4294967295, %s2038_s15   ;;  %p1958_p0 = scmp.ge.s32.totalorder %s2038_s15, 1  ;;  %s2038_s15 = sphi %s2065_s15, %s14_s15  }
   0x2   : > { %p162_p1 = scmp.lt.s32.totalorder %s2038_s15, 3 }
   0x4   : > { %p163_p2 = pnand %p1958_p0, %p162_p1 }
   0x5   : > { %p188_p3 = scmp.lt.s32.totalorder (!%p163_p2), %s1954_s16, 1 }
   0x6   : > { %166 = sbr.rel (%p163_p2) target bundleno = 289 (0x121), region = 36 }
   0xb   : > { %s2776_s16 = smov (!%p188_p3, %s1954_s16), 1  ;;  %v1982_v0 = vld [vmem:[%s2771_s1] ss:$0 sm:$0xff]  ;;  %v1983_v1 = vld [vmem:[%s2771_s1 + $0x1] ss:$0 sm:$0xff]  ;;  %vm236_vm0 = vcmask 1046528  }
   0xc   : > { %s1972_s17 = smul.u32 56, %s2776_s16  ;;  %v1984_v2 = vld [vmem:[%s2771_s1 + $0x2] ss:$0 sm:$0xff]  ;;  %vm274_vm1 = vcmask 1045504   ;;  %v1985_v41 = vld [vmem:[%s2771_s1 + $0x3] ss:$0 sm:$0xff] }
   0xd   : > { %vm312_vm2 = vcmask 1044480   ;;  %v1986_v58 = vld [vmem:[%s2771_s1 + $0x4] ss:$0 sm:$0xff]  ;;  %vm350_vm3 = vcmask 1043456   ;;  %vm388_vm4 = vcmask 1042432   ;;  %vm426_vm5 = vcmask 1041408  }
   0xe   : > { %s2085_s24 = scalar_lea.vmem %s2770_s0, %s1972_s17  ;;  %vm653_vm6 = vcmask 1040384   ;;  %s1973_s28 = smul.u32 20, %s2776_s16  ;;  %vm1893_vm7 = vcmask 519168  }
   0xf   : > { %v1964_v3 = vld [vmem:[%s2085_s24] sm:$0xff]   ;;  %v1971_v4 = vld [vmem:[%s2085_s24 + $0x8] sm:$0xff]   ;;  %v2093_v5 = vld [vmem:[%s2085_s24 + $0x10] sm:$0xff]  }
  0x10   : > { %v1965_v6 = vunpack.c.l.bf16 %v1964_v3  ;;  %v2095_v7 = vunpack.c.h.bf16 %v1964_v3  ;;  %v2097_v8 = vunpack.c.l.bf16 %v1971_v4  ;;  %v2099_v9 = vunpack.c.h.bf16 %v1971_v4  ;;  %v220_v10 = vld [vmem:[%s2085_s24 + $0x14] sm:$0x1]  ;;  %v258_v11 = vld [vmem:[%s2085_s24] sm:$0xe]  ;;  %s197_s14 = scalar_lea.vmem %s2774_s4, %s1973_s28 }
  0x11   : > { %v2104_v12 = vld [vmem:[%s2085_s24 + $0x14] sm:$0x3]  ;;  %v2107_v13 = vunpack.c.l.bf16 %v2093_v5  ;;  %v221_v14 = vunpack.c.l.bf16 %v220_v10  ;;  %v259_v15 = vunpack.c.l.bf16 %v258_v11  ;;  %v334_v63 = vld [vmem:[%s2085_s24] sm:$0xc] }
  0x12   : > { %v297_v16 = vunpack.c.l.bf16 %v2104_v12  ;;  %v210_v17 = vmul.f32 %v1982_v0, %v1965_v6  ;;  %v211_v18 = vmul.f32 %v1982_v0, %v2095_v7  ;;  %v212_v19 = vmul.f32 %v1982_v0, %v2097_v8 }
  0x13   : > { %v213_v20 = vmul.f32 %v1982_v0, %v2099_v9  ;;  %v214_v21 = vmul.f32 %v1982_v0, %v2107_v13  ;;  %v224_v22 = vmul.f32 %v1983_v1, %v1965_v6  ;;  %v225_v23 = vmul.f32 %v1983_v1, %v2095_v7 }
  0x14   : > { %v226_v24 = vmul.f32 %v1983_v1, %v2097_v8  ;;  %v227_v25 = vmul.f32 %v1983_v1, %v2099_v9  ;;  %v228_v26 = vmul.f32 %v1983_v1, %v2107_v13  ;;  %v229_v27 = vmul.f32 %v1983_v1, %v221_v14 }
  0x15   : > { %v262_v28 = vmul.f32 %v1984_v2, %v259_v15  ;;  %v237_v29 = vrot.slane %v224_v22, 1  ;;  %v238_v30 = vrot.slane %v225_v23, 1  ;;  %v263_v32 = vmul.f32 %v1984_v2, %v2095_v7 }
  0x16   : > { %v240_v31 = vrot.slane %v226_v24, 1  ;;  %v242_v33 = vrot.slane %v227_v25, 1  ;;  %v244_v34 = vrot.slane %v228_v26, 1  ;;  %v246_v35 = vrot.slane %v229_v27, 1  ;;  %v1987_v27 = vld [vmem:[%s2771_s1 + $0x5] ss:$0 sm:$0xff] }
  0x17   : > { %v264_v36 = vmul.f32 %v1984_v2, %v2097_v8  ;;  %v239_v37 = vsel %vm236_vm0, %v237_v29, %v238_v30  ;;  %v265_v39 = vmul.f32 %v1984_v2, %v2099_v9  ;;  %v266_v40 = vmul.f32 %v1984_v2, %v2107_v13 }
  0x18   : > { %v241_v38 = vsel %vm236_vm0, %v238_v30, %v240_v31  ;;  %v243_v42 = vsel %vm236_vm0, %v240_v31, %v242_v33  ;;  %v245_v43 = vsel %vm236_vm0, %v242_v33, %v244_v34  ;;  %v247_v44 = vsel %vm236_vm0, %v244_v34, %v246_v35 }
  0x19   : > { %v253_v45 = vadd.f32 %v239_v37, %v210_v17  ;;  %v254_v46 = vadd.f32 %v241_v38, %v211_v18  ;;  %v255_v47 = vadd.f32 %v243_v42, %v212_v19  ;;  %v256_v48 = vadd.f32 %v245_v43, %v213_v20 }
  0x1a   : > { %v257_v49 = vadd.f32 %v247_v44, %v214_v21  ;;  %v267_v50 = vmul.f32 %v1984_v2, %v221_v14  ;;  %v275_v51 = vrot.slane %v262_v28, 2  ;;  %v276_v52 = vrot.slane %v263_v32, 2 }
  0x1b   : > { %v278_v53 = vrot.slane %v264_v36, 2  ;;  %v280_v54 = vrot.slane %v265_v39, 2  ;;  %v282_v55 = vrot.slane %v266_v40, 2  ;;  %v300_v56 = vmul.f32 %v1985_v41, %v259_v15  ;;  %v372_v36 = vld [vmem:[%s2085_s24 + $0x14] sm:$0x7] }
  0x1c   : > { %v301_v57 = vmul.f32 %v1985_v41, %v2095_v7  ;;  %v277_v59 = vsel %vm274_vm1, %v275_v51, %v276_v52  ;;  %v284_v61 = vrot.slane %v267_v50, 2  ;;  %v302_v62 = vmul.f32 %v1985_v41, %v2097_v8 }
  0x1d   : > { %v279_v60 = vsel %vm274_vm1, %v276_v52, %v278_v53  ;;  %v281_v0 = vsel %vm274_vm1, %v278_v53, %v280_v54  ;;  %v283_v1 = vsel %vm274_vm1, %v280_v54, %v282_v55  ;;  %v291_v2 = vadd.f32 %v277_v59, %v253_v45 }
  0x1e   : > { %v292_v3 = vadd.f32 %v279_v60, %v254_v46  ;;  %v285_v4 = vsel %vm274_vm1, %v282_v55, %v284_v61  ;;  %v293_v6 = vadd.f32 %v281_v0, %v255_v47  ;;  %v294_v10 = vadd.f32 %v283_v1, %v256_v48  ;;  %v410_v60 = vld [vmem:[%s2085_s24] sm:$0x8] }
  0x1f   : > { %v303_v11 = vmul.f32 %v1985_v41, %v2099_v9  ;;  %v295_v14 = vadd.f32 %v285_v4, %v257_v49  ;;  %v304_v15 = vmul.f32 %v1985_v41, %v2107_v13  ;;  %v305_v17 = vmul.f32 %v1985_v41, %v297_v16 }
  0x20   : > { %v313_v18 = vrot.slane %v300_v56, 3  ;;  %v314_v19 = vrot.slane %v301_v57, 3  ;;  %v316_v20 = vrot.slane %v302_v62, 3  ;;  %v335_v22 = vunpack.c.l.bf16 %v334_v63 }
  0x21   : > { %v318_v21 = vrot.slane %v303_v11, 3  ;;  %v320_v23 = vrot.slane %v304_v15, 3  ;;  %v322_v24 = vrot.slane %v305_v17, 3  ;;  %v339_v25 = vmul.f32 %v1986_v58, %v2095_v7 }
  0x22   : > { %v340_v26 = vmul.f32 %v1986_v58, %v2097_v8  ;;  %v315_v28 = vsel %vm312_vm2, %v313_v18, %v314_v19  ;;  %v317_v29 = vsel %vm312_vm2, %v314_v19, %v316_v20  ;;  %v338_v31 = vmul.f32 %v1986_v58, %v335_v22 }
  0x23   : > { %v319_v30 = vsel %vm312_vm2, %v316_v20, %v318_v21  ;;  %v321_v32 = vsel %vm312_vm2, %v318_v21, %v320_v23  ;;  %v323_v33 = vsel %vm312_vm2, %v320_v23, %v322_v24  ;;  %v329_v34 = vadd.f32 %v315_v28, %v291_v2 }
  0x24   : > { %v330_v35 = vadd.f32 %v317_v29, %v292_v3  ;;  %v331_v37 = vadd.f32 %v319_v30, %v293_v6  ;;  %v332_v38 = vadd.f32 %v321_v32, %v294_v10  ;;  %v333_v39 = vadd.f32 %v323_v33, %v295_v14  ;;  %v450_v32 = vld [vmem:[%s2085_s24 + $0x18] sm:$0x1] }
  0x25   : > { %v341_v40 = vmul.f32 %v1986_v58, %v2099_v9  ;;  %v342_v41 = vmul.f32 %v1986_v58, %v2107_v13  ;;  %v343_v42 = vmul.f32 %v1986_v58, %v297_v16  ;;  %v351_v43 = vrot.slane %v338_v31, 4  ;;  %v1988_v16 = vld [vmem:[%s2771_s1 + $0x6] ss:$0 sm:$0xff] }
  0x26   : > { %v352_v44 = vrot.slane %v339_v25, 4  ;;  %v354_v45 = vrot.slane %v340_v26, 4  ;;  %v373_v47 = vunpack.c.l.bf16 %v372_v36  ;;  %v376_v48 = vmul.f32 %v1987_v27, %v335_v22 }
  0x27   : > { %v356_v46 = vrot.slane %v341_v40, 4  ;;  %v358_v50 = vrot.slane %v342_v41, 4  ;;  %v360_v51 = vrot.slane %v343_v42, 4  ;;  %v377_v52 = vmul.f32 %v1987_v27, %v2095_v7  ;;  %v1989_v40 = vld [vmem:[%s2771_s1 + $0x7] ss:$0 sm:$0xff] }
  0x28   : > { %v353_v49 = vsel %vm350_vm3, %v351_v43, %v352_v44  ;;  %v355_v53 = vsel %vm350_vm3, %v352_v44, %v354_v45  ;;  %v378_v12 = vmul.f32 %v1987_v27, %v2097_v8  ;;  %v379_v63 = vmul.f32 %v1987_v27, %v2099_v9 }
  0x29   : > { %v357_v54 = vsel %vm350_vm3, %v354_v45, %v356_v46  ;;  %v367_v55 = vadd.f32 %v353_v49, %v329_v34  ;;  %v359_v56 = vsel %vm350_vm3, %v356_v46, %v358_v50  ;;  %v361_v57 = vsel %vm350_vm3, %v358_v50, %v360_v51  ;;  %v1990_v45 = vld [vmem:[%s2771_s1 + $0x8] ss:$0 sm:$0xff]  ;;  %v489_v50 = vld [vmem:[%s2085_s24 + $0x18] sm:$0x3] }
  0x2a   : > { %v368_v58 = vadd.f32 %v355_v53, %v330_v35  ;;  %v369_v59 = vadd.f32 %v357_v54, %v331_v37  ;;  %v370_v61 = vadd.f32 %v359_v56, %v332_v38  ;;  %v371_v62 = vadd.f32 %v361_v57, %v333_v39 }
  0x2b   : > { %v380_v0 = vmul.f32 %v1987_v27, %v2107_v13  ;;  %v381_v1 = vmul.f32 %v1987_v27, %v373_v47  ;;  %v389_v2 = vrot.slane %v376_v48, 5  ;;  %v390_v3 = vrot.slane %v377_v52, 5 }
  0x2c   : > { %v392_v4 = vrot.slane %v378_v12, 5  ;;  %v394_v6 = vrot.slane %v379_v63, 5  ;;  %v411_v11 = vunpack.c.l.bf16 %v410_v60  ;;  %v415_v14 = vmul.f32 %v1988_v16, %v2095_v7  ;;  %v448_v7 = vld [vmem:[%s2085_s24 + $0x4] sm:$0xe] }
  0x2d   : > { %v396_v10 = vrot.slane %v380_v0, 5  ;;  %v391_v15 = vsel %vm388_vm4, %v389_v2, %v390_v3  ;;  %v398_v18 = vrot.slane %v381_v1, 5  ;;  %v416_v19 = vmul.f32 %v1988_v16, %v2097_v8 }
  0x2e   : > { %v393_v17 = vsel %vm388_vm4, %v390_v3, %v392_v4  ;;  %v395_v20 = vsel %vm388_vm4, %v392_v4, %v394_v6  ;;  %v405_v22 = vadd.f32 %v391_v15, %v367_v55  ;;  %v414_v27 = vmul.f32 %v1988_v16, %v411_v11 }
  0x2f   : > { %v397_v21 = vsel %vm388_vm4, %v394_v6, %v396_v10  ;;  %v406_v23 = vadd.f32 %v393_v17, %v368_v58  ;;  %v399_v24 = vsel %vm388_vm4, %v396_v10, %v398_v18  ;;  %v407_v25 = vadd.f32 %v395_v20, %v369_v59  ;;  %v526_v20 = vld [vmem:[%s2085_s24 + $0x4] sm:$0xc] }
  0x30   : > { %v408_v26 = vadd.f32 %v397_v21, %v370_v61  ;;  %v409_v28 = vadd.f32 %v399_v24, %v371_v62  ;;  %v417_v29 = vmul.f32 %v1988_v16, %v2099_v9  ;;  %v418_v30 = vmul.f32 %v1988_v16, %v2107_v13 }
  0x31   : > { %v419_v31 = vmul.f32 %v1988_v16, %v373_v47  ;;  %v427_v33 = vrot.slane %v414_v27, 6  ;;  %v428_v34 = vrot.slane %v415_v14, 6  ;;  %v430_v35 = vrot.slane %v416_v19, 6  ;;  %v1991_v14 = vld [vmem:[%s2771_s1 + $0x9] ss:$0 sm:$0xff] }
  0x32   : > { %v432_v36 = vrot.slane %v417_v29, 6  ;;  %v434_v37 = vrot.slane %v418_v30, 6  ;;  %v451_v39 = vunpack.c.l.bf16 %v448_v7  ;;  %v2190_v43 = vunpack.c.h.bf16 %v2093_v5 }
  0x33   : > { %v436_v38 = vrot.slane %v419_v31, 6  ;;  %v429_v41 = vsel %vm426_vm5, %v427_v33, %v428_v34  ;;  %v431_v42 = vsel %vm426_vm5, %v428_v34, %v430_v35  ;;  %v453_v44 = vunpack.c.l.bf16 %v450_v32 }
  0x34   : > { %v433_v46 = vsel %vm426_vm5, %v430_v35, %v432_v36  ;;  %v435_v47 = vsel %vm426_vm5, %v432_v36, %v434_v37  ;;  %v443_v49 = vadd.f32 %v429_v41, %v405_v22  ;;  %v444_v51 = vadd.f32 %v431_v42, %v406_v23  ;;  %v1992_v41 = vld [vmem:[%s2771_s1 + $0xa] ss:$0 sm:$0xff] }
  0x35   : > { %v437_v48 = vsel %vm426_vm5, %v434_v37, %v436_v38  ;;  %v445_v52 = vadd.f32 %v433_v46, %v407_v25  ;;  %v446_v53 = vadd.f32 %v435_v47, %v408_v26  ;;  %v456_v55 = vmul.f32 %v1989_v40, %v451_v39 }
  0x36   : > { %v447_v54 = vadd.f32 %v437_v48, %v409_v28  ;;  %v457_v5 = vmul.f32 %v1989_v40, %v2097_v8  ;;  %v458_v12 = vmul.f32 %v1989_v40, %v2099_v9  ;;  %v459_v16 = vmul.f32 %v1989_v40, %v2107_v13 }
  0x37   : > { %v460_v56 = vmul.f32 %v1989_v40, %v2190_v43  ;;  %v461_v57 = vmul.f32 %v1989_v40, %v453_v44  ;;  %v490_v58 = vunpack.c.l.bf16 %v489_v50  ;;  %v493_v59 = vmul.f32 %v1990_v45, %v451_v39  ;;  %v563_v40 = vld [vmem:[%s2085_s24 + $0x18] sm:$0x7] }
  0x38   : > { %v468_v60 = vrot.slane %v456_v55, 2  ;;  %v469_v61 = vrot.slane %v457_v5, 2  ;;  %v471_v62 = vrot.slane %v458_v12, 2  ;;  %v473_v63 = vrot.slane %v459_v16, 2 }
  0x39   : > { %v475_v0 = vrot.slane %v460_v56, 2  ;;  %v477_v1 = vrot.slane %v461_v57, 2  ;;  %v494_v2 = vmul.f32 %v1990_v45, %v2097_v8  ;;  %v495_v3 = vmul.f32 %v1990_v45, %v2099_v9 }
  0x3a   : > { %v470_v4 = vsel %vm274_vm1, %v468_v60, %v469_v61  ;;  %v472_v6 = vsel %vm274_vm1, %v469_v61, %v471_v62  ;;  %v474_v10 = vsel %vm274_vm1, %v471_v62, %v473_v63  ;;  %v496_v11 = vmul.f32 %v1990_v45, %v2107_v13 }
  0x3b   : > { %v476_v15 = vsel %vm274_vm1, %v473_v63, %v475_v0  ;;  %v478_v17 = vsel %vm274_vm1, %v475_v0, %v477_v1  ;;  %v484_v18 = vadd.f32 %v470_v4, %v443_v49  ;;  %v485_v19 = vadd.f32 %v472_v6, %v444_v51  ;;  %v600_v1 = vld [vmem:[%s2085_s24 + $0x4] sm:$0x8] }
  0x3c   : > { %v486_v21 = vadd.f32 %v474_v10, %v445_v52  ;;  %v487_v22 = vadd.f32 %v476_v15, %v446_v53  ;;  %v488_v23 = vadd.f32 %v478_v17, %v447_v54  ;;  %v497_v24 = vmul.f32 %v1990_v45, %v2190_v43 }
  0x3d   : > { %v498_v25 = vmul.f32 %v1990_v45, %v490_v58  ;;  %v505_v26 = vrot.slane %v493_v59, 3  ;;  %v506_v27 = vrot.slane %v494_v2, 3  ;;  %v508_v7 = vrot.slane %v495_v3, 3 }
  0x3e   : > { %v510_v28 = vrot.slane %v496_v11, 3  ;;  %v512_v29 = vrot.slane %v497_v24, 3  ;;  %v527_v30 = vunpack.c.l.bf16 %v526_v20  ;;  %v531_v31 = vmul.f32 %v1991_v14, %v2097_v8 }
  0x3f   : > { %v507_v32 = vsel %vm312_vm2, %v505_v26, %v506_v27  ;;  %v509_v33 = vsel %vm312_vm2, %v506_v27, %v508_v7  ;;  %v514_v34 = vrot.slane %v498_v25, 3  ;;  %v532_v35 = vmul.f32 %v1991_v14, %v2099_v9 }
  0x40   : > { %v511_v36 = vsel %vm312_vm2, %v508_v7, %v510_v28  ;;  %v513_v37 = vsel %vm312_vm2, %v510_v28, %v512_v29  ;;  %v521_v38 = vadd.f32 %v507_v32, %v484_v18  ;;  %v522_v39 = vadd.f32 %v509_v33, %v485_v19  ;;  %v1994_v28 = vld [vmem:[%s2771_s1 + $0xc] ss:$0 sm:$0xff]  ;;  %v2254_v33 = vld [vmem:[%s2085_s24 + $0x18] sm:$0xff]  }
  0x41   : > { %v515_v42 = vsel %vm312_vm2, %v512_v29, %v514_v34  ;;  %v523_v44 = vadd.f32 %v511_v36, %v486_v21  ;;  %v524_v45 = vadd.f32 %v513_v37, %v487_v22  ;;  %v530_v46 = vmul.f32 %v1991_v14, %v527_v30 }
  0x42   : > { %v525_v47 = vadd.f32 %v515_v42, %v488_v23  ;;  %v533_v48 = vmul.f32 %v1991_v14, %v2107_v13  ;;  %v534_v49 = vmul.f32 %v1991_v14, %v2190_v43  ;;  %v535_v50 = vmul.f32 %v1991_v14, %v490_v58  ;;  %v1993_v58 = vld [vmem:[%s2771_s1 + $0xb] ss:$0 sm:$0xff] }
  0x43   : > { %v542_v51 = vrot.slane %v530_v46, 4  ;;  %v543_v52 = vrot.slane %v531_v31, 4  ;;  %v545_v53 = vrot.slane %v532_v35, 4  ;;  %v564_v54 = vunpack.c.l.bf16 %v563_v40 }
  0x44   : > { %v547_v55 = vrot.slane %v533_v48, 4  ;;  %v549_v5 = vrot.slane %v534_v49, 4  ;;  %v551_v12 = vrot.slane %v535_v50, 4  ;;  %v567_v16 = vmul.f32 %v1992_v41, %v527_v30 }
  0x45   : > { %v544_v56 = vsel %vm350_vm3, %v542_v51, %v543_v52  ;;  %v546_v57 = vsel %vm350_vm3, %v543_v52, %v545_v53  ;;  %v568_v59 = vmul.f32 %v1992_v41, %v2097_v8  ;;  %v569_v60 = vmul.f32 %v1992_v41, %v2099_v9 }
  0x46   : > { %v548_v61 = vsel %vm350_vm3, %v545_v53, %v547_v55  ;;  %v550_v62 = vsel %vm350_vm3, %v547_v55, %v549_v5  ;;  %v552_v63 = vsel %vm350_vm3, %v549_v5, %v551_v12  ;;  %v558_v0 = vadd.f32 %v544_v56, %v521_v38  ;;  %v1995_v55 = vld [vmem:[%s2771_s1 + $0xd] ss:$0 sm:$0xff] }
  0x47   : > { %v559_v2 = vadd.f32 %v546_v57, %v522_v39  ;;  %v560_v3 = vadd.f32 %v548_v61, %v523_v44  ;;  %v561_v4 = vadd.f32 %v550_v62, %v524_v45  ;;  %v562_v6 = vadd.f32 %v552_v63, %v525_v47 }
  0x48   : > { %v570_v10 = vmul.f32 %v1992_v41, %v2107_v13  ;;  %v571_v11 = vmul.f32 %v1992_v41, %v2190_v43  ;;  %v572_v14 = vmul.f32 %v1992_v41, %v564_v54  ;;  %v579_v15 = vrot.slane %v567_v16, 5 }
  0x49   : > { %v580_v17 = vrot.slane %v568_v59, 5  ;;  %v582_v18 = vrot.slane %v569_v60, 5  ;;  %v601_v19 = vunpack.c.l.bf16 %v600_v1  ;;  %v605_v20 = vmul.f32 %v1993_v58, %v2097_v8 }
  0x4a   : > { %v584_v21 = vrot.slane %v570_v10, 5  ;;  %v586_v22 = vrot.slane %v571_v11, 5  ;;  %v588_v23 = vrot.slane %v572_v14, 5  ;;  %v606_v24 = vmul.f32 %v1993_v58, %v2099_v9 }
  0x4b   : > { %v581_v25 = vsel %vm388_vm4, %v579_v15, %v580_v17  ;;  %v583_v26 = vsel %vm388_vm4, %v580_v17, %v582_v18  ;;  %v604_v27 = vmul.f32 %v1993_v58, %v601_v19  ;;  %v607_v7 = vmul.f32 %v1993_v58, %v2107_v13 }
  0x4c   : > { %v585_v29 = vsel %vm388_vm4, %v582_v18, %v584_v21  ;;  %v587_v30 = vsel %vm388_vm4, %v584_v21, %v586_v22  ;;  %v589_v31 = vsel %vm388_vm4, %v586_v22, %v588_v23  ;;  %v595_v32 = vadd.f32 %v581_v25, %v558_v0 }
  0x4d   : > { %v596_v34 = vadd.f32 %v583_v26, %v559_v2  ;;  %v597_v35 = vadd.f32 %v585_v29, %v560_v3  ;;  %v598_v36 = vadd.f32 %v587_v30, %v561_v4  ;;  %v599_v37 = vadd.f32 %v589_v31, %v562_v6 }
  0x4e   : > { %v608_v38 = vmul.f32 %v1993_v58, %v2190_v43  ;;  %v609_v39 = vmul.f32 %v1993_v58, %v564_v54  ;;  %v616_v40 = vrot.slane %v604_v27, 6  ;;  %v617_v41 = vrot.slane %v605_v20, 6  ;;  %v688_v20 = vld [vmem:[%s2085_s24 + $0x1c] sm:$0x3] }
  0x4f   : > { %v619_v42 = vrot.slane %v606_v24, 6  ;;  %v621_v44 = vrot.slane %v607_v7, 6  ;;  %v2258_v45 = vunpack.c.l.bf16 %v2254_v33  ;;  %v641_v46 = vmul.f32 %v1994_v28, %v601_v19  ;;  %v687_v19 = vld [vmem:[%s2085_s24 + $0x8] sm:$0xc] }
  0x50   : > { %v618_v47 = vsel %vm426_vm5, %v616_v40, %v617_v41  ;;  %v623_v48 = vrot.slane %v608_v38, 6  ;;  %v625_v49 = vrot.slane %v609_v39, 6  ;;  %v642_v50 = vmul.f32 %v1994_v28, %v2097_v8 }
  0x51   : > { %v620_v51 = vsel %vm426_vm5, %v617_v41, %v619_v42  ;;  %v622_v52 = vsel %vm426_vm5, %v619_v42, %v621_v44  ;;  %v632_v53 = vadd.f32 %v618_v47, %v595_v32  ;;  %v643_v54 = vmul.f32 %v1994_v28, %v2099_v9 }
  0x52   : > { %v624_v5 = vsel %vm426_vm5, %v621_v44, %v623_v48  ;;  %v626_v12 = vsel %vm426_vm5, %v623_v48, %v625_v49  ;;  %v633_v16 = vadd.f32 %v620_v51, %v596_v34  ;;  %v634_v56 = vadd.f32 %v622_v52, %v597_v35  ;;  %v726_v34 = vld [vmem:[%s2085_s24 + $0x1c] sm:$0x7] }
  0x53   : > { %v635_v57 = vadd.f32 %v624_v5, %v598_v36  ;;  %v636_v59 = vadd.f32 %v626_v12, %v599_v37  ;;  %v644_v60 = vmul.f32 %v1994_v28, %v2107_v13  ;;  %v645_v58 = vmul.f32 %v1994_v28, %v2190_v43 }
  0x54   : > { %v646_v61 = vmul.f32 %v1994_v28, %v2258_v45  ;;  %v654_v62 = vrot.slane %v641_v46, 7  ;;  %v655_v63 = vrot.slane %v642_v50, 7  ;;  %v657_v0 = vrot.slane %v643_v54, 7  ;;  %v1997_v28 = vld [vmem:[%s2771_s1 + $0xf] ss:$0 sm:$0xff] }
  0x55   : > { %v659_v1 = vrot.slane %v644_v60, 7  ;;  %v661_v2 = vrot.slane %v645_v58, 7  ;;  %v677_v3 = vmul.f32 %v1995_v55, %v2097_v8  ;;  %v678_v10 = vmul.f32 %v1995_v55, %v2099_v9  ;;  %v1996_v8 = vld [vmem:[%s2771_s1 + $0xe] ss:$0 sm:$0xff]  ;;  %v1998_v60 = vld [vmem:[%s2771_s1 + $0x10] ss:$0 sm:$0xff] }
  0x56   : > { %v656_v4 = vsel %vm653_vm6, %v654_v62, %v655_v63  ;;  %v663_v6 = vrot.slane %v646_v61, 7  ;;  %v679_v11 = vmul.f32 %v1995_v55, %v2107_v13  ;;  %v658_v14 = vsel %vm653_vm6, %v655_v63, %v657_v0 }
  0x57   : > { %v660_v15 = vsel %vm653_vm6, %v657_v0, %v659_v1  ;;  %v662_v17 = vsel %vm653_vm6, %v659_v1, %v661_v2  ;;  %v670_v18 = vadd.f32 %v656_v4, %v632_v53  ;;  %v671_v22 = vadd.f32 %v658_v14, %v633_v16 }
  0x58   : > { %v664_v21 = vsel %vm653_vm6, %v661_v2, %v663_v6  ;;  %v672_v23 = vadd.f32 %v660_v15, %v634_v56  ;;  %v673_v24 = vadd.f32 %v662_v17, %v635_v57  ;;  %v680_v26 = vmul.f32 %v1995_v55, %v2190_v43 }
  0x59   : > { %v674_v25 = vadd.f32 %v664_v21, %v636_v59  ;;  %v681_v27 = vmul.f32 %v1995_v55, %v2258_v45  ;;  %v682_v7 = vadd.f32 %v677_v3, %v670_v18  ;;  %v683_v29 = vadd.f32 %v678_v10, %v671_v22  ;;  %v763_v59 = vld [vmem:[%s2085_s24 + $0x8] sm:$0x8]  ;;  %v1999_v22 = vld [vmem:[%s2771_s1 + $0x11] ss:$0 sm:$0xff] }
  0x5a   : > { %v684_v30 = vadd.f32 %v679_v11, %v672_v23  ;;  %v689_v31 = vunpack.c.l.bf16 %v687_v19  ;;  %v690_v32 = vunpack.c.l.bf16 %v688_v20  ;;  %v685_v35 = vadd.f32 %v680_v26, %v673_v24 }
  0x5b   : > { %v686_v36 = vadd.f32 %v681_v27, %v674_v25  ;;  %v694_v37 = vmul.f32 %v1996_v8, %v2099_v9  ;;  %v695_v38 = vmul.f32 %v1996_v8, %v2107_v13  ;;  %v696_v40 = vmul.f32 %v1996_v8, %v2190_v43 }
  0x5c   : > { %v693_v39 = vmul.f32 %v1996_v8, %v689_v31  ;;  %v697_v41 = vmul.f32 %v1996_v8, %v2258_v45  ;;  %v698_v42 = vmul.f32 %v1996_v8, %v690_v32  ;;  %v727_v47 = vunpack.c.l.bf16 %v726_v34 }
  0x5d   : > { %v706_v44 = vrot.slane %v694_v37, 4  ;;  %v708_v46 = vrot.slane %v695_v38, 4  ;;  %v730_v48 = vmul.f32 %v1997_v28, %v689_v31  ;;  %v710_v50 = vrot.slane %v696_v40, 4 }
  0x5e   : > { %v705_v49 = vrot.slane %v693_v39, 4  ;;  %v712_v51 = vrot.slane %v697_v41, 4  ;;  %v714_v52 = vrot.slane %v698_v42, 4  ;;  %v731_v54 = vmul.f32 %v1997_v28, %v2099_v9 }
  0x5f   : > { %v709_v53 = vsel %vm350_vm3, %v706_v44, %v708_v46  ;;  %v732_v55 = vmul.f32 %v1997_v28, %v2107_v13  ;;  %v733_v5 = vmul.f32 %v1997_v28, %v2190_v43  ;;  %v711_v16 = vsel %vm350_vm3, %v708_v46, %v710_v50 }
  0x60   : > { %v707_v12 = vsel %vm350_vm3, %v705_v49, %v706_v44  ;;  %v713_v56 = vsel %vm350_vm3, %v710_v50, %v712_v51  ;;  %v715_v57 = vsel %vm350_vm3, %v712_v51, %v714_v52  ;;  %v722_v61 = vadd.f32 %v709_v53, %v683_v29  ;;  %v2000_v49 = vld [vmem:[%s2771_s1 + $0x12] ss:$0 sm:$0xff] }
  0x61   : > { %v721_v58 = vadd.f32 %v707_v12, %v682_v7  ;;  %v723_v62 = vadd.f32 %v711_v16, %v684_v30  ;;  %v724_v63 = vadd.f32 %v713_v56, %v685_v35  ;;  %v725_v0 = vadd.f32 %v715_v57, %v686_v36 }
  0x62   : > { %v734_v1 = vmul.f32 %v1997_v28, %v2258_v45  ;;  %v735_v2 = vmul.f32 %v1997_v28, %v727_v47  ;;  %v742_v3 = vrot.slane %v730_v48, 5  ;;  %v743_v4 = vrot.slane %v731_v54, 5 }
  0x63   : > { %v745_v6 = vrot.slane %v732_v55, 5  ;;  %v747_v10 = vrot.slane %v733_v5, 5  ;;  %v764_v11 = vunpack.c.l.bf16 %v763_v59  ;;  %v768_v17 = vmul.f32 %v1998_v60, %v2099_v9 }
  0x64   : > { %v749_v14 = vrot.slane %v734_v1, 5  ;;  %v751_v15 = vrot.slane %v735_v2, 5  ;;  %v769_v18 = vmul.f32 %v1998_v60, %v2107_v13  ;;  %v744_v19 = vsel %vm388_vm4, %v742_v3, %v743_v4  ;;  %v2001_v2 = vld [vmem:[%s2771_s1 + $0x13] ss:$0 sm:$0xff] }
  0x65   : > { %v746_v20 = vsel %vm388_vm4, %v743_v4, %v745_v6  ;;  %v748_v8 = vsel %vm388_vm4, %v745_v6, %v747_v10  ;;  %v767_v21 = vmul.f32 %v1998_v60, %v764_v11  ;;  %v758_v25 = vadd.f32 %v744_v19, %v721_v58 }
  0x66   : > { %v750_v23 = vsel %vm388_vm4, %v747_v10, %v749_v14  ;;  %v752_v24 = vsel %vm388_vm4, %v749_v14, %v751_v15  ;;  %v759_v26 = vadd.f32 %v746_v20, %v722_v61  ;;  %v760_v27 = vadd.f32 %v748_v8, %v723_v62 }
  0x67   : > { %v761_v7 = vadd.f32 %v750_v23, %v724_v63  ;;  %v762_v28 = vadd.f32 %v752_v24, %v725_v0  ;;  %v770_v29 = vmul.f32 %v1998_v60, %v2190_v43  ;;  %v771_v30 = vmul.f32 %v1998_v60, %v2258_v45  ;;  %v2002_v23 = vld [vmem:[%s2771_s1 + $0x14] ss:$0 sm:$0xff] }
  0x68   : > { %v772_v31 = vmul.f32 %v1998_v60, %v727_v47  ;;  %v779_v32 = vrot.slane %v767_v21, 6  ;;  %v780_v34 = vrot.slane %v768_v17, 6  ;;  %v782_v35 = vrot.slane %v769_v18, 6 }
  0x69   : > { %v784_v36 = vrot.slane %v770_v29, 6  ;;  %v2322_v37 = vunpack.c.h.bf16 %v2254_v33  ;;  %v804_v38 = vmul.f32 %v1999_v22, %v764_v11  ;;  %v786_v40 = vrot.slane %v771_v30, 6  ;;  %v849_v11 = vld [vmem:[%s2085_s24 + $0x20] sm:$0x1] }
  0x6a   : > { %v781_v39 = vsel %vm426_vm5, %v779_v32, %v780_v34  ;;  %v788_v41 = vrot.slane %v772_v31, 6  ;;  %v805_v42 = vmul.f32 %v1999_v22, %v2099_v9  ;;  %v783_v44 = vsel %vm426_vm5, %v780_v34, %v782_v35 }
  0x6b   : > { %v785_v46 = vsel %vm426_vm5, %v782_v35, %v784_v36  ;;  %v795_v48 = vadd.f32 %v781_v39, %v758_v25  ;;  %v806_v47 = vmul.f32 %v1999_v22, %v2107_v13  ;;  %v787_v33 = vsel %vm426_vm5, %v784_v36, %v786_v40 }
  0x6c   : > { %v789_v50 = vsel %vm426_vm5, %v786_v40, %v788_v41  ;;  %v796_v51 = vadd.f32 %v783_v44, %v759_v26  ;;  %v797_v52 = vadd.f32 %v785_v46, %v760_v27  ;;  %v798_v53 = vadd.f32 %v787_v33, %v761_v7 }
  0x6d   : > { %v799_v54 = vadd.f32 %v789_v50, %v762_v28  ;;  %v807_v55 = vmul.f32 %v1999_v22, %v2190_v43  ;;  %v808_v5 = vmul.f32 %v1999_v22, %v2258_v45  ;;  %v809_v12 = vmul.f32 %v1999_v22, %v2322_v37  ;;  %v886_v22 = vld [vmem:[%s2085_s24 + $0xc] sm:$0xe] }
  0x6e   : > { %v816_v16 = vrot.slane %v804_v38, 7  ;;  %v817_v56 = vrot.slane %v805_v42, 7  ;;  %v819_v57 = vrot.slane %v806_v47, 7  ;;  %v839_v58 = vmul.f32 %v2000_v49, %v2099_v9 }
  0x6f   : > { %v821_v59 = vrot.slane %v807_v55, 7  ;;  %v823_v60 = vrot.slane %v808_v5, 7  ;;  %v840_v61 = vmul.f32 %v2000_v49, %v2107_v13  ;;  %v825_v0 = vrot.slane %v809_v12, 7  ;;  %v2003_v55 = vld [vmem:[%s2771_s1 + $0x15] ss:$0 sm:$0xff] }
  0x70   : > { %v818_v62 = vsel %vm653_vm6, %v816_v16, %v817_v56  ;;  %v820_v63 = vsel %vm653_vm6, %v817_v56, %v819_v57  ;;  %v841_v1 = vmul.f32 %v2000_v49, %v2190_v43  ;;  %v842_v18 = vmul.f32 %v2000_v49, %v2258_v45 }
  0x71   : > { %v822_v3 = vsel %vm653_vm6, %v819_v57, %v821_v59  ;;  %v824_v4 = vsel %vm653_vm6, %v821_v59, %v823_v60  ;;  %v832_v6 = vadd.f32 %v818_v62, %v795_v48  ;;  %v833_v10 = vadd.f32 %v820_v63, %v796_v51 }
  0x72   : > { %v826_v14 = vsel %vm653_vm6, %v823_v60, %v825_v0  ;;  %v834_v15 = vadd.f32 %v822_v3, %v797_v52  ;;  %v835_v17 = vadd.f32 %v824_v4, %v798_v53  ;;  %v843_v20 = vmul.f32 %v2000_v49, %v2322_v37  ;;  %v923_v53 = vld [vmem:[%s2085_s24 + $0xc] sm:$0x8] }
  0x73   : > { %v836_v19 = vadd.f32 %v826_v14, %v799_v54  ;;  %v844_v8 = vadd.f32 %v839_v58, %v832_v6  ;;  %v845_v21 = vadd.f32 %v840_v61, %v833_v10  ;;  %v850_v26 = vunpack.c.l.bf16 %v849_v11  ;;  %v924_v54 = vld [vmem:[%s2085_s24 + $0x20] sm:$0x7] }
  0x74   : > { %v846_v24 = vadd.f32 %v841_v1, %v834_v15  ;;  %v847_v25 = vadd.f32 %v842_v18, %v835_v17  ;;  %v853_v27 = vmul.f32 %v2001_v2, %v2099_v9  ;;  %v854_v28 = vmul.f32 %v2001_v2, %v2107_v13  ;;  %v2380_v15 = vld [vmem:[%s2085_s24 + $0x20] sm:$0xff]   ;;  %v2004_v17 = vld [vmem:[%s2771_s1 + $0x16] ss:$0 sm:$0xff] }
  0x75   : > { %v848_v7 = vadd.f32 %v843_v20, %v836_v19  ;;  %v855_v29 = vmul.f32 %v2001_v2, %v2190_v43  ;;  %v856_v30 = vmul.f32 %v2001_v2, %v2258_v45  ;;  %v857_v31 = vmul.f32 %v2001_v2, %v2322_v37 }
  0x76   : > { %v858_v32 = vmul.f32 %v2001_v2, %v850_v26  ;;  %v865_v34 = vrot.slane %v853_v27, 1  ;;  %v887_v35 = vunpack.c.l.bf16 %v886_v22  ;;  %v866_v36 = vrot.slane %v854_v28, 1 }
  0x77   : > { %v868_v38 = vrot.slane %v855_v29, 1  ;;  %v870_v39 = vrot.slane %v856_v30, 1  ;;  %v891_v40 = vmul.f32 %v2002_v23, %v2107_v13  ;;  %v872_v9 = vrot.slane %v857_v31, 1 }
  0x78   : > { %v874_v41 = vrot.slane %v858_v32, 1  ;;  %v890_v42 = vmul.f32 %v2002_v23, %v887_v35  ;;  %v892_v44 = vmul.f32 %v2002_v23, %v2190_v43  ;;  %v867_v46 = vsel %vm236_vm0, %v865_v34, %v866_v36 }
  0x79   : > { %v869_v48 = vsel %vm236_vm0, %v866_v36, %v868_v38  ;;  %v871_v47 = vsel %vm236_vm0, %v868_v38, %v870_v39  ;;  %v893_v49 = vmul.f32 %v2002_v23, %v2258_v45  ;;  %v873_v33 = vsel %vm236_vm0, %v870_v39, %v872_v9  ;;  %v2005_v38 = vld [vmem:[%s2771_s1 + $0x17] ss:$0 sm:$0xff] }
  0x7a   : > { %v875_v50 = vsel %vm236_vm0, %v872_v9, %v874_v41  ;;  %v881_v51 = vadd.f32 %v867_v46, %v844_v8  ;;  %v882_v52 = vadd.f32 %v869_v48, %v845_v21  ;;  %v883_v5 = vadd.f32 %v871_v47, %v846_v24 }
  0x7b   : > { %v884_v12 = vadd.f32 %v873_v33, %v847_v25  ;;  %v885_v16 = vadd.f32 %v875_v50, %v848_v7  ;;  %v894_v56 = vmul.f32 %v2002_v23, %v2322_v37  ;;  %v895_v57 = vmul.f32 %v2002_v23, %v850_v26 }
  0x7c   : > { %v902_v59 = vrot.slane %v890_v42, 2  ;;  %v903_v60 = vrot.slane %v891_v40, 2  ;;  %v905_v58 = vrot.slane %v892_v44, 2  ;;  %v907_v61 = vrot.slane %v893_v49, 2 }
  0x7d   : > { %v909_v62 = vrot.slane %v894_v56, 2  ;;  %v925_v63 = vunpack.c.l.bf16 %v923_v53  ;;  %v926_v0 = vunpack.c.l.bf16 %v924_v54  ;;  %v911_v3 = vrot.slane %v895_v57, 2  ;;  %v2006_v56 = vld [vmem:[%s2771_s1 + $0x18] ss:$0 sm:$0xff] }
  0x7e   : > { %v904_v1 = vsel %vm274_vm1, %v902_v59, %v903_v60  ;;  %v906_v2 = vsel %vm274_vm1, %v903_v60, %v905_v58  ;;  %v930_v4 = vmul.f32 %v2003_v55, %v2107_v13  ;;  %v908_v6 = vsel %vm274_vm1, %v905_v58, %v907_v61 }
  0x7f   : > { %v910_v10 = vsel %vm274_vm1, %v907_v61, %v909_v62  ;;  %v918_v11 = vadd.f32 %v904_v1, %v881_v51  ;;  %v919_v14 = vadd.f32 %v906_v2, %v882_v52  ;;  %v912_v18 = vsel %vm274_vm1, %v909_v62, %v911_v3  ;;  %v1011_v61 = vld [vmem:[%s2085_s24 + $0x24] sm:$0x1] }
  0x80   : > { %v920_v19 = vadd.f32 %v908_v6, %v883_v5  ;;  %v921_v20 = vadd.f32 %v910_v10, %v884_v12  ;;  %v929_v8 = vmul.f32 %v2003_v55, %v925_v63  ;;  %v922_v21 = vadd.f32 %v912_v18, %v885_v16  ;;  %v1048_v18 = vld [vmem:[%s2085_s24 + $0x10] sm:$0xe] }
  0x81   : > { %v931_v22 = vmul.f32 %v2003_v55, %v2190_v43  ;;  %v932_v23 = vmul.f32 %v2003_v55, %v2258_v45  ;;  %v933_v24 = vmul.f32 %v2003_v55, %v2322_v37  ;;  %v934_v25 = vmul.f32 %v2003_v55, %v926_v0 }
  0x82   : > { %v941_v26 = vrot.slane %v929_v8, 6  ;;  %v942_v27 = vrot.slane %v930_v4, 6  ;;  %v2390_v7 = vunpack.c.l.bf16 %v2380_v15  ;;  %v966_v31 = vmul.f32 %v2004_v17, %v925_v63 }
  0x83   : > { %v944_v28 = vrot.slane %v931_v22, 6  ;;  %v946_v29 = vrot.slane %v932_v23, 6  ;;  %v948_v30 = vrot.slane %v933_v24, 6  ;;  %v950_v34 = vrot.slane %v934_v25, 6 }
  0x84   : > { %v943_v32 = vsel %vm426_vm5, %v941_v26, %v942_v27  ;;  %v967_v35 = vmul.f32 %v2004_v17, %v2107_v13  ;;  %v968_v36 = vmul.f32 %v2004_v17, %v2190_v43  ;;  %v969_v49 = vmul.f32 %v2004_v17, %v2258_v45 }
  0x85   : > { %v945_v39 = vsel %vm426_vm5, %v942_v27, %v944_v28  ;;  %v947_v40 = vsel %vm426_vm5, %v944_v28, %v946_v29  ;;  %v949_v9 = vsel %vm426_vm5, %v946_v29, %v948_v30  ;;  %v957_v41 = vadd.f32 %v943_v32, %v918_v11 }
  0x86   : > { %v951_v42 = vsel %vm426_vm5, %v948_v30, %v950_v34  ;;  %v958_v44 = vadd.f32 %v945_v39, %v919_v14  ;;  %v959_v46 = vadd.f32 %v947_v40, %v920_v19  ;;  %v960_v48 = vadd.f32 %v949_v9, %v921_v20  ;;  %v2007_v19 = vld [vmem:[%s2771_s1 + $0x19] ss:$0 sm:$0xff] }
  0x87   : > { %v961_v47 = vadd.f32 %v951_v42, %v922_v21  ;;  %v970_v33 = vmul.f32 %v2004_v17, %v2322_v37  ;;  %v971_v50 = vmul.f32 %v2004_v17, %v2390_v7  ;;  %v978_v51 = vrot.slane %v966_v31, 7 }
  0x88   : > { %v979_v52 = vrot.slane %v967_v35, 7  ;;  %v981_v53 = vrot.slane %v968_v36, 7  ;;  %v1001_v54 = vmul.f32 %v2005_v38, %v2107_v13  ;;  %v983_v55 = vrot.slane %v969_v49, 7 }
  0x89   : > { %v985_v5 = vrot.slane %v970_v33, 7  ;;  %v987_v12 = vrot.slane %v971_v50, 7  ;;  %v1002_v16 = vmul.f32 %v2005_v38, %v2190_v43  ;;  %v1003_v60 = vmul.f32 %v2005_v38, %v2258_v45 }
  0x8a   : > { %v980_v57 = vsel %vm653_vm6, %v978_v51, %v979_v52  ;;  %v982_v59 = vsel %vm653_vm6, %v979_v52, %v981_v53  ;;  %v1004_v58 = vmul.f32 %v2005_v38, %v2322_v37  ;;  %v984_v62 = vsel %vm653_vm6, %v981_v53, %v983_v55 }
  0x8b   : > { %v986_v63 = vsel %vm653_vm6, %v983_v55, %v985_v5  ;;  %v988_v0 = vsel %vm653_vm6, %v985_v5, %v987_v12  ;;  %v994_v1 = vadd.f32 %v980_v57, %v957_v41  ;;  %v995_v2 = vadd.f32 %v982_v59, %v958_v44  ;;  %v1085_v44 = vld [vmem:[%s2085_s24 + $0x24] sm:$0x3] }
  0x8c   : > { %v996_v3 = vadd.f32 %v984_v62, %v959_v46  ;;  %v997_v4 = vadd.f32 %v986_v63, %v960_v48  ;;  %v998_v6 = vadd.f32 %v988_v0, %v961_v47  ;;  %v1005_v10 = vmul.f32 %v2005_v38, %v2390_v7  ;;  %v2008_v46 = vld [vmem:[%s2771_s1 + $0x1a] ss:$0 sm:$0xff]  ;;  %v2009_v63 = vld [vmem:[%s2771_s1 + $0x1b] ss:$0 sm:$0xff] }
  0x8d   : > { %v1006_v11 = vadd.f32 %v1001_v54, %v994_v1  ;;  %v1012_v14 = vunpack.c.l.bf16 %v1011_v61  ;;  %v1015_v17 = vmul.f32 %v2006_v56, %v2107_v13  ;;  %v1007_v20 = vadd.f32 %v1002_v16, %v995_v2 }
  0x8e   : > { %v1008_v8 = vadd.f32 %v1003_v60, %v996_v3  ;;  %v1009_v21 = vadd.f32 %v1004_v58, %v997_v4  ;;  %v1016_v22 = vmul.f32 %v2006_v56, %v2190_v43  ;;  %v1010_v23 = vadd.f32 %v1005_v10, %v998_v6  ;;  %v1122_v4 = vld [vmem:[%s2085_s24 + $0x10] sm:$0xc] }
  0x8f   : > { %v1017_v24 = vmul.f32 %v2006_v56, %v2258_v45  ;;  %v1018_v25 = vmul.f32 %v2006_v56, %v2322_v37  ;;  %v1019_v26 = vmul.f32 %v2006_v56, %v2390_v7  ;;  %v1020_v27 = vmul.f32 %v2006_v56, %v1012_v14 }
  0x90   : > { %v1027_v13 = vrot.slane %v1015_v17, 1  ;;  %v1028_v28 = vrot.slane %v1016_v22, 1  ;;  %v1049_v29 = vunpack.c.l.bf16 %v1048_v18  ;;  %v1053_v34 = vmul.f32 %v2007_v19, %v2190_v43 }
  0x91   : > { %v1030_v30 = vrot.slane %v1017_v24, 1  ;;  %v1032_v31 = vrot.slane %v1018_v25, 1  ;;  %v1034_v32 = vrot.slane %v1019_v26, 1  ;;  %v1036_v36 = vrot.slane %v1020_v27, 1 }
  0x92   : > { %v1029_v35 = vsel %vm236_vm0, %v1027_v13, %v1028_v28  ;;  %v1052_v38 = vmul.f32 %v2007_v19, %v1049_v29  ;;  %v1054_v39 = vmul.f32 %v2007_v19, %v2258_v45  ;;  %v1055_v51 = vmul.f32 %v2007_v19, %v2322_v37 }
  0x93   : > { %v1031_v40 = vsel %vm236_vm0, %v1028_v28, %v1030_v30  ;;  %v1033_v9 = vsel %vm236_vm0, %v1030_v30, %v1032_v31  ;;  %v1035_v41 = vsel %vm236_vm0, %v1032_v31, %v1034_v32  ;;  %v1043_v42 = vadd.f32 %v1029_v35, %v1006_v11  ;;  %v2010_v31 = vld [vmem:[%s2771_s1 + $0x1c] ss:$0 sm:$0xff] }
  0x94   : > { %v1037_v48 = vsel %vm236_vm0, %v1034_v32, %v1036_v36  ;;  %v1044_v47 = vadd.f32 %v1031_v40, %v1007_v20  ;;  %v1045_v49 = vadd.f32 %v1033_v9, %v1008_v8  ;;  %v1046_v33 = vadd.f32 %v1035_v41, %v1009_v21 }
  0x95   : > { %v1047_v50 = vadd.f32 %v1037_v48, %v1010_v23  ;;  %v1056_v52 = vmul.f32 %v2007_v19, %v2390_v7  ;;  %v1057_v53 = vmul.f32 %v2007_v19, %v1012_v14  ;;  %v1064_v54 = vrot.slane %v1052_v38, 2 }
  0x96   : > { %v1065_v55 = vrot.slane %v1053_v34, 2  ;;  %v1067_v5 = vrot.slane %v1054_v39, 2  ;;  %v1086_v12 = vunpack.c.l.bf16 %v1085_v44  ;;  %v1069_v16 = vrot.slane %v1055_v51, 2 }
  0x97   : > { %v1071_v56 = vrot.slane %v1056_v52, 2  ;;  %v1073_v57 = vrot.slane %v1057_v53, 2  ;;  %v1089_v59 = vmul.f32 %v2008_v46, %v1049_v29  ;;  %v1090_v61 = vmul.f32 %v2008_v46, %v2190_v43 }
  0x98   : > { %v1066_v60 = vsel %vm274_vm1, %v1064_v54, %v1065_v55  ;;  %v1068_v58 = vsel %vm274_vm1, %v1065_v55, %v1067_v5  ;;  %v1091_v62 = vmul.f32 %v2008_v46, %v2258_v45  ;;  %v1070_v0 = vsel %vm274_vm1, %v1067_v5, %v1069_v16 }
  0x99   : > { %v1072_v1 = vsel %vm274_vm1, %v1069_v16, %v1071_v56  ;;  %v1074_v2 = vsel %vm274_vm1, %v1071_v56, %v1073_v57  ;;  %v1080_v3 = vadd.f32 %v1066_v60, %v1043_v42  ;;  %v1081_v6 = vadd.f32 %v1068_v58, %v1044_v47  ;;  %v1173_v16 = vld [vmem:[%s2085_s24 + $0x28] sm:$0x1] }
  0x9a   : > { %v1082_v10 = vadd.f32 %v1070_v0, %v1045_v49  ;;  %v1083_v11 = vadd.f32 %v1072_v1, %v1046_v33  ;;  %v1084_v14 = vadd.f32 %v1074_v2, %v1047_v50  ;;  %v1092_v17 = vmul.f32 %v2008_v46, %v2322_v37  ;;  %v2012_v0 = vld [vmem:[%s2771_s1 + $0x1e] ss:$0 sm:$0xff] }
  0x9b   : > { %v1093_v18 = vmul.f32 %v2008_v46, %v2390_v7  ;;  %v1094_v19 = vmul.f32 %v2008_v46, %v1086_v12  ;;  %v1101_v20 = vrot.slane %v1089_v59, 3  ;;  %v1102_v8 = vrot.slane %v1090_v61, 3 }
  0x9c   : > { %v1104_v21 = vrot.slane %v1091_v62, 3  ;;  %v1123_v22 = vunpack.c.l.bf16 %v1122_v4  ;;  %v1127_v23 = vmul.f32 %v2009_v63, %v2190_v43  ;;  %v1106_v24 = vrot.slane %v1092_v17, 3 }
  0x9d   : > { %v1108_v25 = vrot.slane %v1093_v18, 3  ;;  %v1110_v26 = vrot.slane %v1094_v19, 3  ;;  %v1128_v27 = vmul.f32 %v2009_v63, %v2258_v45  ;;  %v1103_v13 = vsel %vm312_vm2, %v1101_v20, %v1102_v8 }
  0x9e   : > { %v1105_v28 = vsel %vm312_vm2, %v1102_v8, %v1104_v21  ;;  %v1126_v29 = vmul.f32 %v2009_v63, %v1123_v22  ;;  %v1129_v30 = vmul.f32 %v2009_v63, %v2322_v37  ;;  %v1107_v32 = vsel %vm312_vm2, %v1104_v21, %v1106_v24 }
  0x9f   : > { %v1109_v34 = vsel %vm312_vm2, %v1106_v24, %v1108_v25  ;;  %v1111_v35 = vsel %vm312_vm2, %v1108_v25, %v1110_v26  ;;  %v1117_v36 = vadd.f32 %v1103_v13, %v1080_v3  ;;  %v1118_v38 = vadd.f32 %v1105_v28, %v1081_v6  ;;  %v1210_v6 = vld [vmem:[%s2085_s24 + $0x14] sm:$0xe] }
  0xa0   : > { %v1119_v39 = vadd.f32 %v1107_v32, %v1082_v10  ;;  %v1120_v40 = vadd.f32 %v1109_v34, %v1083_v11  ;;  %v1121_v9 = vadd.f32 %v1111_v35, %v1084_v14  ;;  %v1130_v41 = vmul.f32 %v2009_v63, %v2390_v7 }
  0xa1   : > { %v1131_v42 = vmul.f32 %v2009_v63, %v1086_v12  ;;  %v1138_v44 = vrot.slane %v1126_v29, 4  ;;  %v1139_v46 = vrot.slane %v1127_v23, 4  ;;  %v1141_v48 = vrot.slane %v1128_v27, 4 }
  0xa2   : > { %v1143_v47 = vrot.slane %v1129_v30, 4  ;;  %v2467_v49 = vunpack.c.h.bf16 %v2380_v15  ;;  %v1163_v33 = vmul.f32 %v2010_v31, %v2190_v43  ;;  %v1145_v51 = vrot.slane %v1130_v41, 4  ;;  %v2011_v15 = vld [vmem:[%s2771_s1 + $0x1d] ss:$0 sm:$0xff] }
  0xa3   : > { %v1140_v50 = vsel %vm350_vm3, %v1138_v44, %v1139_v46  ;;  %v1147_v52 = vrot.slane %v1131_v42, 4  ;;  %v1164_v53 = vmul.f32 %v2010_v31, %v2258_v45  ;;  %v1142_v54 = vsel %vm350_vm3, %v1139_v46, %v1141_v48 }
  0xa4   : > { %v1144_v55 = vsel %vm350_vm3, %v1141_v48, %v1143_v47  ;;  %v1154_v5 = vadd.f32 %v1140_v50, %v1117_v36  ;;  %v1165_v12 = vmul.f32 %v2010_v31, %v2322_v37  ;;  %v1146_v56 = vsel %vm350_vm3, %v1143_v47, %v1145_v51  ;;  %v1247_v36 = vld [vmem:[%s2085_s24 + $0x28] sm:$0x3] }
  0xa5   : > { %v1148_v57 = vsel %vm350_vm3, %v1145_v51, %v1147_v52  ;;  %v1155_v59 = vadd.f32 %v1142_v54, %v1118_v38  ;;  %v1156_v60 = vadd.f32 %v1144_v55, %v1119_v39  ;;  %v1157_v58 = vadd.f32 %v1146_v56, %v1120_v40  ;;  %v2013_v38 = vld [vmem:[%s2771_s1 + $0x1f] ss:$0 sm:$0xff]  ;;  %v2014_v56 = vld [vmem:[%s2771_s1 + $0x20] ss:$0 sm:$0xff] }
  0xa6   : > { %v1158_v61 = vadd.f32 %v1148_v57, %v1121_v9  ;;  %v1166_v62 = vmul.f32 %v2010_v31, %v2390_v7  ;;  %v1167_v63 = vmul.f32 %v2010_v31, %v2467_v49  ;;  %v1168_v1 = vadd.f32 %v1163_v33, %v1154_v5 }
  0xa7   : > { %v1169_v2 = vadd.f32 %v1164_v53, %v1155_v59  ;;  %v1170_v3 = vadd.f32 %v1165_v12, %v1156_v60  ;;  %v1174_v4 = vunpack.c.l.bf16 %v1173_v16  ;;  %v1177_v14 = vmul.f32 %v2011_v15, %v2190_v43 }
  0xa8   : > { %v1171_v10 = vadd.f32 %v1166_v62, %v1157_v58  ;;  %v1172_v11 = vadd.f32 %v1167_v63, %v1158_v61  ;;  %v1178_v17 = vmul.f32 %v2011_v15, %v2258_v45  ;;  %v1179_v18 = vmul.f32 %v2011_v15, %v2322_v37  ;;  %v1284_v61 = vld [vmem:[%s2085_s24 + $0x14] sm:$0xc] }
  0xa9   : > { %v1180_v19 = vmul.f32 %v2011_v15, %v2390_v7  ;;  %v1181_v20 = vmul.f32 %v2011_v15, %v2467_v49  ;;  %v1182_v8 = vmul.f32 %v2011_v15, %v1174_v4  ;;  %v1189_v21 = vrot.slane %v1177_v14, 1 }
  0xaa   : > { %v1190_v22 = vrot.slane %v1178_v17, 1  ;;  %v1211_v23 = vunpack.c.l.bf16 %v1210_v6  ;;  %v1215_v24 = vmul.f32 %v2012_v0, %v2258_v45  ;;  %v1192_v25 = vrot.slane %v1179_v18, 1 }
  0xab   : > { %v1194_v26 = vrot.slane %v1180_v19, 1  ;;  %v1196_v27 = vrot.slane %v1181_v20, 1  ;;  %v1198_v13 = vrot.slane %v1182_v8, 1  ;;  %v1216_v29 = vmul.f32 %v2012_v0, %v2322_v37 }
  0xac   : > { %v1191_v43 = vsel %vm236_vm0, %v1189_v21, %v1190_v22  ;;  %v1214_v28 = vmul.f32 %v2012_v0, %v1211_v23  ;;  %v1217_v30 = vmul.f32 %v2012_v0, %v2390_v7  ;;  %v1193_v31 = vsel %vm236_vm0, %v1190_v22, %v1192_v25 }
  0xad   : > { %v1195_v32 = vsel %vm236_vm0, %v1192_v25, %v1194_v26  ;;  %v1197_v34 = vsel %vm236_vm0, %v1194_v26, %v1196_v27  ;;  %v1199_v35 = vsel %vm236_vm0, %v1196_v27, %v1198_v13  ;;  %v1205_v39 = vadd.f32 %v1191_v43, %v1168_v1  ;;  %v2015_v25 = vld [vmem:[%s2771_s1 + $0x21] ss:$0 sm:$0xff] }
  0xae   : > { %v1206_v40 = vadd.f32 %v1193_v31, %v1169_v2  ;;  %v1207_v9 = vadd.f32 %v1195_v32, %v1170_v3  ;;  %v1208_v41 = vadd.f32 %v1197_v34, %v1171_v10  ;;  %v1209_v42 = vadd.f32 %v1199_v35, %v1172_v11 }
  0xaf   : > { %v1218_v44 = vmul.f32 %v2012_v0, %v2467_v49  ;;  %v1219_v46 = vmul.f32 %v2012_v0, %v1174_v4  ;;  %v1226_v48 = vrot.slane %v1214_v28, 2  ;;  %v1227_v47 = vrot.slane %v1215_v24, 2  ;;  %v1321_v28 = vld [vmem:[%s2085_s24 + $0x28] sm:$0x7] }
  0xb0   : > { %v1229_v33 = vrot.slane %v1216_v29, 2  ;;  %v1231_v50 = vrot.slane %v1217_v30, 2  ;;  %v1248_v51 = vunpack.c.l.bf16 %v1247_v36  ;;  %v1251_v54 = vmul.f32 %v2013_v38, %v1211_v23 }
  0xb1   : > { %v1233_v52 = vrot.slane %v1218_v44, 2  ;;  %v1235_v53 = vrot.slane %v1219_v46, 2  ;;  %v1252_v55 = vmul.f32 %v2013_v38, %v2258_v45  ;;  %v1228_v5 = vsel %vm274_vm1, %v1226_v48, %v1227_v47 }
  0xb2   : > { %v1230_v12 = vsel %vm274_vm1, %v1227_v47, %v1229_v33  ;;  %v1232_v16 = vsel %vm274_vm1, %v1229_v33, %v1231_v50  ;;  %v1253_v15 = vmul.f32 %v2013_v38, %v2322_v37  ;;  %v1242_v60 = vadd.f32 %v1228_v5, %v1205_v39 }
  0xb3   : > { %v1234_v57 = vsel %vm274_vm1, %v1231_v50, %v1233_v52  ;;  %v1236_v59 = vsel %vm274_vm1, %v1233_v52, %v1235_v53  ;;  %v1243_v58 = vadd.f32 %v1230_v12, %v1206_v40  ;;  %v1244_v62 = vadd.f32 %v1232_v16, %v1207_v9  ;;  %v1358_v52 = vld [vmem:[%s2085_s24 + $0x14] sm:$0x8]  ;;  %v2016_v53 = vld [vmem:[%s2771_s1 + $0x22] ss:$0 sm:$0xff] }
  0xb4   : > { %v1245_v63 = vadd.f32 %v1234_v57, %v1208_v41  ;;  %v1246_v0 = vadd.f32 %v1236_v59, %v1209_v42  ;;  %v1254_v1 = vmul.f32 %v2013_v38, %v2390_v7  ;;  %v1255_v2 = vmul.f32 %v2013_v38, %v2467_v49 }
  0xb5   : > { %v1256_v3 = vmul.f32 %v2013_v38, %v1248_v51  ;;  %v1263_v4 = vrot.slane %v1251_v54, 3  ;;  %v1264_v6 = vrot.slane %v1252_v55, 3  ;;  %v1266_v10 = vrot.slane %v1253_v15, 3 }
  0xb6   : > { %v1268_v11 = vrot.slane %v1254_v1, 3  ;;  %v1285_v14 = vunpack.c.l.bf16 %v1284_v61  ;;  %v1289_v17 = vmul.f32 %v2014_v56, %v2258_v45  ;;  %v1270_v19 = vrot.slane %v1255_v2, 3 }
  0xb7   : > { %v1265_v18 = vsel %vm312_vm2, %v1263_v4, %v1264_v6  ;;  %v1272_v20 = vrot.slane %v1256_v3, 3  ;;  %v1290_v8 = vmul.f32 %v2014_v56, %v2322_v37  ;;  %v1267_v21 = vsel %vm312_vm2, %v1264_v6, %v1266_v10 }
  0xb8   : > { %v1269_v22 = vsel %vm312_vm2, %v1266_v10, %v1268_v11  ;;  %v1279_v23 = vadd.f32 %v1265_v18, %v1242_v60  ;;  %v1288_v24 = vmul.f32 %v2014_v56, %v1285_v14  ;;  %v1271_v26 = vsel %vm312_vm2, %v1268_v11, %v1270_v19  ;;  %v1395_v18 = vld [vmem:[%s2085_s24 + $0x18] sm:$0xe] }
  0xb9   : > { %v1273_v27 = vsel %vm312_vm2, %v1270_v19, %v1272_v20  ;;  %v1280_v13 = vadd.f32 %v1267_v21, %v1243_v58  ;;  %v1281_v43 = vadd.f32 %v1269_v22, %v1244_v62  ;;  %v1282_v29 = vadd.f32 %v1271_v26, %v1245_v63  ;;  %v2553_v19 = vld [vmem:[%s2085_s24 + $0x28] sm:$0xff]  }
  0xba   : > { %v1283_v30 = vadd.f32 %v1273_v27, %v1246_v0  ;;  %v1291_v31 = vmul.f32 %v2014_v56, %v2390_v7  ;;  %v1292_v32 = vmul.f32 %v2014_v56, %v2467_v49  ;;  %v1293_v34 = vmul.f32 %v2014_v56, %v1248_v51  ;;  %v1397_v22 = vld [vmem:[%s2085_s24 + $0x2c] sm:$0x1] }
  0xbb   : > { %v1300_v35 = vrot.slane %v1288_v24, 4  ;;  %v1301_v36 = vrot.slane %v1289_v17, 4  ;;  %v1303_v38 = vrot.slane %v1290_v8, 4  ;;  %v1322_v9 = vunpack.c.l.bf16 %v1321_v28 }
  0xbc   : > { %v1305_v39 = vrot.slane %v1291_v31, 4  ;;  %v1307_v40 = vrot.slane %v1292_v32, 4  ;;  %v1325_v41 = vmul.f32 %v2015_v25, %v1285_v14  ;;  %v1309_v46 = vrot.slane %v1293_v34, 4 }
  0xbd   : > { %v1302_v42 = vsel %vm350_vm3, %v1300_v35, %v1301_v36  ;;  %v1304_v44 = vsel %vm350_vm3, %v1301_v36, %v1303_v38  ;;  %v1326_v48 = vmul.f32 %v2015_v25, %v2258_v45  ;;  %v1327_v12 = vmul.f32 %v2015_v25, %v2322_v37 }
  0xbe   : > { %v1306_v47 = vsel %vm350_vm3, %v1303_v38, %v1305_v39  ;;  %v1308_v33 = vsel %vm350_vm3, %v1305_v39, %v1307_v40  ;;  %v1316_v50 = vadd.f32 %v1302_v42, %v1279_v23  ;;  %v1317_v51 = vadd.f32 %v1304_v44, %v1280_v13  ;;  %v2017_v23 = vld [vmem:[%s2771_s1 + $0x23] ss:$0 sm:$0xff] }
  0xbf   : > { %v1310_v54 = vsel %vm350_vm3, %v1307_v40, %v1309_v46  ;;  %v1318_v55 = vadd.f32 %v1306_v47, %v1281_v43  ;;  %v1319_v5 = vadd.f32 %v1308_v33, %v1282_v29  ;;  %v1328_v15 = vmul.f32 %v2015_v25, %v2390_v7  ;;  %v2018_v40 = vld [vmem:[%s2771_s1 + $0x24] ss:$0 sm:$0xff]  ;;  %v1436_v46 = vld [vmem:[%s2085_s24 + $0x2c] sm:$0x3] }
  0xc0   : > { %v1320_v16 = vadd.f32 %v1310_v54, %v1283_v30  ;;  %v1329_v56 = vmul.f32 %v2015_v25, %v2467_v49  ;;  %v1330_v57 = vmul.f32 %v2015_v25, %v1322_v9  ;;  %v1337_v59 = vrot.slane %v1325_v41, 5 }
  0xc1   : > { %v1338_v60 = vrot.slane %v1326_v48, 5  ;;  %v1340_v58 = vrot.slane %v1327_v12, 5  ;;  %v1359_v61 = vunpack.c.l.bf16 %v1358_v52  ;;  %v1342_v62 = vrot.slane %v1328_v15, 5 }
  0xc2   : > { %v1344_v63 = vrot.slane %v1329_v56, 5  ;;  %v1346_v0 = vrot.slane %v1330_v57, 5  ;;  %v1363_v1 = vmul.f32 %v2016_v53, %v2258_v45  ;;  %v1364_v6 = vmul.f32 %v2016_v53, %v2322_v37 }
  0xc3   : > { %v1339_v2 = vsel %vm388_vm4, %v1337_v59, %v1338_v60  ;;  %v1341_v3 = vsel %vm388_vm4, %v1338_v60, %v1340_v58  ;;  %v1362_v4 = vmul.f32 %v2016_v53, %v1359_v61  ;;  %v1343_v10 = vsel %vm388_vm4, %v1340_v58, %v1342_v62 }
  0xc4   : > { %v1345_v11 = vsel %vm388_vm4, %v1342_v62, %v1344_v63  ;;  %v1347_v14 = vsel %vm388_vm4, %v1344_v63, %v1346_v0  ;;  %v1353_v17 = vadd.f32 %v1339_v2, %v1316_v50  ;;  %v1354_v20 = vadd.f32 %v1341_v3, %v1317_v51  ;;  %v1473_v3 = vld [vmem:[%s2085_s24 + $0x18] sm:$0xc] }
  0xc5   : > { %v1355_v8 = vadd.f32 %v1343_v10, %v1318_v55  ;;  %v1356_v45 = vadd.f32 %v1345_v11, %v1319_v5  ;;  %v1357_v21 = vadd.f32 %v1347_v14, %v1320_v16  ;;  %v1365_v24 = vmul.f32 %v2016_v53, %v2390_v7 }
  0xc6   : > { %v1366_v25 = vmul.f32 %v2016_v53, %v2467_v49  ;;  %v1367_v26 = vmul.f32 %v2016_v53, %v1322_v9  ;;  %v1374_v27 = vrot.slane %v1362_v4, 6  ;;  %v1375_v13 = vrot.slane %v1363_v1, 6  ;;  %v2019_v4 = vld [vmem:[%s2771_s1 + $0x25] ss:$0 sm:$0xff] }
  0xc7   : > { %v1377_v43 = vrot.slane %v1364_v6, 6  ;;  %v1398_v28 = vunpack.c.l.bf16 %v1395_v18  ;;  %v2562_v29 = vunpack.c.l.bf16 %v2553_v19  ;;  %v1379_v30 = vrot.slane %v1365_v24, 6 }
  0xc8   : > { %v1381_v31 = vrot.slane %v1366_v25, 6  ;;  %v1383_v32 = vrot.slane %v1367_v26, 6  ;;  %v1400_v34 = vunpack.c.l.bf16 %v1397_v22  ;;  %v1376_v35 = vsel %vm426_vm5, %v1374_v27, %v1375_v13 }
  0xc9   : > { %v1378_v36 = vsel %vm426_vm5, %v1375_v13, %v1377_v43  ;;  %v1403_v38 = vmul.f32 %v2017_v23, %v1398_v28  ;;  %v1404_v39 = vmul.f32 %v2017_v23, %v2322_v37  ;;  %v1380_v9 = vsel %vm426_vm5, %v1377_v43, %v1379_v30 }
  0xca   : > { %v1382_v41 = vsel %vm426_vm5, %v1379_v30, %v1381_v31  ;;  %v1384_v42 = vsel %vm426_vm5, %v1381_v31, %v1383_v32  ;;  %v1390_v44 = vadd.f32 %v1376_v35, %v1353_v17  ;;  %v1391_v48 = vadd.f32 %v1378_v36, %v1354_v20  ;;  %v2020_v31 = vld [vmem:[%s2771_s1 + $0x26] ss:$0 sm:$0xff] }
  0xcb   : > { %v1392_v47 = vadd.f32 %v1380_v9, %v1355_v8  ;;  %v1393_v33 = vadd.f32 %v1382_v41, %v1356_v45  ;;  %v1394_v50 = vadd.f32 %v1384_v42, %v1357_v21  ;;  %v1405_v51 = vmul.f32 %v2017_v23, %v2390_v7 }
  0xcc   : > { %v1406_v52 = vmul.f32 %v2017_v23, %v2467_v49  ;;  %v1407_v53 = vmul.f32 %v2017_v23, %v2562_v29  ;;  %v1408_v54 = vmul.f32 %v2017_v23, %v1400_v34  ;;  %v1415_v55 = vrot.slane %v1403_v38, 2  ;;  %v1510_v38 = vld [vmem:[%s2085_s24 + $0x2c] sm:$0x7] }
  0xcd   : > { %v1416_v5 = vrot.slane %v1404_v39, 2  ;;  %v1437_v12 = vunpack.c.l.bf16 %v1436_v46  ;;  %v1440_v16 = vmul.f32 %v2018_v40, %v1398_v28  ;;  %v1418_v15 = vrot.slane %v1405_v51, 2 }
  0xce   : > { %v1420_v56 = vrot.slane %v1406_v52, 2  ;;  %v1422_v57 = vrot.slane %v1407_v53, 2  ;;  %v1424_v59 = vrot.slane %v1408_v54, 2  ;;  %v1441_v58 = vmul.f32 %v2018_v40, %v2322_v37 }
  0xcf   : > { %v1417_v60 = vsel %vm274_vm1, %v1415_v55, %v1416_v5  ;;  %v1442_v61 = vmul.f32 %v2018_v40, %v2390_v7  ;;  %v1443_v62 = vmul.f32 %v2018_v40, %v2467_v49  ;;  %v1419_v63 = vsel %vm274_vm1, %v1416_v5, %v1418_v15 }
  0xd0   : > { %v1421_v0 = vsel %vm274_vm1, %v1418_v15, %v1420_v56  ;;  %v1423_v1 = vsel %vm274_vm1, %v1420_v56, %v1422_v57  ;;  %v1425_v2 = vsel %vm274_vm1, %v1422_v57, %v1424_v59  ;;  %v1431_v6 = vadd.f32 %v1417_v60, %v1390_v44  ;;  %v2021_v56 = vld [vmem:[%s2771_s1 + $0x27] ss:$0 sm:$0xff] }
  0xd1   : > { %v1432_v10 = vadd.f32 %v1419_v63, %v1391_v48  ;;  %v1433_v11 = vadd.f32 %v1421_v0, %v1392_v47  ;;  %v1434_v14 = vadd.f32 %v1423_v1, %v1393_v33  ;;  %v1435_v17 = vadd.f32 %v1425_v2, %v1394_v50 }
  0xd2   : > { %v1444_v18 = vmul.f32 %v2018_v40, %v2562_v29  ;;  %v1445_v20 = vmul.f32 %v2018_v40, %v1437_v12  ;;  %v1452_v8 = vrot.slane %v1440_v16, 3  ;;  %v1453_v45 = vrot.slane %v1441_v58, 3 }
  0xd3   : > { %v1455_v21 = vrot.slane %v1442_v61, 3  ;;  %v1457_v22 = vrot.slane %v1443_v62, 3  ;;  %v1474_v23 = vunpack.c.l.bf16 %v1473_v3  ;;  %v1478_v26 = vmul.f32 %v2019_v4, %v2322_v37  ;;  %v1547_v61 = vld [vmem:[%s2085_s24 + $0x18] sm:$0x8] }
  0xd4   : > { %v1459_v24 = vrot.slane %v1444_v18, 3  ;;  %v1461_v25 = vrot.slane %v1445_v20, 3  ;;  %v1479_v27 = vmul.f32 %v2019_v4, %v2390_v7  ;;  %v1454_v13 = vsel %vm312_vm2, %v1452_v8, %v1453_v45 }
  0xd5   : > { %v1456_v43 = vsel %vm312_vm2, %v1453_v45, %v1455_v21  ;;  %v1458_v28 = vsel %vm312_vm2, %v1455_v21, %v1457_v22  ;;  %v1477_v30 = vmul.f32 %v2019_v4, %v1474_v23  ;;  %v1468_v35 = vadd.f32 %v1454_v13, %v1431_v6 }
  0xd6   : > { %v1460_v32 = vsel %vm312_vm2, %v1457_v22, %v1459_v24  ;;  %v1462_v34 = vsel %vm312_vm2, %v1459_v24, %v1461_v25  ;;  %v1469_v36 = vadd.f32 %v1456_v43, %v1432_v10  ;;  %v1470_v39 = vadd.f32 %v1458_v28, %v1433_v11  ;;  %v2022_v25 = vld [vmem:[%s2771_s1 + $0x28] ss:$0 sm:$0xff] }
  0xd7   : > { %v1471_v40 = vadd.f32 %v1460_v32, %v1434_v14  ;;  %v1472_v9 = vadd.f32 %v1462_v34, %v1435_v17  ;;  %v1480_v41 = vmul.f32 %v2019_v4, %v2467_v49  ;;  %v1481_v42 = vmul.f32 %v2019_v4, %v2562_v29 }
  0xd8   : > { %v1482_v44 = vmul.f32 %v2019_v4, %v1437_v12  ;;  %v1489_v46 = vrot.slane %v1477_v30, 4  ;;  %v1490_v48 = vrot.slane %v1478_v26, 4  ;;  %v1492_v47 = vrot.slane %v1479_v27, 4 }
  0xd9   : > { %v1494_v33 = vrot.slane %v1480_v41, 4  ;;  %v1511_v50 = vunpack.c.l.bf16 %v1510_v38  ;;  %v1514_v51 = vmul.f32 %v2020_v31, %v1474_v23  ;;  %v1496_v53 = vrot.slane %v1481_v42, 4 }
  0xda   : > { %v1491_v52 = vsel %vm350_vm3, %v1489_v46, %v1490_v48  ;;  %v1498_v54 = vrot.slane %v1482_v44, 4  ;;  %v1515_v55 = vmul.f32 %v2020_v31, %v2322_v37  ;;  %v1493_v5 = vsel %vm350_vm3, %v1490_v48, %v1492_v47 }
  0xdb   : > { %v1495_v16 = vsel %vm350_vm3, %v1492_v47, %v1494_v33  ;;  %v1505_v15 = vadd.f32 %v1491_v52, %v1468_v35  ;;  %v1516_v12 = vmul.f32 %v2020_v31, %v2390_v7  ;;  %v1497_v57 = vsel %vm350_vm3, %v1494_v33, %v1496_v53  ;;  %v2023_v47 = vld [vmem:[%s2771_s1 + $0x29] ss:$0 sm:$0xff] }
  0xdc   : > { %v1499_v59 = vsel %vm350_vm3, %v1496_v53, %v1498_v54  ;;  %v1506_v60 = vadd.f32 %v1493_v5, %v1469_v36  ;;  %v1507_v58 = vadd.f32 %v1495_v16, %v1470_v39  ;;  %v1508_v62 = vadd.f32 %v1497_v57, %v1471_v40 }
  0xdd   : > { %v1509_v63 = vadd.f32 %v1499_v59, %v1472_v9  ;;  %v1517_v0 = vmul.f32 %v2020_v31, %v2467_v49  ;;  %v1518_v1 = vmul.f32 %v2020_v31, %v2562_v29  ;;  %v1519_v2 = vmul.f32 %v2020_v31, %v1511_v50 }
  0xde   : > { %v1526_v3 = vrot.slane %v1514_v51, 5  ;;  %v1527_v4 = vrot.slane %v1515_v55, 5  ;;  %v1529_v6 = vrot.slane %v1516_v12, 5  ;;  %v1548_v14 = vunpack.c.l.bf16 %v1547_v61 }
  0xdf   : > { %v1531_v10 = vrot.slane %v1517_v0, 5  ;;  %v1533_v11 = vrot.slane %v1518_v1, 5  ;;  %v1552_v17 = vmul.f32 %v2021_v56, %v2322_v37  ;;  %v1535_v8 = vrot.slane %v1519_v2, 5  ;;  %v2024_v0 = vld [vmem:[%s2771_s1 + $0x2a] ss:$0 sm:$0xff] }
  0xe0   : > { %v1528_v18 = vsel %vm388_vm4, %v1526_v3, %v1527_v4  ;;  %v1530_v20 = vsel %vm388_vm4, %v1527_v4, %v1529_v6  ;;  %v1553_v45 = vmul.f32 %v2021_v56, %v2390_v7  ;;  %v1551_v43 = vmul.f32 %v2021_v56, %v1548_v14 }
  0xe1   : > { %v1532_v21 = vsel %vm388_vm4, %v1529_v6, %v1531_v10  ;;  %v1534_v22 = vsel %vm388_vm4, %v1531_v10, %v1533_v11  ;;  %v1542_v23 = vadd.f32 %v1528_v18, %v1505_v15  ;;  %v1543_v24 = vadd.f32 %v1530_v20, %v1506_v60  ;;  %v1634_v6 = vld [vmem:[%s2085_s24 + $0x30] sm:$0x3] }
  0xe2   : > { %v1536_v26 = vsel %vm388_vm4, %v1533_v11, %v1535_v8  ;;  %v1544_v27 = vadd.f32 %v1532_v21, %v1507_v58  ;;  %v1545_v13 = vadd.f32 %v1534_v22, %v1508_v62  ;;  %v1554_v30 = vmul.f32 %v2021_v56, %v2467_v49  ;;  %v2025_v21 = vld [vmem:[%s2771_s1 + $0x2b] ss:$0 sm:$0xff] }
  0xe3   : > { %v1546_v28 = vadd.f32 %v1536_v26, %v1509_v63  ;;  %v1555_v31 = vmul.f32 %v2021_v56, %v2562_v29  ;;  %v1556_v32 = vmul.f32 %v2021_v56, %v1511_v50  ;;  %v1563_v34 = vrot.slane %v1551_v43, 6  ;;  %v1672_v26 = vld [vmem:[%s2085_s24 + $0x30] sm:$0x7] }
  0xe4   : > { %v1564_v35 = vrot.slane %v1552_v17, 6  ;;  %v1566_v36 = vrot.slane %v1553_v45, 6  ;;  %v2629_v38 = vunpack.c.h.bf16 %v2553_v19  ;;  %v1568_v39 = vrot.slane %v1554_v30, 6 }
  0xe5   : > { %v1570_v40 = vrot.slane %v1555_v31, 6  ;;  %v1572_v9 = vrot.slane %v1556_v32, 6  ;;  %v1588_v41 = vmul.f32 %v2022_v25, %v1548_v14  ;;  %v1589_v46 = vmul.f32 %v2022_v25, %v2322_v37 }
  0xe6   : > { %v1565_v42 = vsel %vm426_vm5, %v1563_v34, %v1564_v35  ;;  %v1567_v44 = vsel %vm426_vm5, %v1564_v35, %v1566_v36  ;;  %v1590_v48 = vmul.f32 %v2022_v25, %v2390_v7  ;;  %v1569_v33 = vsel %vm426_vm5, %v1566_v36, %v1568_v39 }
  0xe7   : > { %v1571_v19 = vsel %vm426_vm5, %v1568_v39, %v1570_v40  ;;  %v1573_v50 = vsel %vm426_vm5, %v1570_v40, %v1572_v9  ;;  %v1579_v51 = vadd.f32 %v1565_v42, %v1542_v23  ;;  %v1580_v52 = vadd.f32 %v1567_v44, %v1543_v24 }
  0xe8   : > { %v1581_v53 = vadd.f32 %v1569_v33, %v1544_v27  ;;  %v1582_v54 = vadd.f32 %v1571_v19, %v1545_v13  ;;  %v1583_v55 = vadd.f32 %v1573_v50, %v1546_v28  ;;  %v1591_v5 = vmul.f32 %v2022_v25, %v2467_v49 }
  0xe9   : > { %v1592_v16 = vmul.f32 %v2022_v25, %v2562_v29  ;;  %v1593_v15 = vmul.f32 %v2022_v25, %v2629_v38  ;;  %v1600_v12 = vrot.slane %v1588_v41, 7  ;;  %v1601_v56 = vrot.slane %v1589_v46, 7 }
  0xea   : > { %v1603_v57 = vrot.slane %v1590_v48, 7  ;;  %v1623_v59 = vmul.f32 %v2023_v47, %v2322_v37  ;;  %v1624_v60 = vmul.f32 %v2023_v47, %v2390_v7  ;;  %v1605_v58 = vrot.slane %v1591_v5, 7  ;;  %v1633_v37 = vld [vmem:[%s2085_s24 + $0x1c] sm:$0xc] }
  0xeb   : > { %v1607_v61 = vrot.slane %v1592_v16, 7  ;;  %v1609_v62 = vrot.slane %v1593_v15, 7  ;;  %v1625_v63 = vmul.f32 %v2023_v47, %v2467_v49  ;;  %v1602_v1 = vsel %vm653_vm6, %v1600_v12, %v1601_v56  ;;  %v1709_v15 = vld [vmem:[%s2085_s24 + $0x1c] sm:$0x8] }
  0xec   : > { %v1604_v2 = vsel %vm653_vm6, %v1601_v56, %v1603_v57  ;;  %v1626_v3 = vmul.f32 %v2023_v47, %v2562_v29  ;;  %v1627_v4 = vmul.f32 %v2023_v47, %v2629_v38  ;;  %v1606_v10 = vsel %vm653_vm6, %v1603_v57, %v1605_v58 }
  0xed   : > { %v1608_v11 = vsel %vm653_vm6, %v1605_v58, %v1607_v61  ;;  %v1610_v14 = vsel %vm653_vm6, %v1607_v61, %v1609_v62  ;;  %v1616_v17 = vadd.f32 %v1602_v1, %v1579_v51  ;;  %v1617_v18 = vadd.f32 %v1604_v2, %v1580_v52 }
  0xee   : > { %v1618_v20 = vadd.f32 %v1606_v10, %v1581_v53  ;;  %v1619_v8 = vadd.f32 %v1608_v11, %v1582_v54  ;;  %v1620_v45 = vadd.f32 %v1610_v14, %v1583_v55  ;;  %v1635_v23 = vunpack.c.l.bf16 %v1633_v37  ;;  %v2026_v53 = vld [vmem:[%s2771_s1 + $0x2c] ss:$0 sm:$0xff]  ;;  %v2027_v10 = vld [vmem:[%s2771_s1 + $0x2d] ss:$0 sm:$0xff] }
  0xef   : > { %v1628_v22 = vadd.f32 %v1623_v59, %v1616_v17  ;;  %v1636_v24 = vunpack.c.l.bf16 %v1634_v6  ;;  %v1640_v25 = vmul.f32 %v2024_v0, %v2390_v7  ;;  %v1629_v27 = vadd.f32 %v1624_v60, %v1617_v18 }
  0xf0   : > { %v1630_v13 = vadd.f32 %v1625_v63, %v1618_v20  ;;  %v1631_v43 = vadd.f32 %v1626_v3, %v1619_v8  ;;  %v1632_v28 = vadd.f32 %v1627_v4, %v1620_v45  ;;  %v1639_v30 = vmul.f32 %v2024_v0, %v1635_v23  ;;  %v1746_v20 = vld [vmem:[%s2085_s24 + $0x30] sm:$0xf] }
  0xf1   : > { %v1641_v31 = vmul.f32 %v2024_v0, %v2467_v49  ;;  %v1642_v32 = vmul.f32 %v2024_v0, %v2562_v29  ;;  %v1643_v34 = vmul.f32 %v2024_v0, %v2629_v38  ;;  %v1644_v35 = vmul.f32 %v2024_v0, %v1636_v24 }
  0xf2   : > { %v1652_v36 = vrot.slane %v1640_v25, 4  ;;  %v1673_v39 = vunpack.c.l.bf16 %v1672_v26  ;;  %v1676_v40 = vmul.f32 %v2025_v21, %v1635_v23  ;;  %v1651_v9 = vrot.slane %v1639_v30, 4 }
  0xf3   : > { %v1654_v41 = vrot.slane %v1641_v31, 4  ;;  %v1656_v42 = vrot.slane %v1642_v32, 4  ;;  %v1658_v44 = vrot.slane %v1643_v34, 4  ;;  %v1660_v46 = vrot.slane %v1644_v35, 4 }
  0xf4   : > { %v1677_v48 = vmul.f32 %v2025_v21, %v2390_v7  ;;  %v1678_v47 = vmul.f32 %v2025_v21, %v2467_v49  ;;  %v1679_v33 = vmul.f32 %v2025_v21, %v2562_v29  ;;  %v1653_v19 = vsel %vm350_vm3, %v1651_v9, %v1652_v36 }
  0xf5   : > { %v1655_v50 = vsel %vm350_vm3, %v1652_v36, %v1654_v41  ;;  %v1657_v51 = vsel %vm350_vm3, %v1654_v41, %v1656_v42  ;;  %v1659_v52 = vsel %vm350_vm3, %v1656_v42, %v1658_v44  ;;  %v1661_v54 = vsel %vm350_vm3, %v1658_v44, %v1660_v46 }
  0xf6   : > { %v1667_v55 = vadd.f32 %v1653_v19, %v1628_v22  ;;  %v1668_v5 = vadd.f32 %v1655_v50, %v1629_v27  ;;  %v1669_v16 = vadd.f32 %v1657_v51, %v1630_v13  ;;  %v1670_v12 = vadd.f32 %v1659_v52, %v1631_v43 }
  0xf7   : > { %v1671_v56 = vadd.f32 %v1661_v54, %v1632_v28  ;;  %v1680_v57 = vmul.f32 %v2025_v21, %v2629_v38  ;;  %v1681_v59 = vmul.f32 %v2025_v21, %v1673_v39  ;;  %v1688_v60 = vrot.slane %v1676_v40, 5 }
  0xf8   : > { %v1689_v58 = vrot.slane %v1677_v48, 5  ;;  %v1691_v61 = vrot.slane %v1678_v47, 5  ;;  %v1693_v62 = vrot.slane %v1679_v33, 5  ;;  %v1710_v1 = vunpack.c.l.bf16 %v1709_v15 }
  0xf9   : > { %v1695_v63 = vrot.slane %v1680_v57, 5  ;;  %v1697_v0 = vrot.slane %v1681_v59, 5  ;;  %v1714_v2 = vmul.f32 %v2026_v53, %v2390_v7  ;;  %v1715_v6 = vmul.f32 %v2026_v53, %v2467_v49  ;;  %v2029_v59 = vld [vmem:[%s2771_s1 + $0x2f] ss:$0 sm:$0xff] }
  0xfa   : > { %v1690_v3 = vsel %vm388_vm4, %v1688_v60, %v1689_v58  ;;  %v1692_v4 = vsel %vm388_vm4, %v1689_v58, %v1691_v61  ;;  %v1694_v37 = vsel %vm388_vm4, %v1691_v61, %v1693_v62  ;;  %v1713_v22 = vmul.f32 %v2026_v53, %v1710_v1 }
  0xfb   : > { %v1696_v11 = vsel %vm388_vm4, %v1693_v62, %v1695_v63  ;;  %v1698_v14 = vsel %vm388_vm4, %v1695_v63, %v1697_v0  ;;  %v1704_v17 = vadd.f32 %v1690_v3, %v1667_v55  ;;  %v1705_v18 = vadd.f32 %v1692_v4, %v1668_v5  ;;  %v1795_v63 = vld [vmem:[%s2085_s24 + $0x34] sm:$0x1] }
  0xfc   : > { %v1706_v8 = vadd.f32 %v1694_v37, %v1669_v16  ;;  %v1707_v45 = vadd.f32 %v1696_v11, %v1670_v12  ;;  %v1708_v21 = vadd.f32 %v1698_v14, %v1671_v56  ;;  %v1716_v23 = vmul.f32 %v2026_v53, %v2562_v29  ;;  %v2030_v11 = vld [vmem:[%s2771_s1 + $0x30] ss:$0 sm:$0xff] }
  0xfd   : > { %v1717_v24 = vmul.f32 %v2026_v53, %v2629_v38  ;;  %v1718_v25 = vmul.f32 %v2026_v53, %v1673_v39  ;;  %v1726_v26 = vrot.slane %v1714_v2, 6  ;;  %v1725_v27 = vrot.slane %v1713_v22, 6  ;;  %v2028_v39 = vld [vmem:[%s2771_s1 + $0x2e] ss:$0 sm:$0xff] }
  0xfe   : > { %v1728_v13 = vrot.slane %v1715_v6, 6  ;;  %v2693_v43 = vunpack.c.l.bf16 %v1746_v20  ;;  %v1750_v28 = vmul.f32 %v2027_v10, %v1710_v1  ;;  %v1730_v30 = vrot.slane %v1716_v23, 6 }
  0xff   : > { %v1732_v31 = vrot.slane %v1717_v24, 6  ;;  %v1734_v32 = vrot.slane %v1718_v25, 6  ;;  %v1751_v34 = vmul.f32 %v2027_v10, %v2390_v7  ;;  %v1727_v35 = vsel %vm426_vm5, %v1725_v27, %v1726_v26 }
 0x100   : > { %v1729_v36 = vsel %vm426_vm5, %v1726_v26, %v1728_v13  ;;  %v1752_v40 = vmul.f32 %v2027_v10, %v2467_v49  ;;  %v1753_v9 = vmul.f32 %v2027_v10, %v2562_v29  ;;  %v1731_v41 = vsel %vm426_vm5, %v1728_v13, %v1730_v30 }
 0x101   : > { %v1733_v42 = vsel %vm426_vm5, %v1730_v30, %v1732_v31  ;;  %v1735_v44 = vsel %vm426_vm5, %v1732_v31, %v1734_v32  ;;  %v1741_v46 = vadd.f32 %v1727_v35, %v1704_v17  ;;  %v1742_v48 = vadd.f32 %v1729_v36, %v1705_v18 }
 0x102   : > { %v1743_v47 = vadd.f32 %v1731_v41, %v1706_v8  ;;  %v1744_v33 = vadd.f32 %v1733_v42, %v1707_v45  ;;  %v1745_v19 = vadd.f32 %v1735_v44, %v1708_v21  ;;  %v1754_v50 = vmul.f32 %v2027_v10, %v2629_v38  ;;  %v1832_v8 = vld [vmem:[%s2085_s24 + $0x20] sm:$0xe] }
 0x103   : > { %v1755_v51 = vmul.f32 %v2027_v10, %v2693_v43  ;;  %v1762_v52 = vrot.slane %v1750_v28, 7  ;;  %v1763_v53 = vrot.slane %v1751_v34, 7  ;;  %v1765_v54 = vrot.slane %v1752_v40, 7 }
 0x104   : > { %v1767_v55 = vrot.slane %v1753_v9, 7  ;;  %v1785_v5 = vmul.f32 %v2028_v39, %v2390_v7  ;;  %v1786_v16 = vmul.f32 %v2028_v39, %v2467_v49  ;;  %v1769_v12 = vrot.slane %v1754_v50, 7 }
 0x105   : > { %v1764_v15 = vsel %vm653_vm6, %v1762_v52, %v1763_v53  ;;  %v1771_v56 = vrot.slane %v1755_v51, 7  ;;  %v1787_v57 = vmul.f32 %v2028_v39, %v2562_v29  ;;  %v1766_v60 = vsel %vm653_vm6, %v1763_v53, %v1765_v54 }
 0x106   : > { %v1768_v58 = vsel %vm653_vm6, %v1765_v54, %v1767_v55  ;;  %v1778_v61 = vadd.f32 %v1764_v15, %v1741_v46  ;;  %v1788_v62 = vmul.f32 %v2028_v39, %v2629_v38  ;;  %v1770_v0 = vsel %vm653_vm6, %v1767_v55, %v1769_v12 }
 0x107   : > { %v1772_v1 = vsel %vm653_vm6, %v1769_v12, %v1771_v56  ;;  %v1779_v2 = vadd.f32 %v1766_v60, %v1742_v48  ;;  %v1780_v3 = vadd.f32 %v1768_v58, %v1743_v47  ;;  %v1781_v4 = vadd.f32 %v1770_v0, %v1744_v33  ;;  %v1878_v60 = vld [vmem:[%s2773_s3] sm:$0xff]  ;;  %v1880_v0 = vld [vmem:[%s2773_s3 + $0x10] sm:$0xff] }
 0x108   : > { %v1782_v37 = vadd.f32 %v1772_v1, %v1745_v19  ;;  %v1789_v6 = vmul.f32 %v2028_v39, %v2693_v43  ;;  %v1790_v10 = vadd.f32 %v1785_v5, %v1778_v61  ;;  %v1796_v18 = vunpack.c.l.bf16 %v1795_v63  ;;  %v1879_v63 = vld [vmem:[%s2773_s3 + $0x8] sm:$0xff] }
 0x109   : > { %v1791_v14 = vadd.f32 %v1786_v16, %v1779_v2  ;;  %v1792_v17 = vadd.f32 %v1787_v57, %v1780_v3  ;;  %v1799_v20 = vmul.f32 %v2029_v59, %v2390_v7  ;;  %v1793_v45 = vadd.f32 %v1788_v62, %v1781_v4  ;;  %v1881_v3 = vld [vmem:[%s2773_s3 + $0x18] sm:$0xff]  ;;  %v1882_v4 = vld [vmem:[%s2773_s3 + $0x20] sm:$0xff] }
 0x10a   : > { %v1794_v21 = vadd.f32 %v1789_v6, %v1782_v37  ;;  %v1800_v22 = vmul.f32 %v2029_v59, %v2467_v49  ;;  %v1801_v23 = vmul.f32 %v2029_v59, %v2562_v29  ;;  %v1802_v24 = vmul.f32 %v2029_v59, %v2629_v38 }
 0x10b   : > { %v1803_v25 = vmul.f32 %v2029_v59, %v2693_v43  ;;  %v1804_v26 = vmul.f32 %v2029_v59, %v1796_v18  ;;  %v1811_v27 = vrot.slane %v1799_v20, 1  ;;  %v1833_v30 = vunpack.c.l.bf16 %v1832_v8 }
 0x10c   : > { %v1812_v13 = vrot.slane %v1800_v22, 1  ;;  %v1814_v28 = vrot.slane %v1801_v23, 1  ;;  %v1837_v31 = vmul.f32 %v2030_v11, %v2467_v49  ;;  %v1816_v32 = vrot.slane %v1802_v24, 1 }
 0x10d   : > { %v1818_v7 = vrot.slane %v1803_v25, 1  ;;  %v1820_v34 = vrot.slane %v1804_v26, 1  ;;  %v1838_v35 = vmul.f32 %v2030_v11, %v2562_v29  ;;  %v1836_v9 = vmul.f32 %v2030_v11, %v1833_v30 }
 0x10e   : > { %v1813_v36 = vsel %vm236_vm0, %v1811_v27, %v1812_v13  ;;  %v1815_v40 = vsel %vm236_vm0, %v1812_v13, %v1814_v28  ;;  %v1839_v39 = vmul.f32 %v2030_v11, %v2629_v38  ;;  %v1817_v41 = vsel %vm236_vm0, %v1814_v28, %v1816_v32  ;;  %v2031_v38 = vld [vmem:[%s2772_s2] ss:$0 sm:$0xff] }
 0x10f   : > { %v1819_v42 = vsel %vm236_vm0, %v1816_v32, %v1818_v7  ;;  %v1821_v44 = vsel %vm236_vm0, %v1818_v7, %v1820_v34  ;;  %v1827_v46 = vadd.f32 %v1813_v36, %v1790_v10  ;;  %v1828_v49 = vadd.f32 %v1815_v40, %v1791_v14 }
 0x110   : > { %v1829_v48 = vadd.f32 %v1817_v41, %v1792_v17  ;;  %v1840_v47 = vmul.f32 %v2030_v11, %v2693_v43  ;;  %v1841_v29 = vmul.f32 %v2030_v11, %v1796_v18  ;;  %v1848_v33 = vrot.slane %v1836_v9, 2 }
 0x111   : > { %v1849_v19 = vrot.slane %v1837_v31, 2  ;;  %v1830_v50 = vadd.f32 %v1819_v42, %v1793_v45  ;;  %v1831_v51 = vadd.f32 %v1821_v44, %v1794_v21  ;;  %v1851_v52 = vrot.slane %v1838_v35, 2 }
 0x112   : > { %v1853_v53 = vrot.slane %v1839_v39, 2  ;;  %v1855_v55 = vrot.slane %v1840_v47, 2  ;;  %v1857_v5 = vrot.slane %v1841_v29, 2 }
 0x113   : > { %v1850_v54 = vsel %vm274_vm1, %v1848_v33, %v1849_v19  ;;  %v1852_v16 = vsel %vm274_vm1, %v1849_v19, %v1851_v52 }
 0x114   : > { %v1854_v15 = vsel %vm274_vm1, %v1851_v52, %v1853_v53  ;;  %v1864_v43 = vadd.f32 %v1850_v54, %v1827_v46  ;;  %v1856_v12 = vsel %vm274_vm1, %v1853_v53, %v1855_v55  ;;  %v1858_v56 = vsel %vm274_vm1, %v1855_v55, %v1857_v5 }
 0x115   : > { %v1865_v57 = vadd.f32 %v1852_v16, %v1828_v49  ;;  %v1866_v59 = vadd.f32 %v1854_v15, %v1829_v48  ;;  %v1867_v58 = vadd.f32 %v1856_v12, %v1830_v50  ;;  %v1868_v61 = vadd.f32 %v1858_v56, %v1831_v51 }
 0x116   : > { %v1873_v62 = vadd.f32 %v2031_v38, %v1864_v43 }
 0x117   : > { %v1874_v1 = vadd.f32 %v2031_v38, %v1865_v57  ;;  %v1875_v2 = vadd.f32 %v2031_v38, %v1866_v59  ;;  %v1876_v37 = vadd.f32 %v2031_v38, %v1867_v58  ;;  %v1877_v6 = vadd.f32 %v2031_v38, %v1868_v61 }
 0x118   : > { %v1883_v10 = vadd.f32 %v1878_v60, %v1873_v62 }
 0x119   : > { %v1884_v11 = vadd.f32 %v1879_v63, %v1874_v1  ;;  %v1885_v14 = vadd.f32 %v1880_v0, %v1875_v2  ;;  %v1886_v17 = vadd.f32 %v1881_v3, %v1876_v37  ;;  %v1887_v18 = vadd.f32 %v1882_v4, %v1877_v6 }
 0x11a   : > { %v1888_v20 = vpack.c.bf16 %v1883_v10, %v1883_v10 }
 0x11b   : > { %v1889_v8 = vpack.c.bf16 %v1884_v11, %v1884_v11  ;;  %v1890_v45 = vpack.c.bf16 %v1885_v14, %v1885_v14  ;;  %v1891_v21 = vpack.c.bf16 %v1886_v17, %v1886_v17  ;;  %v1892_v22 = vpack.c.bf16 %v1887_v18, %v1887_v18 }
 0x11c   : > { %1894 = vst.msk [vmem:[%s197_s14] sm:$0xf] %vm1893_vm7, %v1888_v20 }
 0x11d   : > { %1895 = vst.msk [vmem:[%s197_s14 + $0x4] sm:$0xf] %vm1893_vm7, %v1889_v8 }
 0x11e   : > { %1896 = vst.msk [vmem:[%s197_s14 + $0x8] sm:$0xf] %vm1893_vm7, %v1890_v45 }
 0x11f   : > { %1897 = vst.msk [vmem:[%s197_s14 + $0xc] sm:$0xf] %vm1893_vm7, %v1891_v21 }
 0x120   : > { %1898 = vst.msk [vmem:[%s197_s14 + $0x10] sm:$0xf] %vm1893_vm7, %v1892_v22 }
 0x121 PF: > { %s14_s15 = sadd.s32 1, %s2038_s15  }
 0x122   : > { %p11_p4 = scmp.ge.s32.totalorder %s14_s15, 4  }
 0x124   :  { %13 = sbr.rel (!%p11_p4) target bundleno = 1 (0x1), region = 66 }

</bundles_post_ra>
